<compile_context>
chip_gen: v7x
topology: tpu7x:2x2x1
jax: 0.10.0
libtpu: 0.0.40
codegen_flags: <defaults>
</compile_context>

<pallas_src>
import functools

import numpy as np
import jax
import jax.numpy as jnp
from jax.experimental import pallas as pl
from jax.experimental.pallas import tpu as pltpu

BN_EPS = 1e-5

# Real / padded channel counts per conv block (padded to multiples of 8 so the
# sublane dims of every slab / weight are aligned; padded channels are zero).
_CIN_REAL = [3, 6, 12, 18]
_COUT_REAL = [6, 12, 18, 36]
_CIN_PAD = [4, 8, 16, 24]     # block i input channels (== previous cout_pad)
_COUT_PAD = [8, 16, 24, 40]

_COMPILER_PARAMS = pltpu.CompilerParams(
    dimension_semantics=("parallel",),
    vmem_limit_bytes=32 * 1024 * 1024,
)


def _round_up(x, m):
    return ((x + m - 1) // m) * m


# ----------------------------------------------------------------------------
# pltpu.roll rotation-convention probe (run once, outside jit).
# ----------------------------------------------------------------------------
_LANE_SHIFT_MODE = None   # "roll_np" | "roll_rev" | "slice"


def _roll_probe_kernel(x_ref, o_ref):
    o_ref[...] = pltpu.roll(x_ref[...], shift=1, axis=1)


def ensure_lane_shift_mode():
    """Determine how to express `out[:, m] = x[:, m + d]` with pltpu.roll."""
    global _LANE_SHIFT_MODE
    if _LANE_SHIFT_MODE is not None:
        return _LANE_SHIFT_MODE
    mode = "slice"
    try:
        x = (jnp.arange(12 * 1280, dtype=jnp.int32) % 128).astype(
            jnp.bfloat16).reshape(12, 1280)
        y = pl.pallas_call(
            _roll_probe_kernel,
            out_shape=jax.ShapeDtypeStruct((12, 1280), jnp.bfloat16),
        )(x)
        y = np.asarray(jax.block_until_ready(y).astype(jnp.float32))
        xr = np.asarray(x.astype(jnp.float32))
        if np.array_equal(y, np.roll(xr, 1, axis=1)):
            mode = "roll_np"        # numpy convention: out[m] = x[m - shift]
        elif np.array_equal(y, np.roll(xr, -1, axis=1)):
            mode = "roll_rev"       # reversed convention: out[m] = x[m + shift]
    except Exception:
        mode = "slice"
    _LANE_SHIFT_MODE = mode
    return mode


def _lane_shift(x, d, n_pad, mode):
    """out[:, m] = x[:, m + d] for all m with m + d < n_pad.

    Lanes that wrap around land only in the don't-care (py==h-1 / px==h-1 /
    lane >= h*h) region, which downstream consumers crop or zero-weight.
    """
    if d == 0:
        return x
    if mode == "roll_np":
        return pltpu.roll(x, shift=n_pad - d, axis=1)
    if mode == "roll_rev":
        return pltpu.roll(x, shift=d, axis=1)
    # Fallback: static lane slices + concat (always correct, a bit more copies).
    return jnp.concatenate([x[:, d:], x[:, :d]], axis=1)


# ----------------------------------------------------------------------------
# In-kernel fused conv + BN(eval) + 2x2 max-pool + ReLU on quad
# (space-to-depth) slabs, as a single MXU matmul per block.
#
#   x : (4*cin_pad, n_pad)   bf16 quad slab (rows = input parity major,
#                            channel minor; lane m = QY*h + QX, zero padded
#                            past h*h).
#   w : (4*cout_pad, 16*cin_pad) bf16 merged weights: output parity stacked
#                            along M, (shift group, input parity, channel)
#                            stacked along K, BN scale folded in.
#   b : (cout_pad, 1)        f32 folded BN bias (zeros on padded channels).
#   Result: (cout_pad, n_pad) f32 pooled activation; only lanes py*h+px with
#   py, px < h-1 are valid (the rest are don't-care values).
# ----------------------------------------------------------------------------
def _conv_pool(x, w, b, *, h, n_pad, cout_pad, shift_mode):
    shifts = [_lane_shift(x, d, n_pad, shift_mode) for d in (0, 1, h, h + 1)]
    xs = jnp.concatenate(shifts, axis=0)                     # (16*cin_pad, n_pad) bf16
    z = jnp.dot(w, xs, preferred_element_type=jnp.float32)   # (4*cout_pad, n_pad) f32
    # 2x2 max-pool == max over the 4 output-parity candidate row blocks;
    # bias and ReLU hoisted after the max (exact).
    m = jnp.maximum(jnp.maximum(z[:cout_pad], z[cout_pad:2 * cout_pad]),
                    jnp.maximum(z[2 * cout_pad:3 * cout_pad], z[3 * cout_pad:]))
    return jnp.maximum(m + b, 0.0)


def conv_block_kernel(x_ref, w_ref, b_ref, o_ref, *, h, n_pad, cout_pad,
                      shift_mode):
    y = _conv_pool(x_ref[0], w_ref[...], b_ref[...], h=h, n_pad=n_pad,
                   cout_pad=cout_pad, shift_mode=shift_mode)
    o_ref[0] = y.astype(o_ref.dtype)


def conv_block_head_kernel(x_ref, w_ref, b_ref, wl_ref, bl_ref, o_ref, *,
                           h, n_pad, cout_pad, shift_mode):
    """Block 4 fused with the Linear + LogSoftmax head (one batch element)."""
    pooled = _conv_pool(x_ref[0], w_ref[...], b_ref[...], h=h, n_pad=n_pad,
                        cout_pad=cout_pad, shift_mode=shift_mode)  # (40, 256) f32
    parts = []
    for nidx in range(wl_ref.shape[0]):                  # 3 output classes
        prod = pooled * wl_ref[nidx]                     # zero wl at invalid slots
        parts.append(jnp.sum(jnp.sum(prod, axis=1, keepdims=True),
                             axis=0, keepdims=True))     # (1, 1)
    logits = jnp.concatenate(parts, axis=1) + bl_ref[...]    # (1, 3)
    mx = jnp.max(logits, axis=1, keepdims=True)
    zc = logits - mx
    lse = jnp.log(jnp.sum(jnp.exp(zc), axis=1, keepdims=True))
    o_ref[0] = zc - lse


# ----------------------------------------------------------------------------
# Wrappers
# ----------------------------------------------------------------------------
def to_quads(act, c_pad):
    """(B, C, S, S) -> bf16 quad slab (B, 4*c_pad, n_pad), h = (S+2)//2.

    Zero-pads the spatial dims by 1 (SAME conv padding), pads channels to
    c_pad, splits into the 4 spatial parities (space-to-depth) and flattens the
    half-resolution grid into a lane-dense axis padded to a multiple of 128.
    """
    B, C, S, _ = act.shape
    xp = jnp.pad(act.astype(jnp.bfloat16),
                 ((0, 0), (0, c_pad - C), (1, 1), (1, 1)))
    h = (S + 2) // 2
    planes = [xp[:, :, pi::2, pj::2] for pi in (0, 1) for pj in (0, 1)]
    q = jnp.concatenate(planes, axis=1).reshape(B, 4 * c_pad, h * h)
    n_pad = _round_up(h * h, 128)
    if n_pad > h * h:
        q = jnp.pad(q, ((0, 0), (0, 0), (0, n_pad - h * h)))
    return q, h, n_pad


def conv_block(quads, w, b, h, n_pad, cout_pad):
    B, rows, _ = quads.shape
    shift_mode = _LANE_SHIFT_MODE or "slice"
    kern = functools.partial(conv_block_kernel, h=h, n_pad=n_pad,
                             cout_pad=cout_pad, shift_mode=shift_mode)
    return pl.pallas_call(
        kern,
        out_shape=jax.ShapeDtypeStruct((B, cout_pad, n_pad), jnp.bfloat16),
        grid_spec=pltpu.PrefetchScalarGridSpec(
            num_scalar_prefetch=0,
            grid=(B,),
            in_specs=[
                pl.BlockSpec((1, rows, n_pad), lambda bi: (bi, 0, 0)),
                pl.BlockSpec(w.shape, lambda bi: (0, 0)),
                pl.BlockSpec(b.shape, lambda bi: (0, 0)),
            ],
            out_specs=pl.BlockSpec((1, cout_pad, n_pad), lambda bi: (bi, 0, 0)),
        ),
        compiler_params=_COMPILER_PARAMS,
    )(quads, w, b)


def conv_block_head(quads, w, b, wl, bl, h, n_pad, cout_pad):
    B, rows, _ = quads.shape
    shift_mode = _LANE_SHIFT_MODE or "slice"
    kern = functools.partial(conv_block_head_kernel, h=h, n_pad=n_pad,
                             cout_pad=cout_pad, shift_mode=shift_mode)
    out = pl.pallas_call(
        kern,
        out_shape=jax.ShapeDtypeStruct((B, 1, 3), jnp.float32),
        grid_spec=pltpu.PrefetchScalarGridSpec(
            num_scalar_prefetch=0,
            grid=(B,),
            in_specs=[
                pl.BlockSpec((1, rows, n_pad), lambda bi: (bi, 0, 0)),
                pl.BlockSpec(w.shape, lambda bi: (0, 0)),
                pl.BlockSpec(b.shape, lambda bi: (0, 0)),
                pl.BlockSpec(wl.shape, lambda bi: (0, 0, 0)),
                pl.BlockSpec(bl.shape, lambda bi: (0, 0)),
            ],
            out_specs=pl.BlockSpec((1, 1, 3), lambda bi: (bi, 0, 0)),
        ),
        compiler_params=_COMPILER_PARAMS,
    )(quads, w, b, wl, bl)
    return out.reshape(B, 3)


def net_forward(x_nchw, params):
    act = x_nchw
    nblocks = len(params["conv_blocks"])
    for idx, (w, b) in enumerate(params["conv_blocks"]):
        quads, h, n_pad = to_quads(act, _CIN_PAD[idx])
        cout_pad = _COUT_PAD[idx]
        if idx + 1 < nblocks:
            y = conv_block(quads, w, b, h, n_pad, cout_pad)  # (B, cout_pad, n_pad) bf16
            B = y.shape[0]
            P = h - 1
            # Crop the don't-care last row/col; keep padded (zero) channels.
            act = y[:, :, :h * h].reshape(B, cout_pad, h, h)[:, :, :P, :P]
        else:
            return conv_block_head(quads, w, b, params["wl"], params["bl"],
                                   h, n_pad, cout_pad)


net_forward_jit = jax.jit(net_forward)


# ----------------------------------------------------------------------------
# Parameter preparation (deterministic synthetic values; matches module shapes)
# ----------------------------------------------------------------------------
def make_w_merged(wt, scale, cin_pad, cout_pad):
    """Merged conv weights (4*cout_pad, 16*cin_pad) with BN scale folded in.

    Row  ij*cout_pad + co           -> output parity ij = i*2+j, channel co.
    Col  g*4*cin_pad + p*cin_pad+ci -> shift group g = sy*2+sx (lane shift
                                       d = sy*h + sx), input parity p, ci.
    Value = scale[co] * wt[co, ci, 2*sy+pi-i, 2*sx+pj-j] when the tap is inside
    the 3x3 kernel, else 0; zero rows/cols for padded channels.
    """
    cout, cin = wt.shape[0], wt.shape[1]
    ws = np.asarray(wt, np.float32) * np.asarray(scale, np.float32)[:, None, None, None]
    W = np.zeros((4 * cout_pad, 16 * cin_pad), np.float32)
    for i in range(2):
        for j in range(2):
            ij = i * 2 + j
            for sy in range(2):
                for sx in range(2):
                    g = sy * 2 + sx
                    for pi in range(2):
                        for pj in range(2):
                            p = pi * 2 + pj
                            dy = 2 * sy + pi - i
                            dx = 2 * sx + pj - j
                            if 0 <= dy < 3 and 0 <= dx < 3:
                                r0 = ij * cout_pad
                                c0 = g * 4 * cin_pad + p * cin_pad
                                W[r0:r0 + cout, c0:c0 + cin] = ws[:, :, dy, dx]
    return jnp.asarray(W, jnp.bfloat16)


def init_params(key):
    conv_blocks, raw_convs = [], []
    for li in range(4):
        cin, cout = _CIN_REAL[li], _COUT_REAL[li]
        cin_pad, cout_pad = _CIN_PAD[li], _COUT_PAD[li]
        key, k1, k2, k3, k4, k5, k6 = jax.random.split(key, 7)
        wt = jax.random.normal(k1, (cout, cin, 3, 3), jnp.float32) * (1.0 / (cin * 9) ** 0.5)
        bconv = jax.random.normal(k2, (cout,), jnp.float32) * 0.1
        gamma = jax.random.uniform(k3, (cout,), jnp.float32, 0.5, 1.5)
        beta = jax.random.normal(k4, (cout,), jnp.float32) * 0.1
        mean = jax.random.normal(k5, (cout,), jnp.float32) * 0.1
        var = jax.random.uniform(k6, (cout,), jnp.float32, 0.5, 1.5)
        # Fold conv bias + eval-mode BatchNorm into per-channel scale / bias.
        scale = gamma / jnp.sqrt(var + BN_EPS)
        bias = beta + (bconv - mean) * scale
        w_merged = make_w_merged(wt, scale, cin_pad, cout_pad)
        bias_pad = jnp.zeros((cout_pad, 1), jnp.float32).at[:cout, 0].set(bias)
        conv_blocks.append((w_merged, bias_pad))
        raw_convs.append((wt, bconv, gamma, beta, mean, var))

    key, k1, k2 = jax.random.split(key, 3)
    w_lin = jax.random.normal(k1, (36 * 14 * 14, 3), jnp.float32) * (1.0 / (36 * 14 * 14) ** 0.5)
    b_lin = jax.random.normal(k2, (3,), jnp.float32) * 0.1
    # Pre-permute the Linear weight to the kernel's padded (class, channel,
    # py*15+px) layout: channels 36->40, lanes 225->256, zeros everywhere the
    # pooled slab carries padding / don't-care values.
    n4 = _round_up(15 * 15, 128)
    wl_np = np.zeros((3, _COUT_PAD[3], n4), np.float32)
    wlr = np.asarray(w_lin, np.float32).reshape(36, 14, 14, 3)
    for c in range(36):
        for py in range(14):
            wl_np[:, c, py * 15: py * 15 + 14] = wlr[c, py, :, :].T
    params = {"conv_blocks": conv_blocks,
              "wl": jnp.asarray(wl_np),
              "bl": b_lin.reshape(1, 3)}
    raw = {"convs": raw_convs, "w_lin": w_lin, "b_lin": b_lin}
    return params, raw


# ----------------------------------------------------------------------------
# Pure-JAX reference (for correctness check)
# ----------------------------------------------------------------------------
def reference_forward(x_nchw, raw):
    x = jnp.transpose(x_nchw, (0, 2, 3, 1))
    for (wt, bconv, gamma, beta, mean, var) in raw["convs"]:
        w_hwio = jnp.transpose(wt, (2, 3, 1, 0))
        y = jax.lax.conv_general_dilated(
            x, w_hwio, (1, 1), "SAME",
            dimension_numbers=("NHWC", "HWIO", "NHWC"),
            precision=jax.lax.Precision.HIGHEST) + bconv
        y = (y - mean) / jnp.sqrt(var + BN_EPS) * gamma + beta
        y = jnp.maximum(y, 0.0)
        x = jax.lax.reduce_window(y, -jnp.inf, jax.lax.max,
                                  (1, 2, 2, 1), (1, 2, 2, 1), "VALID")
    flat = jnp.transpose(x, (0, 3, 1, 2)).reshape(x.shape[0], -1)
    logits = jnp.dot(flat, raw["w_lin"], precision=jax.lax.Precision.HIGHEST) + raw["b_lin"]
    return jax.nn.log_softmax(logits, axis=1)


if __name__ == "__main__":
    key = jax.random.PRNGKey(0)
    key, pkey, xkey = jax.random.split(key, 3)
    params, raw = init_params(pkey)

    # Probe pltpu.roll's rotation convention once (outside jit) so the
    # in-kernel lane shifts use the correct direction.
    ensure_lane_shift_mode()

    # Input spatial must be 224 so four 2x2 pools leave 14x14, matching
    # Linear(36*14*14, 3); batch kept small.
    x = jax.random.normal(xkey, (2, 3, 224, 224), jnp.float32)

    out = jax.block_until_ready(net_forward_jit(x, params))
    ref = jax.block_until_ready(reference_forward(x, raw))

    assert out.shape == (2, 3), out.shape
    # Tolerance slightly loosened vs the all-f32 version because activations /
    # weights are carried in bfloat16 (reference stays f32).
    if not jnp.allclose(out, ref, rtol=2e-2, atol=8e-2):
        raise AssertionError(
            f"mismatch vs reference: max abs diff = {float(jnp.max(jnp.abs(out - ref)))}")
    print("KERNEL_OK")
</pallas_src>

<mosaic_0001>
module attributes {stable_mosaic.version = 11 : i64} {
  func.func @_roll_probe_kernel(%arg0: memref<12x1280xbf16, #tpu.memory_space<vmem>>, %arg1: memref<12x1280xbf16, #tpu.memory_space<vmem>>) attributes {dimension_semantics = [], scalar_prefetch = 0 : i64, scratch_operands = 0 : i64, tpu.core_type = #tpu.core_type<tc>} {
    %c0 = arith.constant 0 : index
    %c0_0 = arith.constant 0 : index
    %0 = vector.load %arg0[%c0, %c0_0] : memref<12x1280xbf16, #tpu.memory_space<vmem>>, vector<12x1280xbf16>
    %c1_i32 = arith.constant 1 : i32
    %1 = tpu.dynamic_rotate %0 by %c1_i32 dim 1 : vector<12x1280xbf16>, i32 -> vector<12x1280xbf16>
    %c0_1 = arith.constant 0 : index
    %c0_2 = arith.constant 0 : index
    %2 = vector.load %arg1[%c0_1, %c0_2] : memref<12x1280xbf16, #tpu.memory_space<vmem>>, vector<12x1280xbf16>
    tpu.vector_store %arg1[%c0_1, %c0_2], %1 {strides = array<i32>} : memref<12x1280xbf16, #tpu.memory_space<vmem>>, vector<12x1280xbf16>,
    return
  }
}

module attributes {stable_mosaic.version = 11 : i64} {
  func.func @conv_block_kernel(%arg0: i32, %arg1: memref<1x16x12800xbf16, #tpu.memory_space<vmem>>, %arg2: memref<32x64xbf16, #tpu.memory_space<vmem>>, %arg3: memref<8x1xf32, #tpu.memory_space<vmem>>, %arg4: memref<1x8x12800xbf16, #tpu.memory_space<vmem>>) attributes {dimension_semantics = [#tpu.dimension_semantics<parallel>], iteration_bounds = array<i64: 2>, scalar_prefetch = 0 : i64, scratch_operands = 0 : i64, tpu.core_type = #tpu.core_type<tc>, window_params = [{transform_indices = @transform_0, window_bounds = array<i64: 1, 16, 12800>}, {pipeline_mode = #tpu.pipeline_mode<synchronous>, transform_indices = @transform_1, window_bounds = array<i64: 32, 64>}, {pipeline_mode = #tpu.pipeline_mode<synchronous>, transform_indices = @transform_2, window_bounds = array<i64: 8, 1>}, {transform_indices = @transform_3, window_bounds = array<i64: 1, 8, 12800>}]} {
    %c0 = arith.constant 0 : index
    %c0_0 = arith.constant 0 : index
    %c0_1 = arith.constant 0 : index
    %0 = vector.load %arg1[%c0, %c0_0, %c0_1] : memref<1x16x12800xbf16, #tpu.memory_space<vmem>>, vector<1x16x12800xbf16>
    %1 = vector.shape_cast %0 : vector<1x16x12800xbf16> to vector<16x12800xbf16>
    %c0_2 = arith.constant 0 : index
    %c0_3 = arith.constant 0 : index
    %2 = vector.load %arg2[%c0_2, %c0_3] : memref<32x64xbf16, #tpu.memory_space<vmem>>, vector<32x64xbf16>
    %c0_4 = arith.constant 0 : index
    %c0_5 = arith.constant 0 : index
    %3 = vector.load %arg3[%c0_4, %c0_5] : memref<8x1xf32, #tpu.memory_space<vmem>>, vector<8x1xf32>
    %4 = vector.extract_strided_slice %1 {offsets = [0, 1], sizes = [16, 12799], strides = [1, 1]} : vector<16x12800xbf16> to vector<16x12799xbf16>
    %5 = vector.extract_strided_slice %1 {offsets = [0, 0], sizes = [16, 1], strides = [1, 1]} : vector<16x12800xbf16> to vector<16x1xbf16>
    %6 = tpu.concatenate %4, %5 in 1 : vector<16x12799xbf16>, vector<16x1xbf16> -> vector<16x12800xbf16>
    %7 = vector.extract_strided_slice %1 {offsets = [0, 113], sizes = [16, 12687], strides = [1, 1]} : vector<16x12800xbf16> to vector<16x12687xbf16>
    %8 = vector.extract_strided_slice %1 {offsets = [0, 0], sizes = [16, 113], strides = [1, 1]} : vector<16x12800xbf16> to vector<16x113xbf16>
    %9 = tpu.concatenate %7, %8 in 1 : vector<16x12687xbf16>, vector<16x113xbf16> -> vector<16x12800xbf16>
    %10 = vector.extract_strided_slice %1 {offsets = [0, 114], sizes = [16, 12686], strides = [1, 1]} : vector<16x12800xbf16> to vector<16x12686xbf16>
    %11 = vector.extract_strided_slice %1 {offsets = [0, 0], sizes = [16, 114], strides = [1, 1]} : vector<16x12800xbf16> to vector<16x114xbf16>
    %12 = tpu.concatenate %10, %11 in 1 : vector<16x12686xbf16>, vector<16x114xbf16> -> vector<16x12800xbf16>
    %13 = tpu.concatenate %1, %6, %9, %12 in 0 : vector<16x12800xbf16>, vector<16x12800xbf16>, vector<16x12800xbf16>, vector<16x12800xbf16> -> vector<64x12800xbf16>
    %cst = arith.constant dense<0.000000e+00> : vector<32x12800xf32>
    %14 = tpu.matmul %2, %13, %cst {dimension_numbers = #tpu.dot_dimension_numbers<[1], [0], [0], [1], [0, 0, 1, 1], [], []>} : vector<32x64xbf16>, vector<64x12800xbf16>, vector<32x12800xf32> -> vector<32x12800xf32>
    %15 = vector.extract_strided_slice %14 {offsets = [0, 0], sizes = [8, 12800], strides = [1, 1]} : vector<32x12800xf32> to vector<8x12800xf32>
    %16 = vector.extract_strided_slice %14 {offsets = [8, 0], sizes = [8, 12800], strides = [1, 1]} : vector<32x12800xf32> to vector<8x12800xf32>
    %17 = arith.maximumf %15, %16 : vector<8x12800xf32>
    %18 = vector.extract_strided_slice %14 {offsets = [16, 0], sizes = [8, 12800], strides = [1, 1]} : vector<32x12800xf32> to vector<8x12800xf32>
    %19 = vector.extract_strided_slice %14 {offsets = [24, 0], sizes = [8, 12800], strides = [1, 1]} : vector<32x12800xf32> to vector<8x12800xf32>
    %20 = arith.maximumf %18, %19 : vector<8x12800xf32>
    %21 = arith.maximumf %17, %20 : vector<8x12800xf32>
    %22 = vector.broadcast %3 : vector<8x1xf32> to vector<8x12800xf32>
    %23 = arith.addf %21, %22 : vector<8x12800xf32>
    %cst_6 = arith.constant 0.000000e+00 : f32
    %24 = vector.broadcast %cst_6 : f32 to vector<8x12800xf32>
    %25 = arith.maximumf %23, %24 : vector<8x12800xf32>
    %26 = arith.truncf %25 : vector<8x12800xf32> to vector<8x12800xbf16>
    %c0_7 = arith.constant 0 : index
    %c0_8 = arith.constant 0 : index
    %c0_9 = arith.constant 0 : index
    %27 = vector.load %arg4[%c0_7, %c0_8, %c0_9] : memref<1x8x12800xbf16, #tpu.memory_space<vmem>>, vector<1x8x12800xbf16>
    %28 = vector.shape_cast %27 : vector<1x8x12800xbf16> to vector<8x12800xbf16>
    %29 = vector.shape_cast %26 : vector<8x12800xbf16> to vector<1x8x12800xbf16>
    tpu.vector_store %arg4[%c0_7, %c0_8, %c0_9], %29 {strides = array<i32>} : memref<1x8x12800xbf16, #tpu.memory_space<vmem>>, vector<1x8x12800xbf16>,
    return
  }
  func.func @transform_0(%arg0: i32) -> (i32, i32, i32) {
    %c0_i32 = arith.constant 0 : i32
    %c0_i32_0 = arith.constant 0 : i32
    %c0_i32_1 = arith.constant 0 : i32
    return %arg0, %c0_i32, %c0_i32_0 : i32, i32, i32
  }
  func.func @transform_1(%arg0: i32) -> (i32, i32) {
    %c0_i32 = arith.constant 0 : i32
    %c0_i32_0 = arith.constant 0 : i32
    %c0_i32_1 = arith.constant 0 : i32
    return %c0_i32, %c0_i32_0 : i32, i32
  }
  func.func @transform_2(%arg0: i32) -> (i32, i32) {
    %c0_i32 = arith.constant 0 : i32
    %c0_i32_0 = arith.constant 0 : i32
    %c0_i32_1 = arith.constant 0 : i32
    return %c0_i32, %c0_i32_0 : i32, i32
  }
  func.func @transform_3(%arg0: i32) -> (i32, i32, i32) {
    %c0_i32 = arith.constant 0 : i32
    %c0_i32_0 = arith.constant 0 : i32
    %c0_i32_1 = arith.constant 0 : i32
    return %arg0, %c0_i32, %c0_i32_0 : i32, i32, i32
  }
}

module attributes {stable_mosaic.version = 11 : i64} {
  func.func @conv_block_kernel(%arg0: i32, %arg1: memref<1x32x3328xbf16, #tpu.memory_space<vmem>>, %arg2: memref<64x128xbf16, #tpu.memory_space<vmem>>, %arg3: memref<16x1xf32, #tpu.memory_space<vmem>>, %arg4: memref<1x16x3328xbf16, #tpu.memory_space<vmem>>) attributes {dimension_semantics = [#tpu.dimension_semantics<parallel>], iteration_bounds = array<i64: 2>, scalar_prefetch = 0 : i64, scratch_operands = 0 : i64, tpu.core_type = #tpu.core_type<tc>, window_params = [{transform_indices = @transform_0, window_bounds = array<i64: 1, 32, 3328>}, {pipeline_mode = #tpu.pipeline_mode<synchronous>, transform_indices = @transform_1, window_bounds = array<i64: 64, 128>}, {pipeline_mode = #tpu.pipeline_mode<synchronous>, transform_indices = @transform_2, window_bounds = array<i64: 16, 1>}, {transform_indices = @transform_3, window_bounds = array<i64: 1, 16, 3328>}]} {
    %c0 = arith.constant 0 : index
    %c0_0 = arith.constant 0 : index
    %c0_1 = arith.constant 0 : index
    %0 = vector.load %arg1[%c0, %c0_0, %c0_1] : memref<1x32x3328xbf16, #tpu.memory_space<vmem>>, vector<1x32x3328xbf16>
    %1 = vector.shape_cast %0 : vector<1x32x3328xbf16> to vector<32x3328xbf16>
    %c0_2 = arith.constant 0 : index
    %c0_3 = arith.constant 0 : index
    %2 = vector.load %arg2[%c0_2, %c0_3] : memref<64x128xbf16, #tpu.memory_space<vmem>>, vector<64x128xbf16>
    %c0_4 = arith.constant 0 : index
    %c0_5 = arith.constant 0 : index
    %3 = vector.load %arg3[%c0_4, %c0_5] : memref<16x1xf32, #tpu.memory_space<vmem>>, vector<16x1xf32>
    %4 = vector.extract_strided_slice %1 {offsets = [0, 1], sizes = [32, 3327], strides = [1, 1]} : vector<32x3328xbf16> to vector<32x3327xbf16>
    %5 = vector.extract_strided_slice %1 {offsets = [0, 0], sizes = [32, 1], strides = [1, 1]} : vector<32x3328xbf16> to vector<32x1xbf16>
    %6 = tpu.concatenate %4, %5 in 1 : vector<32x3327xbf16>, vector<32x1xbf16> -> vector<32x3328xbf16>
    %7 = vector.extract_strided_slice %1 {offsets = [0, 57], sizes = [32, 3271], strides = [1, 1]} : vector<32x3328xbf16> to vector<32x3271xbf16>
    %8 = vector.extract_strided_slice %1 {offsets = [0, 0], sizes = [32, 57], strides = [1, 1]} : vector<32x3328xbf16> to vector<32x57xbf16>
    %9 = tpu.concatenate %7, %8 in 1 : vector<32x3271xbf16>, vector<32x57xbf16> -> vector<32x3328xbf16>
    %10 = vector.extract_strided_slice %1 {offsets = [0, 58], sizes = [32, 3270], strides = [1, 1]} : vector<32x3328xbf16> to vector<32x3270xbf16>
    %11 = vector.extract_strided_slice %1 {offsets = [0, 0], sizes = [32, 58], strides = [1, 1]} : vector<32x3328xbf16> to vector<32x58xbf16>
    %12 = tpu.concatenate %10, %11 in 1 : vector<32x3270xbf16>, vector<32x58xbf16> -> vector<32x3328xbf16>
    %13 = tpu.concatenate %1, %6, %9, %12 in 0 : vector<32x3328xbf16>, vector<32x3328xbf16>, vector<32x3328xbf16>, vector<32x3328xbf16> -> vector<128x3328xbf16>
    %cst = arith.constant dense<0.000000e+00> : vector<64x3328xf32>
    %14 = tpu.matmul %2, %13, %cst {dimension_numbers = #tpu.dot_dimension_numbers<[1], [0], [0], [1], [0, 0, 1, 1], [], []>} : vector<64x128xbf16>, vector<128x3328xbf16>, vector<64x3328xf32> -> vector<64x3328xf32>
    %15 = vector.extract_strided_slice %14 {offsets = [0, 0], sizes = [16, 3328], strides = [1, 1]} : vector<64x3328xf32> to vector<16x3328xf32>
    %16 = vector.extract_strided_slice %14 {offsets = [16, 0], sizes = [16, 3328], strides = [1, 1]} : vector<64x3328xf32> to vector<16x3328xf32>
    %17 = arith.maximumf %15, %16 : vector<16x3328xf32>
    %18 = vector.extract_strided_slice %14 {offsets = [32, 0], sizes = [16, 3328], strides = [1, 1]} : vector<64x3328xf32> to vector<16x3328xf32>
    %19 = vector.extract_strided_slice %14 {offsets = [48, 0], sizes = [16, 3328], strides = [1, 1]} : vector<64x3328xf32> to vector<16x3328xf32>
    %20 = arith.maximumf %18, %19 : vector<16x3328xf32>
    %21 = arith.maximumf %17, %20 : vector<16x3328xf32>
    %22 = vector.broadcast %3 : vector<16x1xf32> to vector<16x3328xf32>
    %23 = arith.addf %21, %22 : vector<16x3328xf32>
    %cst_6 = arith.constant 0.000000e+00 : f32
    %24 = vector.broadcast %cst_6 : f32 to vector<16x3328xf32>
    %25 = arith.maximumf %23, %24 : vector<16x3328xf32>
    %26 = arith.truncf %25 : vector<16x3328xf32> to vector<16x3328xbf16>
    %c0_7 = arith.constant 0 : index
    %c0_8 = arith.constant 0 : index
    %c0_9 = arith.constant 0 : index
    %27 = vector.load %arg4[%c0_7, %c0_8, %c0_9] : memref<1x16x3328xbf16, #tpu.memory_space<vmem>>, vector<1x16x3328xbf16>
    %28 = vector.shape_cast %27 : vector<1x16x3328xbf16> to vector<16x3328xbf16>
    %29 = vector.shape_cast %26 : vector<16x3328xbf16> to vector<1x16x3328xbf16>
    tpu.vector_store %arg4[%c0_7, %c0_8, %c0_9], %29 {strides = array<i32>} : memref<1x16x3328xbf16, #tpu.memory_space<vmem>>, vector<1x16x3328xbf16>,
    return
  }
  func.func @transform_0(%arg0: i32) -> (i32, i32, i32) {
    %c0_i32 = arith.constant 0 : i32
    %c0_i32_0 = arith.constant 0 : i32
    %c0_i32_1 = arith.constant 0 : i32
    return %arg0, %c0_i32, %c0_i32_0 : i32, i32, i32
  }
  func.func @transform_1(%arg0: i32) -> (i32, i32) {
    %c0_i32 = arith.constant 0 : i32
    %c0_i32_0 = arith.constant 0 : i32
    %c0_i32_1 = arith.constant 0 : i32
    return %c0_i32, %c0_i32_0 : i32, i32
  }
  func.func @transform_2(%arg0: i32) -> (i32, i32) {
    %c0_i32 = arith.constant 0 : i32
    %c0_i32_0 = arith.constant 0 : i32
    %c0_i32_1 = arith.constant 0 : i32
    return %c0_i32, %c0_i32_0 : i32, i32
  }
  func.func @transform_3(%arg0: i32) -> (i32, i32, i32) {
    %c0_i32 = arith.constant 0 : i32
    %c0_i32_0 = arith.constant 0 : i32
    %c0_i32_1 = arith.constant 0 : i32
    return %arg0, %c0_i32, %c0_i32_0 : i32, i32, i32
  }
}

module attributes {stable_mosaic.version = 11 : i64} {
  func.func @conv_block_kernel(%arg0: i32, %arg1: memref<1x64x896xbf16, #tpu.memory_space<vmem>>, %arg2: memref<96x256xbf16, #tpu.memory_space<vmem>>, %arg3: memref<24x1xf32, #tpu.memory_space<vmem>>, %arg4: memref<1x24x896xbf16, #tpu.memory_space<vmem>>) attributes {dimension_semantics = [#tpu.dimension_semantics<parallel>], iteration_bounds = array<i64: 2>, scalar_prefetch = 0 : i64, scratch_operands = 0 : i64, tpu.core_type = #tpu.core_type<tc>, window_params = [{transform_indices = @transform_0, window_bounds = array<i64: 1, 64, 896>}, {pipeline_mode = #tpu.pipeline_mode<synchronous>, transform_indices = @transform_1, window_bounds = array<i64: 96, 256>}, {pipeline_mode = #tpu.pipeline_mode<synchronous>, transform_indices = @transform_2, window_bounds = array<i64: 24, 1>}, {transform_indices = @transform_3, window_bounds = array<i64: 1, 24, 896>}]} {
    %c0 = arith.constant 0 : index
    %c0_0 = arith.constant 0 : index
    %c0_1 = arith.constant 0 : index
    %0 = vector.load %arg1[%c0, %c0_0, %c0_1] : memref<1x64x896xbf16, #tpu.memory_space<vmem>>, vector<1x64x896xbf16>
    %1 = vector.shape_cast %0 : vector<1x64x896xbf16> to vector<64x896xbf16>
    %c0_2 = arith.constant 0 : index
    %c0_3 = arith.constant 0 : index
    %2 = vector.load %arg2[%c0_2, %c0_3] : memref<96x256xbf16, #tpu.memory_space<vmem>>, vector<96x256xbf16>
    %c0_4 = arith.constant 0 : index
    %c0_5 = arith.constant 0 : index
    %3 = vector.load %arg3[%c0_4, %c0_5] : memref<24x1xf32, #tpu.memory_space<vmem>>, vector<24x1xf32>
    %4 = vector.extract_strided_slice %1 {offsets = [0, 1], sizes = [64, 895], strides = [1, 1]} : vector<64x896xbf16> to vector<64x895xbf16>
    %5 = vector.extract_strided_slice %1 {offsets = [0, 0], sizes = [64, 1], strides = [1, 1]} : vector<64x896xbf16> to vector<64x1xbf16>
    %6 = tpu.concatenate %4, %5 in 1 : vector<64x895xbf16>, vector<64x1xbf16> -> vector<64x896xbf16>
    %7 = vector.extract_strided_slice %1 {offsets = [0, 29], sizes = [64, 867], strides = [1, 1]} : vector<64x896xbf16> to vector<64x867xbf16>
    %8 = vector.extract_strided_slice %1 {offsets = [0, 0], sizes = [64, 29], strides = [1, 1]} : vector<64x896xbf16> to vector<64x29xbf16>
    %9 = tpu.concatenate %7, %8 in 1 : vector<64x867xbf16>, vector<64x29xbf16> -> vector<64x896xbf16>
    %10 = vector.extract_strided_slice %1 {offsets = [0, 30], sizes = [64, 866], strides = [1, 1]} : vector<64x896xbf16> to vector<64x866xbf16>
    %11 = vector.extract_strided_slice %1 {offsets = [0, 0], sizes = [64, 30], strides = [1, 1]} : vector<64x896xbf16> to vector<64x30xbf16>
    %12 = tpu.concatenate %10, %11 in 1 : vector<64x866xbf16>, vector<64x30xbf16> -> vector<64x896xbf16>
    %13 = tpu.concatenate %1, %6, %9, %12 in 0 : vector<64x896xbf16>, vector<64x896xbf16>, vector<64x896xbf16>, vector<64x896xbf16> -> vector<256x896xbf16>
    %cst = arith.constant dense<0.000000e+00> : vector<96x896xf32>
    %14 = tpu.matmul %2, %13, %cst {dimension_numbers = #tpu.dot_dimension_numbers<[1], [0], [0], [1], [0, 0, 1, 1], [], []>} : vector<96x256xbf16>, vector<256x896xbf16>, vector<96x896xf32> -> vector<96x896xf32>
    %15 = vector.extract_strided_slice %14 {offsets = [0, 0], sizes = [24, 896], strides = [1, 1]} : vector<96x896xf32> to vector<24x896xf32>
    %16 = vector.extract_strided_slice %14 {offsets = [24, 0], sizes = [24, 896], strides = [1, 1]} : vector<96x896xf32> to vector<24x896xf32>
    %17 = arith.maximumf %15, %16 : vector<24x896xf32>
    %18 = vector.extract_strided_slice %14 {offsets = [48, 0], sizes = [24, 896], strides = [1, 1]} : vector<96x896xf32> to vector<24x896xf32>
    %19 = vector.extract_strided_slice %14 {offsets = [72, 0], sizes = [24, 896], strides = [1, 1]} : vector<96x896xf32> to vector<24x896xf32>
    %20 = arith.maximumf %18, %19 : vector<24x896xf32>
    %21 = arith.maximumf %17, %20 : vector<24x896xf32>
    %22 = vector.broadcast %3 : vector<24x1xf32> to vector<24x896xf32>
    %23 = arith.addf %21, %22 : vector<24x896xf32>
    %cst_6 = arith.constant 0.000000e+00 : f32
    %24 = vector.broadcast %cst_6 : f32 to vector<24x896xf32>
    %25 = arith.maximumf %23, %24 : vector<24x896xf32>
    %26 = arith.truncf %25 : vector<24x896xf32> to vector<24x896xbf16>
    %c0_7 = arith.constant 0 : index
    %c0_8 = arith.constant 0 : index
    %c0_9 = arith.constant 0 : index
    %27 = vector.load %arg4[%c0_7, %c0_8, %c0_9] : memref<1x24x896xbf16, #tpu.memory_space<vmem>>, vector<1x24x896xbf16>
    %28 = vector.shape_cast %27 : vector<1x24x896xbf16> to vector<24x896xbf16>
    %29 = vector.shape_cast %26 : vector<24x896xbf16> to vector<1x24x896xbf16>
    tpu.vector_store %arg4[%c0_7, %c0_8, %c0_9], %29 {strides = array<i32>} : memref<1x24x896xbf16, #tpu.memory_space<vmem>>, vector<1x24x896xbf16>,
    return
  }
  func.func @transform_0(%arg0: i32) -> (i32, i32, i32) {
    %c0_i32 = arith.constant 0 : i32
    %c0_i32_0 = arith.constant 0 : i32
    %c0_i32_1 = arith.constant 0 : i32
    return %arg0, %c0_i32, %c0_i32_0 : i32, i32, i32
  }
  func.func @transform_1(%arg0: i32) -> (i32, i32) {
    %c0_i32 = arith.constant 0 : i32
    %c0_i32_0 = arith.constant 0 : i32
    %c0_i32_1 = arith.constant 0 : i32
    return %c0_i32, %c0_i32_0 : i32, i32
  }
  func.func @transform_2(%arg0: i32) -> (i32, i32) {
    %c0_i32 = arith.constant 0 : i32
    %c0_i32_0 = arith.constant 0 : i32
    %c0_i32_1 = arith.constant 0 : i32
    return %c0_i32, %c0_i32_0 : i32, i32
  }
  func.func @transform_3(%arg0: i32) -> (i32, i32, i32) {
    %c0_i32 = arith.constant 0 : i32
    %c0_i32_0 = arith.constant 0 : i32
    %c0_i32_1 = arith.constant 0 : i32
    return %arg0, %c0_i32, %c0_i32_0 : i32, i32, i32
  }
}

module attributes {stable_mosaic.version = 11 : i64} {
  func.func @conv_block_head_kernel(%arg0: i32, %arg1: memref<1x96x256xbf16, #tpu.memory_space<vmem>>, %arg2: memref<160x384xbf16, #tpu.memory_space<vmem>>, %arg3: memref<40x1xf32, #tpu.memory_space<vmem>>, %arg4: memref<3x40x256xf32, #tpu.memory_space<vmem>>, %arg5: memref<1x3xf32, #tpu.memory_space<vmem>>, %arg6: memref<1x1x3xf32, #tpu.memory_space<vmem>>) attributes {dimension_semantics = [#tpu.dimension_semantics<parallel>], iteration_bounds = array<i64: 2>, scalar_prefetch = 0 : i64, scratch_operands = 0 : i64, tpu.core_type = #tpu.core_type<tc>, window_params = [{transform_indices = @transform_0, window_bounds = array<i64: 1, 96, 256>}, {pipeline_mode = #tpu.pipeline_mode<synchronous>, transform_indices = @transform_1, window_bounds = array<i64: 160, 384>}, {pipeline_mode = #tpu.pipeline_mode<synchronous>, transform_indices = @transform_2, window_bounds = array<i64: 40, 1>}, {pipeline_mode = #tpu.pipeline_mode<synchronous>, transform_indices = @transform_3, window_bounds = array<i64: 3, 40, 256>}, {pipeline_mode = #tpu.pipeline_mode<synchronous>, transform_indices = @transform_4, window_bounds = array<i64: 1, 3>}, {transform_indices = @transform_5, window_bounds = array<i64: 1, 1, 3>}]} {
    %c0 = arith.constant 0 : index
    %c0_0 = arith.constant 0 : index
    %c0_1 = arith.constant 0 : index
    %0 = vector.load %arg1[%c0, %c0_0, %c0_1] : memref<1x96x256xbf16, #tpu.memory_space<vmem>>, vector<1x96x256xbf16>
    %1 = vector.shape_cast %0 : vector<1x96x256xbf16> to vector<96x256xbf16>
    %c0_2 = arith.constant 0 : index
    %c0_3 = arith.constant 0 : index
    %2 = vector.load %arg2[%c0_2, %c0_3] : memref<160x384xbf16, #tpu.memory_space<vmem>>, vector<160x384xbf16>
    %c0_4 = arith.constant 0 : index
    %c0_5 = arith.constant 0 : index
    %3 = vector.load %arg3[%c0_4, %c0_5] : memref<40x1xf32, #tpu.memory_space<vmem>>, vector<40x1xf32>
    %4 = vector.extract_strided_slice %1 {offsets = [0, 1], sizes = [96, 255], strides = [1, 1]} : vector<96x256xbf16> to vector<96x255xbf16>
    %5 = vector.extract_strided_slice %1 {offsets = [0, 0], sizes = [96, 1], strides = [1, 1]} : vector<96x256xbf16> to vector<96x1xbf16>
    %6 = tpu.concatenate %4, %5 in 1 : vector<96x255xbf16>, vector<96x1xbf16> -> vector<96x256xbf16>
    %7 = vector.extract_strided_slice %1 {offsets = [0, 15], sizes = [96, 241], strides = [1, 1]} : vector<96x256xbf16> to vector<96x241xbf16>
    %8 = vector.extract_strided_slice %1 {offsets = [0, 0], sizes = [96, 15], strides = [1, 1]} : vector<96x256xbf16> to vector<96x15xbf16>
    %9 = tpu.concatenate %7, %8 in 1 : vector<96x241xbf16>, vector<96x15xbf16> -> vector<96x256xbf16>
    %10 = vector.extract_strided_slice %1 {offsets = [0, 16], sizes = [96, 240], strides = [1, 1]} : vector<96x256xbf16> to vector<96x240xbf16>
    %11 = vector.extract_strided_slice %1 {offsets = [0, 0], sizes = [96, 16], strides = [1, 1]} : vector<96x256xbf16> to vector<96x16xbf16>
    %12 = tpu.concatenate %10, %11 in 1 : vector<96x240xbf16>, vector<96x16xbf16> -> vector<96x256xbf16>
    %13 = tpu.concatenate %1, %6, %9, %12 in 0 : vector<96x256xbf16>, vector<96x256xbf16>, vector<96x256xbf16>, vector<96x256xbf16> -> vector<384x256xbf16>
    %cst = arith.constant dense<0.000000e+00> : vector<160x256xf32>
    %14 = tpu.matmul %2, %13, %cst {dimension_numbers = #tpu.dot_dimension_numbers<[1], [0], [0], [1], [0, 0, 1, 1], [], []>} : vector<160x384xbf16>, vector<384x256xbf16>, vector<160x256xf32> -> vector<160x256xf32>
    %15 = vector.extract_strided_slice %14 {offsets = [0, 0], sizes = [40, 256], strides = [1, 1]} : vector<160x256xf32> to vector<40x256xf32>
    %16 = vector.extract_strided_slice %14 {offsets = [40, 0], sizes = [40, 256], strides = [1, 1]} : vector<160x256xf32> to vector<40x256xf32>
    %17 = arith.maximumf %15, %16 : vector<40x256xf32>
    %18 = vector.extract_strided_slice %14 {offsets = [80, 0], sizes = [40, 256], strides = [1, 1]} : vector<160x256xf32> to vector<40x256xf32>
    %19 = vector.extract_strided_slice %14 {offsets = [120, 0], sizes = [40, 256], strides = [1, 1]} : vector<160x256xf32> to vector<40x256xf32>
    %20 = arith.maximumf %18, %19 : vector<40x256xf32>
    %21 = arith.maximumf %17, %20 : vector<40x256xf32>
    %22 = vector.broadcast %3 : vector<40x1xf32> to vector<40x256xf32>
    %23 = arith.addf %21, %22 : vector<40x256xf32>
    %cst_6 = arith.constant 0.000000e+00 : f32
    %24 = vector.broadcast %cst_6 : f32 to vector<40x256xf32>
    %25 = arith.maximumf %23, %24 : vector<40x256xf32>
    %c0_7 = arith.constant 0 : index
    %c0_8 = arith.constant 0 : index
    %c0_9 = arith.constant 0 : index
    %26 = vector.load %arg4[%c0_7, %c0_8, %c0_9] : memref<3x40x256xf32, #tpu.memory_space<vmem>>, vector<1x40x256xf32>
    %27 = vector.shape_cast %26 : vector<1x40x256xf32> to vector<40x256xf32>
    %28 = arith.mulf %25, %27 : vector<40x256xf32>
    %cst_10 = arith.constant dense<0.000000e+00> : vector<40xf32>
    %29 = vector.multi_reduction <add>, %28, %cst_10 [1] : vector<40x256xf32> to vector<40xf32>
    %30 = vector.shape_cast %29 : vector<40xf32> to vector<40x1xf32>
    %cst_11 = arith.constant dense<0.000000e+00> : vector<1xf32>
    %31 = vector.multi_reduction <add>, %30, %cst_11 [0] : vector<40x1xf32> to vector<1xf32>
    %32 = vector.shape_cast %31 : vector<1xf32> to vector<1x1xf32>
    %c1 = arith.constant 1 : index
    %c0_12 = arith.constant 0 : index
    %c0_13 = arith.constant 0 : index
    %33 = vector.load %arg4[%c1, %c0_12, %c0_13] : memref<3x40x256xf32, #tpu.memory_space<vmem>>, vector<1x40x256xf32>
    %34 = vector.shape_cast %33 : vector<1x40x256xf32> to vector<40x256xf32>
    %35 = arith.mulf %25, %34 : vector<40x256xf32>
    %cst_14 = arith.constant dense<0.000000e+00> : vector<40xf32>
    %36 = vector.multi_reduction <add>, %35, %cst_14 [1] : vector<40x256xf32> to vector<40xf32>
    %37 = vector.shape_cast %36 : vector<40xf32> to vector<40x1xf32>
    %cst_15 = arith.constant dense<0.000000e+00> : vector<1xf32>
    %38 = vector.multi_reduction <add>, %37, %cst_15 [0] : vector<40x1xf32> to vector<1xf32>
    %39 = vector.shape_cast %38 : vector<1xf32> to vector<1x1xf32>
    %c2 = arith.constant 2 : index
    %c0_16 = arith.constant 0 : index
    %c0_17 = arith.constant 0 : index
    %40 = vector.load %arg4[%c2, %c0_16, %c0_17] : memref<3x40x256xf32, #tpu.memory_space<vmem>>, vector<1x40x256xf32>
    %41 = vector.shape_cast %40 : vector<1x40x256xf32> to vector<40x256xf32>
    %42 = arith.mulf %25, %41 : vector<40x256xf32>
    %cst_18 = arith.constant dense<0.000000e+00> : vector<40xf32>
    %43 = vector.multi_reduction <add>, %42, %cst_18 [1] : vector<40x256xf32> to vector<40xf32>
    %44 = vector.shape_cast %43 : vector<40xf32> to vector<40x1xf32>
    %cst_19 = arith.constant dense<0.000000e+00> : vector<1xf32>
    %45 = vector.multi_reduction <add>, %44, %cst_19 [0] : vector<40x1xf32> to vector<1xf32>
    %46 = vector.shape_cast %45 : vector<1xf32> to vector<1x1xf32>
    %47 = tpu.concatenate %32, %39, %46 in 1 : vector<1x1xf32>, vector<1x1xf32>, vector<1x1xf32> -> vector<1x3xf32>
    %c0_20 = arith.constant 0 : index
    %c0_21 = arith.constant 0 : index
    %48 = vector.load %arg5[%c0_20, %c0_21] : memref<1x3xf32, #tpu.memory_space<vmem>>, vector<1x3xf32>
    %49 = arith.addf %47, %48 : vector<1x3xf32>
    %cst_22 = arith.constant dense<0xFF800000> : vector<1xf32>
    %50 = vector.multi_reduction <maximumf>, %49, %cst_22 [1] : vector<1x3xf32> to vector<1xf32>
    %51 = vector.shape_cast %50 : vector<1xf32> to vector<1x1xf32>
    %52 = vector.broadcast %51 : vector<1x1xf32> to vector<1x3xf32>
    %53 = arith.subf %49, %52 : vector<1x3xf32>
    %54 = math.exp %53 : vector<1x3xf32>
    %cst_23 = arith.constant dense<0.000000e+00> : vector<1xf32>
    %55 = vector.multi_reduction <add>, %54, %cst_23 [1] : vector<1x3xf32> to vector<1xf32>
    %56 = vector.shape_cast %55 : vector<1xf32> to vector<1x1xf32>
    %57 = math.log %56 : vector<1x1xf32>
    %58 = vector.broadcast %57 : vector<1x1xf32> to vector<1x3xf32>
    %59 = arith.subf %53, %58 : vector<1x3xf32>
    %c0_24 = arith.constant 0 : index
    %c0_25 = arith.constant 0 : index
    %c0_26 = arith.constant 0 : index
    %60 = vector.load %arg6[%c0_24, %c0_25, %c0_26] : memref<1x1x3xf32, #tpu.memory_space<vmem>>, vector<1x1x3xf32>
    %61 = vector.shape_cast %60 : vector<1x1x3xf32> to vector<1x3xf32>
    %62 = vector.shape_cast %59 : vector<1x3xf32> to vector<1x1x3xf32>
    tpu.vector_store %arg6[%c0_24, %c0_25, %c0_26], %62 {strides = array<i32>} : memref<1x1x3xf32, #tpu.memory_space<vmem>>, vector<1x1x3xf32>,
    return
  }
  func.func @transform_0(%arg0: i32) -> (i32, i32, i32) {
    %c0_i32 = arith.constant 0 : i32
    %c0_i32_0 = arith.constant 0 : i32
    %c0_i32_1 = arith.constant 0 : i32
    return %arg0, %c0_i32, %c0_i32_0 : i32, i32, i32
  }
  func.func @transform_1(%arg0: i32) -> (i32, i32) {
    %c0_i32 = arith.constant 0 : i32
    %c0_i32_0 = arith.constant 0 : i32
    %c0_i32_1 = arith.constant 0 : i32
    return %c0_i32, %c0_i32_0 : i32, i32
  }
  func.func @transform_2(%arg0: i32) -> (i32, i32) {
    %c0_i32 = arith.constant 0 : i32
    %c0_i32_0 = arith.constant 0 : i32
    %c0_i32_1 = arith.constant 0 : i32
    return %c0_i32, %c0_i32_0 : i32, i32
  }
  func.func @transform_3(%arg0: i32) -> (i32, i32, i32) {
    %c0_i32 = arith.constant 0 : i32
    %c0_i32_0 = arith.constant 0 : i32
    %c0_i32_1 = arith.constant 0 : i32
    %c0_i32_2 = arith.constant 0 : i32
    return %c0_i32, %c0_i32_0, %c0_i32_1 : i32, i32, i32
  }
  func.func @transform_4(%arg0: i32) -> (i32, i32) {
    %c0_i32 = arith.constant 0 : i32
    %c0_i32_0 = arith.constant 0 : i32
    %c0_i32_1 = arith.constant 0 : i32
    return %c0_i32, %c0_i32_0 : i32, i32
  }
  func.func @transform_5(%arg0: i32) -> (i32, i32, i32) {
    %c0_i32 = arith.constant 0 : i32
    %c0_i32_0 = arith.constant 0 : i32
    %c0_i32_1 = arith.constant 0 : i32
    return %arg0, %c0_i32, %c0_i32_0 : i32, i32, i32
  }
}

</mosaic_0001>

<bundles_post_ra>
// kernel: net_forward.4
= control target key start
LH: loop header
LB: loop body
LE: loop exit
PB: predicated region body
PF: predicated region fallthrough
CT: control target
= control target key end

     0   :  { %s6192_s12 = smov 0   ;;  %s8644_s0 = inlined_call_operand.vmem [shape: bf16[2,16,12800], index: 0, kind: input, shape index: {}]   ;;  %s8645_s1 = inlined_call_operand.vmem [shape: bf16[32,64], index: 1, kind: input, shape index: {}]   ;;  %s8646_s2 = inlined_call_operand.vmem [shape: f32[8,1], index: 2, kind: input, shape index: {}]   ;;  %s8647_s3 = inlined_call_operand.vmem [shape: bf16[2,8,12800], index: 3, kind: output, shape index: {}]  }
   0x1 LB: > { %s5666_s13 = sadd.s32 4294967295, %s6166_s12   ;;  %p5670_p0 = scmp.ge.s32.totalorder %s6166_s12, 1  ;;  %s6166_s12 = sphi %s6192_s12, %s13_s12  }
   0x2   : > { %p137_p1 = scmp.lt.s32.totalorder %s6166_s12, 3 }
   0x4   : > { %p138_p2 = pnand %p5670_p0, %p137_p1 }
   0x6   : > { %141 = sbr.rel (%p138_p2) target bundleno = 971 (0x3cb), region = 32 }
   0xd   : > { %p161_p3 = scmp.lt.s32.totalorder %s5666_s13, 1  ;;  %s6168_s18 = smov 127   ;;  %v8648_v5 = vmov 0   ;;  %vm877_vm0 = vcmask 1039360   ;;  %vm1281_vm1 = vcmask 121856   ;;  %vm1685_vm2 = vcmask 113664  }
   0xe   : > { %s6169_s19 = smov 15   ;;  %s6170_s20 = smov 14   ;;  %2038 = vmatprep.mubr.bf16.mxu0 %v8648_v5  ;;  %2091 = vmatprep.mubr.bf16.mxu1 %v8648_v5  ;;  %v6439_v52 = vld [vmem:[%s8645_s1] sm:$0xff]   ;;  %vm1999_vm3 = vcmask 523264  }
   0xf   : > { %s8797_s13 = smov (!%p161_p3, %s5666_s13), 1  ;;  %5991 = vset.pattern.permute.xlu0 %v8648_v5 }
  0x10   : > { %s5977_s14 = smul.u32 800, %s8797_s13 }
  0x12   : > { %s6206_s17 = scalar_lea.vmem %s8644_s0, %s5977_s14  ;;  %s5978_s14 = smul.u32 400, %s8797_s13 }
  0x13   : > { %v5992_v0 = vld [vmem:[%s6206_s17 + $0xc] ss:$400 sps:$4 sm:$0xff]   ;;  %v5994_v1 = vld [vmem:[%s6206_s17 + $0x4] ss:$400 sps:$4 sm:$0xff]   ;;  %v6212_v2 = vld [vmem:[%s6206_s17 + $0x10] ss:$400 sps:$4 sm:$0xff]  }
  0x14   : > { %683 = vrot.lane.b32.xlu1 %v5992_v0, %s6168_s18  ;;  %2059 = vmatprep.subr.bf16.mxu1 %v5992_v0  ;;  %v5998_v3 = vld [vmem:[%s6206_s17 + $0x8] ss:$400 sps:$4 sm:$0xff]   ;;  %v5999_v4 = vld [vmem:[%s6206_s17] ss:$400 sps:$4 sm:$0xff]   ;;  %v6233_v6 = vld [vmem:[%s6206_s17 + $0x14] ss:$400 sps:$4 sm:$0xff]   ;;  %s8468_s16 = scalar_lea.vmem %s8647_s3, %s5978_s14 }
  0x15   : > { %679 = vrot.lane.b32.xlu0 %v5994_v1, %s6168_s18  ;;  %2006 = vmatprep.subr.bf16.mxu0 %v5994_v1  ;;  %v6239_v7 = vld [vmem:[%s6206_s17 + $0x1c] ss:$400 sps:$4 sm:$0xff]   ;;  %v6244_v8 = vld [vmem:[%s6206_s17 + $0x18] ss:$400 sps:$4 sm:$0xff]   ;;  %v6252_v9 = vld [vmem:[%s6206_s17 + $0x20] ss:$400 sps:$4 sm:$0xff]  }
  0x16   : > { %2060 = vmatpush1.bf16.msra.mxu1 %v5998_v3  ;;  %2007 = vmatpush1.bf16.msra.mxu0 %v5999_v4  ;;  %v6269_v10 = vld [vmem:[%s6206_s17 + $0x24] ss:$400 sps:$4 sm:$0xff]   ;;  %v6276_v11 = vld [vmem:[%s6206_s17 + $0x2c] ss:$400 sps:$4 sm:$0xff]   ;;  %v6281_v12 = vld [vmem:[%s6206_s17 + $0x28] ss:$400 sps:$4 sm:$0xff]  }
  0x17   : > { %v6288_v13 = vld [vmem:[%s6206_s17 + $0x30] ss:$400 sps:$4 sm:$0xff]   ;;  %v6305_v14 = vld [vmem:[%s6206_s17 + $0x34] ss:$400 sps:$4 sm:$0xff]   ;;  %v6312_v15 = vld [vmem:[%s6206_s17 + $0x3c] ss:$400 sps:$4 sm:$0xff]  }
  0x18   : > { %685 = vrot.lane.b32.xlu1 %v6212_v2, %s6168_s18  ;;  %v6317_v16 = vld [vmem:[%s6206_s17 + $0x38] ss:$400 sps:$4 sm:$0xff]   ;;  %v6324_v17 = vld [vmem:[%s6206_s17 + $0x40] ss:$400 sps:$4 sm:$0xff]   ;;  %v6341_v18 = vld [vmem:[%s6206_s17 + $0x44] ss:$400 sps:$4 sm:$0xff]  }
  0x19   : > { %681 = vrot.lane.b32.xlu0 %v5998_v3, %s6168_s18  ;;  %v6348_v19 = vld [vmem:[%s6206_s17 + $0x4c] ss:$400 sps:$4 sm:$0xff]   ;;  %v6353_v20 = vld [vmem:[%s6206_s17 + $0x48] ss:$400 sps:$4 sm:$0xff]   ;;  %v6360_v21 = vld [vmem:[%s6206_s17 + $0x50] ss:$400 sps:$4 sm:$0xff]  }
  0x1a   : > { %v6383_v29 = vld [vmem:[%s6206_s17 + $0x54] ss:$400 sps:$4 sm:$0xff]   ;;  %v6394_v33 = vld [vmem:[%s6206_s17 + $0x5c] ss:$400 sps:$4 sm:$0xff]   ;;  %v6399_v34 = vld [vmem:[%s6206_s17 + $0x58] ss:$400 sps:$4 sm:$0xff]  }
  0x1b   : > { %v6407_v38 = vld [vmem:[%s6206_s17 + $0x60] ss:$400 sps:$4 sm:$0xff]   ;;  %v6449_v55 = vld [vmem:[%s6206_s17 + $0x64] ss:$400 sps:$4 sm:$0xff]   ;;  %v6464_v59 = vld [vmem:[%s6206_s17 + $0x6c] ss:$400 sps:$4 sm:$0xff]  }
  0x1c   : > { %1083 = vrot.lane.b32.xlu1 %v5994_v1, %s6169_s19  ;;  %v6470_v60 = vld [vmem:[%s6206_s17 + $0x68] ss:$400 sps:$4 sm:$0xff]  }
  0x1d   : > { %677 = vrot.lane.b32.xlu0 %v5999_v4, %s6168_s18 }
  0x20   : > { %1087 = vrot.lane.b32.xlu1 %v5992_v0, %s6169_s19 }
  0x21   : > { %1085 = vrot.lane.b32.xlu0 %v5998_v3, %s6169_s19 }
  0x24   : > { %1081 = vrot.lane.b32.xlu1 %v5999_v4, %s6169_s19 }
  0x25   : > { %1089 = vrot.lane.b32.xlu0 %v6212_v2, %s6169_s19 }
  0x28   : > { %1489 = vrot.lane.b32.xlu1 %v5998_v3, %s6170_s20 }
  0x29   : > { %1487 = vrot.lane.b32.xlu0 %v5994_v1, %s6170_s20  ;;  %v6484_v1 = vld [vmem:[%s8645_s1 + $0x8] sm:$0xff]  }
  0x2c   : > { %1493 = vrot.lane.b32.xlu1 %v6212_v2, %s6170_s20 }
  0x2d   : > { %1491 = vrot.lane.b32.xlu0 %v5992_v0, %s6170_s20 }
  0x30   : > { %687 = vrot.lane.b32.xlu1 %v6233_v6, %s6168_s18 }
  0x31   : > { %1485 = vrot.lane.b32.xlu0 %v5999_v4, %s6170_s20 }
  0x34   : > { %691 = vrot.lane.b32.xlu1 %v6239_v7, %s6168_s18 }
  0x35   : > { %689 = vrot.lane.b32.xlu0 %v6244_v8, %s6168_s18 }
  0x38   : > { %1091 = vrot.lane.b32.xlu1 %v6233_v6, %s6169_s19 }
  0x39   : > { %693 = vrot.lane.b32.xlu0 %v6252_v9, %s6168_s18 }
  0x3c   : > { %1095 = vrot.lane.b32.xlu1 %v6239_v7, %s6169_s19 }
  0x3d   : > { %1093 = vrot.lane.b32.xlu0 %v6244_v8, %s6169_s19 }
  0x40   : > { %1495 = vrot.lane.b32.xlu1 %v6233_v6, %s6170_s20 }
  0x41   : > { %1097 = vrot.lane.b32.xlu0 %v6252_v9, %s6169_s19 }
  0x44   : > { %1499 = vrot.lane.b32.xlu1 %v6239_v7, %s6170_s20 }
  0x45   : > { %1497 = vrot.lane.b32.xlu0 %v6244_v8, %s6170_s20 }
  0x48   : > { %695 = vrot.lane.b32.xlu1 %v6269_v10, %s6168_s18 }
  0x49   : > { %1501 = vrot.lane.b32.xlu0 %v6252_v9, %s6170_s20 }
  0x4c   : > { %699 = vrot.lane.b32.xlu1 %v6276_v11, %s6168_s18 }
  0x4d   : > { %697 = vrot.lane.b32.xlu0 %v6281_v12, %s6168_s18 }
  0x50   : > { %1099 = vrot.lane.b32.xlu1 %v6269_v10, %s6169_s19 }
  0x51   : > { %701 = vrot.lane.b32.xlu0 %v6288_v13, %s6168_s18 }
  0x54   : > { %1103 = vrot.lane.b32.xlu1 %v6276_v11, %s6169_s19 }
  0x55   : > { %1101 = vrot.lane.b32.xlu0 %v6281_v12, %s6169_s19 }
  0x58   : > { %1503 = vrot.lane.b32.xlu1 %v6269_v10, %s6170_s20 }
  0x59   : > { %1105 = vrot.lane.b32.xlu0 %v6288_v13, %s6169_s19 }
  0x5c   : > { %1507 = vrot.lane.b32.xlu1 %v6276_v11, %s6170_s20 }
  0x5d   : > { %1505 = vrot.lane.b32.xlu0 %v6281_v12, %s6170_s20 }
  0x60   : > { %703 = vrot.lane.b32.xlu1 %v6305_v14, %s6168_s18 }
  0x61   : > { %1509 = vrot.lane.b32.xlu0 %v6288_v13, %s6170_s20 }
  0x64   : > { %707 = vrot.lane.b32.xlu1 %v6312_v15, %s6168_s18 }
  0x65   : > { %705 = vrot.lane.b32.xlu0 %v6317_v16, %s6168_s18 }
  0x68   : > { %1107 = vrot.lane.b32.xlu1 %v6305_v14, %s6169_s19 }
  0x69   : > { %709 = vrot.lane.b32.xlu0 %v6324_v17, %s6168_s18 }
  0x6c   : > { %1111 = vrot.lane.b32.xlu1 %v6312_v15, %s6169_s19 }
  0x6d   : > { %1109 = vrot.lane.b32.xlu0 %v6317_v16, %s6169_s19 }
  0x70   : > { %1511 = vrot.lane.b32.xlu1 %v6305_v14, %s6170_s20 }
  0x71   : > { %1113 = vrot.lane.b32.xlu0 %v6324_v17, %s6169_s19 }
  0x74   : > { %1515 = vrot.lane.b32.xlu1 %v6312_v15, %s6170_s20 }
  0x75   : > { %1513 = vrot.lane.b32.xlu0 %v6317_v16, %s6170_s20 }
  0x78   : > { %711 = vrot.lane.b32.xlu1 %v6341_v18, %s6168_s18 }
  0x79   : > { %1517 = vrot.lane.b32.xlu0 %v6324_v17, %s6170_s20 }
  0x7c   : > { %715 = vrot.lane.b32.xlu1 %v6348_v19, %s6168_s18 }
  0x7d   : > { %713 = vrot.lane.b32.xlu0 %v6353_v20, %s6168_s18 }
  0x80   : > { %1115 = vrot.lane.b32.xlu1 %v6341_v18, %s6169_s19 }
  0x81   : > { %717 = vrot.lane.b32.xlu0 %v6360_v21, %s6168_s18 }
  0x84   : > { %1119 = vrot.lane.b32.xlu1 %v6348_v19, %s6169_s19 }
  0x85   : > { %1117 = vrot.lane.b32.xlu0 %v6353_v20, %s6169_s19 }
  0x86   : > { %v684_v22 = vpop.permute.xlu1 %683 }
  0x87   : > { %v680_v23 = vpop.permute.xlu0 %679 }
  0x88   : > { %1519 = vrot.lane.b32.xlu1 %v6341_v18, %s6170_s20 }
  0x89   : > { %1121 = vrot.lane.b32.xlu0 %v6360_v21, %s6169_s19 }
  0x8a   : > { %v6374_v24 = vpop.permute.xlu1 %685 }
  0x8b   : > { %v682_v25 = vpop.permute.xlu0 %681  ;;  %v881_v26 = vsel %vm877_vm0, %v684_v22, %v6374_v24 }
  0x8c   : > { %2061 = vmatprep.subr.bf16.mxu1 %v881_v26  ;;  %1523 = vrot.lane.b32.xlu1 %v6348_v19, %s6170_s20  ;;  %v879_v27 = vsel %vm877_vm0, %v680_v23, %v682_v25  ;;  %v880_v28 = vsel %vm877_vm0, %v682_v25, %v684_v22 }
  0x8d   : > { %1521 = vrot.lane.b32.xlu0 %v6353_v20, %s6170_s20  ;;  %2008 = vmatprep.subr.bf16.mxu0 %v879_v27 }
  0x8e   : > { %2062 = vmatpush1.bf16.msra.mxu1 %v880_v28  ;;  %v1084_v30 = vpop.permute.xlu1 %1083 }
  0x8f   : > { %v6387_v31 = vpop.permute.xlu0 %677 }
  0x90   : > { %719 = vrot.lane.b32.xlu1 %v6383_v29, %s6168_s18  ;;  %v878_v32 = vsel %vm877_vm0, %v6387_v31, %v680_v23 }
  0x91   : > { %1525 = vrot.lane.b32.xlu0 %v6360_v21, %s6170_s20  ;;  %2009 = vmatpush1.bf16.msra.mxu0 %v878_v32 }
  0x92   : > { %v1088_v35 = vpop.permute.xlu1 %1087 }
  0x93   : > { %v1086_v36 = vpop.permute.xlu0 %1085 }
  0x94   : > { %723 = vrot.lane.b32.xlu1 %v6394_v33, %s6168_s18  ;;  %v1283_v37 = vsel %vm1281_vm1, %v1084_v30, %v1086_v36  ;;  %v1284_v43 = vsel %vm1281_vm1, %v1086_v36, %v1088_v35 }
  0x95   : > { %721 = vrot.lane.b32.xlu0 %v6399_v34, %s6168_s18  ;;  %2010 = vmatprep.subr.bf16.mxu0 %v1283_v37  ;;  %v6523_v37 = vld [vmem:[%s6206_s17 + $0x74] ss:$400 sps:$4 sm:$0xff]  }
  0x96   : > { %v6409_v39 = vpop.permute.xlu1 %1081 }
  0x97   : > { %v6411_v40 = vpop.permute.xlu0 %1089  ;;  %v1282_v41 = vsel %vm1281_vm1, %v6409_v39, %v1084_v30 }
  0x98   : > { %1123 = vrot.lane.b32.xlu1 %v6383_v29, %s6169_s19  ;;  %2011 = vmatpush1.bf16.msra.mxu0 %v1282_v41  ;;  %v1285_v42 = vsel %vm1281_vm1, %v1088_v35, %v6411_v40 }
  0x99   : > { %725 = vrot.lane.b32.xlu0 %v6407_v38, %s6168_s18  ;;  %2063 = vmatprep.subr.bf16.mxu1 %v1285_v42 }
  0x9a   : > { %2064 = vmatpush1.bf16.msra.mxu1 %v1284_v43  ;;  %v1490_v44 = vpop.permute.xlu1 %1489  ;;  %v6536_v43 = vld [vmem:[%s6206_s17 + $0x7c] ss:$400 sps:$4 sm:$0xff]  }
  0x9b   : > { %v1488_v45 = vpop.permute.xlu0 %1487 }
  0x9c   : > { %1127 = vrot.lane.b32.xlu1 %v6394_v33, %s6169_s19  ;;  %v1687_v46 = vsel %vm1685_vm2, %v1488_v45, %v1490_v44 }
  0x9d   : > { %1125 = vrot.lane.b32.xlu0 %v6399_v34, %s6169_s19  ;;  %2012 = vmatprep.subr.bf16.mxu0 %v1687_v46 }
  0x9e   : > { %v6427_v47 = vpop.permute.xlu1 %1493 }
  0x9f   : > { %v1492_v48 = vpop.permute.xlu0 %1491 }
  0xa0   : > { %1527 = vrot.lane.b32.xlu1 %v6383_v29, %s6170_s20  ;;  %v1689_v49 = vsel %vm1685_vm2, %v1492_v48, %v6427_v47  ;;  %v1688_v50 = vsel %vm1685_vm2, %v1490_v44, %v1492_v48  ;;  %v6542_v44 = vld [vmem:[%s6206_s17 + $0x78] ss:$400 sps:$4 sm:$0xff]  }
  0xa1   : > { %1129 = vrot.lane.b32.xlu0 %v6407_v38, %s6169_s19  ;;  %2065 = vmatprep.subr.bf16.mxu1 %v1689_v49 }
  0xa2   : > { %2066 = vmatpush1.bf16.msra.mxu1 %v1688_v50  ;;  %v688_v51 = vpop.permute.xlu1 %687 }
  0xa3   : > { %v6441_v53 = vpop.permute.xlu0 %1485  ;;  %2165 = vmatprep.subr.bf16.mxu1 %v6239_v7  ;;  %v882_v63 = vsel %vm877_vm0, %v6374_v24, %v688_v51 }
  0xa4   : > { %1531 = vrot.lane.b32.xlu1 %v6394_v33, %s6170_s20  ;;  %v1686_v54 = vsel %vm1685_vm2, %v6441_v53, %v1488_v45 }
  0xa5   : > { %1529 = vrot.lane.b32.xlu0 %v6399_v34, %s6170_s20  ;;  %2013 = vmatpush1.bf16.msra.mxu0 %v1686_v54 }
  0xa6   : > { %v692_v56 = vpop.permute.xlu1 %691  ;;  %2112 = vmatprep.subr.bf16.mxu0 %v6233_v6  ;;  %5777 = vmatmul.mubr.msk.bf16.vlgmr.msra.gmra.mrb[0].mxu1 %vm1999_vm3, %v6439_v52 }
  0xa7   : > { %v690_v57 = vpop.permute.xlu0 %689  ;;  %2166 = vmatpush1.bf16.msra.mxu1 %v6244_v8  ;;  %2101 = vmatprep.mubr.bf16.mxu1 %v8648_v5 }
  0xa8   : > { %727 = vrot.lane.b32.xlu1 %v6449_v55, %s6168_s18  ;;  %5775 = vmatmul.mubr.msk.bf16.vlgmr.msra.gmra.mrb[0].mxu0 %vm1999_vm3, %v6439_v52  ;;  %v883_v58 = vsel %vm877_vm0, %v688_v51, %v690_v57  ;;  %v884_v3 = vsel %vm877_vm0, %v690_v57, %v692_v56 }
  0xa9   : > { %1533 = vrot.lane.b32.xlu0 %v6407_v38, %s6170_s20  ;;  %2113 = vmatpush1.bf16.msra.mxu0 %v6212_v2  ;;  %v6489_v2 = vld [vmem:[%s6206_s17 + $0x70] ss:$400 sps:$4 sm:$0xff]  }
  0xaa   : > { %2114 = vmatprep.subr.bf16.mxu0 %v883_v58  ;;  %v1092_v61 = vpop.permute.xlu1 %1091  ;;  %2048 = vmatprep.mubr.bf16.mxu0 %v8648_v5 }
  0xab   : > { %v6473_v62 = vpop.permute.xlu0 %693  ;;  %v1286_v8 = vsel %vm1281_vm1, %v6411_v40, %v1092_v61 }
  0xac   : > { %731 = vrot.lane.b32.xlu1 %v6464_v59, %s6168_s18  ;;  %v885_v0 = vsel %vm877_vm0, %v692_v56, %v6473_v62 }
  0xad   : > { %729 = vrot.lane.b32.xlu0 %v6470_v60, %s6168_s18  ;;  %2115 = vmatpush1.bf16.msra.mxu0 %v882_v63 }
  0xae   : > { %2167 = vmatprep.subr.bf16.mxu1 %v885_v0  ;;  %v1096_v4 = vpop.permute.xlu1 %1095  ;;  %5778 = vmatmul.mubr.msk.bf16.gmra.mrb[4].mxu1 %vm1999_vm3, %v6484_v1 }
  0xaf   : > { %2168 = vmatpush1.bf16.msra.mxu1 %v884_v3  ;;  %v1094_v6 = vpop.permute.xlu0 %1093  ;;  %2197 = vmatprep.mubr.bf16.mxu1 %v8648_v5 }
  0xb0   : > { %1131 = vrot.lane.b32.xlu1 %v6449_v55, %s6169_s19  ;;  %v1287_v7 = vsel %vm1281_vm1, %v1092_v61, %v1094_v6  ;;  %5776 = vmatmul.mubr.msk.bf16.gmra.mrb[4].mxu0 %vm1999_vm3, %v6484_v1  ;;  %v1288_v25 = vsel %vm1281_vm1, %v1094_v6, %v1096_v4 }
  0xb1   : > { %733 = vrot.lane.b32.xlu0 %v6489_v2, %s6168_s18  ;;  %2116 = vmatprep.subr.bf16.mxu0 %v1287_v7  ;;  %v6588_v7 = vld [vmem:[%s6206_s17 + $0x84] ss:$400 sps:$4 sm:$0xff]  }
  0xb2   : > { %2117 = vmatpush1.bf16.msra.mxu0 %v1286_v8  ;;  %v1496_v22 = vpop.permute.xlu1 %1495  ;;  %2144 = vmatprep.mubr.bf16.mxu0 %v8648_v5 }
  0xb3   : > { %v1098_v23 = vpop.permute.xlu0 %1097  ;;  %v1690_v30 = vsel %vm1685_vm2, %v6427_v47, %v1496_v22  ;;  %v6556_v47 = vld [vmem:[%s6206_s17 + $0x80] ss:$400 sps:$4 sm:$0xff]  }
  0xb4   : > { %1135 = vrot.lane.b32.xlu1 %v6464_v59, %s6169_s19  ;;  %v1289_v24 = vsel %vm1281_vm1, %v1096_v4, %v1098_v23 }
  0xb5   : > { %1133 = vrot.lane.b32.xlu0 %v6470_v60, %s6169_s19  ;;  %2169 = vmatprep.subr.bf16.mxu1 %v1289_v24  ;;  %v6601_v24 = vld [vmem:[%s6206_s17 + $0x8c] ss:$400 sps:$4 sm:$0xff]  }
  0xb6   : > { %2170 = vmatpush1.bf16.msra.mxu1 %v1288_v25  ;;  %v1500_v26 = vpop.permute.xlu1 %1499  ;;  %v6607_v25 = vld [vmem:[%s6206_s17 + $0x88] ss:$400 sps:$4 sm:$0xff]  }
  0xb7   : > { %v1498_v27 = vpop.permute.xlu0 %1497 }
  0xb8   : > { %1535 = vrot.lane.b32.xlu1 %v6449_v55, %s6170_s20  ;;  %v1691_v28 = vsel %vm1685_vm2, %v1496_v22, %v1498_v27  ;;  %v1692_v40 = vsel %vm1685_vm2, %v1498_v27, %v1500_v26 }
  0xb9   : > { %1137 = vrot.lane.b32.xlu0 %v6489_v2, %s6169_s19  ;;  %2118 = vmatprep.subr.bf16.mxu0 %v1691_v28  ;;  %v6620_v28 = vld [vmem:[%s6206_s17 + $0x90] ss:$400 sps:$4 sm:$0xff]  }
  0xba   : > { %2119 = vmatpush1.bf16.msra.mxu0 %v1690_v30  ;;  %v696_v32 = vpop.permute.xlu1 %695 }
  0xbb   : > { %v1502_v35 = vpop.permute.xlu0 %1501  ;;  %2218 = vmatprep.subr.bf16.mxu0 %v6269_v10 }
  0xbc   : > { %1539 = vrot.lane.b32.xlu1 %v6464_v59, %s6170_s20  ;;  %v1693_v36 = vsel %vm1685_vm2, %v1500_v26, %v1502_v35 }
  0xbd   : > { %1537 = vrot.lane.b32.xlu0 %v6470_v60, %s6170_s20  ;;  %2171 = vmatprep.subr.bf16.mxu1 %v1693_v36 }
  0xbe   : > { %5779 = vmatmul.mubr.msk.bf16.vlgmr.msra.gmra.mrb[8].mxu0 %vm1999_vm3, %v6439_v52  ;;  %2172 = vmatpush1.bf16.msra.mxu1 %v1692_v40  ;;  %v700_v41 = vpop.permute.xlu1 %699 }
  0xbf   : > { %2219 = vmatpush1.bf16.msra.mxu0 %v6252_v9  ;;  %v698_v10 = vpop.permute.xlu0 %697  ;;  %2271 = vmatprep.subr.bf16.mxu1 %v6276_v11  ;;  %v886_v9 = vsel %vm877_vm0, %v6473_v62, %v696_v32 }
  0xc0   : > { %735 = vrot.lane.b32.xlu1 %v6523_v37, %s6168_s18  ;;  %v887_v42 = vsel %vm877_vm0, %v696_v32, %v698_v10  ;;  %2154 = vmatprep.mubr.bf16.mxu0 %v8648_v5  ;;  %v888_v48 = vsel %vm877_vm0, %v698_v10, %v700_v41 }
  0xc1   : > { %1541 = vrot.lane.b32.xlu0 %v6489_v2, %s6170_s20  ;;  %2220 = vmatprep.subr.bf16.mxu0 %v887_v42 }
  0xc2   : > { %5781 = vmatmul.mubr.msk.bf16.vlgmr.msra.gmra.mrb[8].mxu1 %vm1999_vm3, %v6439_v52  ;;  %v1100_v11 = vpop.permute.xlu1 %1099 }
  0xc3   : > { %2221 = vmatpush1.bf16.msra.mxu0 %v886_v9  ;;  %2272 = vmatpush1.bf16.msra.mxu1 %v6281_v12  ;;  %v702_v45 = vpop.permute.xlu0 %701  ;;  %v1290_v51 = vsel %vm1281_vm1, %v1098_v23, %v1100_v11 }
  0xc4   : > { %739 = vrot.lane.b32.xlu1 %v6536_v43, %s6168_s18  ;;  %v889_v46 = vsel %vm877_vm0, %v700_v41, %v702_v45  ;;  %2207 = vmatprep.mubr.bf16.mxu1 %v8648_v5 }
  0xc5   : > { %737 = vrot.lane.b32.xlu0 %v6542_v44, %s6168_s18  ;;  %2273 = vmatprep.subr.bf16.mxu1 %v889_v46 }
  0xc6   : > { %v1104_v49 = vpop.permute.xlu1 %1103  ;;  %5780 = vmatmul.mubr.msk.bf16.gmra.mrb[12].mxu0 %vm1999_vm3, %v6484_v1 }
  0xc7   : > { %2274 = vmatpush1.bf16.msra.mxu1 %v888_v48  ;;  %v1102_v12 = vpop.permute.xlu0 %1101  ;;  %2250 = vmatprep.mubr.bf16.mxu0 %v8648_v5 }
  0xc8   : > { %1139 = vrot.lane.b32.xlu1 %v6523_v37, %s6169_s19  ;;  %v1291_v50 = vsel %vm1281_vm1, %v1100_v11, %v1102_v12  ;;  %v1292_v58 = vsel %vm1281_vm1, %v1102_v12, %v1104_v49 }
  0xc9   : > { %741 = vrot.lane.b32.xlu0 %v6556_v47, %s6168_s18  ;;  %2222 = vmatprep.subr.bf16.mxu0 %v1291_v50  ;;  %v6652_v50 = vld [vmem:[%s6206_s17 + $0x94] ss:$400 sps:$4 sm:$0xff]  }
  0xca   : > { %2223 = vmatpush1.bf16.msra.mxu0 %v1290_v51  ;;  %v1504_v54 = vpop.permute.xlu1 %1503  ;;  %5782 = vmatmul.mubr.msk.bf16.gmra.mrb[12].mxu1 %vm1999_vm3, %v6484_v1 }
  0xcb   : > { %v1106_v56 = vpop.permute.xlu0 %1105  ;;  %2303 = vmatprep.mubr.bf16.mxu1 %v8648_v5  ;;  %v1694_v0 = vsel %vm1685_vm2, %v1502_v35, %v1504_v54 }
  0xcc   : > { %1143 = vrot.lane.b32.xlu1 %v6536_v43, %s6169_s19  ;;  %v1293_v57 = vsel %vm1281_vm1, %v1104_v49, %v1106_v56 }
  0xcd   : > { %1141 = vrot.lane.b32.xlu0 %v6542_v44, %s6169_s19  ;;  %2275 = vmatprep.subr.bf16.mxu1 %v1293_v57  ;;  %v6665_v57 = vld [vmem:[%s6206_s17 + $0x9c] ss:$400 sps:$4 sm:$0xff]  }
  0xce   : > { %2276 = vmatpush1.bf16.msra.mxu1 %v1292_v58  ;;  %v1508_v61 = vpop.permute.xlu1 %1507  ;;  %v6671_v58 = vld [vmem:[%s6206_s17 + $0x98] ss:$400 sps:$4 sm:$0xff]  }
  0xcf   : > { %v1506_v62 = vpop.permute.xlu0 %1505 }
  0xd0   : > { %1543 = vrot.lane.b32.xlu1 %v6523_v37, %s6170_s20  ;;  %v1695_v63 = vsel %vm1685_vm2, %v1504_v54, %v1506_v62  ;;  %v1696_v8 = vsel %vm1685_vm2, %v1506_v62, %v1508_v61 }
  0xd1   : > { %1145 = vrot.lane.b32.xlu0 %v6556_v47, %s6169_s19  ;;  %2224 = vmatprep.subr.bf16.mxu0 %v1695_v63  ;;  %v6684_v63 = vld [vmem:[%s6206_s17 + $0xa0] ss:$400 sps:$4 sm:$0xff]  }
  0xd2   : > { %2225 = vmatpush1.bf16.msra.mxu0 %v1694_v0  ;;  %v704_v3 = vpop.permute.xlu1 %703 }
  0xd3   : > { %v1510_v4 = vpop.permute.xlu0 %1509  ;;  %2324 = vmatprep.subr.bf16.mxu0 %v6305_v14 }
  0xd4   : > { %1547 = vrot.lane.b32.xlu1 %v6536_v43, %s6170_s20  ;;  %v1697_v6 = vsel %vm1685_vm2, %v1508_v61, %v1510_v4 }
  0xd5   : > { %1545 = vrot.lane.b32.xlu0 %v6542_v44, %s6170_s20  ;;  %2277 = vmatprep.subr.bf16.mxu1 %v1697_v6 }
  0xd6   : > { %5783 = vmatmul.mubr.msk.bf16.vlgmr.msra.gmra.mrb[16].mxu0 %vm1999_vm3, %v6439_v52  ;;  %2278 = vmatpush1.bf16.msra.mxu1 %v1696_v8  ;;  %v708_v22 = vpop.permute.xlu1 %707 }
  0xd7   : > { %2325 = vmatpush1.bf16.msra.mxu0 %v6288_v13  ;;  %v706_v14 = vpop.permute.xlu0 %705  ;;  %2377 = vmatprep.subr.bf16.mxu1 %v6312_v15  ;;  %v890_v13 = vsel %vm877_vm0, %v702_v45, %v704_v3 }
  0xd8   : > { %743 = vrot.lane.b32.xlu1 %v6588_v7, %s6168_s18  ;;  %v891_v23 = vsel %vm877_vm0, %v704_v3, %v706_v14  ;;  %2260 = vmatprep.mubr.bf16.mxu0 %v8648_v5  ;;  %v892_v30 = vsel %vm877_vm0, %v706_v14, %v708_v22 }
  0xd9   : > { %1549 = vrot.lane.b32.xlu0 %v6556_v47, %s6170_s20  ;;  %2326 = vmatprep.subr.bf16.mxu0 %v891_v23 }
  0xda   : > { %5785 = vmatmul.mubr.msk.bf16.vlgmr.msra.gmra.mrb[16].mxu1 %vm1999_vm3, %v6439_v52  ;;  %v1108_v15 = vpop.permute.xlu1 %1107 }
  0xdb   : > { %2327 = vmatpush1.bf16.msra.mxu0 %v890_v13  ;;  %2378 = vmatpush1.bf16.msra.mxu1 %v6317_v16  ;;  %v710_v26 = vpop.permute.xlu0 %709  ;;  %v1294_v36 = vsel %vm1281_vm1, %v1106_v56, %v1108_v15 }
  0xdc   : > { %747 = vrot.lane.b32.xlu1 %v6601_v24, %s6168_s18  ;;  %v893_v27 = vsel %vm877_vm0, %v708_v22, %v710_v26  ;;  %2313 = vmatprep.mubr.bf16.mxu1 %v8648_v5 }
  0xdd   : > { %745 = vrot.lane.b32.xlu0 %v6607_v25, %s6168_s18  ;;  %2379 = vmatprep.subr.bf16.mxu1 %v893_v27 }
  0xde   : > { %v1112_v32 = vpop.permute.xlu1 %1111  ;;  %5784 = vmatmul.mubr.msk.bf16.gmra.mrb[20].mxu0 %vm1999_vm3, %v6484_v1 }
  0xdf   : > { %2380 = vmatpush1.bf16.msra.mxu1 %v892_v30  ;;  %v1110_v16 = vpop.permute.xlu0 %1109  ;;  %2356 = vmatprep.mubr.bf16.mxu0 %v8648_v5 }
  0xe0   : > { %1147 = vrot.lane.b32.xlu1 %v6588_v7, %s6169_s19  ;;  %v1295_v35 = vsel %vm1281_vm1, %v1108_v15, %v1110_v16  ;;  %v1296_v42 = vsel %vm1281_vm1, %v1110_v16, %v1112_v32 }
  0xe1   : > { %749 = vrot.lane.b32.xlu0 %v6620_v28, %s6168_s18  ;;  %2328 = vmatprep.subr.bf16.mxu0 %v1295_v35  ;;  %v6716_v35 = vld [vmem:[%s6206_s17 + $0xa4] ss:$400 sps:$4 sm:$0xff]  }
  0xe2   : > { %2329 = vmatpush1.bf16.msra.mxu0 %v1294_v36  ;;  %v1512_v40 = vpop.permute.xlu1 %1511  ;;  %5786 = vmatmul.mubr.msk.bf16.gmra.mrb[20].mxu1 %vm1999_vm3, %v6484_v1 }
  0xe3   : > { %v1114_v41 = vpop.permute.xlu0 %1113  ;;  %2409 = vmatprep.mubr.bf16.mxu1 %v8648_v5  ;;  %v1698_v46 = vsel %vm1685_vm2, %v1510_v4, %v1512_v40 }
  0xe4   : > { %1151 = vrot.lane.b32.xlu1 %v6601_v24, %s6169_s19  ;;  %v1297_v10 = vsel %vm1281_vm1, %v1112_v32, %v1114_v41 }
  0xe5   : > { %1149 = vrot.lane.b32.xlu0 %v6607_v25, %s6169_s19  ;;  %2381 = vmatprep.subr.bf16.mxu1 %v1297_v10  ;;  %v6729_v10 = vld [vmem:[%s6206_s17 + $0xac] ss:$400 sps:$4 sm:$0xff]  }
  0xe6   : > { %2382 = vmatpush1.bf16.msra.mxu1 %v1296_v42  ;;  %v1516_v9 = vpop.permute.xlu1 %1515  ;;  %v6735_v42 = vld [vmem:[%s6206_s17 + $0xa8] ss:$400 sps:$4 sm:$0xff]  }
  0xe7   : > { %v1514_v11 = vpop.permute.xlu0 %1513 }
  0xe8   : > { %1551 = vrot.lane.b32.xlu1 %v6588_v7, %s6170_s20  ;;  %v1699_v45 = vsel %vm1685_vm2, %v1512_v40, %v1514_v11  ;;  %v1700_v51 = vsel %vm1685_vm2, %v1514_v11, %v1516_v9 }
  0xe9   : > { %1153 = vrot.lane.b32.xlu0 %v6620_v28, %s6169_s19  ;;  %2330 = vmatprep.subr.bf16.mxu0 %v1699_v45  ;;  %v6748_v45 = vld [vmem:[%s6206_s17 + $0xb0] ss:$400 sps:$4 sm:$0xff]  }
  0xea   : > { %2331 = vmatpush1.bf16.msra.mxu0 %v1698_v46  ;;  %v712_v48 = vpop.permute.xlu1 %711 }
  0xeb   : > { %v1518_v49 = vpop.permute.xlu0 %1517  ;;  %2430 = vmatprep.subr.bf16.mxu0 %v6341_v18 }
  0xec   : > { %1555 = vrot.lane.b32.xlu1 %v6601_v24, %s6170_s20  ;;  %v1701_v12 = vsel %vm1685_vm2, %v1516_v9, %v1518_v49 }
  0xed   : > { %1553 = vrot.lane.b32.xlu0 %v6607_v25, %s6170_s20  ;;  %2383 = vmatprep.subr.bf16.mxu1 %v1701_v12 }
  0xee   : > { %5787 = vmatmul.mubr.msk.bf16.vlgmr.msra.gmra.mrb[24].mxu0 %vm1999_vm3, %v6439_v52  ;;  %2384 = vmatpush1.bf16.msra.mxu1 %v1700_v51  ;;  %v716_v54 = vpop.permute.xlu1 %715 }
  0xef   : > { %2431 = vmatpush1.bf16.msra.mxu0 %v6324_v17  ;;  %v714_v18 = vpop.permute.xlu0 %713  ;;  %2483 = vmatprep.subr.bf16.mxu1 %v6348_v19  ;;  %v894_v17 = vsel %vm877_vm0, %v710_v26, %v712_v48 }
  0xf0   : > { %751 = vrot.lane.b32.xlu1 %v6652_v50, %s6168_s18  ;;  %v895_v56 = vsel %vm877_vm0, %v712_v48, %v714_v18  ;;  %2366 = vmatprep.mubr.bf16.mxu0 %v8648_v5  ;;  %v896_v0 = vsel %vm877_vm0, %v714_v18, %v716_v54 }
  0xf1   : > { %1557 = vrot.lane.b32.xlu0 %v6620_v28, %s6170_s20  ;;  %2432 = vmatprep.subr.bf16.mxu0 %v895_v56 }
  0xf2   : > { %5789 = vmatmul.mubr.msk.bf16.vlgmr.msra.gmra.mrb[24].mxu1 %vm1999_vm3, %v6439_v52  ;;  %v1116_v19 = vpop.permute.xlu1 %1115 }
  0xf3   : > { %2433 = vmatpush1.bf16.msra.mxu0 %v894_v17  ;;  %2484 = vmatpush1.bf16.msra.mxu1 %v6353_v20  ;;  %v718_v61 = vpop.permute.xlu0 %717  ;;  %v1298_v6 = vsel %vm1281_vm1, %v1114_v41, %v1116_v19 }
  0xf4   : > { %755 = vrot.lane.b32.xlu1 %v6665_v57, %s6168_s18  ;;  %v897_v62 = vsel %vm877_vm0, %v716_v54, %v718_v61  ;;  %2419 = vmatprep.mubr.bf16.mxu1 %v8648_v5 }
  0xf5   : > { %753 = vrot.lane.b32.xlu0 %v6671_v58, %s6168_s18  ;;  %2485 = vmatprep.subr.bf16.mxu1 %v897_v62 }
  0xf6   : > { %v1120_v3 = vpop.permute.xlu1 %1119  ;;  %5788 = vmatmul.mubr.msk.bf16.gmra.mrb[28].mxu0 %vm1999_vm3, %v6484_v1 }
  0xf7   : > { %2486 = vmatpush1.bf16.msra.mxu1 %v896_v0  ;;  %v1118_v20 = vpop.permute.xlu0 %1117  ;;  %2462 = vmatprep.mubr.bf16.mxu0 %v8648_v5 }
  0xf8   : > { %1155 = vrot.lane.b32.xlu1 %v6652_v50, %s6169_s19  ;;  %v1299_v4 = vsel %vm1281_vm1, %v1116_v19, %v1118_v20  ;;  %v1300_v23 = vsel %vm1281_vm1, %v1118_v20, %v1120_v3 }
  0xf9   : > { %757 = vrot.lane.b32.xlu0 %v6684_v63, %s6168_s18  ;;  %2434 = vmatprep.subr.bf16.mxu0 %v1299_v4  ;;  %v6780_v4 = vld [vmem:[%s6206_s17 + $0xb4] ss:$400 sps:$4 sm:$0xff]  }
  0xfa   : > { %2435 = vmatpush1.bf16.msra.mxu0 %v1298_v6  ;;  %v1520_v8 = vpop.permute.xlu1 %1519  ;;  %5790 = vmatmul.mubr.msk.bf16.gmra.mrb[28].mxu1 %vm1999_vm3, %v6484_v1 }
  0xfb   : > { %v1122_v22 = vpop.permute.xlu0 %1121  ;;  %2515 = vmatprep.mubr.bf16.mxu1 %v8648_v5  ;;  %v1702_v27 = vsel %vm1685_vm2, %v1518_v49, %v1520_v8 }
  0xfc   : > { %1159 = vrot.lane.b32.xlu1 %v6665_v57, %s6169_s19  ;;  %v1301_v14 = vsel %vm1281_vm1, %v1120_v3, %v1122_v22 }
  0xfd   : > { %1157 = vrot.lane.b32.xlu0 %v6671_v58, %s6169_s19  ;;  %2487 = vmatprep.subr.bf16.mxu1 %v1301_v14  ;;  %v6793_v14 = vld [vmem:[%s6206_s17 + $0xbc] ss:$400 sps:$4 sm:$0xff]  }
  0xfe   : > { %2488 = vmatpush1.bf16.msra.mxu1 %v1300_v23  ;;  %v1524_v13 = vpop.permute.xlu1 %1523  ;;  %v6799_v23 = vld [vmem:[%s6206_s17 + $0xb8] ss:$400 sps:$4 sm:$0xff]  }
  0xff   : > { %v1522_v15 = vpop.permute.xlu0 %1521 }
 0x100   : > { %1559 = vrot.lane.b32.xlu1 %v6652_v50, %s6170_s20  ;;  %v1703_v26 = vsel %vm1685_vm2, %v1520_v8, %v1522_v15  ;;  %v1704_v36 = vsel %vm1685_vm2, %v1522_v15, %v1524_v13 }
 0x101   : > { %1161 = vrot.lane.b32.xlu0 %v6684_v63, %s6169_s19  ;;  %2436 = vmatprep.subr.bf16.mxu0 %v1703_v26  ;;  %v6812_v26 = vld [vmem:[%s6206_s17 + $0xc0] ss:$400 sps:$4 sm:$0xff]  }
 0x102   : > { %2437 = vmatpush1.bf16.msra.mxu0 %v1702_v27  ;;  %v720_v30 = vpop.permute.xlu1 %719 }
 0x103   : > { %v1526_v32 = vpop.permute.xlu0 %1525  ;;  %2536 = vmatprep.subr.bf16.mxu0 %v6383_v29 }
 0x104   : > { %1563 = vrot.lane.b32.xlu1 %v6665_v57, %s6170_s20  ;;  %v1705_v16 = vsel %vm1685_vm2, %v1524_v13, %v1526_v32 }
 0x105   : > { %1561 = vrot.lane.b32.xlu0 %v6671_v58, %s6170_s20  ;;  %2489 = vmatprep.subr.bf16.mxu1 %v1705_v16 }
 0x106   : > { %5791 = vmatmul.mubr.msk.bf16.vlgmr.msra.gmra.mrb[32].mxu0 %vm1999_vm3, %v6439_v52  ;;  %2490 = vmatpush1.bf16.msra.mxu1 %v1704_v36  ;;  %v724_v40 = vpop.permute.xlu1 %723 }
 0x107   : > { %2537 = vmatpush1.bf16.msra.mxu0 %v6360_v21  ;;  %v722_v29 = vpop.permute.xlu0 %721  ;;  %2589 = vmatprep.subr.bf16.mxu1 %v6394_v33  ;;  %v898_v21 = vsel %vm877_vm0, %v718_v61, %v720_v30 }
 0x108   : > { %759 = vrot.lane.b32.xlu1 %v6716_v35, %s6168_s18  ;;  %v899_v41 = vsel %vm877_vm0, %v720_v30, %v722_v29  ;;  %2472 = vmatprep.mubr.bf16.mxu0 %v8648_v5  ;;  %v900_v46 = vsel %vm877_vm0, %v722_v29, %v724_v40 }
 0x109   : > { %1565 = vrot.lane.b32.xlu0 %v6684_v63, %s6170_s20  ;;  %2538 = vmatprep.subr.bf16.mxu0 %v899_v41 }
 0x10a   : > { %5793 = vmatmul.mubr.msk.bf16.vlgmr.msra.gmra.mrb[32].mxu1 %vm1999_vm3, %v6439_v52  ;;  %v1124_v33 = vpop.permute.xlu1 %1123 }
 0x10b   : > { %2539 = vmatpush1.bf16.msra.mxu0 %v898_v21  ;;  %2590 = vmatpush1.bf16.msra.mxu1 %v6399_v34  ;;  %v726_v9 = vpop.permute.xlu0 %725  ;;  %v1302_v12 = vsel %vm1281_vm1, %v1122_v22, %v1124_v33 }
 0x10c   : > { %763 = vrot.lane.b32.xlu1 %v6729_v10, %s6168_s18  ;;  %v901_v11 = vsel %vm877_vm0, %v724_v40, %v726_v9  ;;  %2525 = vmatprep.mubr.bf16.mxu1 %v8648_v5 }
 0x10d   : > { %761 = vrot.lane.b32.xlu0 %v6735_v42, %s6168_s18  ;;  %2591 = vmatprep.subr.bf16.mxu1 %v901_v11 }
 0x10e   : > { %v1128_v48 = vpop.permute.xlu1 %1127  ;;  %5792 = vmatmul.mubr.msk.bf16.gmra.mrb[36].mxu0 %vm1999_vm3, %v6484_v1 }
 0x10f   : > { %2592 = vmatpush1.bf16.msra.mxu1 %v900_v46  ;;  %v1126_v34 = vpop.permute.xlu0 %1125  ;;  %2568 = vmatprep.mubr.bf16.mxu0 %v8648_v5 }
 0x110   : > { %1163 = vrot.lane.b32.xlu1 %v6716_v35, %s6169_s19  ;;  %v1303_v49 = vsel %vm1281_vm1, %v1124_v33, %v1126_v34  ;;  %v1304_v56 = vsel %vm1281_vm1, %v1126_v34, %v1128_v48 }
 0x111   : > { %765 = vrot.lane.b32.xlu0 %v6748_v45, %s6168_s18  ;;  %2540 = vmatprep.subr.bf16.mxu0 %v1303_v49  ;;  %v6844_v49 = vld [vmem:[%s6206_s17 + $0xc4] ss:$400 sps:$4 sm:$0xff]  }
 0x112   : > { %2541 = vmatpush1.bf16.msra.mxu0 %v1302_v12  ;;  %v1528_v51 = vpop.permute.xlu1 %1527  ;;  %5794 = vmatmul.mubr.msk.bf16.gmra.mrb[36].mxu1 %vm1999_vm3, %v6484_v1 }
 0x113   : > { %v1130_v54 = vpop.permute.xlu0 %1129  ;;  %2621 = vmatprep.mubr.bf16.mxu1 %v8648_v5  ;;  %v1706_v62 = vsel %vm1685_vm2, %v1526_v32, %v1528_v51 }
 0x114   : > { %1167 = vrot.lane.b32.xlu1 %v6729_v10, %s6169_s19  ;;  %v1305_v18 = vsel %vm1281_vm1, %v1128_v48, %v1130_v54 }
 0x115   : > { %1165 = vrot.lane.b32.xlu0 %v6735_v42, %s6169_s19  ;;  %2593 = vmatprep.subr.bf16.mxu1 %v1305_v18  ;;  %v6857_v18 = vld [vmem:[%s6206_s17 + $0xcc] ss:$400 sps:$4 sm:$0xff]  }
 0x116   : > { %2594 = vmatpush1.bf16.msra.mxu1 %v1304_v56  ;;  %v1532_v17 = vpop.permute.xlu1 %1531  ;;  %v6863_v56 = vld [vmem:[%s6206_s17 + $0xc8] ss:$400 sps:$4 sm:$0xff]  }
 0x117   : > { %v1530_v19 = vpop.permute.xlu0 %1529 }
 0x118   : > { %1567 = vrot.lane.b32.xlu1 %v6716_v35, %s6170_s20  ;;  %v1707_v61 = vsel %vm1685_vm2, %v1528_v51, %v1530_v19  ;;  %v1708_v6 = vsel %vm1685_vm2, %v1530_v19, %v1532_v17 }
 0x119   : > { %1169 = vrot.lane.b32.xlu0 %v6748_v45, %s6169_s19  ;;  %2542 = vmatprep.subr.bf16.mxu0 %v1707_v61  ;;  %v6876_v61 = vld [vmem:[%s6206_s17 + $0xd0] ss:$400 sps:$4 sm:$0xff]  }
 0x11a   : > { %2543 = vmatpush1.bf16.msra.mxu0 %v1706_v62  ;;  %v728_v0 = vpop.permute.xlu1 %727 }
 0x11b   : > { %v1534_v3 = vpop.permute.xlu0 %1533  ;;  %2642 = vmatprep.subr.bf16.mxu0 %v6449_v55 }
 0x11c   : > { %1571 = vrot.lane.b32.xlu1 %v6729_v10, %s6170_s20  ;;  %v1709_v20 = vsel %vm1685_vm2, %v1532_v17, %v1534_v3 }
 0x11d   : > { %1569 = vrot.lane.b32.xlu0 %v6735_v42, %s6170_s20  ;;  %2595 = vmatprep.subr.bf16.mxu1 %v1709_v20 }
 0x11e   : > { %5795 = vmatmul.mubr.msk.bf16.vlgmr.msra.gmra.mrb[40].mxu0 %vm1999_vm3, %v6439_v52  ;;  %2596 = vmatpush1.bf16.msra.mxu1 %v1708_v6  ;;  %v732_v8 = vpop.permute.xlu1 %731 }
 0x11f   : > { %2643 = vmatpush1.bf16.msra.mxu0 %v6407_v38  ;;  %v730_v55 = vpop.permute.xlu0 %729  ;;  %2695 = vmatprep.subr.bf16.mxu1 %v6464_v59  ;;  %v902_v38 = vsel %vm877_vm0, %v726_v9, %v728_v0 }
 0x120   : > { %767 = vrot.lane.b32.xlu1 %v6780_v4, %s6168_s18  ;;  %v903_v22 = vsel %vm877_vm0, %v728_v0, %v730_v55  ;;  %2578 = vmatprep.mubr.bf16.mxu0 %v8648_v5  ;;  %v904_v27 = vsel %vm877_vm0, %v730_v55, %v732_v8 }
 0x121   : > { %1573 = vrot.lane.b32.xlu0 %v6748_v45, %s6170_s20  ;;  %2644 = vmatprep.subr.bf16.mxu0 %v903_v22 }
 0x122   : > { %5797 = vmatmul.mubr.msk.bf16.vlgmr.msra.gmra.mrb[40].mxu1 %vm1999_vm3, %v6439_v52  ;;  %v1132_v59 = vpop.permute.xlu1 %1131 }
 0x123   : > { %2645 = vmatpush1.bf16.msra.mxu0 %v902_v38  ;;  %2696 = vmatpush1.bf16.msra.mxu1 %v6470_v60  ;;  %v734_v13 = vpop.permute.xlu0 %733  ;;  %v1306_v16 = vsel %vm1281_vm1, %v1130_v54, %v1132_v59 }
 0x124   : > { %771 = vrot.lane.b32.xlu1 %v6793_v14, %s6168_s18  ;;  %v905_v15 = vsel %vm877_vm0, %v732_v8, %v734_v13  ;;  %2631 = vmatprep.mubr.bf16.mxu1 %v8648_v5 }
 0x125   : > { %769 = vrot.lane.b32.xlu0 %v6799_v23, %s6168_s18  ;;  %2697 = vmatprep.subr.bf16.mxu1 %v905_v15 }
 0x126   : > { %v1136_v30 = vpop.permute.xlu1 %1135  ;;  %5796 = vmatmul.mubr.msk.bf16.gmra.mrb[44].mxu0 %vm1999_vm3, %v6484_v1 }
 0x127   : > { %2698 = vmatpush1.bf16.msra.mxu1 %v904_v27  ;;  %v1134_v60 = vpop.permute.xlu0 %1133  ;;  %2674 = vmatprep.mubr.bf16.mxu0 %v8648_v5 }
 0x128   : > { %1171 = vrot.lane.b32.xlu1 %v6780_v4, %s6169_s19  ;;  %v1307_v32 = vsel %vm1281_vm1, %v1132_v59, %v1134_v60  ;;  %v1308_v41 = vsel %vm1281_vm1, %v1134_v60, %v1136_v30 }
 0x129   : > { %773 = vrot.lane.b32.xlu0 %v6812_v26, %s6168_s18  ;;  %2646 = vmatprep.subr.bf16.mxu0 %v1307_v32  ;;  %v6908_v32 = vld [vmem:[%s6206_s17 + $0xd4] ss:$400 sps:$4 sm:$0xff]  }
 0x12a   : > { %2647 = vmatpush1.bf16.msra.mxu0 %v1306_v16  ;;  %v1536_v36 = vpop.permute.xlu1 %1535  ;;  %5798 = vmatmul.mubr.msk.bf16.gmra.mrb[44].mxu1 %vm1999_vm3, %v6484_v1 }
 0x12b   : > { %v1138_v40 = vpop.permute.xlu0 %1137  ;;  %2727 = vmatprep.mubr.bf16.mxu1 %v8648_v5  ;;  %v1710_v11 = vsel %vm1685_vm2, %v1534_v3, %v1536_v36 }
 0x12c   : > { %1175 = vrot.lane.b32.xlu1 %v6793_v14, %s6169_s19  ;;  %v1309_v29 = vsel %vm1281_vm1, %v1136_v30, %v1138_v40 }
 0x12d   : > { %1173 = vrot.lane.b32.xlu0 %v6799_v23, %s6169_s19  ;;  %2699 = vmatprep.subr.bf16.mxu1 %v1309_v29  ;;  %v6921_v29 = vld [vmem:[%s6206_s17 + $0xdc] ss:$400 sps:$4 sm:$0xff]  }
 0x12e   : > { %2700 = vmatpush1.bf16.msra.mxu1 %v1308_v41  ;;  %v1540_v21 = vpop.permute.xlu1 %1539  ;;  %v6927_v41 = vld [vmem:[%s6206_s17 + $0xd8] ss:$400 sps:$4 sm:$0xff]  }
 0x12f   : > { %v1538_v33 = vpop.permute.xlu0 %1537 }
 0x130   : > { %1575 = vrot.lane.b32.xlu1 %v6780_v4, %s6170_s20  ;;  %v1711_v9 = vsel %vm1685_vm2, %v1536_v36, %v1538_v33  ;;  %v1712_v12 = vsel %vm1685_vm2, %v1538_v33, %v1540_v21 }
 0x131   : > { %1177 = vrot.lane.b32.xlu0 %v6812_v26, %s6169_s19  ;;  %2648 = vmatprep.subr.bf16.mxu0 %v1711_v9  ;;  %v6940_v9 = vld [vmem:[%s6206_s17 + $0xe0] ss:$400 sps:$4 sm:$0xff]  }
 0x132   : > { %2649 = vmatpush1.bf16.msra.mxu0 %v1710_v11  ;;  %v736_v46 = vpop.permute.xlu1 %735 }
 0x133   : > { %v1542_v48 = vpop.permute.xlu0 %1541  ;;  %2748 = vmatprep.subr.bf16.mxu0 %v6523_v37 }
 0x134   : > { %1579 = vrot.lane.b32.xlu1 %v6793_v14, %s6170_s20  ;;  %v1713_v34 = vsel %vm1685_vm2, %v1540_v21, %v1542_v48 }
 0x135   : > { %1577 = vrot.lane.b32.xlu0 %v6799_v23, %s6170_s20  ;;  %2701 = vmatprep.subr.bf16.mxu1 %v1713_v34 }
 0x136   : > { %5799 = vmatmul.mubr.msk.bf16.vlgmr.msra.gmra.mrb[48].mxu0 %vm1999_vm3, %v6439_v52  ;;  %2702 = vmatpush1.bf16.msra.mxu1 %v1712_v12  ;;  %v740_v51 = vpop.permute.xlu1 %739 }
 0x137   : > { %2749 = vmatpush1.bf16.msra.mxu0 %v6489_v2  ;;  %v738_v37 = vpop.permute.xlu0 %737  ;;  %2801 = vmatprep.subr.bf16.mxu1 %v6536_v43  ;;  %v906_v2 = vsel %vm877_vm0, %v734_v13, %v736_v46 }
 0x138   : > { %775 = vrot.lane.b32.xlu1 %v6844_v49, %s6168_s18  ;;  %v907_v54 = vsel %vm877_vm0, %v736_v46, %v738_v37  ;;  %2684 = vmatprep.mubr.bf16.mxu0 %v8648_v5  ;;  %v908_v62 = vsel %vm877_vm0, %v738_v37, %v740_v51 }
 0x139   : > { %1581 = vrot.lane.b32.xlu0 %v6812_v26, %s6170_s20  ;;  %2750 = vmatprep.subr.bf16.mxu0 %v907_v54 }
 0x13a   : > { %5801 = vmatmul.mubr.msk.bf16.vlgmr.msra.gmra.mrb[48].mxu1 %vm1999_vm3, %v6439_v52  ;;  %v1140_v43 = vpop.permute.xlu1 %1139 }
 0x13b   : > { %2751 = vmatpush1.bf16.msra.mxu0 %v906_v2  ;;  %2802 = vmatpush1.bf16.msra.mxu1 %v6542_v44  ;;  %v742_v17 = vpop.permute.xlu0 %741  ;;  %v1310_v20 = vsel %vm1281_vm1, %v1138_v40, %v1140_v43 }
 0x13c   : > { %779 = vrot.lane.b32.xlu1 %v6857_v18, %s6168_s18  ;;  %v909_v19 = vsel %vm877_vm0, %v740_v51, %v742_v17  ;;  %2737 = vmatprep.mubr.bf16.mxu1 %v8648_v5 }
 0x13d   : > { %777 = vrot.lane.b32.xlu0 %v6863_v56, %s6168_s18  ;;  %2803 = vmatprep.subr.bf16.mxu1 %v909_v19 }
 0x13e   : > { %v1144_v0 = vpop.permute.xlu1 %1143  ;;  %5800 = vmatmul.mubr.msk.bf16.gmra.mrb[52].mxu0 %vm1999_vm3, %v6484_v1 }
 0x13f   : > { %2804 = vmatpush1.bf16.msra.mxu1 %v908_v62  ;;  %v1142_v44 = vpop.permute.xlu0 %1141  ;;  %2780 = vmatprep.mubr.bf16.mxu0 %v8648_v5 }
 0x140   : > { %1179 = vrot.lane.b32.xlu1 %v6844_v49, %s6169_s19  ;;  %v1311_v3 = vsel %vm1281_vm1, %v1140_v43, %v1142_v44  ;;  %v1312_v22 = vsel %vm1281_vm1, %v1142_v44, %v1144_v0 }
 0x141   : > { %781 = vrot.lane.b32.xlu0 %v6876_v61, %s6168_s18  ;;  %2752 = vmatprep.subr.bf16.mxu0 %v1311_v3 }
 0x142   : > { %2753 = vmatpush1.bf16.msra.mxu0 %v1310_v20  ;;  %v1544_v6 = vpop.permute.xlu1 %1543  ;;  %5802 = vmatmul.mubr.msk.bf16.gmra.mrb[52].mxu1 %vm1999_vm3, %v6484_v1 }
 0x143   : > { %v1146_v8 = vpop.permute.xlu0 %1145  ;;  %2833 = vmatprep.mubr.bf16.mxu1 %v8648_v5  ;;  %v1714_v15 = vsel %vm1685_vm2, %v1542_v48, %v1544_v6 }
 0x144   : > { %1183 = vrot.lane.b32.xlu1 %v6857_v18, %s6169_s19  ;;  %v1313_v55 = vsel %vm1281_vm1, %v1144_v0, %v1146_v8  ;;  %v6978_v0 = vld [vmem:[%s6206_s17 + $0xe4] ss:$400 sps:$4 sm:$0xff]  }
 0x145   : > { %1181 = vrot.lane.b32.xlu0 %v6863_v56, %s6169_s19  ;;  %2805 = vmatprep.subr.bf16.mxu1 %v1313_v55  ;;  %v7002_v55 = vld [vmem:[%s6206_s17 + $0xe8] ss:$400 sps:$4 sm:$0xff]  }
 0x146   : > { %2806 = vmatpush1.bf16.msra.mxu1 %v1312_v22  ;;  %v1548_v38 = vpop.permute.xlu1 %1547 }
 0x147   : > { %v1546_v59 = vpop.permute.xlu0 %1545 }
 0x148   : > { %1583 = vrot.lane.b32.xlu1 %v6844_v49, %s6170_s20  ;;  %v1715_v13 = vsel %vm1685_vm2, %v1544_v6, %v1546_v59  ;;  %v1716_v16 = vsel %vm1685_vm2, %v1546_v59, %v1548_v38  ;;  %v7015_v59 = vld [vmem:[%s6206_s17 + $0xf0] ss:$400 sps:$4 sm:$0xff]  }
 0x149   : > { %1185 = vrot.lane.b32.xlu0 %v6876_v61, %s6169_s19  ;;  %2754 = vmatprep.subr.bf16.mxu0 %v1715_v13 }
 0x14a   : > { %2755 = vmatpush1.bf16.msra.mxu0 %v1714_v15  ;;  %v744_v27 = vpop.permute.xlu1 %743 }
 0x14b   : > { %v1550_v30 = vpop.permute.xlu0 %1549  ;;  %2854 = vmatprep.subr.bf16.mxu0 %v6588_v7 }
 0x14c   : > { %1587 = vrot.lane.b32.xlu1 %v6857_v18, %s6170_s20  ;;  %v1717_v60 = vsel %vm1685_vm2, %v1548_v38, %v1550_v30 }
 0x14d   : > { %1585 = vrot.lane.b32.xlu0 %v6863_v56, %s6170_s20  ;;  %2807 = vmatprep.subr.bf16.mxu1 %v1717_v60 }
 0x14e   : > { %5803 = vmatmul.mubr.msk.bf16.vlgmr.msra.gmra.mrb[56].mxu0 %vm1999_vm3, %v6439_v52  ;;  %2808 = vmatpush1.bf16.msra.mxu1 %v1716_v16  ;;  %v748_v36 = vpop.permute.xlu1 %747 }
 0x14f   : > { %2855 = vmatpush1.bf16.msra.mxu0 %v6556_v47  ;;  %v746_v7 = vpop.permute.xlu0 %745  ;;  %2907 = vmatprep.subr.bf16.mxu1 %v6601_v24  ;;  %v910_v47 = vsel %vm877_vm0, %v742_v17, %v744_v27 }
 0x150   : > { %783 = vrot.lane.b32.xlu1 %v6908_v32, %s6168_s18  ;;  %v911_v40 = vsel %vm877_vm0, %v744_v27, %v746_v7  ;;  %2790 = vmatprep.mubr.bf16.mxu0 %v8648_v5 }
 0x151   : > { %1589 = vrot.lane.b32.xlu0 %v6876_v61, %s6170_s20  ;;  %2856 = vmatprep.subr.bf16.mxu0 %v911_v40 }
 0x152   : > { %5805 = vmatmul.mubr.msk.bf16.vlgmr.msra.gmra.mrb[56].mxu1 %vm1999_vm3, %v6439_v52  ;;  %v1148_v24 = vpop.permute.xlu1 %1147  ;;  %v912_v52 = vsel %vm877_vm0, %v746_v7, %v748_v36 }
 0x153   : > { %2857 = vmatpush1.bf16.msra.mxu0 %v910_v47  ;;  %2908 = vmatpush1.bf16.msra.mxu1 %v6607_v25  ;;  %v750_v21 = vpop.permute.xlu0 %749  ;;  %v1314_v48 = vsel %vm1281_vm1, %v1146_v8, %v1148_v24  ;;  %v6996_v8 = vld [vmem:[%s6206_s17 + $0xec] ss:$400 sps:$4 sm:$0xff]  }
 0x154   : > { %787 = vrot.lane.b32.xlu1 %v6921_v29, %s6168_s18  ;;  %v913_v33 = vsel %vm877_vm0, %v748_v36, %v750_v21  ;;  %2843 = vmatprep.mubr.bf16.mxu1 %v8648_v5 }
 0x155   : > { %785 = vrot.lane.b32.xlu0 %v6927_v41, %s6168_s18  ;;  %2909 = vmatprep.subr.bf16.mxu1 %v913_v33 }
 0x156   : > { %v1152_v11 = vpop.permute.xlu1 %1151  ;;  %5804 = vmatmul.mubr.msk.bf16.gmra.mrb[60].mxu0 %vm1999_vm3, %v6484_v1 }
 0x157   : > { %2910 = vmatpush1.bf16.msra.mxu1 %v912_v52  ;;  %v1150_v25 = vpop.permute.xlu0 %1149  ;;  %2886 = vmatprep.mubr.bf16.mxu0 %v8648_v5 }
 0x158   : > { %1187 = vrot.lane.b32.xlu1 %v6908_v32, %s6169_s19  ;;  %v1315_v46 = vsel %vm1281_vm1, %v1148_v24, %v1150_v25  ;;  %v1316_v37 = vsel %vm1281_vm1, %v1150_v25, %v1152_v11 }
 0x159   : > { %789 = vrot.lane.b32.xlu0 %v6940_v9, %s6168_s18  ;;  %2858 = vmatprep.subr.bf16.mxu0 %v1315_v46  ;;  %v7054_v46 = vld [vmem:[%s6206_s17 + $0xf4] ss:$400 sps:$4 sm:$0xff]  }
 0x15a   : > { %2859 = vmatpush1.bf16.msra.mxu0 %v1314_v48  ;;  %v1552_v34 = vpop.permute.xlu1 %1551  ;;  %5806 = vmatmul.mubr.msk.bf16.gmra.mrb[60].mxu1 %vm1999_vm3, %v6484_v1 }
 0x15b   : > { %v6954_v12 = vpop.permute.xlu0 %1153  ;;  %2939 = vmatprep.mubr.bf16.mxu1 %v8648_v5  ;;  %v1718_v43 = vsel %vm1685_vm2, %v1550_v30, %v1552_v34 }
 0x15c   : > { %1191 = vrot.lane.b32.xlu1 %v6921_v29, %s6169_s19  ;;  %v1317_v51 = vsel %vm1281_vm1, %v1152_v11, %v6954_v12 }
 0x15d   : > { %1189 = vrot.lane.b32.xlu0 %v6927_v41, %s6169_s19  ;;  %2911 = vmatprep.subr.bf16.mxu1 %v1317_v51  ;;  %v7067_v51 = vld [vmem:[%s6206_s17 + $0xfc] ss:$400 sps:$4 sm:$0xff]  }
 0x15e   : > { %2912 = vmatpush1.bf16.msra.mxu1 %v1316_v37  ;;  %v1556_v54 = vpop.permute.xlu1 %1555  ;;  %v7073_v37 = vld [vmem:[%s6206_s17 + $0xf8] ss:$400 sps:$4 sm:$0xff]  }
 0x15f   : > { %v1554_v1 = vpop.permute.xlu0 %1553 }
 0x160   : > { %1591 = vrot.lane.b32.xlu1 %v6908_v32, %s6170_s20  ;;  %v1719_v2 = vsel %vm1685_vm2, %v1552_v34, %v1554_v1  ;;  %v1720_v44 = vsel %vm1685_vm2, %v1554_v1, %v1556_v54 }
 0x161   : > { %1193 = vrot.lane.b32.xlu0 %v6940_v9, %s6169_s19  ;;  %2860 = vmatprep.subr.bf16.mxu0 %v1719_v2  ;;  %v6090_v2 = vld [vmem:[%s6206_s17 + $0x100] ss:$400 sps:$4 sm:$0xff]  }
 0x162   : > { %2861 = vmatpush1.bf16.msra.mxu0 %v1718_v43  ;;  %v752_v17 = vpop.permute.xlu1 %751 }
 0x163   : > { %v6970_v19 = vpop.permute.xlu0 %1557  ;;  %2960 = vmatprep.subr.bf16.mxu0 %v6652_v50  ;;  %v6986_v50 = vld [vmem:[%s8645_s1] sm:$0xff]  }
 0x164   : > { %1595 = vrot.lane.b32.xlu1 %v6921_v29, %s6170_s20  ;;  %v1721_v62 = vsel %vm1685_vm2, %v1556_v54, %v6970_v19 }
 0x165   : > { %1593 = vrot.lane.b32.xlu0 %v6927_v41, %s6170_s20  ;;  %2913 = vmatprep.subr.bf16.mxu1 %v1721_v62 }
 0x166   : > { %5807 = vmatmul.mubr.msk.bf16.vlgmr.msra.gmra.mrb[64].mxu0 %vm1999_vm3, %v6986_v50  ;;  %2914 = vmatpush1.bf16.msra.mxu1 %v1720_v44  ;;  %v756_v3 = vpop.permute.xlu1 %755 }
 0x167   : > { %2961 = vmatpush1.bf16.msra.mxu0 %v6620_v28  ;;  %v754_v20 = vpop.permute.xlu0 %753  ;;  %3013 = vmatprep.subr.bf16.mxu1 %v6665_v57  ;;  %v914_v28 = vsel %vm877_vm0, %v750_v21, %v752_v17 }
 0x168   : > { %791 = vrot.lane.b32.xlu1 %v6978_v0, %s6168_s18  ;;  %v915_v6 = vsel %vm877_vm0, %v752_v17, %v754_v20  ;;  %2896 = vmatprep.mubr.bf16.mxu0 %v8648_v5  ;;  %v916_v13 = vsel %vm877_vm0, %v754_v20, %v756_v3 }
 0x169   : > { %1597 = vrot.lane.b32.xlu0 %v6940_v9, %s6170_s20  ;;  %2962 = vmatprep.subr.bf16.mxu0 %v915_v6 }
 0x16a   : > { %5809 = vmatmul.mubr.msk.bf16.vlgmr.msra.gmra.mrb[64].mxu1 %vm1999_vm3, %v6986_v50  ;;  %v1156_v57 = vpop.permute.xlu1 %1155 }
 0x16b   : > { %2963 = vmatpush1.bf16.msra.mxu0 %v914_v28  ;;  %3014 = vmatpush1.bf16.msra.mxu1 %v6671_v58  ;;  %v758_v22 = vpop.permute.xlu0 %757  ;;  %v7021_v58 = vld [vmem:[%s8645_s1 + $0x8] sm:$0xff]   ;;  %v1318_v60 = vsel %vm1281_vm1, %v6954_v12, %v1156_v57 }
 0x16c   : > { %795 = vrot.lane.b32.xlu1 %v6996_v8, %s6168_s18  ;;  %v917_v38 = vsel %vm877_vm0, %v756_v3, %v758_v22  ;;  %2949 = vmatprep.mubr.bf16.mxu1 %v8648_v5 }
 0x16d   : > { %793 = vrot.lane.b32.xlu0 %v7002_v55, %s6168_s18  ;;  %3015 = vmatprep.subr.bf16.mxu1 %v917_v38 }
 0x16e   : > { %v1160_v15 = vpop.permute.xlu1 %1159  ;;  %5808 = vmatmul.mubr.msk.bf16.gmra.mrb[68].mxu0 %vm1999_vm3, %v7021_v58 }
 0x16f   : > { %3016 = vmatpush1.bf16.msra.mxu1 %v916_v13  ;;  %v1158_v27 = vpop.permute.xlu0 %1157  ;;  %2992 = vmatprep.mubr.bf16.mxu0 %v8648_v5 }
 0x170   : > { %1195 = vrot.lane.b32.xlu1 %v6978_v0, %s6169_s19  ;;  %v1319_v30 = vsel %vm1281_vm1, %v1156_v57, %v1158_v27  ;;  %v1320_v40 = vsel %vm1281_vm1, %v1158_v27, %v1160_v15 }
 0x171   : > { %797 = vrot.lane.b32.xlu0 %v7015_v59, %s6168_s18  ;;  %2964 = vmatprep.subr.bf16.mxu0 %v1319_v30  ;;  %v7114_v30 = vld [vmem:[%s6206_s17 + $0x104] ss:$400 sps:$4 sm:$0xff]  }
 0x172   : > { %2965 = vmatpush1.bf16.msra.mxu0 %v1318_v60  ;;  %v1560_v16 = vpop.permute.xlu1 %1559  ;;  %5810 = vmatmul.mubr.msk.bf16.gmra.mrb[68].mxu1 %vm1999_vm3, %v7021_v58 }
 0x173   : > { %v1162_v36 = vpop.permute.xlu0 %1161  ;;  %3045 = vmatprep.mubr.bf16.mxu1 %v8648_v5  ;;  %v1722_v33 = vsel %vm1685_vm2, %v6970_v19, %v1560_v16 }
 0x174   : > { %1199 = vrot.lane.b32.xlu1 %v6996_v8, %s6169_s19  ;;  %v1321_v7 = vsel %vm1281_vm1, %v1160_v15, %v1162_v36 }
 0x175   : > { %1197 = vrot.lane.b32.xlu0 %v7002_v55, %s6169_s19  ;;  %3017 = vmatprep.subr.bf16.mxu1 %v1321_v7  ;;  %v7127_v7 = vld [vmem:[%s6206_s17 + $0x10c] ss:$400 sps:$4 sm:$0xff]  }
 0x176   : > { %3018 = vmatpush1.bf16.msra.mxu1 %v1320_v40  ;;  %v1564_v47 = vpop.permute.xlu1 %1563  ;;  %v7132_v40 = vld [vmem:[%s6206_s17 + $0x108] ss:$400 sps:$4 sm:$0xff]  }
 0x177   : > { %v1562_v24 = vpop.permute.xlu0 %1561 }
 0x178   : > { %1599 = vrot.lane.b32.xlu1 %v6978_v0, %s6170_s20  ;;  %v1723_v21 = vsel %vm1685_vm2, %v1560_v16, %v1562_v24  ;;  %v1724_v48 = vsel %vm1685_vm2, %v1562_v24, %v1564_v47 }
 0x179   : > { %1201 = vrot.lane.b32.xlu0 %v7015_v59, %s6169_s19  ;;  %2966 = vmatprep.subr.bf16.mxu0 %v1723_v21  ;;  %v6096_v21 = vld [vmem:[%s6206_s17 + $0x110] ss:$400 sps:$4 sm:$0xff]  }
 0x17a   : > { %2967 = vmatpush1.bf16.msra.mxu0 %v1722_v33  ;;  %v760_v52 = vpop.permute.xlu1 %759 }
 0x17b   : > { %v1566_v11 = vpop.permute.xlu0 %1565  ;;  %3066 = vmatprep.subr.bf16.mxu0 %v6716_v35 }
 0x17c   : > { %1603 = vrot.lane.b32.xlu1 %v6996_v8, %s6170_s20  ;;  %v1725_v25 = vsel %vm1685_vm2, %v1564_v47, %v1566_v11 }
 0x17d   : > { %1601 = vrot.lane.b32.xlu0 %v7002_v55, %s6170_s20  ;;  %3019 = vmatprep.subr.bf16.mxu1 %v1725_v25 }
 0x17e   : > { %5811 = vmatmul.mubr.msk.bf16.vlgmr.msra.gmra.mrb[72].mxu0 %vm1999_vm3, %v6986_v50  ;;  %3020 = vmatpush1.bf16.msra.mxu1 %v1724_v48  ;;  %v764_v34 = vpop.permute.xlu1 %763 }
 0x17f   : > { %3067 = vmatpush1.bf16.msra.mxu0 %v6684_v63  ;;  %v762_v35 = vpop.permute.xlu0 %761  ;;  %3119 = vmatprep.subr.bf16.mxu1 %v6729_v10  ;;  %v918_v63 = vsel %vm877_vm0, %v758_v22, %v760_v52 }
 0x180   : > { %799 = vrot.lane.b32.xlu1 %v7054_v46, %s6168_s18  ;;  %v919_v12 = vsel %vm877_vm0, %v760_v52, %v762_v35  ;;  %3002 = vmatprep.mubr.bf16.mxu0 %v8648_v5  ;;  %v920_v43 = vsel %vm877_vm0, %v762_v35, %v764_v34 }
 0x181   : > { %1605 = vrot.lane.b32.xlu0 %v7015_v59, %s6170_s20  ;;  %3068 = vmatprep.subr.bf16.mxu0 %v919_v12 }
 0x182   : > { %5813 = vmatmul.mubr.msk.bf16.vlgmr.msra.gmra.mrb[72].mxu1 %vm1999_vm3, %v6986_v50  ;;  %v1164_v10 = vpop.permute.xlu1 %1163 }
 0x183   : > { %3069 = vmatpush1.bf16.msra.mxu0 %v918_v63  ;;  %3120 = vmatpush1.bf16.msra.mxu1 %v6735_v42  ;;  %v766_v54 = vpop.permute.xlu0 %765  ;;  %v1322_v62 = vsel %vm1281_vm1, %v1162_v36, %v1164_v10 }
 0x184   : > { %803 = vrot.lane.b32.xlu1 %v7067_v51, %s6168_s18  ;;  %v921_v1 = vsel %vm877_vm0, %v764_v34, %v766_v54  ;;  %3055 = vmatprep.mubr.bf16.mxu1 %v8648_v5 }
 0x185   : > { %801 = vrot.lane.b32.xlu0 %v7073_v37, %s6168_s18  ;;  %3121 = vmatprep.subr.bf16.mxu1 %v921_v1 }
 0x186   : > { %v1168_v17 = vpop.permute.xlu1 %1167  ;;  %5812 = vmatmul.mubr.msk.bf16.gmra.mrb[76].mxu0 %vm1999_vm3, %v7021_v58 }
 0x187   : > { %3122 = vmatpush1.bf16.msra.mxu1 %v920_v43  ;;  %v1166_v42 = vpop.permute.xlu0 %1165  ;;  %3098 = vmatprep.mubr.bf16.mxu0 %v8648_v5 }
 0x188   : > { %1203 = vrot.lane.b32.xlu1 %v7054_v46, %s6169_s19  ;;  %v1323_v19 = vsel %vm1281_vm1, %v1164_v10, %v1166_v42  ;;  %v1324_v6 = vsel %vm1281_vm1, %v1166_v42, %v1168_v17  ;;  %v7182_v42 = vld [vmem:[%s6206_s17 + $0x114] ss:$400 sps:$4 sm:$0xff]  }
 0x189   : > { %805 = vrot.lane.b32.xlu0 %v6090_v2, %s6168_s18  ;;  %3070 = vmatprep.subr.bf16.mxu0 %v1323_v19 }
 0x18a   : > { %3071 = vmatpush1.bf16.msra.mxu0 %v1322_v62  ;;  %v1568_v44 = vpop.permute.xlu1 %1567  ;;  %5814 = vmatmul.mubr.msk.bf16.gmra.mrb[76].mxu1 %vm1999_vm3, %v7021_v58  ;;  %v2040_v62 = vpop.f32.mrb[0].mxu0 }
 0x18b   : > { %v1170_v3 = vpop.permute.xlu0 %1169  ;;  %3151 = vmatprep.mubr.bf16.mxu1 %v8648_v5  ;;  %v1726_v38 = vsel %vm1685_vm2, %v1566_v11, %v1568_v44 }
 0x18c   : > { %1207 = vrot.lane.b32.xlu1 %v7067_v51, %s6169_s19  ;;  %v1325_v20 = vsel %vm1281_vm1, %v1168_v17, %v1170_v3 }
 0x18d   : > { %1205 = vrot.lane.b32.xlu0 %v7073_v37, %s6169_s19  ;;  %3123 = vmatprep.subr.bf16.mxu1 %v1325_v20 }
 0x18e   : > { %3124 = vmatpush1.bf16.msra.mxu1 %v1324_v6  ;;  %v1572_v28 = vpop.permute.xlu1 %1571 }
 0x18f   : > { %v1570_v57 = vpop.permute.xlu0 %1569 }
 0x190   : > { %1607 = vrot.lane.b32.xlu1 %v7054_v46, %s6170_s20  ;;  %v1727_v22 = vsel %vm1685_vm2, %v1568_v44, %v1570_v57  ;;  %v1728_v60 = vsel %vm1685_vm2, %v1570_v57, %v1572_v28  ;;  %v2093_v44 = vpop.f32.mrb[0].mxu1  ;;  %v2042_v57 = vpop.f32.mrb[1].mxu0 }
 0x191   : > { %1209 = vrot.lane.b32.xlu0 %v6090_v2, %s6169_s19  ;;  %3072 = vmatprep.subr.bf16.mxu0 %v1727_v22  ;;  %v2095_v20 = vpop.f32.mrb[1].mxu1 }
 0x192   : > { %3073 = vmatpush1.bf16.msra.mxu0 %v1726_v38  ;;  %v768_v13 = vpop.permute.xlu1 %767  ;;  %v2097_v22 = vpop.f32.mrb[2].mxu1  ;;  %v7200_v38 = vld [vmem:[%s6206_s17 + $0x118] ss:$400 sps:$4 sm:$0xff]  }
 0x193   : > { %v1574_v15 = vpop.permute.xlu0 %1573  ;;  %3172 = vmatprep.subr.bf16.mxu0 %v6780_v4 }
 0x194   : > { %1611 = vrot.lane.b32.xlu1 %v7067_v51, %s6170_s20  ;;  %v1729_v27 = vsel %vm1685_vm2, %v1572_v28, %v1574_v15  ;;  %v7195_v28 = vld [vmem:[%s6206_s17 + $0x11c] ss:$400 sps:$4 sm:$0xff]  }
 0x195   : > { %1609 = vrot.lane.b32.xlu0 %v7073_v37, %s6170_s20  ;;  %3125 = vmatprep.subr.bf16.mxu1 %v1729_v27 }
 0x196   : > { %5815 = vmatmul.mubr.msk.bf16.vlgmr.msra.gmra.mrb[80].mxu0 %vm1999_vm3, %v6986_v50  ;;  %3126 = vmatpush1.bf16.msra.mxu1 %v1728_v60  ;;  %v772_v16 = vpop.permute.xlu1 %771 }
 0x197   : > { %3173 = vmatpush1.bf16.msra.mxu0 %v6748_v45  ;;  %v770_v4 = vpop.permute.xlu0 %769  ;;  %3225 = vmatprep.subr.bf16.mxu1 %v6793_v14  ;;  %v922_v45 = vsel %vm877_vm0, %v766_v54, %v768_v13 }
 0x198   : > { %807 = vrot.lane.b32.xlu1 %v7114_v30, %s6168_s18  ;;  %v923_v36 = vsel %vm877_vm0, %v768_v13, %v770_v4  ;;  %3108 = vmatprep.mubr.bf16.mxu0 %v8648_v5  ;;  %v924_v33 = vsel %vm877_vm0, %v770_v4, %v772_v16  ;;  %v4658_v13 = vmax.f32 %v2093_v44, %v2097_v22 }
 0x199   : > { %1613 = vrot.lane.b32.xlu0 %v6090_v2, %s6170_s20  ;;  %3174 = vmatprep.subr.bf16.mxu0 %v923_v36 }
 0x19a   : > { %5817 = vmatmul.mubr.msk.bf16.vlgmr.msra.gmra.mrb[80].mxu1 %vm1999_vm3, %v6986_v50  ;;  %v1172_v14 = vpop.permute.xlu1 %1171 }
 0x19b   : > { %3175 = vmatpush1.bf16.msra.mxu0 %v922_v45  ;;  %3226 = vmatpush1.bf16.msra.mxu1 %v6799_v23  ;;  %v7138_v47 = vpop.permute.xlu0 %773  ;;  %v1326_v25 = vsel %vm1281_vm1, %v1170_v3, %v1172_v14 }
 0x19c   : > { %811 = vrot.lane.b32.xlu1 %v7127_v7, %s6168_s18  ;;  %v925_v24 = vsel %vm877_vm0, %v772_v16, %v7138_v47  ;;  %3161 = vmatprep.mubr.bf16.mxu1 %v8648_v5 }
 0x19d   : > { %809 = vrot.lane.b32.xlu0 %v7132_v40, %s6168_s18  ;;  %3227 = vmatprep.subr.bf16.mxu1 %v925_v24 }
 0x19e   : > { %v1176_v52 = vpop.permute.xlu1 %1175  ;;  %5816 = vmatmul.mubr.msk.bf16.gmra.mrb[84].mxu0 %vm1999_vm3, %v7021_v58 }
 0x19f   : > { %3228 = vmatpush1.bf16.msra.mxu1 %v924_v33  ;;  %v1174_v23 = vpop.permute.xlu0 %1173  ;;  %3204 = vmatprep.mubr.bf16.mxu0 %v8648_v5  ;;  %v7217_v33 = vld [vmem:[%s6206_s17 + $0x120] ss:$400 sps:$4 sm:$0xff]  }
 0x1a0   : > { %1211 = vrot.lane.b32.xlu1 %v7114_v30, %s6169_s19  ;;  %v1327_v11 = vsel %vm1281_vm1, %v1172_v14, %v1174_v23  ;;  %v1328_v12 = vsel %vm1281_vm1, %v1174_v23, %v1176_v52 }
 0x1a1   : > { %813 = vrot.lane.b32.xlu0 %v6096_v21, %s6168_s18  ;;  %3176 = vmatprep.subr.bf16.mxu0 %v1327_v11 }
 0x1a2   : > { %3177 = vmatpush1.bf16.msra.mxu0 %v1326_v25  ;;  %v1576_v48 = vpop.permute.xlu1 %1575  ;;  %5818 = vmatmul.mubr.msk.bf16.gmra.mrb[84].mxu1 %vm1999_vm3, %v7021_v58 }
 0x1a3   : > { %v7159_v34 = vpop.permute.xlu0 %1177  ;;  %3257 = vmatprep.mubr.bf16.mxu1 %v8648_v5  ;;  %v1730_v1 = vsel %vm1685_vm2, %v1574_v15, %v1576_v48 }
 0x1a4   : > { %1215 = vrot.lane.b32.xlu1 %v7127_v7, %s6169_s19  ;;  %v1329_v35 = vsel %vm1281_vm1, %v1176_v52, %v7159_v34 }
 0x1a5   : > { %1213 = vrot.lane.b32.xlu0 %v7132_v40, %s6169_s19  ;;  %3229 = vmatprep.subr.bf16.mxu1 %v1329_v35 }
 0x1a6   : > { %3230 = vmatpush1.bf16.msra.mxu1 %v1328_v12  ;;  %v1580_v63 = vpop.permute.xlu1 %1579 }
 0x1a7   : > { %v1578_v10 = vpop.permute.xlu0 %1577 }
 0x1a8   : > { %1615 = vrot.lane.b32.xlu1 %v7114_v30, %s6170_s20  ;;  %v1731_v54 = vsel %vm1685_vm2, %v1576_v48, %v1578_v10  ;;  %v1732_v19 = vsel %vm1685_vm2, %v1578_v10, %v1580_v63 }
 0x1a9   : > { %1217 = vrot.lane.b32.xlu0 %v6096_v21, %s6169_s19  ;;  %3178 = vmatprep.subr.bf16.mxu0 %v1731_v54 }
 0x1aa   : > { %3179 = vmatpush1.bf16.msra.mxu0 %v1730_v1  ;;  %v776_v2 = vpop.permute.xlu1 %775 }
 0x1ab   : > { %v7174_v43 = vpop.permute.xlu0 %1581  ;;  %3278 = vmatprep.subr.bf16.mxu0 %v6844_v49  ;;  %v926_v15 = vsel %vm877_vm0, %v7138_v47, %v776_v2 }
 0x1ac   : > { %1619 = vrot.lane.b32.xlu1 %v7127_v7, %s6170_s20  ;;  %v1733_v17 = vsel %vm1685_vm2, %v1580_v63, %v7174_v43 }
 0x1ad   : > { %1617 = vrot.lane.b32.xlu0 %v7132_v40, %s6170_s20  ;;  %3231 = vmatprep.subr.bf16.mxu1 %v1733_v17 }
 0x1ae   : > { %5819 = vmatmul.mubr.msk.bf16.vlgmr.msra.gmra.mrb[88].mxu0 %vm1999_vm3, %v6986_v50  ;;  %3232 = vmatpush1.bf16.msra.mxu1 %v1732_v19  ;;  %v780_v49 = vpop.permute.xlu1 %779 }
 0x1af   : > { %3279 = vmatpush1.bf16.msra.mxu0 %v6812_v26  ;;  %v778_v3 = vpop.permute.xlu0 %777  ;;  %3331 = vmatprep.subr.bf16.mxu1 %v6857_v18  ;;  %v2044_v26 = vpop.f32.mrb[2].mxu0 }
 0x1b0   : > { %815 = vrot.lane.b32.xlu1 %v7182_v42, %s6168_s18  ;;  %v927_v6 = vsel %vm877_vm0, %v776_v2, %v778_v3  ;;  %3214 = vmatprep.mubr.bf16.mxu0 %v8648_v5  ;;  %v2099_v18 = vpop.f32.mrb[3].mxu1  ;;  %v4656_v60 = vmax.f32 %v2040_v62, %v2044_v26  ;;  %v2046_v4 = vpop.f32.mrb[3].mxu0  ;;  %v928_v23 = vsel %vm877_vm0, %v778_v3, %v780_v49 }
 0x1b1   : > { %1621 = vrot.lane.b32.xlu0 %v6096_v21, %s6170_s20  ;;  %3280 = vmatprep.subr.bf16.mxu0 %v927_v6  ;;  %v4659_v16 = vmax.f32 %v2095_v20, %v2099_v18  ;;  %v4657_v45 = vmax.f32 %v2042_v57, %v2046_v4  ;;  %v2050_v14 = vpop.f32.mrb[4].mxu0  ;;  %v2103_v47 = vpop.f32.mrb[4].mxu1 }
 0x1b2   : > { %5821 = vmatmul.mubr.msk.bf16.vlgmr.msra.gmra.mrb[88].mxu1 %vm1999_vm3, %v6986_v50  ;;  %v1180_v27 = vpop.permute.xlu1 %1179  ;;  %v2052_v21 = vpop.f32.mrb[5].mxu0 }
 0x1b3   : > { %3281 = vmatpush1.bf16.msra.mxu0 %v926_v15  ;;  %3332 = vmatpush1.bf16.msra.mxu1 %v6863_v56  ;;  %v7207_v36 = vpop.permute.xlu0 %781  ;;  %v2105_v56 = vpop.f32.mrb[5].mxu1  ;;  %v1330_v17 = vsel %vm1281_vm1, %v7159_v34, %v1180_v27 }
 0x1b4   : > { %819 = vrot.lane.b32.xlu1 %v7195_v28, %s6168_s18  ;;  %v929_v24 = vsel %vm877_vm0, %v780_v49, %v7207_v36  ;;  %3267 = vmatprep.mubr.bf16.mxu1 %v8648_v5  ;;  %v2054_v52 = vpop.f32.mrb[6].mxu0  ;;  %v2107_v48 = vpop.f32.mrb[6].mxu1 }
 0x1b5   : > { %817 = vrot.lane.b32.xlu0 %v7200_v38, %s6168_s18  ;;  %3333 = vmatprep.subr.bf16.mxu1 %v929_v24  ;;  %v4756_v25 = vmax.f32 %v2050_v14, %v2054_v52  ;;  %v4758_v12 = vmax.f32 %v2103_v47, %v2107_v48  ;;  %v2109_v63 = vpop.f32.mrb[7].mxu1  ;;  %v2056_v2 = vpop.f32.mrb[7].mxu0 }
 0x1b6   : > { %v1184_v11 = vpop.permute.xlu1 %1183  ;;  %5820 = vmatmul.mubr.msk.bf16.gmra.mrb[92].mxu0 %vm1999_vm3, %v7021_v58  ;;  %v4759_v1 = vmax.f32 %v2105_v56, %v2109_v63  ;;  %v4757_v62 = vmax.f32 %v2052_v21, %v2056_v2  ;;  %v2146_v57 = vpop.f32.mrb[8].mxu0 }
 0x1b7   : > { %3334 = vmatpush1.bf16.msra.mxu1 %v928_v23  ;;  %v1182_v35 = vpop.permute.xlu0 %1181  ;;  %3310 = vmatprep.mubr.bf16.mxu0 %v8648_v5  ;;  %v7226_v54 = vmax.f32 %v4656_v60, %v4756_v25  ;;  %v7232_v19 = vmax.f32 %v4658_v13, %v4758_v12  ;;  %v2199_v22 = vpop.f32.mrb[8].mxu1 }
 0x1b8   : > { %1219 = vrot.lane.b32.xlu1 %v7182_v42, %s6169_s19  ;;  %v1331_v10 = vsel %vm1281_vm1, %v1180_v27, %v1182_v35  ;;  %v7236_v49 = vmax.f32 %v4659_v16, %v4759_v1  ;;  %v7241_v20 = vmax.f32 %v4657_v45, %v4757_v62  ;;  %v1332_v6 = vsel %vm1281_vm1, %v1182_v35, %v1184_v11  ;;  %v2201_v18 = vpop.f32.mrb[9].mxu1  ;;  %v2148_v27 = vpop.f32.mrb[9].mxu0  ;;  %v7278_v62 = vld [vmem:[%s6206_s17 + $0x12c] ss:$400 sps:$4 sm:$0xff]  }
 0x1b9   : > { %821 = vrot.lane.b32.xlu0 %v7217_v33, %s6168_s18  ;;  %3282 = vmatprep.subr.bf16.mxu0 %v1331_v10  ;;  %v2203_v60 = vpop.f32.mrb[10].mxu1  ;;  %v2150_v4 = vpop.f32.mrb[10].mxu0 }
 0x1ba   : > { %3283 = vmatpush1.bf16.msra.mxu0 %v1330_v17  ;;  %v1584_v44 = vpop.permute.xlu1 %1583  ;;  %5822 = vmatmul.mubr.msk.bf16.gmra.mrb[92].mxu1 %vm1999_vm3, %v7021_v58  ;;  %v4662_v45 = vmax.f32 %v2199_v22, %v2203_v60  ;;  %v2205_v14 = vpop.f32.mrb[11].mxu1  ;;  %v4660_v47 = vmax.f32 %v2146_v57, %v2150_v4 }
 0x1bb   : > { %v7238_v3 = vpop.permute.xlu0 %1185  ;;  %3363 = vmatprep.mubr.bf16.mxu1 %v8648_v5  ;;  %v1734_v16 = vsel %vm1685_vm2, %v7174_v43, %v1584_v44  ;;  %v4663_v21 = vmax.f32 %v2201_v18, %v2205_v14  ;;  %v2209_v25 = vpop.f32.mrb[12].mxu1 }
 0x1bc   : > { %1223 = vrot.lane.b32.xlu1 %v7195_v28, %s6169_s19  ;;  %v1333_v34 = vsel %vm1281_vm1, %v1184_v11, %v7238_v3  ;;  %v7265_v11 = vld [vmem:[%s6206_s17 + $0x124] ss:$400 sps:$4 sm:$0xff]  }
 0x1bd   : > { %1221 = vrot.lane.b32.xlu0 %v7200_v38, %s6169_s19  ;;  %3335 = vmatprep.subr.bf16.mxu1 %v1333_v34 }
 0x1be   : > { %3336 = vmatpush1.bf16.msra.mxu1 %v1332_v6  ;;  %v1588_v26 = vpop.permute.xlu1 %1587 }
 0x1bf   : > { %v1586_v13 = vpop.permute.xlu0 %1585 }
 0x1c0   : > { %1623 = vrot.lane.b32.xlu1 %v7182_v42, %s6170_s20  ;;  %v1735_v15 = vsel %vm1685_vm2, %v1584_v44, %v1586_v13  ;;  %v2152_v42 = vpop.f32.mrb[11].mxu0  ;;  %v1736_v35 = vsel %vm1685_vm2, %v1586_v13, %v1588_v26 }
 0x1c1   : > { %1225 = vrot.lane.b32.xlu0 %v7217_v33, %s6169_s19  ;;  %3284 = vmatprep.subr.bf16.mxu0 %v1735_v15  ;;  %v4661_v52 = vmax.f32 %v2148_v27, %v2152_v42  ;;  %v2156_v23 = vpop.f32.mrb[12].mxu0 }
 0x1c2   : > { %3285 = vmatpush1.bf16.msra.mxu0 %v1734_v16  ;;  %v784_v24 = vpop.permute.xlu1 %783  ;;  %v2158_v48 = vpop.f32.mrb[13].mxu0 }
 0x1c3   : > { %v7257_v56 = vpop.permute.xlu0 %1589  ;;  %3384 = vmatprep.subr.bf16.mxu0 %v6908_v32  ;;  %v2211_v32 = vpop.f32.mrb[13].mxu1  ;;  %v930_v22 = vsel %vm877_vm0, %v7207_v36, %v784_v24  ;;  %v7309_v36 = vld [vmem:[%s6206_s17 + $0x130] ss:$400 sps:$4 sm:$0xff]  }
 0x1c4   : > { %1627 = vrot.lane.b32.xlu1 %v7195_v28, %s6170_s20  ;;  %v1737_v43 = vsel %vm1685_vm2, %v1588_v26, %v7257_v56  ;;  %v2160_v12 = vpop.f32.mrb[14].mxu0  ;;  %v2213_v10 = vpop.f32.mrb[14].mxu1 }
 0x1c5   : > { %1625 = vrot.lane.b32.xlu0 %v7200_v38, %s6170_s20  ;;  %3337 = vmatprep.subr.bf16.mxu1 %v1737_v43  ;;  %v4760_v63 = vmax.f32 %v2156_v23, %v2160_v12  ;;  %v4762_v38 = vmax.f32 %v2209_v25, %v2213_v10  ;;  %v2215_v2 = vpop.f32.mrb[15].mxu1  ;;  %v2162_v34 = vpop.f32.mrb[15].mxu0 }
 0x1c6   : > { %5823 = vmatmul.mubr.msk.bf16.vlgmr.msra.gmra.mrb[96].mxu0 %vm1999_vm3, %v6986_v50  ;;  %3338 = vmatpush1.bf16.msra.mxu1 %v1736_v35  ;;  %v788_v28 = vpop.permute.xlu1 %787  ;;  %v4763_v6 = vmax.f32 %v2211_v32, %v2215_v2  ;;  %v4761_v57 = vmax.f32 %v2158_v48, %v2162_v34  ;;  %v2305_v27 = vpop.f32.mrb[16].mxu1 }
 0x1c7   : > { %3385 = vmatpush1.bf16.msra.mxu0 %v6876_v61  ;;  %v786_v1 = vpop.permute.xlu0 %785  ;;  %3437 = vmatprep.subr.bf16.mxu1 %v6921_v29  ;;  %v7281_v44 = vmax.f32 %v4660_v47, %v4760_v63  ;;  %v7286_v61 = vld [vmem:[%s6206_s17 + $0x128] ss:$400 sps:$4 sm:$0xff]   ;;  %v7288_v29 = vmax.f32 %v4662_v45, %v4762_v38  ;;  %v2307_v4 = vpop.f32.mrb[17].mxu1 }
 0x1c8   : > { %823 = vrot.lane.b32.xlu1 %v7265_v11, %s6168_s18  ;;  %v931_v17 = vsel %vm877_vm0, %v784_v24, %v786_v1  ;;  %3320 = vmatprep.mubr.bf16.mxu0 %v8648_v5  ;;  %v7299_v18 = vmax.f32 %v4661_v52, %v4761_v57  ;;  %v932_v60 = vsel %vm877_vm0, %v786_v1, %v788_v28 }
 0x1c9   : > { %1629 = vrot.lane.b32.xlu0 %v7217_v33, %s6170_s20  ;;  %3386 = vmatprep.subr.bf16.mxu0 %v931_v17  ;;  %v7297_v33 = vmax.f32 %v4663_v21, %v4763_v6  ;;  %v2309_v21 = vpop.f32.mrb[18].mxu1 }
 0x1ca   : > { %5825 = vmatmul.mubr.msk.bf16.vlgmr.msra.gmra.mrb[96].mxu1 %vm1999_vm3, %v6986_v50  ;;  %v1188_v26 = vpop.permute.xlu1 %1187  ;;  %v4666_v23 = vmax.f32 %v2305_v27, %v2309_v21  ;;  %v2311_v43 = vpop.f32.mrb[19].mxu1 }
 0x1cb   : > { %3387 = vmatpush1.bf16.msra.mxu0 %v930_v22  ;;  %3438 = vmatpush1.bf16.msra.mxu1 %v6927_v41  ;;  %v7295_v13 = vpop.permute.xlu0 %789  ;;  %v2252_v41 = vpop.f32.mrb[16].mxu0  ;;  %v1334_v42 = vsel %vm1281_vm1, %v7238_v3, %v1188_v26  ;;  %v4667_v35 = vmax.f32 %v2307_v4, %v2311_v43 }
 0x1cc   : > { %827 = vrot.lane.b32.xlu1 %v7278_v62, %s6168_s18  ;;  %v933_v15 = vsel %vm877_vm0, %v788_v28, %v7295_v13  ;;  %3373 = vmatprep.mubr.bf16.mxu1 %v8648_v5  ;;  %v2254_v14 = vpop.f32.mrb[17].mxu0  ;;  %v2315_v63 = vpop.f32.mrb[20].mxu1 }
 0x1cd   : > { %825 = vrot.lane.b32.xlu0 %v7286_v61, %s6168_s18  ;;  %3439 = vmatprep.subr.bf16.mxu1 %v933_v15  ;;  %v2256_v47 = vpop.f32.mrb[18].mxu0  ;;  %v2317_v10 = vpop.f32.mrb[21].mxu1 }
 0x1ce   : > { %v1192_v16 = vpop.permute.xlu1 %1191  ;;  %5824 = vmatmul.mubr.msk.bf16.gmra.mrb[100].mxu0 %vm1999_vm3, %v7021_v58  ;;  %v4664_v52 = vmax.f32 %v2252_v41, %v2256_v47  ;;  %v2258_v25 = vpop.f32.mrb[19].mxu0 }
 0x1cf   : > { %3440 = vmatpush1.bf16.msra.mxu1 %v932_v60  ;;  %v1190_v45 = vpop.permute.xlu0 %1189  ;;  %3416 = vmatprep.mubr.bf16.mxu0 %v8648_v5  ;;  %v4665_v32 = vmax.f32 %v2254_v14, %v2258_v25  ;;  %v2262_v12 = vpop.f32.mrb[20].mxu0 }
 0x1d0   : > { %1227 = vrot.lane.b32.xlu1 %v7265_v11, %s6169_s19  ;;  %v1335_v24 = vsel %vm1281_vm1, %v1188_v26, %v1190_v45  ;;  %v2264_v1 = vpop.f32.mrb[21].mxu0  ;;  %v1336_v38 = vsel %vm1281_vm1, %v1190_v45, %v1192_v16  ;;  %v2319_v17 = vpop.f32.mrb[22].mxu1 }
 0x1d1   : > { %829 = vrot.lane.b32.xlu0 %v7309_v36, %s6168_s18  ;;  %3388 = vmatprep.subr.bf16.mxu0 %v1335_v24  ;;  %v2266_v2 = vpop.f32.mrb[22].mxu0  ;;  %v4766_v57 = vmax.f32 %v2315_v63, %v2319_v17  ;;  %v2321_v22 = vpop.f32.mrb[23].mxu1 }
 0x1d2   : > { %3389 = vmatpush1.bf16.msra.mxu0 %v1334_v42  ;;  %v1592_v48 = vpop.permute.xlu1 %1591  ;;  %5826 = vmatmul.mubr.msk.bf16.gmra.mrb[100].mxu1 %vm1999_vm3, %v7021_v58  ;;  %v4764_v6 = vmax.f32 %v2262_v12, %v2266_v2  ;;  %v4767_v15 = vmax.f32 %v2317_v10, %v2321_v22  ;;  %v2268_v41 = vpop.f32.mrb[23].mxu0  ;;  %v7393_v22 = vld [vmem:[%s6206_s17 + $0x140] ss:$400 sps:$4 sm:$0xff]  }
 0x1d3   : > { %v7324_v28 = vpop.permute.xlu0 %1193  ;;  %3469 = vmatprep.mubr.bf16.mxu1 %v8648_v5  ;;  %v7339_v4 = vmax.f32 %v4666_v23, %v4766_v57  ;;  %v4765_v14 = vmax.f32 %v2264_v1, %v2268_v41  ;;  %v2358_v23 = vpop.f32.mrb[24].mxu0 }
 0x1d4   : > { %1231 = vrot.lane.b32.xlu1 %v7278_v62, %s6169_s19  ;;  %v1337_v3 = vsel %vm1281_vm1, %v1192_v16, %v7324_v28  ;;  %v7337_v60 = vmax.f32 %v4664_v52, %v4764_v6  ;;  %v1738_v16 = vsel %vm1685_vm2, %v7257_v56, %v1592_v48  ;;  %v7345_v45 = vmax.f32 %v4667_v35, %v4767_v15  ;;  %v7357_v52 = vld [vmem:[%s6206_s17 + $0x134] ss:$400 sps:$4 sm:$0xff]   ;;  %v2411_v43 = vpop.f32.mrb[24].mxu1  ;;  %v7370_v35 = vld [vmem:[%s6206_s17 + $0x13c] ss:$400 sps:$4 sm:$0xff]  }
 0x1d5   : > { %1229 = vrot.lane.b32.xlu0 %v7286_v61, %s6169_s19  ;;  %3441 = vmatprep.subr.bf16.mxu1 %v1337_v3  ;;  %v7350_v21 = vmax.f32 %v4665_v32, %v4765_v14  ;;  %v2360_v32 = vpop.f32.mrb[25].mxu0 }
 0x1d6   : > { %3442 = vmatpush1.bf16.msra.mxu1 %v1336_v38  ;;  %v1596_v34 = vpop.permute.xlu1 %1595  ;;  %v2362_v63 = vpop.f32.mrb[26].mxu0 }
 0x1d7   : > { %v1594_v26 = vpop.permute.xlu0 %1593  ;;  %v4668_v38 = vmax.f32 %v2358_v23, %v2362_v63  ;;  %v2364_v17 = vpop.f32.mrb[27].mxu0 }
 0x1d8   : > { %1631 = vrot.lane.b32.xlu1 %v7265_v11, %s6170_s20  ;;  %v1739_v27 = vsel %vm1685_vm2, %v1592_v48, %v1594_v26  ;;  %v1740_v56 = vsel %vm1685_vm2, %v1594_v26, %v1596_v34  ;;  %v2413_v48 = vpop.f32.mrb[25].mxu1  ;;  %v2368_v6 = vpop.f32.mrb[28].mxu0 }
 0x1d9   : > { %1233 = vrot.lane.b32.xlu0 %v7309_v36, %s6169_s19  ;;  %3390 = vmatprep.subr.bf16.mxu0 %v1739_v27  ;;  %v2415_v12 = vpop.f32.mrb[26].mxu1  ;;  %v2370_v57 = vpop.f32.mrb[29].mxu0 }
 0x1da   : > { %3391 = vmatpush1.bf16.msra.mxu0 %v1738_v16  ;;  %v792_v24 = vpop.permute.xlu1 %791  ;;  %v2417_v3 = vpop.f32.mrb[27].mxu1 }
 0x1db   : > { %v7347_v47 = vpop.permute.xlu0 %1597  ;;  %3490 = vmatprep.subr.bf16.mxu0 %v6978_v0  ;;  %v934_v10 = vsel %vm877_vm0, %v7295_v13, %v792_v24  ;;  %v4671_v2 = vmax.f32 %v2413_v48, %v2417_v3  ;;  %v2421_v13 = vpop.f32.mrb[28].mxu1 }
 0x1dc   : > { %1635 = vrot.lane.b32.xlu1 %v7278_v62, %s6170_s20  ;;  %v1741_v42 = vsel %vm1685_vm2, %v1596_v34, %v7347_v47  ;;  %v4669_v34 = vmax.f32 %v2360_v32, %v2364_v17  ;;  %v2372_v26 = vpop.f32.mrb[30].mxu0 }
 0x1dd   : > { %1633 = vrot.lane.b32.xlu0 %v7286_v61, %s6170_s20  ;;  %3443 = vmatprep.subr.bf16.mxu1 %v1741_v42  ;;  %v4768_v27 = vmax.f32 %v2368_v6, %v2372_v26 }
 0x1de   : > { %5827 = vmatmul.mubr.msk.bf16.vlgmr.msra.gmra.mrb[104].mxu0 %vm1999_vm3, %v6986_v50  ;;  %3444 = vmatpush1.bf16.msra.mxu1 %v1740_v56  ;;  %v796_v0 = vpop.permute.xlu1 %795 }
 0x1df   : > { %3491 = vmatpush1.bf16.msra.mxu0 %v6940_v9  ;;  %v794_v25 = vpop.permute.xlu0 %793  ;;  %3543 = vmatprep.subr.bf16.mxu1 %v6996_v8  ;;  %v7376_v9 = vld [vmem:[%s6206_s17 + $0x138] ss:$400 sps:$4 sm:$0xff]   ;;  %v4670_v8 = vmax.f32 %v2411_v43, %v2415_v12  ;;  %v7402_v23 = vmax.f32 %v4668_v38, %v4768_v27 }
 0x1e0   : > { %831 = vrot.lane.b32.xlu1 %v7357_v52, %s6168_s18  ;;  %v935_v61 = vsel %vm877_vm0, %v792_v24, %v794_v25  ;;  %3426 = vmatprep.mubr.bf16.mxu0 %v8648_v5  ;;  %v936_v15 = vsel %vm877_vm0, %v794_v25, %v796_v0 }
 0x1e1   : > { %1637 = vrot.lane.b32.xlu0 %v7309_v36, %s6170_s20  ;;  %3492 = vmatprep.subr.bf16.mxu0 %v935_v61 }
 0x1e2   : > { %5829 = vmatmul.mubr.msk.bf16.vlgmr.msra.gmra.mrb[104].mxu1 %vm1999_vm3, %v6986_v50  ;;  %v1196_v1 = vpop.permute.xlu1 %1195 }
 0x1e3   : > { %3493 = vmatpush1.bf16.msra.mxu0 %v934_v10  ;;  %3544 = vmatpush1.bf16.msra.mxu1 %v7002_v55  ;;  %v7383_v36 = vpop.permute.xlu0 %797  ;;  %v2423_v55 = vpop.f32.mrb[29].mxu1  ;;  %v1338_v25 = vsel %vm1281_vm1, %v7324_v28, %v1196_v1 }
 0x1e4   : > { %835 = vrot.lane.b32.xlu1 %v7370_v35, %s6168_s18  ;;  %v937_v50 = vsel %vm877_vm0, %v796_v0, %v7383_v36  ;;  %3479 = vmatprep.mubr.bf16.mxu1 %v8648_v5  ;;  %v2425_v16 = vpop.f32.mrb[30].mxu1  ;;  %v2374_v0 = vpop.f32.mrb[31].mxu0 }
 0x1e5   : > { %833 = vrot.lane.b32.xlu0 %v7376_v9, %s6168_s18  ;;  %3545 = vmatprep.subr.bf16.mxu1 %v937_v50  ;;  %v4770_v24 = vmax.f32 %v2421_v13, %v2425_v16  ;;  %v2427_v42 = vpop.f32.mrb[31].mxu1  ;;  %v4769_v61 = vmax.f32 %v2370_v57, %v2374_v0 }
 0x1e6   : > { %v1200_v41 = vpop.permute.xlu1 %1199  ;;  %5828 = vmatmul.mubr.msk.bf16.gmra.mrb[108].mxu0 %vm1999_vm3, %v7021_v58  ;;  %v4771_v43 = vmax.f32 %v2423_v55, %v2427_v42  ;;  %v2517_v10 = vpop.f32.mrb[32].mxu1  ;;  %v7441_v42 = vld [vmem:[%s6206_s17 + $0x144] ss:$400 sps:$4 sm:$0xff]  }
 0x1e7   : > { %3546 = vmatpush1.bf16.msra.mxu1 %v936_v15  ;;  %v1198_v14 = vpop.permute.xlu0 %1197  ;;  %3522 = vmatprep.mubr.bf16.mxu0 %v8648_v5  ;;  %v7408_v48 = vmax.f32 %v4670_v8, %v4770_v24  ;;  %v7417_v3 = vmax.f32 %v4669_v34, %v4769_v61  ;;  %v2464_v8 = vpop.f32.mrb[32].mxu0  ;;  %v7449_v61 = vld [vmem:[%s8645_s1] sm:$0xff]  }
 0x1e8   : > { %1235 = vrot.lane.b32.xlu1 %v7357_v52, %s6169_s19  ;;  %v1339_v56 = vsel %vm1281_vm1, %v1196_v1, %v1198_v14  ;;  %v7412_v12 = vmax.f32 %v4671_v2, %v4771_v43  ;;  %v2519_v2 = vpop.f32.mrb[33].mxu1  ;;  %v2466_v34 = vpop.f32.mrb[33].mxu0 }
 0x1e9   : > { %837 = vrot.lane.b32.xlu0 %v7393_v22, %s6168_s18  ;;  %3494 = vmatprep.subr.bf16.mxu0 %v1339_v56  ;;  %v2521_v6 = vpop.f32.mrb[34].mxu1  ;;  %v2468_v13 = vpop.f32.mrb[34].mxu0 }
 0x1ea   : > { %3495 = vmatpush1.bf16.msra.mxu0 %v1338_v25  ;;  %v1600_v32 = vpop.permute.xlu1 %1599  ;;  %5830 = vmatmul.mubr.msk.bf16.gmra.mrb[108].mxu1 %vm1999_vm3, %v7021_v58  ;;  %v1340_v58 = vsel %vm1281_vm1, %v1198_v14, %v1200_v41  ;;  %v4674_v57 = vmax.f32 %v2517_v10, %v2521_v6  ;;  %v2523_v55 = vpop.f32.mrb[35].mxu1  ;;  %v4672_v15 = vmax.f32 %v2464_v8, %v2468_v13 }
 0x1eb   : > { %v7414_v63 = vpop.permute.xlu0 %1201  ;;  %3575 = vmatprep.mubr.bf16.mxu1 %v8648_v5  ;;  %v1742_v50 = vsel %vm1685_vm2, %v7347_v47, %v1600_v32  ;;  %v4675_v27 = vmax.f32 %v2519_v2, %v2523_v55  ;;  %v2527_v56 = vpop.f32.mrb[36].mxu1  ;;  %v7459_v2 = vld [vmem:[%s6206_s17 + $0x14c] ss:$400 sps:$4 sm:$0xff]  }
 0x1ec   : > { %1239 = vrot.lane.b32.xlu1 %v7370_v35, %s6169_s19  ;;  %v1341_v28 = vsel %vm1281_vm1, %v1200_v41, %v7414_v63  ;;  %v2470_v41 = vpop.f32.mrb[35].mxu0 }
 0x1ed   : > { %1237 = vrot.lane.b32.xlu0 %v7376_v9, %s6169_s19  ;;  %3547 = vmatprep.subr.bf16.mxu1 %v1341_v28  ;;  %v4673_v14 = vmax.f32 %v2466_v34, %v2470_v41  ;;  %v2474_v24 = vpop.f32.mrb[36].mxu0 }
 0x1ee   : > { %3548 = vmatpush1.bf16.msra.mxu1 %v1340_v58  ;;  %v1604_v1 = vpop.permute.xlu1 %1603  ;;  %v2476_v43 = vpop.f32.mrb[37].mxu0 }
 0x1ef   : > { %v1602_v38 = vpop.permute.xlu0 %1601  ;;  %v2478_v25 = vpop.f32.mrb[38].mxu0 }
 0x1f0   : > { %1639 = vrot.lane.b32.xlu1 %v7357_v52, %s6170_s20  ;;  %v1743_v17 = vsel %vm1685_vm2, %v1600_v32, %v1602_v38  ;;  %v1744_v0 = vsel %vm1685_vm2, %v1602_v38, %v1604_v1  ;;  %v4772_v28 = vmax.f32 %v2474_v24, %v2478_v25  ;;  %v7496_v24 = vld [vmem:[%s8645_s1 + $0x8] sm:$0xff]  }
 0x1f1   : > { %1241 = vrot.lane.b32.xlu0 %v7393_v22, %s6169_s19  ;;  %3496 = vmatprep.subr.bf16.mxu0 %v1743_v17 }
 0x1f2   : > { %3497 = vmatpush1.bf16.msra.mxu0 %v1742_v50  ;;  %v800_v26 = vpop.permute.xlu1 %799  ;;  %v7462_v17 = vmax.f32 %v4672_v15, %v4772_v28 }
 0x1f3   : > { %v7433_v16 = vpop.permute.xlu0 %1605  ;;  %3596 = vmatprep.subr.bf16.mxu0 %v7054_v46  ;;  %v2529_v46 = vpop.f32.mrb[37].mxu1  ;;  %v938_v13 = vsel %vm877_vm0, %v7383_v36, %v800_v26  ;;  %v7490_v36 = vld [vmem:[%s6206_s17 + $0x150] ss:$400 sps:$4 sm:$0xff]  }
 0x1f4   : > { %1643 = vrot.lane.b32.xlu1 %v7370_v35, %s6170_s20  ;;  %v1745_v47 = vsel %vm1685_vm2, %v1604_v1, %v7433_v16  ;;  %v2531_v58 = vpop.f32.mrb[38].mxu1  ;;  %v2480_v1 = vpop.f32.mrb[39].mxu0 }
 0x1f5   : > { %1641 = vrot.lane.b32.xlu0 %v7376_v9, %s6170_s20  ;;  %3549 = vmatprep.subr.bf16.mxu1 %v1745_v47  ;;  %v4774_v10 = vmax.f32 %v2527_v56, %v2531_v58  ;;  %v2533_v34 = vpop.f32.mrb[39].mxu1  ;;  %v4773_v6 = vmax.f32 %v2476_v43, %v2480_v1 }
 0x1f6   : > { %5831 = vmatmul.mubr.msk.bf16.vlgmr.msra.gmra.mrb[112].mxu0 %vm1999_vm3, %v7449_v61  ;;  %3550 = vmatpush1.bf16.msra.mxu1 %v1744_v0  ;;  %v804_v32 = vpop.permute.xlu1 %803  ;;  %v4775_v50 = vmax.f32 %v2529_v46, %v2533_v34 }
 0x1f7   : > { %3597 = vmatpush1.bf16.msra.mxu0 %v7015_v59  ;;  %v802_v8 = vpop.permute.xlu0 %801  ;;  %3649 = vmatprep.subr.bf16.mxu1 %v7067_v51  ;;  %v7467_v59 = vld [vmem:[%s6206_s17 + $0x148] ss:$400 sps:$4 sm:$0xff]   ;;  %v7469_v51 = vmax.f32 %v4674_v57, %v4774_v10 }
 0x1f8   : > { %839 = vrot.lane.b32.xlu1 %v7441_v42, %s6168_s18  ;;  %v939_v38 = vsel %vm877_vm0, %v800_v26, %v802_v8  ;;  %3532 = vmatprep.mubr.bf16.mxu0 %v8648_v5  ;;  %v7480_v41 = vmax.f32 %v4675_v27, %v4775_v50  ;;  %v2623_v26 = vpop.f32.mrb[40].mxu1 }
 0x1f9   : > { %1645 = vrot.lane.b32.xlu0 %v7393_v22, %s6170_s20  ;;  %3598 = vmatprep.subr.bf16.mxu0 %v939_v38  ;;  %8663 = vst [vmem:[#allocation2_spill] sm:$0xff] %v7469_v51  ;;  %v7478_v22 = vmax.f32 %v4673_v14, %v4773_v6  ;;  %v940_v14 = vsel %vm877_vm0, %v802_v8, %v804_v32  ;;  %v2625_v47 = vpop.f32.mrb[41].mxu1 }
 0x1fa   : > { %5833 = vmatmul.mubr.msk.bf16.vlgmr.msra.gmra.mrb[112].mxu1 %vm1999_vm3, %v7449_v61  ;;  %v1204_v55 = vpop.permute.xlu1 %1203  ;;  %8665 = vst [vmem:[#allocation4_spill] sm:$0xff] %v7480_v41  ;;  %v2627_v25 = vpop.f32.mrb[42].mxu1 }
 0x1fb   : > { %3599 = vmatpush1.bf16.msra.mxu0 %v938_v13  ;;  %3650 = vmatpush1.bf16.msra.mxu1 %v7073_v37  ;;  %v7476_v15 = vpop.permute.xlu0 %805  ;;  %8664 = vst [vmem:[#allocation3_spill] sm:$0xff] %v7478_v22  ;;  %v2570_v37 = vpop.f32.mrb[40].mxu0  ;;  %v4678_v58 = vmax.f32 %v2623_v26, %v2627_v25 }
 0x1fc   : > { %843 = vrot.lane.b32.xlu1 %v7459_v2, %s6168_s18  ;;  %v941_v57 = vsel %vm877_vm0, %v804_v32, %v7476_v15  ;;  %3585 = vmatprep.mubr.bf16.mxu1 %v8648_v5  ;;  %v2572_v43 = vpop.f32.mrb[41].mxu0  ;;  %v1342_v32 = vsel %vm1281_vm1, %v7414_v63, %v1204_v55  ;;  %v2629_v10 = vpop.f32.mrb[43].mxu1 }
 0x1fd   : > { %841 = vrot.lane.b32.xlu0 %v7467_v59, %s6168_s18  ;;  %3651 = vmatprep.subr.bf16.mxu1 %v941_v57  ;;  %v2574_v46 = vpop.f32.mrb[42].mxu0  ;;  %v4679_v34 = vmax.f32 %v2625_v47, %v2629_v10  ;;  %v2633_v13 = vpop.f32.mrb[44].mxu1 }
 0x1fe   : > { %v1208_v27 = vpop.permute.xlu1 %1207  ;;  %5832 = vmatmul.mubr.msk.bf16.gmra.mrb[116].mxu0 %vm1999_vm3, %v7496_v24  ;;  %v4676_v28 = vmax.f32 %v2570_v37, %v2574_v46  ;;  %v2576_v8 = vpop.f32.mrb[43].mxu0 }
 0x1ff   : > { %3652 = vmatpush1.bf16.msra.mxu1 %v940_v14  ;;  %v1206_v56 = vpop.permute.xlu0 %1205  ;;  %3628 = vmatprep.mubr.bf16.mxu0 %v8648_v5  ;;  %v4677_v38 = vmax.f32 %v2572_v43, %v2576_v8  ;;  %v2580_v6 = vpop.f32.mrb[44].mxu0 }
 0x200   : > { %1243 = vrot.lane.b32.xlu1 %v7441_v42, %s6169_s19  ;;  %v1343_v0 = vsel %vm1281_vm1, %v1204_v55, %v1206_v56  ;;  %v2635_v55 = vpop.f32.mrb[45].mxu1  ;;  %v2582_v57 = vpop.f32.mrb[45].mxu0  ;;  %v1344_v37 = vsel %vm1281_vm1, %v1206_v56, %v1208_v27 }
 0x201   : > { %845 = vrot.lane.b32.xlu0 %v7490_v36, %s6168_s18  ;;  %3600 = vmatprep.subr.bf16.mxu0 %v1343_v0  ;;  %v2584_v26 = vpop.f32.mrb[46].mxu0  ;;  %v2637_v14 = vpop.f32.mrb[46].mxu1 }
 0x202   : > { %3601 = vmatpush1.bf16.msra.mxu0 %v1342_v32  ;;  %v1608_v1 = vpop.permute.xlu1 %1607  ;;  %5834 = vmatmul.mubr.msk.bf16.gmra.mrb[116].mxu1 %vm1999_vm3, %v7496_v24  ;;  %v4776_v43 = vmax.f32 %v2580_v6, %v2584_v26  ;;  %v4778_v0 = vmax.f32 %v2633_v13, %v2637_v14  ;;  %v2586_v46 = vpop.f32.mrb[47].mxu0 }
 0x203   : > { %v7510_v50 = vpop.permute.xlu0 %1209  ;;  %3681 = vmatprep.mubr.bf16.mxu1 %v8648_v5  ;;  %v4777_v32 = vmax.f32 %v2582_v57, %v2586_v46  ;;  %v2639_v8 = vpop.f32.mrb[47].mxu1 }
 0x204   : > { %1247 = vrot.lane.b32.xlu1 %v7459_v2, %s6169_s19  ;;  %v1345_v63 = vsel %vm1281_vm1, %v1208_v27, %v7510_v50  ;;  %v7523_v5 = vmax.f32 %v4676_v28, %v4776_v43  ;;  %v1746_v27 = vsel %vm1685_vm2, %v7433_v16, %v1608_v1  ;;  %v4779_v6 = vmax.f32 %v2635_v55, %v2639_v8  ;;  %v6148_v55 = vld [vmem:[%s6206_s17 + $0x100] ss:$400 sps:$4 sm:$0xff]   ;;  %v7560_v43 = vld [vmem:[%s6206_s17 + $0x15c] ss:$400 sps:$4 sm:$0xff]  }
 0x205   : > { %1245 = vrot.lane.b32.xlu0 %v7467_v59, %s6169_s19  ;;  %3653 = vmatprep.subr.bf16.mxu1 %v1345_v63  ;;  %v7525_v63 = vmax.f32 %v4678_v58, %v4778_v0  ;;  %v7531_v56 = vmax.f32 %v4677_v38, %v4777_v32  ;;  %v8670_v0 = vmov 0   ;;  %v7566_v32 = vld [vmem:[%s6206_s17 + $0x158] ss:$400 sps:$4 sm:$0xff]  }
 0x206   : > { %3654 = vmatpush1.bf16.msra.mxu1 %v1344_v37  ;;  %v1612_v47 = vpop.permute.xlu1 %1611  ;;  %8666 = vst [vmem:[#allocation5_spill] sm:$0xff] %v7523_v5  ;;  %v7536_v28 = vmax.f32 %v4679_v34, %v4779_v6  ;;  %v7543_v37 = vld [vmem:[%s6206_s17 + $0x154] ss:$400 sps:$4 sm:$0xff]  }
 0x207   : > { %v1610_v25 = vpop.permute.xlu0 %1609  ;;  %8667 = vst [vmem:[#allocation6_spill] sm:$0xff] %v7525_v63  ;;  %8668 = vst [vmem:[#allocation7_spill] sm:$0xff] %v7531_v56 }
 0x208   : > { %1647 = vrot.lane.b32.xlu1 %v7441_v42, %s6170_s20  ;;  %v1747_v10 = vsel %vm1685_vm2, %v1608_v1, %v1610_v25  ;;  %8669 = vst [vmem:[#allocation8_spill] sm:$0xff] %v7536_v28  ;;  %v1748_v16 = vsel %vm1685_vm2, %v1610_v25, %v1612_v47 }
 0x209   : > { %1249 = vrot.lane.b32.xlu0 %v7490_v36, %s6169_s19  ;;  %3602 = vmatprep.subr.bf16.mxu0 %v1747_v10  ;;  %v2676_v1 = vpop.f32.mrb[48].mxu0 }
 0x20a   : > { %3603 = vmatpush1.bf16.msra.mxu0 %v1746_v27  ;;  %v808_v13 = vpop.permute.xlu1 %807  ;;  %v2678_v14 = vpop.f32.mrb[49].mxu0 }
 0x20b   : > { %v7533_v57 = vpop.permute.xlu0 %1613  ;;  %3702 = vmatprep.subr.bf16.mxu0 %v7114_v30  ;;  %v2680_v46 = vpop.f32.mrb[50].mxu0  ;;  %v942_v6 = vsel %vm877_vm0, %v7476_v15, %v808_v13 }
 0x20c   : > { %1651 = vrot.lane.b32.xlu1 %v7459_v2, %s6170_s20  ;;  %v1749_v58 = vsel %vm1685_vm2, %v1612_v47, %v7533_v57  ;;  %v4680_v8 = vmax.f32 %v2676_v1, %v2680_v46  ;;  %v2682_v10 = vpop.f32.mrb[51].mxu0 }
 0x20d   : > { %1649 = vrot.lane.b32.xlu0 %v7467_v59, %s6170_s20  ;;  %3655 = vmatprep.subr.bf16.mxu1 %v1749_v58  ;;  %v7548_v38 = vpop.f32.mrb[48].mxu1 }
 0x20e   : > { %5835 = vmatmul.mubr.msk.bf16.vlgmr.msra.gmra.mrb[120].mxu0 %vm1999_vm3, %v7449_v61  ;;  %3656 = vmatpush1.bf16.msra.mxu1 %v1748_v16  ;;  %v812_v30 = vpop.permute.xlu1 %811  ;;  %v7552_v34 = vpop.f32.mrb[49].mxu1  ;;  %v4681_v16 = vmax.f32 %v2678_v14, %v2682_v10 }
 0x20f   : > { %3703 = vmatpush1.bf16.msra.mxu0 %v6148_v55  ;;  %v810_v26 = vpop.permute.xlu0 %809  ;;  %3755 = vmatprep.subr.bf16.mxu1 %v7127_v7  ;;  %v2733_v25 = vpop.f32.mrb[50].mxu1 }
 0x210   : > { %847 = vrot.lane.b32.xlu1 %v7543_v37, %s6168_s18  ;;  %v943_v47 = vsel %vm877_vm0, %v808_v13, %v810_v26  ;;  %3638 = vmatprep.mubr.bf16.mxu0 %v8670_v0  ;;  %v4682_v7 = vmax.f32 %v7548_v38, %v2733_v25  ;;  %v2735_v27 = vpop.f32.mrb[51].mxu1  ;;  %v7585_v13 = vld [vmem:[%s6206_s17 + $0x160] ss:$400 sps:$4 sm:$0xff]   ;;  %v944_v46 = vsel %vm877_vm0, %v810_v26, %v812_v30 }
 0x211   : > { %1653 = vrot.lane.b32.xlu0 %v7490_v36, %s6170_s20  ;;  %3704 = vmatprep.subr.bf16.mxu0 %v943_v47  ;;  %v4683_v55 = vmax.f32 %v7552_v34, %v2735_v27  ;;  %v2686_v36 = vpop.f32.mrb[52].mxu0 }
 0x212   : > { %5837 = vmatmul.mubr.msk.bf16.vlgmr.msra.gmra.mrb[120].mxu1 %vm1999_vm3, %v7449_v61  ;;  %v1212_v58 = vpop.permute.xlu1 %1211  ;;  %v2688_v38 = vpop.f32.mrb[53].mxu0 }
 0x213   : > { %3705 = vmatpush1.bf16.msra.mxu0 %v942_v6  ;;  %3756 = vmatpush1.bf16.msra.mxu1 %v7132_v40  ;;  %v7575_v1 = vpop.permute.xlu0 %813  ;;  %v2690_v15 = vpop.f32.mrb[54].mxu0 }
 0x214   : > { %851 = vrot.lane.b32.xlu1 %v7560_v43, %s6168_s18  ;;  %v945_v47 = vsel %vm877_vm0, %v812_v30, %v7575_v1  ;;  %3691 = vmatprep.mubr.bf16.mxu1 %v8670_v0  ;;  %v4780_v40 = vmax.f32 %v2686_v36, %v2690_v15  ;;  %v2692_v14 = vpop.f32.mrb[55].mxu0 }
 0x215   : > { %849 = vrot.lane.b32.xlu0 %v7566_v32, %s6168_s18  ;;  %3757 = vmatprep.subr.bf16.mxu1 %v945_v47  ;;  %v2739_v34 = vpop.f32.mrb[52].mxu1  ;;  %v4781_v27 = vmax.f32 %v2688_v38, %v2692_v14  ;;  %v1346_v38 = vsel %vm1281_vm1, %v7510_v50, %v1212_v58 }
 0x216   : > { %v1216_v25 = vpop.permute.xlu1 %1215  ;;  %5836 = vmatmul.mubr.msk.bf16.gmra.mrb[124].mxu0 %vm1999_vm3, %v7496_v24  ;;  %v2741_v10 = vpop.f32.mrb[53].mxu1  ;;  %v7591_v28 = vmax.f32 %v4680_v8, %v4780_v40 }
 0x217   : > { %3758 = vmatpush1.bf16.msra.mxu1 %v944_v46  ;;  %v1214_v6 = vpop.permute.xlu0 %1213  ;;  %3734 = vmatprep.mubr.bf16.mxu0 %v8670_v0  ;;  %v2743_v47 = vpop.f32.mrb[54].mxu1  ;;  %v7596_v30 = vmax.f32 %v4681_v16, %v4781_v27 }
 0x218   : > { %8671 = vst [vmem:[#allocation9_spill] sm:$0xff] %v7591_v28  ;;  %1251 = vrot.lane.b32.xlu1 %v7543_v37, %s6169_s19  ;;  %v1347_v36 = vsel %vm1281_vm1, %v1212_v58, %v1214_v6  ;;  %v4782_v15 = vmax.f32 %v2739_v34, %v2743_v47  ;;  %v2745_v26 = vpop.f32.mrb[55].mxu1 }
 0x219   : > { %8672 = vst [vmem:[#allocation10_spill] sm:$0xff] %v7596_v30  ;;  %853 = vrot.lane.b32.xlu0 %v7585_v13, %s6168_s18  ;;  %3706 = vmatprep.subr.bf16.mxu0 %v1347_v36  ;;  %v4783_v14 = vmax.f32 %v2741_v10, %v2745_v26  ;;  %v6149_v36 = vld [vmem:[%s6206_s17 + $0x114] ss:$400 sps:$4 sm:$0xff]  }
 0x21a   : > { %3707 = vmatpush1.bf16.msra.mxu0 %v1346_v38  ;;  %v1616_v8 = vpop.permute.xlu1 %1615  ;;  %5838 = vmatmul.mubr.msk.bf16.gmra.mrb[124].mxu1 %vm1999_vm3, %v7496_v24  ;;  %v7604_v40 = vmax.f32 %v4682_v7, %v4782_v15  ;;  %v1348_v7 = vsel %vm1281_vm1, %v1214_v6, %v1216_v25  ;;  %v7637_v26 = vld [vmem:[%s6206_s17 + $0x164] ss:$400 sps:$4 sm:$0xff]  }
 0x21b   : > { %v7606_v46 = vpop.permute.xlu0 %1217  ;;  %3787 = vmatprep.mubr.bf16.mxu1 %v8670_v0  ;;  %v7609_v16 = vmax.f32 %v4683_v55, %v4783_v14  ;;  %v1750_v10 = vsel %vm1685_vm2, %v7533_v57, %v1616_v8 }
 0x21c   : > { %8673 = vst [vmem:[#allocation11_spill] sm:$0xff] %v7604_v40  ;;  %1255 = vrot.lane.b32.xlu1 %v7560_v43, %s6169_s19  ;;  %v1349_v50 = vsel %vm1281_vm1, %v1216_v25, %v7606_v46 }
 0x21d   : > { %8674 = vst [vmem:[#allocation12_spill] sm:$0xff] %v7609_v16  ;;  %1253 = vrot.lane.b32.xlu0 %v7566_v32, %s6169_s19  ;;  %3759 = vmatprep.subr.bf16.mxu1 %v1349_v50 }
 0x21e   : > { %3760 = vmatpush1.bf16.msra.mxu1 %v1348_v7  ;;  %v1620_v58 = vpop.permute.xlu1 %1619 }
 0x21f   : > { %v1618_v34 = vpop.permute.xlu0 %1617 }
 0x220   : > { %1655 = vrot.lane.b32.xlu1 %v7543_v37, %s6170_s20  ;;  %v1751_v55 = vsel %vm1685_vm2, %v1616_v8, %v1618_v34  ;;  %v1752_v8 = vsel %vm1685_vm2, %v1618_v34, %v1620_v58 }
 0x221   : > { %1257 = vrot.lane.b32.xlu0 %v7585_v13, %s6169_s19  ;;  %3708 = vmatprep.subr.bf16.mxu0 %v1751_v55  ;;  %v7625_v27 = vpop.f32.mrb[56].mxu0 }
 0x222   : > { %3709 = vmatpush1.bf16.msra.mxu0 %v1750_v10  ;;  %v816_v25 = vpop.permute.xlu1 %815  ;;  %v7627_v6 = vpop.f32.mrb[57].mxu0 }
 0x223   : > { %v7629_v47 = vpop.permute.xlu0 %1621  ;;  %3808 = vmatprep.subr.bf16.mxu0 %v6149_v36  ;;  %v2786_v15 = vpop.f32.mrb[58].mxu0  ;;  %v946_v16 = vsel %vm877_vm0, %v7575_v1, %v816_v25 }
 0x224   : > { %1659 = vrot.lane.b32.xlu1 %v7560_v43, %s6170_s20  ;;  %v1753_v57 = vsel %vm1685_vm2, %v1620_v58, %v7629_v47  ;;  %v4684_v38 = vmax.f32 %v7625_v27, %v2786_v15  ;;  %v2788_v14 = vpop.f32.mrb[59].mxu0  ;;  %v6150_v27 = vld [vmem:[%s6206_s17 + $0x110] ss:$400 sps:$4 sm:$0xff]   ;;  %v6151_v58 = vld [vmem:[%s6206_s17 + $0x11c] ss:$400 sps:$4 sm:$0xff]  }
 0x225   : > { %1657 = vrot.lane.b32.xlu0 %v7566_v32, %s6170_s20  ;;  %3761 = vmatprep.subr.bf16.mxu1 %v1753_v57  ;;  %v7643_v50 = vpop.f32.mrb[56].mxu1  ;;  %v4685_v7 = vmax.f32 %v7627_v6, %v2788_v14  ;;  %v7654_v6 = vld [vmem:[%s6206_s17 + $0x16c] ss:$400 sps:$4 sm:$0xff]  }
 0x226   : > { %5839 = vmatmul.mubr.msk.bf16.vlgmr.msra.gmra.mrb[128].mxu0 %vm1999_vm3, %v7449_v61  ;;  %3762 = vmatpush1.bf16.msra.mxu1 %v1752_v8  ;;  %v820_v55 = vpop.permute.xlu1 %819  ;;  %v2837_v10 = vpop.f32.mrb[57].mxu1  ;;  %v7661_v8 = vld [vmem:[%s6206_s17 + $0x168] ss:$400 sps:$4 sm:$0xff]  }
 0x227   : > { %3809 = vmatpush1.bf16.msra.mxu0 %v6150_v27  ;;  %v818_v36 = vpop.permute.xlu0 %817  ;;  %3861 = vmatprep.subr.bf16.mxu1 %v6151_v58  ;;  %v2839_v34 = vpop.f32.mrb[58].mxu1 }
 0x228   : > { %855 = vrot.lane.b32.xlu1 %v7637_v26, %s6168_s18  ;;  %v947_v15 = vsel %vm877_vm0, %v816_v25, %v818_v36  ;;  %3744 = vmatprep.mubr.bf16.mxu0 %v8670_v0  ;;  %v4686_v57 = vmax.f32 %v7643_v50, %v2839_v34  ;;  %v2841_v14 = vpop.f32.mrb[59].mxu1  ;;  %v6152_v50 = vld [vmem:[%s6206_s17 + $0x118] ss:$400 sps:$4 sm:$0xff]  }
 0x229   : > { %1661 = vrot.lane.b32.xlu0 %v7585_v13, %s6170_s20  ;;  %3810 = vmatprep.subr.bf16.mxu0 %v947_v15  ;;  %v4687_v27 = vmax.f32 %v2837_v10, %v2841_v14  ;;  %v2792_v58 = vpop.f32.mrb[60].mxu0 }
 0x22a   : > { %5841 = vmatmul.mubr.msk.bf16.vlgmr.msra.gmra.mrb[128].mxu1 %vm1999_vm3, %v7449_v61  ;;  %v1220_v40 = vpop.permute.xlu1 %1219  ;;  %v2794_v30 = vpop.f32.mrb[61].mxu0 }
 0x22b   : > { %3811 = vmatpush1.bf16.msra.mxu0 %v946_v16  ;;  %3862 = vmatpush1.bf16.msra.mxu1 %v6152_v50  ;;  %v7668_v34 = vpop.permute.xlu0 %821  ;;  %v2796_v28 = vpop.f32.mrb[62].mxu0  ;;  %v7678_v16 = vld [vmem:[%s6206_s17 + $0x170] ss:$400 sps:$4 sm:$0xff]   ;;  %v948_v50 = vsel %vm877_vm0, %v818_v36, %v820_v55 }
 0x22c   : > { %859 = vrot.lane.b32.xlu1 %v7654_v6, %s6168_s18  ;;  %v949_v10 = vsel %vm877_vm0, %v820_v55, %v7668_v34  ;;  %3797 = vmatprep.mubr.bf16.mxu1 %v8670_v0  ;;  %v4784_v1 = vmax.f32 %v2792_v58, %v2796_v28  ;;  %v2798_v25 = vpop.f32.mrb[63].mxu0 }
 0x22d   : > { %857 = vrot.lane.b32.xlu0 %v7661_v8, %s6168_s18  ;;  %3863 = vmatprep.subr.bf16.mxu1 %v949_v10  ;;  %v2845_v15 = vpop.f32.mrb[60].mxu1  ;;  %v4785_v14 = vmax.f32 %v2794_v30, %v2798_v25  ;;  %v1350_v10 = vsel %vm1281_vm1, %v7606_v46, %v1220_v40 }
 0x22e   : > { %v1224_v63 = vpop.permute.xlu1 %1223  ;;  %5840 = vmatmul.mubr.msk.bf16.gmra.mrb[132].mxu0 %vm1999_vm3, %v7496_v24  ;;  %v2847_v56 = vpop.f32.mrb[61].mxu1  ;;  %v7683_v5 = vmax.f32 %v4684_v38, %v4784_v1 }
 0x22f   : > { %3864 = vmatpush1.bf16.msra.mxu1 %v948_v50  ;;  %v1222_v28 = vpop.permute.xlu0 %1221  ;;  %3840 = vmatprep.mubr.bf16.mxu0 %v8670_v0  ;;  %v2849_v58 = vpop.f32.mrb[62].mxu1  ;;  %v7686_v41 = vmax.f32 %v4685_v7, %v4785_v14 }
 0x230   : > { %8675 = vst [vmem:[#allocation13_spill] sm:$0xff] %v7683_v5  ;;  %1259 = vrot.lane.b32.xlu1 %v7637_v26, %s6169_s19  ;;  %v1351_v30 = vsel %vm1281_vm1, %v1220_v40, %v1222_v28  ;;  %v4786_v55 = vmax.f32 %v2845_v15, %v2849_v58  ;;  %v2851_v36 = vpop.f32.mrb[63].mxu1 }
 0x231   : > { %8676 = vst [vmem:[#allocation14_spill] sm:$0xff] %v7686_v41  ;;  %861 = vrot.lane.b32.xlu0 %v7678_v16, %s6168_s18  ;;  %3812 = vmatprep.subr.bf16.mxu0 %v1351_v30  ;;  %v4787_v38 = vmax.f32 %v2847_v56, %v2851_v36  ;;  %v1352_v56 = vsel %vm1281_vm1, %v1222_v28, %v1224_v63 }
 0x232   : > { %3813 = vmatpush1.bf16.msra.mxu0 %v1350_v10  ;;  %v1624_v1 = vpop.permute.xlu1 %1623  ;;  %5842 = vmatmul.mubr.msk.bf16.gmra.mrb[132].mxu1 %vm1999_vm3, %v7496_v24  ;;  %v7697_v7 = vmax.f32 %v4686_v57, %v4786_v55  ;;  %v7728_v55 = vld [vmem:[%s6206_s17 + $0x174] ss:$400 sps:$4 sm:$0xff]  }
 0x233   : > { %v7699_v25 = vpop.permute.xlu0 %1225  ;;  %3893 = vmatprep.mubr.bf16.mxu1 %v8670_v0  ;;  %v7702_v15 = vmax.f32 %v4687_v27, %v4787_v38  ;;  %v1754_v14 = vsel %vm1685_vm2, %v7629_v47, %v1624_v1 }
 0x234   : > { %8677 = vst [vmem:[#allocation15_spill] sm:$0xff] %v7697_v7  ;;  %1263 = vrot.lane.b32.xlu1 %v7654_v6, %s6169_s19  ;;  %v1353_v40 = vsel %vm1281_vm1, %v1224_v63, %v7699_v25 }
 0x235   : > { %8678 = vst [vmem:[#allocation16_spill] sm:$0xff] %v7702_v15  ;;  %1261 = vrot.lane.b32.xlu0 %v7661_v8, %s6169_s19  ;;  %3865 = vmatprep.subr.bf16.mxu1 %v1353_v40 }
 0x236   : > { %3866 = vmatpush1.bf16.msra.mxu1 %v1352_v56  ;;  %v1628_v46 = vpop.permute.xlu1 %1627 }
 0x237   : > { %v1626_v57 = vpop.permute.xlu0 %1625 }
 0x238   : > { %1663 = vrot.lane.b32.xlu1 %v7637_v26, %s6170_s20  ;;  %v1755_v27 = vsel %vm1685_vm2, %v1624_v1, %v1626_v57  ;;  %v1756_v38 = vsel %vm1685_vm2, %v1626_v57, %v1628_v46 }
 0x239   : > { %1265 = vrot.lane.b32.xlu0 %v7678_v16, %s6169_s19  ;;  %3814 = vmatprep.subr.bf16.mxu0 %v1755_v27  ;;  %v2888_v63 = vpop.f32.mrb[64].mxu0  ;;  %v6153_v27 = vld [vmem:[%s6206_s17 + $0x120] ss:$400 sps:$4 sm:$0xff]  }
 0x23a   : > { %3815 = vmatpush1.bf16.msra.mxu0 %v1754_v14  ;;  %v824_v50 = vpop.permute.xlu1 %823  ;;  %v7718_v28 = vpop.f32.mrb[65].mxu0 }
 0x23b   : > { %v7720_v58 = vpop.permute.xlu0 %1629  ;;  %3914 = vmatprep.subr.bf16.mxu0 %v7265_v11  ;;  %v2892_v30 = vpop.f32.mrb[66].mxu0 }
 0x23c   : > { %1667 = vrot.lane.b32.xlu1 %v7654_v6, %s6170_s20  ;;  %v1757_v47 = vsel %vm1685_vm2, %v1628_v46, %v7720_v58  ;;  %v4688_v36 = vmax.f32 %v2888_v63, %v2892_v30  ;;  %v2894_v10 = vpop.f32.mrb[67].mxu0  ;;  %v7744_v63 = vld [vmem:[%s6206_s17 + $0x17c] ss:$400 sps:$4 sm:$0xff]  }
 0x23d   : > { %1665 = vrot.lane.b32.xlu0 %v7661_v8, %s6170_s20  ;;  %3867 = vmatprep.subr.bf16.mxu1 %v1757_v47  ;;  %v7733_v11 = vpop.f32.mrb[64].mxu1  ;;  %v4689_v1 = vmax.f32 %v7718_v28, %v2894_v10  ;;  %v7751_v47 = vld [vmem:[%s6206_s17 + $0x178] ss:$400 sps:$4 sm:$0xff]  }
 0x23e   : > { %5843 = vmatmul.mubr.msk.bf16.vlgmr.msra.gmra.mrb[136].mxu0 %vm1999_vm3, %v7449_v61  ;;  %3868 = vmatpush1.bf16.msra.mxu1 %v1756_v38  ;;  %v828_v40 = vpop.permute.xlu1 %827  ;;  %v2943_v56 = vpop.f32.mrb[65].mxu1  ;;  %v950_v38 = vsel %vm877_vm0, %v7668_v34, %v824_v50 }
 0x23f   : > { %3915 = vmatpush1.bf16.msra.mxu0 %v6153_v27  ;;  %v826_v14 = vpop.permute.xlu0 %825  ;;  %3967 = vmatprep.subr.bf16.mxu1 %v7278_v62  ;;  %v2945_v46 = vpop.f32.mrb[66].mxu1 }
 0x240   : > { %863 = vrot.lane.b32.xlu1 %v7728_v55, %s6168_s18  ;;  %v951_v57 = vsel %vm877_vm0, %v824_v50, %v826_v14  ;;  %3850 = vmatprep.mubr.bf16.mxu0 %v8670_v0  ;;  %v4690_v28 = vmax.f32 %v7733_v11, %v2945_v46  ;;  %v2947_v30 = vpop.f32.mrb[67].mxu1  ;;  %v6154_v11 = vld [vmem:[%s6206_s17 + $0x128] ss:$400 sps:$4 sm:$0xff]  }
 0x241   : > { %1669 = vrot.lane.b32.xlu0 %v7678_v16, %s6170_s20  ;;  %3916 = vmatprep.subr.bf16.mxu0 %v951_v57  ;;  %v4691_v62 = vmax.f32 %v2943_v56, %v2947_v30  ;;  %v2898_v10 = vpop.f32.mrb[68].mxu0  ;;  %v7768_v57 = vld [vmem:[%s6206_s17 + $0x180] ss:$400 sps:$4 sm:$0xff]  }
 0x242   : > { %5845 = vmatmul.mubr.msk.bf16.vlgmr.msra.gmra.mrb[136].mxu1 %vm1999_vm3, %v7449_v61  ;;  %v1228_v27 = vpop.permute.xlu1 %1227  ;;  %v2900_v15 = vpop.f32.mrb[69].mxu0 }
 0x243   : > { %3917 = vmatpush1.bf16.msra.mxu0 %v950_v38  ;;  %3968 = vmatpush1.bf16.msra.mxu1 %v6154_v11  ;;  %v7758_v46 = vpop.permute.xlu0 %829  ;;  %v2902_v7 = vpop.f32.mrb[70].mxu0  ;;  %v952_v11 = vsel %vm877_vm0, %v826_v14, %v828_v40 }
 0x244   : > { %867 = vrot.lane.b32.xlu1 %v7744_v63, %s6168_s18  ;;  %v953_v56 = vsel %vm877_vm0, %v828_v40, %v7758_v46  ;;  %3903 = vmatprep.mubr.bf16.mxu1 %v8670_v0  ;;  %v4788_v34 = vmax.f32 %v2898_v10, %v2902_v7  ;;  %v2904_v50 = vpop.f32.mrb[71].mxu0 }
 0x245   : > { %865 = vrot.lane.b32.xlu0 %v7751_v47, %s6168_s18  ;;  %3969 = vmatprep.subr.bf16.mxu1 %v953_v56  ;;  %v2951_v30 = vpop.f32.mrb[68].mxu1  ;;  %v4789_v38 = vmax.f32 %v2900_v15, %v2904_v50  ;;  %v1354_v56 = vsel %vm1281_vm1, %v7699_v25, %v1228_v27 }
 0x246   : > { %v1232_v41 = vpop.permute.xlu1 %1231  ;;  %5844 = vmatmul.mubr.msk.bf16.gmra.mrb[140].mxu0 %vm1999_vm3, %v7496_v24  ;;  %v2953_v5 = vpop.f32.mrb[69].mxu1  ;;  %v7773_v51 = vmax.f32 %v4688_v36, %v4788_v34 }
 0x247   : > { %3970 = vmatpush1.bf16.msra.mxu1 %v952_v11  ;;  %v1230_v7 = vpop.permute.xlu0 %1229  ;;  %3946 = vmatprep.mubr.bf16.mxu0 %v8670_v0  ;;  %v2955_v10 = vpop.f32.mrb[70].mxu1  ;;  %v7776_v22 = vmax.f32 %v4689_v1, %v4789_v38 }
 0x248   : > { %8679 = vst [vmem:[#allocation17_spill] sm:$0xff] %v7773_v51  ;;  %1267 = vrot.lane.b32.xlu1 %v7728_v55, %s6169_s19  ;;  %v1355_v15 = vsel %vm1281_vm1, %v1228_v27, %v1230_v7  ;;  %v4790_v40 = vmax.f32 %v2951_v30, %v2955_v10  ;;  %v2957_v14 = vpop.f32.mrb[71].mxu1 }
 0x249   : > { %8680 = vst [vmem:[#allocation18_spill] sm:$0xff] %v7776_v22  ;;  %869 = vrot.lane.b32.xlu0 %v7768_v57, %s6168_s18  ;;  %3918 = vmatprep.subr.bf16.mxu0 %v1355_v15  ;;  %v4791_v36 = vmax.f32 %v2953_v5, %v2957_v14  ;;  %v1356_v5 = vsel %vm1281_vm1, %v1230_v7, %v1232_v41 }
 0x24a   : > { %3919 = vmatpush1.bf16.msra.mxu0 %v1354_v56  ;;  %v1632_v34 = vpop.permute.xlu1 %1631  ;;  %5846 = vmatmul.mubr.msk.bf16.gmra.mrb[140].mxu1 %vm1999_vm3, %v7496_v24  ;;  %v7787_v1 = vmax.f32 %v4690_v28, %v4790_v40  ;;  %v7816_v40 = vld [vmem:[%s6206_s17 + $0x184] ss:$400 sps:$4 sm:$0xff]  }
 0x24b   : > { %v7789_v50 = vpop.permute.xlu0 %1233  ;;  %3999 = vmatprep.mubr.bf16.mxu1 %v8670_v0  ;;  %v7792_v30 = vmax.f32 %v4691_v62, %v4791_v36  ;;  %v1758_v38 = vsel %vm1685_vm2, %v7720_v58, %v1632_v34 }
 0x24c   : > { %8681 = vst [vmem:[#allocation19_spill] sm:$0xff] %v7787_v1  ;;  %1271 = vrot.lane.b32.xlu1 %v7744_v63, %s6169_s19  ;;  %v1357_v25 = vsel %vm1281_vm1, %v1232_v41, %v7789_v50 }
 0x24d   : > { %8682 = vst [vmem:[#allocation20_spill] sm:$0xff] %v7792_v30  ;;  %1269 = vrot.lane.b32.xlu0 %v7751_v47, %s6169_s19  ;;  %3971 = vmatprep.subr.bf16.mxu1 %v1357_v25 }
 0x24e   : > { %3972 = vmatpush1.bf16.msra.mxu1 %v1356_v5  ;;  %v1636_v28 = vpop.permute.xlu1 %1635 }
 0x24f   : > { %v1634_v27 = vpop.permute.xlu0 %1633 }
 0x250   : > { %1671 = vrot.lane.b32.xlu1 %v7728_v55, %s6170_s20  ;;  %v1759_v62 = vsel %vm1685_vm2, %v1632_v34, %v1634_v27  ;;  %v1760_v36 = vsel %vm1685_vm2, %v1634_v27, %v1636_v28 }
 0x251   : > { %1273 = vrot.lane.b32.xlu0 %v7768_v57, %s6169_s19  ;;  %3920 = vmatprep.subr.bf16.mxu0 %v1759_v62  ;;  %v2994_v41 = vpop.f32.mrb[72].mxu0  ;;  %v6155_v62 = vld [vmem:[%s6206_s17 + $0x130] ss:$400 sps:$4 sm:$0xff]  }
 0x252   : > { %3921 = vmatpush1.bf16.msra.mxu0 %v1758_v38  ;;  %v832_v11 = vpop.permute.xlu1 %831  ;;  %v2996_v7 = vpop.f32.mrb[73].mxu0 }
 0x253   : > { %v7808_v10 = vpop.permute.xlu0 %1637  ;;  %4020 = vmatprep.subr.bf16.mxu0 %v7357_v52  ;;  %v2998_v15 = vpop.f32.mrb[74].mxu0 }
 0x254   : > { %1675 = vrot.lane.b32.xlu1 %v7744_v63, %s6170_s20  ;;  %v1761_v58 = vsel %vm1685_vm2, %v1636_v28, %v7808_v10  ;;  %v4692_v14 = vmax.f32 %v2994_v41, %v2998_v15  ;;  %v3000_v56 = vpop.f32.mrb[75].mxu0  ;;  %v7829_v41 = vld [vmem:[%s6206_s17 + $0x18c] ss:$400 sps:$4 sm:$0xff]  }
 0x255   : > { %1673 = vrot.lane.b32.xlu0 %v7751_v47, %s6170_s20  ;;  %3973 = vmatprep.subr.bf16.mxu1 %v1761_v58  ;;  %v3047_v52 = vpop.f32.mrb[72].mxu1  ;;  %v4693_v34 = vmax.f32 %v2996_v7, %v3000_v56  ;;  %v7835_v58 = vld [vmem:[%s6206_s17 + $0x188] ss:$400 sps:$4 sm:$0xff]  }
 0x256   : > { %5847 = vmatmul.mubr.msk.bf16.vlgmr.msra.gmra.mrb[144].mxu0 %vm1999_vm3, %v7449_v61  ;;  %3974 = vmatpush1.bf16.msra.mxu1 %v1760_v36  ;;  %v836_v25 = vpop.permute.xlu1 %835  ;;  %v3049_v5 = vpop.f32.mrb[73].mxu1  ;;  %v954_v36 = vsel %vm877_vm0, %v7758_v46, %v832_v11 }
 0x257   : > { %4021 = vmatpush1.bf16.msra.mxu0 %v6155_v62  ;;  %v834_v38 = vpop.permute.xlu0 %833  ;;  %4073 = vmatprep.subr.bf16.mxu1 %v7370_v35  ;;  %v3051_v28 = vpop.f32.mrb[74].mxu1 }
 0x258   : > { %871 = vrot.lane.b32.xlu1 %v7816_v40, %s6168_s18  ;;  %v955_v27 = vsel %vm877_vm0, %v832_v11, %v834_v38  ;;  %3956 = vmatprep.mubr.bf16.mxu0 %v8670_v0  ;;  %v4694_v7 = vmax.f32 %v3047_v52, %v3051_v28  ;;  %v3053_v15 = vpop.f32.mrb[75].mxu1 }
 0x259   : > { %1677 = vrot.lane.b32.xlu0 %v7768_v57, %s6170_s20  ;;  %4022 = vmatprep.subr.bf16.mxu0 %v955_v27  ;;  %v4695_v56 = vmax.f32 %v3049_v5, %v3053_v15  ;;  %v3004_v35 = vpop.f32.mrb[76].mxu0 }
 0x25a   : > { %5849 = vmatmul.mubr.msk.bf16.vlgmr.msra.gmra.mrb[144].mxu1 %vm1999_vm3, %v7449_v61  ;;  %v1236_v62 = vpop.permute.xlu1 %1235  ;;  %v3006_v30 = vpop.f32.mrb[77].mxu0 }
 0x25b   : > { %4023 = vmatpush1.bf16.msra.mxu0 %v954_v36  ;;  %4074 = vmatpush1.bf16.msra.mxu1 %v7376_v9  ;;  %v7842_v52 = vpop.permute.xlu0 %837  ;;  %v3008_v28 = vpop.f32.mrb[78].mxu0  ;;  %v956_v9 = vsel %vm877_vm0, %v834_v38, %v836_v25 }
 0x25c   : > { %875 = vrot.lane.b32.xlu1 %v7829_v41, %s6168_s18  ;;  %v957_v5 = vsel %vm877_vm0, %v836_v25, %v7842_v52  ;;  %4009 = vmatprep.mubr.bf16.mxu1 %v8670_v0  ;;  %v4792_v46 = vmax.f32 %v3004_v35, %v3008_v28  ;;  %v3010_v11 = vpop.f32.mrb[79].mxu0 }
 0x25d   : > { %873 = vrot.lane.b32.xlu0 %v7835_v58, %s6168_s18  ;;  %4075 = vmatprep.subr.bf16.mxu1 %v957_v5  ;;  %v3057_v27 = vpop.f32.mrb[76].mxu1  ;;  %v4793_v15 = vmax.f32 %v3006_v30, %v3010_v11  ;;  %v1358_v5 = vsel %vm1281_vm1, %v7789_v50, %v1236_v62 }
 0x25e   : > { %v1240_v36 = vpop.permute.xlu1 %1239  ;;  %5848 = vmatmul.mubr.msk.bf16.gmra.mrb[148].mxu0 %vm1999_vm3, %v7496_v24  ;;  %v3059_v1 = vpop.f32.mrb[77].mxu1  ;;  %v7854_v22 = vmax.f32 %v4692_v14, %v4792_v46 }
 0x25f   : > { %4076 = vmatpush1.bf16.msra.mxu1 %v956_v9  ;;  %v1238_v51 = vpop.permute.xlu0 %1237  ;;  %4052 = vmatprep.mubr.bf16.mxu0 %v8670_v0  ;;  %v3061_v35 = vpop.f32.mrb[78].mxu1  ;;  %v7857_v28 = vmax.f32 %v4693_v34, %v4793_v15 }
 0x260   : > { %1277 = vrot.lane.b32.xlu1 %v7835_v58, %s6169_s19  ;;  %v1359_v30 = vsel %vm1281_vm1, %v1236_v62, %v1238_v51  ;;  %v4794_v25 = vmax.f32 %v3057_v27, %v3061_v35  ;;  %v3063_v38 = vpop.f32.mrb[79].mxu1 }
 0x261   : > { %1275 = vrot.lane.b32.xlu0 %v7816_v40, %s6169_s19  ;;  %4024 = vmatprep.subr.bf16.mxu0 %v1359_v30  ;;  %v4795_v14 = vmax.f32 %v3059_v1, %v3063_v38  ;;  %v1360_v1 = vsel %vm1281_vm1, %v1238_v51, %v1240_v36 }
 0x262   : > { %4025 = vmatpush1.bf16.msra.mxu0 %v1358_v5  ;;  %v1640_v46 = vpop.permute.xlu1 %1639  ;;  %5850 = vmatmul.mubr.msk.bf16.gmra.mrb[148].mxu1 %vm1999_vm3, %v7496_v24  ;;  %v7868_v34 = vmax.f32 %v4694_v7, %v4794_v25 }
 0x263   : > { %v7870_v11 = vpop.permute.xlu0 %1241  ;;  %4105 = vmatprep.mubr.bf16.mxu1 %v8670_v0  ;;  %v7873_v27 = vmax.f32 %v4695_v56, %v4795_v14  ;;  %v1762_v15 = vsel %vm1685_vm2, %v7808_v10, %v1640_v46 }
 0x264   : > { %8683 = vst [vmem:[#allocation21_spill] sm:$0xff] %v7868_v34  ;;  %1679 = vrot.lane.b32.xlu1 %v7816_v40, %s6170_s20  ;;  %v1361_v50 = vsel %vm1281_vm1, %v1240_v36, %v7870_v11  ;;  %v276_v36 = vld [vmem:[%s8646_s2] sm:$0xff] }
 0x265   : > { %8684 = vst [vmem:[#allocation22_spill] sm:$0xff] %v7873_v27  ;;  %1279 = vrot.lane.b32.xlu0 %v7829_v41, %s6169_s19  ;;  %4077 = vmatprep.subr.bf16.mxu1 %v1361_v50 }
 0x266   : > { %4078 = vmatpush1.bf16.msra.mxu1 %v1360_v1  ;;  %v1644_v7 = vpop.permute.xlu1 %1643 }
 0x267   : > { %v1642_v62 = vpop.permute.xlu0 %1641 }
 0x268   : > { %1683 = vrot.lane.b32.xlu1 %v7829_v41, %s6170_s20  ;;  %v1763_v56 = vsel %vm1685_vm2, %v1640_v46, %v1642_v62  ;;  %v1764_v14 = vsel %vm1685_vm2, %v1642_v62, %v1644_v7 }
 0x269   : > { %1681 = vrot.lane.b32.xlu0 %v7835_v58, %s6170_s20  ;;  %4026 = vmatprep.subr.bf16.mxu0 %v1763_v56  ;;  %v3100_v51 = vpop.f32.mrb[80].mxu0 }
 0x26a   : > { %4027 = vmatpush1.bf16.msra.mxu0 %v1762_v15  ;;  %v840_v9 = vpop.permute.xlu1 %839  ;;  %v3102_v35 = vpop.f32.mrb[81].mxu0  ;;  %v6156_v15 = vld [vmem:[%s6206_s17 + $0x140] ss:$400 sps:$4 sm:$0xff]  }
 0x26b   : > { %v7892_v30 = vpop.permute.xlu0 %1645  ;;  %4126 = vmatprep.subr.bf16.mxu0 %v7441_v42  ;;  %v3104_v25 = vpop.f32.mrb[82].mxu0 }
 0x26c   : > { %v1765_v10 = vsel %vm1685_vm2, %v1644_v7, %v7892_v30  ;;  %v4696_v38 = vmax.f32 %v3100_v51, %v3104_v25  ;;  %v3106_v5 = vpop.f32.mrb[83].mxu0  ;;  %v958_v25 = vsel %vm877_vm0, %v7842_v52, %v840_v9 }
 0x26d   : > { %4958 = vperm.xlu0 %5991, %v276_v36   ;;  %4079 = vmatprep.subr.bf16.mxu1 %v1765_v10  ;;  %v3153_v46 = vpop.f32.mrb[80].mxu1  ;;  %v4697_v50 = vmax.f32 %v3102_v35, %v3106_v5 }
 0x26e   : > { %5851 = vmatmul.mubr.msk.bf16.vlgmr.msra.gmra.mrb[152].mxu0 %vm1999_vm3, %v7449_v61  ;;  %4080 = vmatpush1.bf16.msra.mxu1 %v1764_v14  ;;  %v844_v1 = vpop.permute.xlu1 %843  ;;  %v3155_v56 = vpop.f32.mrb[81].mxu1 }
 0x26f   : > { %4127 = vmatpush1.bf16.msra.mxu0 %v6156_v15  ;;  %v842_v42 = vpop.permute.xlu0 %841  ;;  %4179 = vmatprep.subr.bf16.mxu1 %v7459_v2  ;;  %v3157_v27 = vpop.f32.mrb[82].mxu1 }
 0x270   : > { %v959_v51 = vsel %vm877_vm0, %v840_v9, %v842_v42  ;;  %4062 = vmatprep.mubr.bf16.mxu0 %v8670_v0  ;;  %v4698_v7 = vmax.f32 %v3153_v46, %v3157_v27  ;;  %v3159_v62 = vpop.f32.mrb[83].mxu1 }
 0x271   : > { %4128 = vmatprep.subr.bf16.mxu0 %v959_v51  ;;  %5853 = vmatmul.mubr.msk.bf16.vlgmr.msra.gmra.mrb[152].mxu1 %vm1999_vm3, %v7449_v61  ;;  %v4699_v36 = vmax.f32 %v3155_v56, %v3159_v62  ;;  %v3110_v35 = vpop.f32.mrb[84].mxu0  ;;  %v960_v56 = vsel %vm877_vm0, %v842_v42, %v844_v1 }
 0x272   : > { %4180 = vmatpush1.bf16.msra.mxu1 %v7467_v59  ;;  %v1244_v10 = vpop.permute.xlu1 %1243  ;;  %4115 = vmatprep.mubr.bf16.mxu1 %v8670_v0  ;;  %v3112_v2 = vpop.f32.mrb[85].mxu0 }
 0x273   : > { %4129 = vmatpush1.bf16.msra.mxu0 %v958_v25  ;;  %v7910_v5 = vpop.permute.xlu0 %845  ;;  %v3114_v27 = vpop.f32.mrb[86].mxu0 }
 0x274   : > { %v961_v14 = vsel %vm877_vm0, %v844_v1, %v7910_v5  ;;  %v4796_v46 = vmax.f32 %v3110_v35, %v3114_v27  ;;  %v3116_v61 = vpop.f32.mrb[87].mxu0 }
 0x275   : > { %4181 = vmatprep.subr.bf16.mxu1 %v961_v14  ;;  %v3163_v15 = vpop.f32.mrb[84].mxu1  ;;  %v4797_v52 = vmax.f32 %v3112_v2, %v3116_v61  ;;  %v1362_v2 = vsel %vm1281_vm1, %v7870_v11, %v1244_v10 }
 0x276   : > { %4182 = vmatpush1.bf16.msra.mxu1 %v960_v56  ;;  %v1248_v59 = vpop.permute.xlu1 %1247  ;;  %5852 = vmatmul.mubr.msk.bf16.gmra.mrb[156].mxu0 %vm1999_vm3, %v7496_v24  ;;  %v3165_v9 = vpop.f32.mrb[85].mxu1  ;;  %v7917_v51 = vmax.f32 %v4696_v38, %v4796_v46 }
 0x277   : > { %v1246_v62 = vpop.permute.xlu0 %1245  ;;  %4158 = vmatprep.mubr.bf16.mxu0 %v8670_v0  ;;  %v3167_v25 = vpop.f32.mrb[86].mxu1  ;;  %v7920_v34 = vmax.f32 %v4697_v50, %v4797_v52 }
 0x278   : > { %v1363_v35 = vsel %vm1281_vm1, %v1244_v10, %v1246_v62  ;;  %v4798_v1 = vmax.f32 %v3163_v15, %v3167_v25  ;;  %v3169_v42 = vpop.f32.mrb[87].mxu1  ;;  %v1364_v11 = vsel %vm1281_vm1, %v1246_v62, %v1248_v59 }
 0x279   : > { %4130 = vmatprep.subr.bf16.mxu0 %v1363_v35  ;;  %5854 = vmatmul.mubr.msk.bf16.gmra.mrb[156].mxu1 %vm1999_vm3, %v7496_v24  ;;  %v4799_v27 = vmax.f32 %v3165_v9, %v3169_v42 }
 0x27a   : > { %4131 = vmatpush1.bf16.msra.mxu0 %v1362_v2  ;;  %v1648_v38 = vpop.permute.xlu1 %1647  ;;  %4211 = vmatprep.mubr.bf16.mxu1 %v8670_v0  ;;  %v7928_v14 = vmax.f32 %v4698_v7, %v4798_v1 }
 0x27b   : > { %v7930_v50 = vpop.permute.xlu0 %1249  ;;  %v7932_v46 = vmax.f32 %v4699_v36, %v4799_v27  ;;  %v1766_v15 = vsel %vm1685_vm2, %v7892_v30, %v1648_v38  ;;  %v7949_v30 = vld [vmem:[%s8645_s1] sm:$0xff]  }
 0x27c   : > { %v1365_v61 = vsel %vm1281_vm1, %v1248_v59, %v7930_v50 }
 0x27d   : > { %8685 = vst [vmem:[#allocation23_spill] sm:$0xff] %v7932_v46  ;;  %4183 = vmatprep.subr.bf16.mxu1 %v1365_v61 }
 0x27e   : > { %4184 = vmatpush1.bf16.msra.mxu1 %v1364_v11  ;;  %v1652_v10 = vpop.permute.xlu1 %1651 }
 0x27f   : > { %v1650_v24 = vpop.permute.xlu0 %1649 }
 0x280   : > { %v1767_v56 = vsel %vm1685_vm2, %v1648_v38, %v1650_v24  ;;  %v1768_v1 = vsel %vm1685_vm2, %v1650_v24, %v1652_v10 }
 0x281   : > { %4132 = vmatprep.subr.bf16.mxu0 %v1767_v56  ;;  %v3206_v7 = vpop.f32.mrb[88].mxu0 }
 0x282   : > { %4133 = vmatpush1.bf16.msra.mxu0 %v1766_v15  ;;  %v848_v36 = vpop.permute.xlu1 %847  ;;  %v3208_v52 = vpop.f32.mrb[89].mxu0 }
 0x283   : > { %v7940_v9 = vpop.permute.xlu0 %1653  ;;  %4232 = vmatprep.subr.bf16.mxu0 %v7543_v37  ;;  %v3210_v59 = vpop.f32.mrb[90].mxu0  ;;  %v6158_v37 = vld [vmem:[%s6206_s17 + $0x150] ss:$400 sps:$4 sm:$0xff]   ;;  %v962_v15 = vsel %vm877_vm0, %v7910_v5, %v848_v36 }
 0x284   : > { %v1769_v62 = vsel %vm1685_vm2, %v1652_v10, %v7940_v9  ;;  %v4700_v25 = vmax.f32 %v3206_v7, %v3210_v59  ;;  %v3212_v35 = vpop.f32.mrb[91].mxu0 }
 0x285   : > { %4185 = vmatprep.subr.bf16.mxu1 %v1769_v62  ;;  %5855 = vmatmul.mubr.msk.bf16.vlgmr.msra.gmra.mrb[160].mxu0 %vm1999_vm3, %v7949_v30  ;;  %v3259_v42 = vpop.f32.mrb[88].mxu1  ;;  %v4701_v2 = vmax.f32 %v3208_v52, %v3212_v35 }
 0x286   : > { %4186 = vmatpush1.bf16.msra.mxu1 %v1768_v1  ;;  %4233 = vmatpush1.bf16.msra.mxu0 %v6158_v37  ;;  %v852_v27 = vpop.permute.xlu1 %851  ;;  %v3261_v38 = vpop.f32.mrb[89].mxu1  ;;  %v7971_v37 = vld [vmem:[%s8645_s1 + $0x8] sm:$0xff]  }
 0x287   : > { %v850_v61 = vpop.permute.xlu0 %849  ;;  %4285 = vmatprep.subr.bf16.mxu1 %v7560_v43  ;;  %4168 = vmatprep.mubr.bf16.mxu0 %v8670_v0  ;;  %v3263_v11 = vpop.f32.mrb[90].mxu1 }
 0x288   : > { %v963_v10 = vsel %vm877_vm0, %v848_v36, %v850_v61  ;;  %v4702_v24 = vmax.f32 %v3259_v42, %v3263_v11  ;;  %v3265_v56 = vpop.f32.mrb[91].mxu1  ;;  %v964_v42 = vsel %vm877_vm0, %v850_v61, %v852_v27 }
 0x289   : > { %4234 = vmatprep.subr.bf16.mxu0 %v963_v10  ;;  %5857 = vmatmul.mubr.msk.bf16.vlgmr.msra.gmra.mrb[160].mxu1 %vm1999_vm3, %v7949_v30  ;;  %v4703_v7 = vmax.f32 %v3261_v38, %v3265_v56  ;;  %v3216_v52 = vpop.f32.mrb[92].mxu0 }
 0x28a   : > { %4235 = vmatpush1.bf16.msra.mxu0 %v962_v15  ;;  %4286 = vmatpush1.bf16.msra.mxu1 %v7566_v32  ;;  %v1252_v43 = vpop.permute.xlu1 %1251  ;;  %v3218_v59 = vpop.f32.mrb[93].mxu0 }
 0x28b   : > { %v7962_v62 = vpop.permute.xlu0 %853  ;;  %4221 = vmatprep.mubr.bf16.mxu1 %v8670_v0  ;;  %v3220_v35 = vpop.f32.mrb[94].mxu0  ;;  %v1366_v46 = vsel %vm1281_vm1, %v7930_v50, %v1252_v43 }
 0x28c   : > { %v965_v1 = vsel %vm877_vm0, %v852_v27, %v7962_v62  ;;  %v4800_v5 = vmax.f32 %v3216_v52, %v3220_v35  ;;  %v3222_v36 = vpop.f32.mrb[95].mxu0 }
 0x28d   : > { %4287 = vmatprep.subr.bf16.mxu1 %v965_v1  ;;  %5856 = vmatmul.mubr.msk.bf16.gmra.mrb[164].mxu0 %vm1999_vm3, %v7971_v37  ;;  %v3269_v32 = vpop.f32.mrb[92].mxu1  ;;  %v4801_v38 = vmax.f32 %v3218_v59, %v3222_v36 }
 0x28e   : > { %4288 = vmatpush1.bf16.msra.mxu1 %v964_v42  ;;  %v1256_v11 = vpop.permute.xlu1 %1255  ;;  %4264 = vmatprep.mubr.bf16.mxu0 %v8670_v0  ;;  %v3271_v10 = vpop.f32.mrb[93].mxu1  ;;  %v7976_v56 = vmax.f32 %v4700_v25, %v4800_v5 }
 0x28f   : > { %v1254_v15 = vpop.permute.xlu0 %1253  ;;  %v3273_v27 = vpop.f32.mrb[94].mxu1  ;;  %v7978_v61 = vmax.f32 %v4701_v2, %v4801_v38 }
 0x290   : > { %v1367_v52 = vsel %vm1281_vm1, %v1252_v43, %v1254_v15  ;;  %v4802_v35 = vmax.f32 %v3269_v32, %v3273_v27  ;;  %v3275_v1 = vpop.f32.mrb[95].mxu1  ;;  %v1368_v50 = vsel %vm1281_vm1, %v1254_v15, %v1256_v11 }
 0x291   : > { %4236 = vmatprep.subr.bf16.mxu0 %v1367_v52  ;;  %5858 = vmatmul.mubr.msk.bf16.gmra.mrb[164].mxu1 %vm1999_vm3, %v7971_v37  ;;  %v4803_v59 = vmax.f32 %v3271_v10, %v3275_v1 }
 0x292   : > { %4237 = vmatpush1.bf16.msra.mxu0 %v1366_v46  ;;  %v1656_v36 = vpop.permute.xlu1 %1655  ;;  %4317 = vmatprep.mubr.bf16.mxu1 %v8670_v0  ;;  %v7986_v25 = vmax.f32 %v4702_v24, %v4802_v35 }
 0x293   : > { %v7988_v2 = vpop.permute.xlu0 %1257  ;;  %v7990_v5 = vmax.f32 %v4703_v7, %v4803_v59  ;;  %v1770_v38 = vsel %vm1685_vm2, %v7940_v9, %v1656_v36 }
 0x294   : > { %v1369_v42 = vsel %vm1281_vm1, %v1256_v11, %v7988_v2 }
 0x295   : > { %8686 = vst [vmem:[#allocation24_spill] sm:$0xff] %v7990_v5  ;;  %4289 = vmatprep.subr.bf16.mxu1 %v1369_v42 }
 0x296   : > { %4290 = vmatpush1.bf16.msra.mxu1 %v1368_v50  ;;  %v1660_v43 = vpop.permute.xlu1 %1659 }
 0x297   : > { %v1658_v32 = vpop.permute.xlu0 %1657 }
 0x298   : > { %v1771_v46 = vsel %vm1685_vm2, %v1656_v36, %v1658_v32  ;;  %v1772_v1 = vsel %vm1685_vm2, %v1658_v32, %v1660_v43 }
 0x299   : > { %4238 = vmatprep.subr.bf16.mxu0 %v1771_v46  ;;  %v3312_v24 = vpop.f32.mrb[96].mxu0 }
 0x29a   : > { %4239 = vmatpush1.bf16.msra.mxu0 %v1770_v38  ;;  %v856_v10 = vpop.permute.xlu1 %855  ;;  %v3314_v7 = vpop.f32.mrb[97].mxu0 }
 0x29b   : > { %v7998_v27 = vpop.permute.xlu0 %1661  ;;  %4338 = vmatprep.subr.bf16.mxu0 %v7637_v26  ;;  %v3316_v52 = vpop.f32.mrb[98].mxu0  ;;  %v966_v38 = vsel %vm877_vm0, %v7962_v62, %v856_v10 }
 0x29c   : > { %v1773_v11 = vsel %vm1685_vm2, %v1660_v43, %v7998_v27  ;;  %v4704_v15 = vmax.f32 %v3312_v24, %v3316_v52  ;;  %v3318_v35 = vpop.f32.mrb[99].mxu0 }
 0x29d   : > { %4291 = vmatprep.subr.bf16.mxu1 %v1773_v11  ;;  %5859 = vmatmul.mubr.msk.bf16.vlgmr.msra.gmra.mrb[168].mxu0 %vm1999_vm3, %v7949_v30  ;;  %v3365_v9 = vpop.f32.mrb[96].mxu1  ;;  %v4705_v59 = vmax.f32 %v3314_v7, %v3318_v35 }
 0x29e   : > { %4292 = vmatpush1.bf16.msra.mxu1 %v1772_v1  ;;  %4339 = vmatpush1.bf16.msra.mxu0 %v7585_v13  ;;  %v860_v36 = vpop.permute.xlu1 %859  ;;  %v3367_v42 = vpop.f32.mrb[97].mxu1 }
 0x29f   : > { %v858_v26 = vpop.permute.xlu0 %857  ;;  %4391 = vmatprep.subr.bf16.mxu1 %v7654_v6  ;;  %4274 = vmatprep.mubr.bf16.mxu0 %v8670_v0  ;;  %v3369_v50 = vpop.f32.mrb[98].mxu1 }
 0x2a0   : > { %v967_v46 = vsel %vm877_vm0, %v856_v10, %v858_v26  ;;  %v4706_v43 = vmax.f32 %v3365_v9, %v3369_v50  ;;  %v3371_v32 = vpop.f32.mrb[99].mxu1  ;;  %v968_v1 = vsel %vm877_vm0, %v858_v26, %v860_v36 }
 0x2a1   : > { %4340 = vmatprep.subr.bf16.mxu0 %v967_v46  ;;  %5861 = vmatmul.mubr.msk.bf16.vlgmr.msra.gmra.mrb[168].mxu1 %vm1999_vm3, %v7949_v30  ;;  %v4707_v13 = vmax.f32 %v3367_v42, %v3371_v32  ;;  %v3322_v24 = vpop.f32.mrb[100].mxu0 }
 0x2a2   : > { %4341 = vmatpush1.bf16.msra.mxu0 %v966_v38  ;;  %4392 = vmatpush1.bf16.msra.mxu1 %v7661_v8  ;;  %v1260_v6 = vpop.permute.xlu1 %1259  ;;  %v3324_v7 = vpop.f32.mrb[101].mxu0 }
 0x2a3   : > { %v8015_v52 = vpop.permute.xlu0 %861  ;;  %4327 = vmatprep.mubr.bf16.mxu1 %v8670_v0  ;;  %v3326_v11 = vpop.f32.mrb[102].mxu0 }
 0x2a4   : > { %v969_v35 = vsel %vm877_vm0, %v860_v36, %v8015_v52  ;;  %v4804_v62 = vmax.f32 %v3322_v24, %v3326_v11  ;;  %v3328_v10 = vpop.f32.mrb[103].mxu0  ;;  %v1370_v11 = vsel %vm1281_vm1, %v7988_v2, %v1260_v6 }
 0x2a5   : > { %4393 = vmatprep.subr.bf16.mxu1 %v969_v35  ;;  %5860 = vmatmul.mubr.msk.bf16.gmra.mrb[172].mxu0 %vm1999_vm3, %v7971_v37  ;;  %v3375_v9 = vpop.f32.mrb[100].mxu1  ;;  %v4805_v8 = vmax.f32 %v3324_v7, %v3328_v10 }
 0x2a6   : > { %4394 = vmatpush1.bf16.msra.mxu1 %v968_v1  ;;  %v1264_v42 = vpop.permute.xlu1 %1263  ;;  %4370 = vmatprep.mubr.bf16.mxu0 %v8670_v0  ;;  %v3377_v50 = vpop.f32.mrb[101].mxu1  ;;  %v8024_v46 = vmax.f32 %v4704_v15, %v4804_v62 }
 0x2a7   : > { %v1262_v32 = vpop.permute.xlu0 %1261  ;;  %v3379_v38 = vpop.f32.mrb[102].mxu1  ;;  %v8026_v5 = vmax.f32 %v4705_v59, %v4805_v8 }
 0x2a8   : > { %v1371_v24 = vsel %vm1281_vm1, %v1260_v6, %v1262_v32  ;;  %v4806_v36 = vmax.f32 %v3375_v9, %v3379_v38  ;;  %v3381_v26 = vpop.f32.mrb[103].mxu1  ;;  %v1372_v2 = vsel %vm1281_vm1, %v1262_v32, %v1264_v42 }
 0x2a9   : > { %4342 = vmatprep.subr.bf16.mxu0 %v1371_v24  ;;  %5862 = vmatmul.mubr.msk.bf16.gmra.mrb[172].mxu1 %vm1999_vm3, %v7971_v37  ;;  %v4807_v7 = vmax.f32 %v3377_v50, %v3381_v26 }
 0x2aa   : > { %4343 = vmatpush1.bf16.msra.mxu0 %v1370_v11  ;;  %v1664_v35 = vpop.permute.xlu1 %1663  ;;  %4423 = vmatprep.mubr.bf16.mxu1 %v8670_v0  ;;  %v8034_v15 = vmax.f32 %v4706_v43, %v4806_v36 }
 0x2ab   : > { %v8036_v59 = vpop.permute.xlu0 %1265  ;;  %v8038_v62 = vmax.f32 %v4707_v13, %v4807_v7  ;;  %v1774_v8 = vsel %vm1685_vm2, %v7998_v27, %v1664_v35 }
 0x2ac   : > { %v1373_v10 = vsel %vm1281_vm1, %v1264_v42, %v8036_v59 }
 0x2ad   : > { %4395 = vmatprep.subr.bf16.mxu1 %v1373_v10 }
 0x2ae   : > { %4396 = vmatpush1.bf16.msra.mxu1 %v1372_v2  ;;  %v1668_v6 = vpop.permute.xlu1 %1667 }
 0x2af   : > { %v1666_v1 = vpop.permute.xlu0 %1665 }
 0x2b0   : > { %v1775_v9 = vsel %vm1685_vm2, %v1664_v35, %v1666_v1  ;;  %v1776_v26 = vsel %vm1685_vm2, %v1666_v1, %v1668_v6 }
 0x2b1   : > { %4344 = vmatprep.subr.bf16.mxu0 %v1775_v9  ;;  %v3418_v43 = vpop.f32.mrb[104].mxu0 }
 0x2b2   : > { %4345 = vmatpush1.bf16.msra.mxu0 %v1774_v8  ;;  %v864_v50 = vpop.permute.xlu1 %863  ;;  %v3420_v13 = vpop.f32.mrb[105].mxu0 }
 0x2b3   : > { %v8046_v38 = vpop.permute.xlu0 %1669  ;;  %4444 = vmatprep.subr.bf16.mxu0 %v7728_v55  ;;  %v3422_v24 = vpop.f32.mrb[106].mxu0  ;;  %v970_v9 = vsel %vm877_vm0, %v8015_v52, %v864_v50 }
 0x2b4   : > { %v1777_v42 = vsel %vm1685_vm2, %v1668_v6, %v8046_v38  ;;  %v4708_v32 = vmax.f32 %v3418_v43, %v3422_v24  ;;  %v3424_v36 = vpop.f32.mrb[107].mxu0 }
 0x2b5   : > { %4397 = vmatprep.subr.bf16.mxu1 %v1777_v42  ;;  %5863 = vmatmul.mubr.msk.bf16.vlgmr.msra.gmra.mrb[176].mxu0 %vm1999_vm3, %v7949_v30  ;;  %v3471_v27 = vpop.f32.mrb[104].mxu1  ;;  %v4709_v11 = vmax.f32 %v3420_v13, %v3424_v36 }
 0x2b6   : > { %4398 = vmatpush1.bf16.msra.mxu1 %v1776_v26  ;;  %4445 = vmatpush1.bf16.msra.mxu0 %v7678_v16  ;;  %v868_v7 = vpop.permute.xlu1 %867  ;;  %v3473_v35 = vpop.f32.mrb[105].mxu1 }
 0x2b7   : > { %v866_v55 = vpop.permute.xlu0 %865  ;;  %4497 = vmatprep.subr.bf16.mxu1 %v7744_v63  ;;  %4380 = vmatprep.mubr.bf16.mxu0 %v8670_v0  ;;  %v3475_v10 = vpop.f32.mrb[106].mxu1 }
 0x2b8   : > { %v971_v2 = vsel %vm877_vm0, %v864_v50, %v866_v55  ;;  %v4710_v6 = vmax.f32 %v3471_v27, %v3475_v10  ;;  %v3477_v1 = vpop.f32.mrb[107].mxu1  ;;  %v972_v36 = vsel %vm877_vm0, %v866_v55, %v868_v7 }
 0x2b9   : > { %5865 = vmatmul.mubr.msk.bf16.vlgmr.msra.gmra.mrb[176].mxu1 %vm1999_vm3, %v7949_v30  ;;  %4446 = vmatprep.subr.bf16.mxu0 %v971_v2  ;;  %v4711_v16 = vmax.f32 %v3473_v35, %v3477_v1  ;;  %v3428_v8 = vpop.f32.mrb[108].mxu0 }
 0x2ba   : > { %4447 = vmatpush1.bf16.msra.mxu0 %v970_v9  ;;  %4498 = vmatpush1.bf16.msra.mxu1 %v7751_v47  ;;  %v1268_v63 = vpop.permute.xlu1 %1267  ;;  %v3430_v43 = vpop.f32.mrb[109].mxu0 }
 0x2bb   : > { %v8063_v13 = vpop.permute.xlu0 %869  ;;  %4433 = vmatprep.mubr.bf16.mxu1 %v8670_v0  ;;  %v3432_v24 = vpop.f32.mrb[110].mxu0 }
 0x2bc   : > { %v973_v42 = vsel %vm877_vm0, %v868_v7, %v8063_v13  ;;  %v4808_v52 = vmax.f32 %v3428_v8, %v3432_v24  ;;  %v3434_v50 = vpop.f32.mrb[111].mxu0  ;;  %v1374_v24 = vsel %vm1281_vm1, %v8036_v59, %v1268_v63 }
 0x2bd   : > { %4499 = vmatprep.subr.bf16.mxu1 %v973_v42  ;;  %5864 = vmatmul.mubr.msk.bf16.gmra.mrb[180].mxu0 %vm1999_vm3, %v7971_v37  ;;  %v3481_v26 = vpop.f32.mrb[108].mxu1  ;;  %v4809_v47 = vmax.f32 %v3430_v43, %v3434_v50 }
 0x2be   : > { %4500 = vmatpush1.bf16.msra.mxu1 %v972_v36  ;;  %v1272_v27 = vpop.permute.xlu1 %1271  ;;  %4476 = vmatprep.mubr.bf16.mxu0 %v8670_v0  ;;  %v3483_v35 = vpop.f32.mrb[109].mxu1  ;;  %v8072_v10 = vmax.f32 %v4708_v32, %v4808_v52 }
 0x2bf   : > { %v1270_v2 = vpop.permute.xlu0 %1269  ;;  %v3485_v1 = vpop.f32.mrb[110].mxu1  ;;  %v8074_v9 = vmax.f32 %v4709_v11, %v4809_v47 }
 0x2c0   : > { %8687 = vst [vmem:[#allocation25_spill] sm:$0xff] %v8072_v10  ;;  %v1375_v8 = vsel %vm1281_vm1, %v1268_v63, %v1270_v2  ;;  %v4810_v7 = vmax.f32 %v3481_v26, %v3485_v1  ;;  %v3487_v55 = vpop.f32.mrb[111].mxu1  ;;  %v1376_v36 = vsel %vm1281_vm1, %v1270_v2, %v1272_v27 }
 0x2c1   : > { %8688 = vst [vmem:[#allocation26_spill] sm:$0xff] %v8074_v9  ;;  %5866 = vmatmul.mubr.msk.bf16.gmra.mrb[180].mxu1 %vm1999_vm3, %v7971_v37  ;;  %4448 = vmatprep.subr.bf16.mxu0 %v1375_v8  ;;  %v4811_v43 = vmax.f32 %v3483_v35, %v3487_v55 }
 0x2c2   : > { %4449 = vmatpush1.bf16.msra.mxu0 %v1374_v24  ;;  %v1672_v42 = vpop.permute.xlu1 %1671  ;;  %4529 = vmatprep.mubr.bf16.mxu1 %v8670_v0  ;;  %v8082_v32 = vmax.f32 %v4710_v6, %v4810_v7 }
 0x2c3   : > { %v1274_v11 = vpop.permute.xlu0 %1273  ;;  %v8084_v52 = vmax.f32 %v4711_v16, %v4811_v43  ;;  %v1778_v47 = vsel %vm1685_vm2, %v8046_v38, %v1672_v42 }
 0x2c4   : > { %8689 = vst [vmem:[#allocation27_spill] sm:$0xff] %v8082_v32  ;;  %v1377_v50 = vsel %vm1281_vm1, %v1272_v27, %v1274_v11 }
 0x2c5   : > { %8690 = vst [vmem:[#allocation28_spill] sm:$0xff] %v8084_v52  ;;  %4501 = vmatprep.subr.bf16.mxu1 %v1377_v50 }
 0x2c6   : > { %4502 = vmatpush1.bf16.msra.mxu1 %v1376_v36  ;;  %v1676_v59 = vpop.permute.xlu1 %1675 }
 0x2c7   : > { %v1674_v63 = vpop.permute.xlu0 %1673 }
 0x2c8   : > { %v1779_v26 = vsel %vm1685_vm2, %v1672_v42, %v1674_v63  ;;  %v1780_v55 = vsel %vm1685_vm2, %v1674_v63, %v1676_v59 }
 0x2c9   : > { %4450 = vmatprep.subr.bf16.mxu0 %v1779_v26  ;;  %v3524_v35 = vpop.f32.mrb[112].mxu0 }
 0x2ca   : > { %4451 = vmatpush1.bf16.msra.mxu0 %v1778_v47  ;;  %v872_v6 = vpop.permute.xlu1 %871  ;;  %v3526_v1 = vpop.f32.mrb[113].mxu0 }
 0x2cb   : > { %v8091_v16 = vpop.permute.xlu0 %1677  ;;  %4550 = vmatprep.subr.bf16.mxu0 %v7816_v40  ;;  %v3528_v8 = vpop.f32.mrb[114].mxu0  ;;  %v974_v26 = vsel %vm877_vm0, %v8063_v13, %v872_v6 }
 0x2cc   : > { %v1781_v27 = vsel %vm1685_vm2, %v1676_v59, %v8091_v16  ;;  %v4712_v2 = vmax.f32 %v3524_v35, %v3528_v8  ;;  %v3530_v7 = vpop.f32.mrb[115].mxu0 }
 0x2cd   : > { %5867 = vmatmul.mubr.msk.bf16.vlgmr.msra.gmra.mrb[184].mxu0 %vm1999_vm3, %v7949_v30  ;;  %4503 = vmatprep.subr.bf16.mxu1 %v1781_v27  ;;  %v3577_v38 = vpop.f32.mrb[112].mxu1  ;;  %v4713_v24 = vmax.f32 %v3526_v1, %v3530_v7 }
 0x2ce   : > { %4504 = vmatpush1.bf16.msra.mxu1 %v1780_v55  ;;  %4551 = vmatpush1.bf16.msra.mxu0 %v7768_v57  ;;  %v876_v43 = vpop.permute.xlu1 %875  ;;  %v3579_v42 = vpop.f32.mrb[113].mxu1 }
 0x2cf   : > { %v874_v40 = vpop.permute.xlu0 %873  ;;  %4603 = vmatprep.subr.bf16.mxu1 %v7829_v41  ;;  %4486 = vmatprep.mubr.bf16.mxu0 %v8670_v0  ;;  %v3581_v50 = vpop.f32.mrb[114].mxu1  ;;  %v1079_v35 = vsel %vm877_vm0, %v876_v43, %v6387_v31 }
 0x2d0   : > { %v975_v36 = vsel %vm877_vm0, %v872_v6, %v874_v40  ;;  %v4714_v59 = vmax.f32 %v3577_v38, %v3581_v50  ;;  %v3583_v63 = vpop.f32.mrb[115].mxu1  ;;  %v976_v38 = vsel %vm877_vm0, %v874_v40, %v876_v43 }
 0x2d1   : > { %5869 = vmatmul.mubr.msk.bf16.vlgmr.msra.gmra.mrb[184].mxu1 %vm1999_vm3, %v7949_v30  ;;  %4552 = vmatprep.subr.bf16.mxu0 %v975_v36  ;;  %v4715_v57 = vmax.f32 %v3579_v42, %v3583_v63  ;;  %v3534_v47 = vpop.f32.mrb[116].mxu0 }
 0x2d2   : > { %4553 = vmatpush1.bf16.msra.mxu0 %v974_v26  ;;  %4604 = vmatpush1.bf16.msra.mxu1 %v7835_v58  ;;  %v1278_v41 = vpop.permute.xlu1 %1277  ;;  %v3536_v1 = vpop.f32.mrb[117].mxu0 }
 0x2d3   : > { %4605 = vmatprep.subr.bf16.mxu1 %v1079_v35  ;;  %v1276_v8 = vpop.permute.xlu0 %1275  ;;  %4539 = vmatprep.mubr.bf16.mxu1 %v8670_v0  ;;  %v3538_v27 = vpop.f32.mrb[118].mxu0 }
 0x2d4   : > { %v1378_v13 = vsel %vm1281_vm1, %v1274_v11, %v1276_v8  ;;  %v1379_v6 = vsel %vm1281_vm1, %v1276_v8, %v1278_v41  ;;  %v4812_v7 = vmax.f32 %v3534_v47, %v3538_v27  ;;  %v3540_v55 = vpop.f32.mrb[119].mxu0 }
 0x2d5   : > { %5868 = vmatmul.mubr.msk.bf16.gmra.mrb[188].mxu0 %vm1999_vm3, %v7971_v37  ;;  %4554 = vmatprep.subr.bf16.mxu0 %v1379_v6  ;;  %v3587_v58 = vpop.f32.mrb[116].mxu1  ;;  %v4813_v31 = vmax.f32 %v3536_v1, %v3540_v55 }
 0x2d6   : > { %4555 = vmatpush1.bf16.msra.mxu0 %v1378_v13  ;;  %4606 = vmatpush1.bf16.msra.mxu1 %v976_v38  ;;  %v1680_v42 = vpop.permute.xlu1 %1679  ;;  %v3589_v50 = vpop.f32.mrb[117].mxu1  ;;  %v8116_v36 = vmax.f32 %v4712_v2, %v4812_v7 }
 0x2d7   : > { %v1280_v63 = vpop.permute.xlu0 %1279  ;;  %4582 = vmatprep.mubr.bf16.mxu0 %v8670_v0  ;;  %v3591_v11 = vpop.f32.mrb[118].mxu1  ;;  %v8119_v26 = vmax.f32 %v4713_v24, %v4813_v31  ;;  %v1782_v6 = vsel %vm1685_vm2, %v8091_v16, %v1680_v42  ;;  %v8714_v16 = vld [vmem:[#allocation2_spill] sm:$0xff] }
 0x2d8   : > { %8691 = vst [vmem:[#allocation29_spill] sm:$0xff] %v8116_v36  ;;  %v1380_v43 = vsel %vm1281_vm1, %v1278_v41, %v1280_v63  ;;  %v1483_v40 = vsel %vm1281_vm1, %v1280_v63, %v6409_v39  ;;  %v4814_v47 = vmax.f32 %v3587_v58, %v3591_v11  ;;  %v3593_v35 = vpop.f32.mrb[119].mxu1 }
 0x2d9   : > { %8692 = vst [vmem:[#allocation30_spill] sm:$0xff] %v8119_v26  ;;  %5870 = vmatmul.mubr.msk.bf16.gmra.mrb[188].mxu1 %vm1999_vm3, %v7971_v37  ;;  %4607 = vmatprep.subr.bf16.mxu1 %v1483_v40  ;;  %v4815_v1 = vmax.f32 %v3589_v50, %v3593_v35  ;;  %v8715_v40 = vld [vmem:[#allocation4_spill] sm:$0xff] }
 0x2da   : > { %4608 = vmatpush1.bf16.msra.mxu1 %v1380_v43  ;;  %v1684_v2 = vpop.permute.xlu1 %1683  ;;  %4635 = vmatprep.mubr.bf16.mxu1 %v8670_v0  ;;  %v8127_v8 = vmax.f32 %v4714_v59, %v4814_v47 }
 0x2db   : > { %v1682_v24 = vpop.permute.xlu0 %1681  ;;  %v1887_v41 = vsel %vm1685_vm2, %v1684_v2, %v6441_v53  ;;  %v8131_v27 = vmax.f32 %v4715_v57, %v4815_v1 }
 0x2dc   : > { %8693 = vst [vmem:[#allocation31_spill] sm:$0xff] %v8127_v8  ;;  %v1784_v39 = vsel %vm1685_vm2, %v1682_v24, %v1684_v2  ;;  %v1783_v13 = vsel %vm1685_vm2, %v1680_v42, %v1682_v24  ;;  %4609 = vmatprep.subr.bf16.mxu1 %v1887_v41 }
 0x2dd   : > { %8694 = vst [vmem:[#allocation32_spill] sm:$0xff] %v8131_v27  ;;  %4556 = vmatprep.subr.bf16.mxu0 %v1783_v13  ;;  %v8716_v13 = vld [vmem:[#allocation5_spill] sm:$0xff]  ;;  %v8734_v27 = vld [vmem:[#allocation23_spill] sm:$0xff] }
 0x2de   : > { %4557 = vmatpush1.bf16.msra.mxu0 %v1782_v6  ;;  %4610 = vmatpush1.bf16.msra.mxu1 %v1784_v39  ;;  %v8717_v39 = vld [vmem:[#allocation7_spill] sm:$0xff] }
 0x2e1   : > { %5871 = vmatmul.mubr.msk.bf16.vlgmr.msra.gmra.mrb[192].mxu0 %vm1999_vm3, %v7949_v30  ;;  %5873 = vmatmul.mubr.msk.bf16.vlgmr.msra.gmra.mrb[192].mxu1 %vm1999_vm3, %v7949_v30  ;;  %v8141_v53 = vpop.f32.mrb[120].mxu0 }
 0x2e2   : > { %8695 = vst [vmem:[#allocation33_spill] sm:$0xff] %v8141_v53  ;;  %4592 = vmatprep.mubr.bf16.mxu0 %v8670_v0  ;;  %4645 = vmatprep.mubr.bf16.mxu1 %v8670_v0  ;;  %v8145_v59 = vpop.f32.mrb[121].mxu0  ;;  %v8713_v0 = vld [vmem:[#allocation3_spill] sm:$0xff]  ;;  %v8731_v53 = vld [vmem:[#allocation20_spill] sm:$0xff] }
 0x2e3   : > { %8696 = vst [vmem:[#allocation34_spill] sm:$0xff] %v8145_v59  ;;  %v8147_v57 = vpop.f32.mrb[122].mxu0  ;;  %v8721_v59 = vld [vmem:[#allocation10_spill] sm:$0xff] }
 0x2e4   : > { %8697 = vst [vmem:[#allocation35_spill] sm:$0xff] %v8147_v57  ;;  %v8151_v7 = vpop.f32.mrb[123].mxu0  ;;  %v8730_v57 = vld [vmem:[#allocation19_spill] sm:$0xff] }
 0x2e5   : > { %8698 = vst [vmem:[#allocation36_spill] sm:$0xff] %v8151_v7  ;;  %v8153_v55 = vpop.f32.mrb[120].mxu1  ;;  %v8720_v7 = vld [vmem:[#allocation9_spill] sm:$0xff] }
 0x2e6   : > { %8699 = vst [vmem:[#allocation37_spill] sm:$0xff] %v8153_v55  ;;  %v8157_v38 = vpop.f32.mrb[121].mxu1  ;;  %v8723_v55 = vld [vmem:[#allocation12_spill] sm:$0xff] }
 0x2e7   : > { %8700 = vst [vmem:[#allocation38_spill] sm:$0xff] %v8157_v38  ;;  %v8159_v58 = vpop.f32.mrb[122].mxu1  ;;  %v8719_v38 = vld [vmem:[#allocation8_spill] sm:$0xff] }
 0x2e8   : > { %8701 = vst [vmem:[#allocation39_spill] sm:$0xff] %v8159_v58  ;;  %v8163_v31 = vpop.f32.mrb[123].mxu1  ;;  %v8722_v58 = vld [vmem:[#allocation11_spill] sm:$0xff] }
 0x2e9   : > { %8702 = vst [vmem:[#allocation40_spill] sm:$0xff] %v8163_v31  ;;  %5872 = vmatmul.mubr.msk.bf16.gmra.mrb[196].mxu0 %vm1999_vm3, %v7971_v37  ;;  %5874 = vmatmul.mubr.msk.bf16.gmra.mrb[196].mxu1 %vm1999_vm3, %v7971_v37  ;;  %v8171_v50 = vpop.f32.mrb[124].mxu0  ;;  %v8718_v31 = vld [vmem:[#allocation6_spill] sm:$0xff] }
 0x2ea   : > { %8703 = vst [vmem:[#allocation41_spill] sm:$0xff] %v8171_v50  ;;  %v8173_v63 = vpop.f32.mrb[125].mxu0  ;;  %v8733_v50 = vld [vmem:[#allocation22_spill] sm:$0xff] }
 0x2eb   : > { %8704 = vst [vmem:[#allocation42_spill] sm:$0xff] %v8173_v63  ;;  %v8175_v11 = vpop.f32.mrb[126].mxu0  ;;  %v8726_v63 = vld [vmem:[#allocation15_spill] sm:$0xff] }
 0x2ec   : > { %8705 = vst [vmem:[#allocation43_spill] sm:$0xff] %v8175_v11  ;;  %v8177_v43 = vpop.permute.xlu0 %4958  ;;  %v8181_v47 = vpop.f32.mrb[127].mxu0  ;;  %v8732_v11 = vld [vmem:[#allocation21_spill] sm:$0xff] }
 0x2ed   : > { %8706 = vst [vmem:[#allocation44_spill] sm:$0xff] %v8177_v43  ;;  %8707 = vst [vmem:[#allocation45_spill] sm:$0xff] %v8181_v47  ;;  %v8185_v35 = vadd.f32 %v8177_v43, %v8024_v46  ;;  %v8189_v37 = vadd.f32 %v8177_v43, %v8034_v15  ;;  %v8193_v1 = vadd.f32 %v8177_v43, %v7226_v54  ;;  %v8199_v24 = vpop.f32.mrb[124].mxu1  ;;  %v8727_v47 = vld [vmem:[#allocation16_spill] sm:$0xff] }
 0x2ee   : > { %v8197_v2 = vadd.f32 %v8177_v43, %v7241_v20  ;;  %8709 = vst [vmem:[#allocation47_spill] sm:$0xff] %v8199_v24  ;;  %v8203_v41 = vadd.f32 %v8177_v43, %v7232_v19  ;;  %v8207_v46 = vadd.f32 %v8177_v43, %v7236_v49  ;;  %v8211_v15 = vadd.f32 %v8177_v43, %v7281_v44  ;;  %v8217_v20 = vpop.f32.mrb[125].mxu1  ;;  %v8728_v24 = vld [vmem:[#allocation17_spill] sm:$0xff] }
 0x2ef   : > { %8708 = vst [vmem:[#allocation46_spill] sm:$0xff] %v8189_v37  ;;  %v8215_v54 = vadd.f32 %v8177_v43, %v7299_v18  ;;  %8710 = vst [vmem:[#allocation48_spill] sm:$0xff] %v8217_v20  ;;  %v8223_v19 = vadd.f32 %v8177_v43, %v7288_v29  ;;  %v8227_v49 = vadd.f32 %v8177_v43, %v7297_v33  ;;  %v8229_v44 = vpop.f32.mrb[126].mxu1  ;;  %v8724_v20 = vld [vmem:[#allocation13_spill] sm:$0xff]  ;;  %v8735_v37 = vld [vmem:[#allocation24_spill] sm:$0xff] }
 0x2f0   : > { %8711 = vst [vmem:[#allocation49_spill] sm:$0xff] %v8229_v44  ;;  %v8233_v18 = vadd.f32 %v8177_v43, %v7337_v60  ;;  %v8237_v6 = vadd.f32 %v8177_v43, %v7350_v21  ;;  %v8241_v42 = vadd.f32 %v8177_v43, %v7339_v4  ;;  %v8245_v29 = vadd.f32 %v8177_v43, %v7345_v45  ;;  %v8247_v33 = vpop.f32.mrb[127].mxu1  ;;  %v8729_v44 = vld [vmem:[#allocation18_spill] sm:$0xff] }
 0x2f1   : > { %8712 = vst [vmem:[#allocation50_spill] sm:$0xff] %v8247_v33  ;;  %v8251_v30 = vadd.f32 %v8177_v43, %v7402_v23  ;;  %v8255_v60 = vadd.f32 %v8177_v43, %v7417_v3  ;;  %v8259_v21 = vadd.f32 %v8177_v43, %v7408_v48  ;;  %v8263_v4 = vadd.f32 %v8177_v43, %v7412_v12  ;;  %v8725_v33 = vld [vmem:[#allocation14_spill] sm:$0xff] }
 0x2f2   : > { %v8267_v45 = vadd.f32 %v8177_v43, %v7462_v17  ;;  %v8271_v23 = vadd.f32 %v8177_v43, %v8713_v0  ;;  %v8275_v3 = vadd.f32 %v8177_v43, %v8714_v16  ;;  %v8279_v48 = vadd.f32 %v8177_v43, %v8715_v40 }
 0x2f3   : > { %v8283_v12 = vadd.f32 %v8177_v43, %v8716_v13  ;;  %v8287_v17 = vadd.f32 %v8177_v43, %v8717_v39  ;;  %v8291_v0 = vadd.f32 %v8177_v43, %v8718_v31  ;;  %v8295_v16 = vadd.f32 %v8177_v43, %v8719_v38 }
 0x2f4   : > { %v8299_v40 = vadd.f32 %v8177_v43, %v8720_v7  ;;  %v8303_v13 = vadd.f32 %v8177_v43, %v8721_v59  ;;  %v8307_v39 = vadd.f32 %v8177_v43, %v8722_v58  ;;  %v8311_v31 = vadd.f32 %v8177_v43, %v8723_v55 }
 0x2f5   : > { %v8315_v38 = vadd.f32 %v8177_v43, %v8724_v20  ;;  %v8319_v7 = vadd.f32 %v8177_v43, %v8725_v33  ;;  %v8323_v59 = vadd.f32 %v8177_v43, %v8726_v63  ;;  %v8327_v58 = vadd.f32 %v8177_v43, %v8727_v47 }
 0x2f6   : > { %v8331_v55 = vadd.f32 %v8177_v43, %v8728_v24  ;;  %v8335_v20 = vadd.f32 %v8177_v43, %v8729_v44  ;;  %v8339_v33 = vadd.f32 %v8177_v43, %v8730_v57  ;;  %v8343_v63 = vadd.f32 %v8177_v43, %v8731_v53 }
 0x2f7   : > { %v8347_v47 = vadd.f32 %v8177_v43, %v7854_v22  ;;  %v8351_v24 = vadd.f32 %v8177_v43, %v7857_v28  ;;  %v8355_v44 = vadd.f32 %v8177_v43, %v8732_v11  ;;  %v8359_v57 = vadd.f32 %v8177_v43, %v8733_v50 }
 0x2f8   : > { %v8363_v53 = vadd.f32 %v8177_v43, %v7917_v51  ;;  %v8367_v22 = vadd.f32 %v8177_v43, %v7920_v34  ;;  %v8371_v28 = vadd.f32 %v8177_v43, %v7928_v14  ;;  %v8375_v11 = vadd.f32 %v8177_v43, %v8734_v27 }
 0x2f9   : > { %v8379_v50 = vadd.f32 %v8177_v43, %v7976_v56  ;;  %v8383_v51 = vadd.f32 %v8177_v43, %v7978_v61  ;;  %v8387_v34 = vadd.f32 %v8177_v43, %v7986_v25  ;;  %v8391_v14 = vadd.f32 %v8177_v43, %v8735_v37  ;;  %v8393_v26 = vpop.f32.mrb[128].mxu0 }
 0x2fa   : > { %8736 = vst [vmem:[#allocation3_spill] sm:$0xff] %v8393_v26  ;;  %v8397_v27 = vadd.f32 %v8177_v43, %v8026_v5  ;;  %v5062_v8 = vmax.f32 %v8197_v2, 0.0  ;;  %v5063_v61 = vmax.f32 %v8203_v41, 0.0  ;;  %v8402_v36 = vpop.f32.mrb[129].mxu0  ;;  %v5064_v25 = vmax.f32 %v8207_v46, 0.0 }
 0x2fb   : > { %8737 = vst [vmem:[#allocation2_spill] sm:$0xff] %v8402_v36  ;;  %v5065_v52 = vmax.f32 %v8211_v15, 0.0  ;;  %v5066_v37 = vmax.f32 %v8215_v54, 0.0  ;;  %v5067_v26 = vmax.f32 %v8223_v19, 0.0  ;;  %v8408_v9 = vpop.f32.mrb[130].mxu0  ;;  %v5068_v5 = vmax.f32 %v8227_v49, 0.0 }
 0x2fc   : > { %8738 = vst [vmem:[#allocation4_spill] sm:$0xff] %v8408_v9  ;;  %v5069_v56 = vmax.f32 %v8233_v18, 0.0  ;;  %v5070_v2 = vmax.f32 %v8237_v6, 0.0  ;;  %v5071_v41 = vmax.f32 %v8241_v42, 0.0  ;;  %v8414_v32 = vpop.f32.mrb[131].mxu0  ;;  %v5072_v46 = vmax.f32 %v8245_v29, 0.0 }
 0x2fd   : > { %8739 = vst [vmem:[#allocation5_spill] sm:$0xff] %v8414_v32  ;;  %v5073_v15 = vmax.f32 %v8251_v30, 0.0  ;;  %v5074_v54 = vmax.f32 %v8255_v60, 0.0  ;;  %v5075_v19 = vmax.f32 %v8259_v21, 0.0  ;;  %v8420_v36 = vpop.f32.mrb[128].mxu1  ;;  %v5076_v49 = vmax.f32 %v8263_v4, 0.0 }
 0x2fe   : > { %8740 = vst [vmem:[#allocation7_spill] sm:$0xff] %v8420_v36  ;;  %v5077_v18 = vmax.f32 %v8267_v45, 0.0  ;;  %v5078_v6 = vmax.f32 %v8271_v23, 0.0  ;;  %v5079_v42 = vmax.f32 %v8275_v3, 0.0  ;;  %v8426_v32 = vpop.f32.mrb[129].mxu1  ;;  %v5080_v29 = vmax.f32 %v8279_v48, 0.0 }
 0x2ff   : > { %8741 = vst [vmem:[#allocation6_spill] sm:$0xff] %v8426_v32  ;;  %v5081_v30 = vmax.f32 %v8283_v12, 0.0  ;;  %v5082_v60 = vmax.f32 %v8287_v17, 0.0  ;;  %v5083_v21 = vmax.f32 %v8291_v0, 0.0  ;;  %v8432_v36 = vpop.f32.mrb[130].mxu1  ;;  %v5084_v4 = vmax.f32 %v8295_v16, 0.0 }
 0x300   : > { %8742 = vst [vmem:[#allocation8_spill] sm:$0xff] %v8432_v36  ;;  %v5085_v45 = vmax.f32 %v8299_v40, 0.0  ;;  %v5086_v23 = vmax.f32 %v8303_v13, 0.0  ;;  %v5087_v3 = vmax.f32 %v8307_v39, 0.0  ;;  %v8438_v9 = vpop.f32.mrb[131].mxu1  ;;  %v5088_v48 = vmax.f32 %v8311_v31, 0.0 }
 0x301   : > { %8743 = vst [vmem:[#allocation9_spill] sm:$0xff] %v8438_v9  ;;  %v5089_v12 = vmax.f32 %v8315_v38, 0.0  ;;  %v5090_v17 = vmax.f32 %v8319_v7, 0.0  ;;  %v5091_v0 = vmax.f32 %v8323_v59, 0.0  ;;  %v8445_v32 = vpop.f32.mrb[132].mxu0  ;;  %v5092_v16 = vmax.f32 %v8327_v58, 0.0 }
 0x302   : > { %8744 = vst [vmem:[#allocation10_spill] sm:$0xff] %v8445_v32  ;;  %v5093_v40 = vmax.f32 %v8331_v55, 0.0  ;;  %v5094_v13 = vmax.f32 %v8335_v20, 0.0  ;;  %v5095_v39 = vmax.f32 %v8339_v33, 0.0  ;;  %v8451_v9 = vpop.f32.mrb[133].mxu0  ;;  %v5096_v31 = vmax.f32 %v8343_v63, 0.0 }
 0x303   : > { %8745 = vst [vmem:[#allocation11_spill] sm:$0xff] %v8451_v9  ;;  %v5097_v38 = vmax.f32 %v8347_v47, 0.0  ;;  %v5098_v7 = vmax.f32 %v8351_v24, 0.0  ;;  %v5099_v59 = vmax.f32 %v8355_v44, 0.0  ;;  %v8457_v36 = vpop.f32.mrb[134].mxu0  ;;  %v5100_v58 = vmax.f32 %v8359_v57, 0.0 }
 0x304   : > { %8746 = vst [vmem:[#allocation12_spill] sm:$0xff] %v8457_v36  ;;  %v5101_v55 = vmax.f32 %v8363_v53, 0.0  ;;  %v5102_v20 = vmax.f32 %v8367_v22, 0.0  ;;  %v5103_v33 = vmax.f32 %v8371_v28, 0.0  ;;  %v8463_v32 = vpop.f32.mrb[135].mxu0  ;;  %v5104_v63 = vmax.f32 %v8375_v11, 0.0 }
 0x305   : > { %8747 = vst [vmem:[#allocation13_spill] sm:$0xff] %v8463_v32  ;;  %v5105_v47 = vmax.f32 %v8379_v50, 0.0  ;;  %v5106_v24 = vmax.f32 %v8383_v51, 0.0  ;;  %v5107_v44 = vmax.f32 %v8387_v34, 0.0  ;;  %v8474_v57 = vpop.f32.mrb[132].mxu1  ;;  %v5108_v53 = vmax.f32 %v8391_v14, 0.0 }
 0x306   : > { %8748 = vst [vmem:[#allocation14_spill] sm:$0xff] %v8474_v57  ;;  %v5110_v22 = vmax.f32 %v8397_v27, 0.0  ;;  %v8749_v28 = vmax.f32 %v8193_v1, 0.0  ;;  %v5928_v32 = vpack.c.bf16 %v5064_v25, %v5063_v61  ;;  %v8480_v36 = vpop.f32.mrb[133].mxu1  ;;  %v5929_v11 = vpack.c.bf16 %v5066_v37, %v5065_v52 }
 0x307   : > { %v5930_v50 = vpack.c.bf16 %v5068_v5, %v5067_v26  ;;  %v5931_v51 = vpack.c.bf16 %v5070_v2, %v5069_v56  ;;  %v5932_v34 = vpack.c.bf16 %v5072_v46, %v5071_v41  ;;  %v8482_v57 = vpop.f32.mrb[134].mxu1  ;;  %v5933_v10 = vpack.c.bf16 %v5074_v54, %v5073_v15  ;;  %v8751_v54 = vld [vmem:[#allocation44_spill] sm:$0xff] }
 0x308   : > { %v5927_v9 = vpack.c.bf16 %v5062_v8, %v8749_v28  ;;  %v5934_v14 = vpack.c.bf16 %v5076_v49, %v5075_v19  ;;  %v5935_v43 = vpack.c.bf16 %v5078_v6, %v5077_v18  ;;  %v5936_v27 = vpack.c.bf16 %v5080_v29, %v5079_v42  ;;  %5562 = vst [vmem:[%s8468_s16 + $0x8] sm:$0xff] %v5928_v32  ;;  %v8486_v8 = vpop.f32.mrb[135].mxu1  ;;  %v8752_v49 = vld [vmem:[#allocation25_spill] sm:$0xff]  ;;  %v8753_v6 = vld [vmem:[#allocation27_spill] sm:$0xff]  ;;  %v8754_v42 = vld [vmem:[#allocation26_spill] sm:$0xff] }
 0x309   : > { %v5937_v52 = vpack.c.bf16 %v5082_v60, %v5081_v30  ;;  %v5938_v26 = vpack.c.bf16 %v5084_v4, %v5083_v21  ;;  %v5939_v1 = vpack.c.bf16 %v5086_v23, %v5085_v45  ;;  %v5940_v56 = vpack.c.bf16 %v5088_v48, %v5087_v3  ;;  %5563 = vst [vmem:[%s8468_s16 + $0x10] sm:$0xff] %v5929_v11  ;;  %v8755_v30 = vld [vmem:[#allocation28_spill] sm:$0xff]  ;;  %v8756_v21 = vld [vmem:[#allocation29_spill] sm:$0xff]  ;;  %v8757_v45 = vld [vmem:[#allocation31_spill] sm:$0xff] }
 0x30a   : > { %5561 = vst [vmem:[%s8468_s16] sm:$0xff] %v5927_v9  ;;  %5564 = vst [vmem:[%s8468_s16 + $0x18] sm:$0xff] %v5930_v50  ;;  %v5941_v61 = vpack.c.bf16 %v5090_v17, %v5089_v12  ;;  %v5942_v9 = vpack.c.bf16 %v5092_v16, %v5091_v0  ;;  %v5943_v25 = vpack.c.bf16 %v5094_v13, %v5093_v40  ;;  %v8750_v15 = vmax.f32 %v8185_v35, 0.0  ;;  %v8758_v3 = vld [vmem:[#allocation30_spill] sm:$0xff]  ;;  %v8768_v50 = vld [vmem:[#allocation49_spill] sm:$0xff] }
 0x30b   : > { %5565 = vst [vmem:[%s8468_s16 + $0x20] sm:$0xff] %v5931_v51  ;;  %5566 = vst [vmem:[%s8468_s16 + $0x28] sm:$0xff] %v5932_v34  ;;  %v5944_v32 = vpack.c.bf16 %v5096_v31, %v5095_v39  ;;  %v5945_v37 = vpack.c.bf16 %v5098_v7, %v5097_v38  ;;  %v5946_v5 = vpack.c.bf16 %v5100_v58, %v5099_v59  ;;  %v8759_v40 = vld [vmem:[#allocation46_spill] sm:$0xff]  ;;  %v8769_v51 = vld [vmem:[#allocation47_spill] sm:$0xff] }
 0x30c   : > { %5567 = vst [vmem:[%s8468_s16 + $0x30] sm:$0xff] %v5933_v10  ;;  %5568 = vst [vmem:[%s8468_s16 + $0x38] sm:$0xff] %v5934_v14  ;;  %v5947_v2 = vpack.c.bf16 %v5102_v20, %v5101_v55  ;;  %v5948_v41 = vpack.c.bf16 %v5104_v63, %v5103_v33  ;;  %v5949_v46 = vpack.c.bf16 %v5106_v24, %v5105_v47  ;;  %v8760_v13 = vmax.f32 %v8759_v40, 0.0  ;;  %v8761_v55 = vld [vmem:[#allocation32_spill] sm:$0xff]  ;;  %v8762_v33 = vld [vmem:[#allocation41_spill] sm:$0xff] }
 0x30d   : > { %5569 = vst [vmem:[%s8468_s16 + $0x40] sm:$0xff] %v5935_v43  ;;  %5570 = vst [vmem:[%s8468_s16 + $0x48] sm:$0xff] %v5936_v27  ;;  %v5950_v10 = vpack.c.bf16 %v5108_v53, %v5107_v44  ;;  %v5951_v43 = vpack.c.bf16 %v5110_v22, %v8750_v15  ;;  %v5012_v19 = vadd.f32 %v8751_v54, %v8038_v62  ;;  %v8763_v63 = vld [vmem:[#allocation43_spill] sm:$0xff]  ;;  %v8765_v24 = vld [vmem:[#allocation33_spill] sm:$0xff] }
 0x30e   : > { %5571 = vst [vmem:[%s8468_s16 + $0x50] sm:$0xff] %v5937_v52  ;;  %5572 = vst [vmem:[%s8468_s16 + $0x58] sm:$0xff] %v5938_v26  ;;  %v5013_v18 = vadd.f32 %v8751_v54, %v8752_v49  ;;  %v5015_v35 = vadd.f32 %v8751_v54, %v8753_v6  ;;  %v5014_v29 = vadd.f32 %v8751_v54, %v8754_v42  ;;  %v8766_v44 = vld [vmem:[#allocation35_spill] sm:$0xff]  ;;  %v8770_v14 = vld [vmem:[#allocation45_spill] sm:$0xff] }
 0x30f   : > { %5573 = vst [vmem:[%s8468_s16 + $0x60] sm:$0xff] %v5939_v1  ;;  %5574 = vst [vmem:[%s8468_s16 + $0x68] sm:$0xff] %v5940_v56  ;;  %v5016_v60 = vadd.f32 %v8751_v54, %v8755_v30  ;;  %v5112_v62 = vmax.f32 %v5012_v19, 0.0  ;;  %v5017_v4 = vadd.f32 %v8751_v54, %v8756_v21  ;;  %v5019_v23 = vadd.f32 %v8751_v54, %v8757_v45  ;;  %v8771_v27 = vld [vmem:[#allocation42_spill] sm:$0xff]  ;;  %v8773_v1 = vld [vmem:[#allocation48_spill] sm:$0xff] }
 0x310   : > { %5575 = vst [vmem:[%s8468_s16 + $0x70] sm:$0xff] %v5941_v61  ;;  %5576 = vst [vmem:[%s8468_s16 + $0x78] sm:$0xff] %v5942_v9  ;;  %v5018_v48 = vadd.f32 %v8751_v54, %v8758_v3  ;;  %v5113_v12 = vmax.f32 %v5013_v18, 0.0  ;;  %v5115_v17 = vmax.f32 %v5015_v35, 0.0  ;;  %v5114_v0 = vmax.f32 %v5014_v29, 0.0  ;;  %v8772_v26 = vld [vmem:[#allocation50_spill] sm:$0xff] }
 0x311   : > { %5577 = vst [vmem:[%s8468_s16 + $0x80] sm:$0xff] %v5943_v25  ;;  %5578 = vst [vmem:[%s8468_s16 + $0x88] sm:$0xff] %v5944_v32  ;;  %v5116_v16 = vmax.f32 %v5016_v60, 0.0  ;;  %v5952_v39 = vpack.c.bf16 %v5112_v62, %v8760_v13  ;;  %v5117_v31 = vmax.f32 %v5017_v4, 0.0  ;;  %v5119_v38 = vmax.f32 %v5019_v23, 0.0  ;;  %v8539_v28 = vpop.f32.mrb[136].mxu0 }
 0x312   : > { %5579 = vst [vmem:[%s8468_s16 + $0x90] sm:$0xff] %v5945_v37  ;;  %5580 = vst [vmem:[%s8468_s16 + $0x98] sm:$0xff] %v5946_v5  ;;  %v5118_v7 = vmax.f32 %v5018_v48, 0.0  ;;  %v5953_v59 = vpack.c.bf16 %v5114_v0, %v5113_v12  ;;  %v5020_v20 = vadd.f32 %v8751_v54, %v8761_v55  ;;  %v8764_v47 = vmax.f32 %v8762_v33, %v8763_v63  ;;  %v8548_v61 = vpop.f32.mrb[137].mxu0  ;;  %v8774_v32 = vld [vmem:[#allocation4_spill] sm:$0xff]  ;;  %v8775_v37 = vld [vmem:[#allocation3_spill] sm:$0xff] }
 0x313   : > { %5581 = vst [vmem:[%s8468_s16 + $0xa0] sm:$0xff] %v5947_v2  ;;  %5582 = vst [vmem:[%s8468_s16 + $0xa8] sm:$0xff] %v5948_v41  ;;  %v5954_v58 = vpack.c.bf16 %v5116_v16, %v5115_v17  ;;  %v8767_v53 = vmax.f32 %v8765_v24, %v8766_v44  ;;  %v4818_v34 = vmax.f32 %v8769_v51, %v8768_v50  ;;  %v8776_v2 = vld [vmem:[#allocation8_spill] sm:$0xff]  ;;  %v8777_v41 = vld [vmem:[#allocation7_spill] sm:$0xff] }
 0x314   : > { %5583 = vst [vmem:[%s8468_s16 + $0xb0] sm:$0xff] %v5949_v46  ;;  %5584 = vst [vmem:[%s8468_s16 + $0xb8] sm:$0xff] %v5950_v10  ;;  %v5955_v11 = vpack.c.bf16 %v5118_v7, %v5117_v31  ;;  %v4817_v52 = vmax.f32 %v8771_v27, %v8770_v14  ;;  %v4819_v56 = vmax.f32 %v8773_v1, %v8772_v26  ;;  %v5120_v9 = vmax.f32 %v5020_v20, 0.0  ;;  %v3846_v10 = vpop.f32.mrb[138].mxu0  ;;  %v8778_v15 = vld [vmem:[#allocation37_spill] sm:$0xff]  ;;  %v8781_v18 = vld [vmem:[#allocation34_spill] sm:$0xff] }
 0x315   : > { %5585 = vst [vmem:[%s8468_s16 + $0xc0] sm:$0xff] %v5951_v43  ;;  %v4916_v22 = vmax.f32 %v8767_v53, %v8764_v47  ;;  %5586 = vst [vmem:[%s8468_s16 + $0xc8] sm:$0xff] %v5952_v39  ;;  %v4720_v5 = vmax.f32 %v8775_v37, %v8774_v32  ;;  %v4722_v46 = vmax.f32 %v8777_v41, %v8776_v2  ;;  %v8779_v43 = vld [vmem:[#allocation39_spill] sm:$0xff]  ;;  %v8782_v6 = vld [vmem:[#allocation36_spill] sm:$0xff]  ;;  %v3848_v23 = vpop.f32.mrb[139].mxu0  ;;  %v3895_v39 = vpop.f32.mrb[136].mxu1 }
 0x316   : > { %5587 = vst [vmem:[%s8468_s16 + $0xd0] sm:$0xff] %v5953_v59  ;;  %5588 = vst [vmem:[%s8468_s16 + $0xd8] sm:$0xff] %v5954_v58  ;;  %v8780_v19 = vmax.f32 %v8778_v15, %v8779_v43  ;;  %v8783_v35 = vmax.f32 %v8781_v18, %v8782_v6  ;;  %v8784_v29 = vld [vmem:[#allocation38_spill] sm:$0xff]  ;;  %v8785_v30 = vld [vmem:[#allocation40_spill] sm:$0xff]  ;;  %v5956_v3 = vpack.c.bf16 %v5120_v9, %v5119_v38  ;;  %v3897_v20 = vpop.f32.mrb[137].mxu1 }
 0x317   : > { %v5021_v25 = vadd.f32 %v8751_v54, %v4916_v22  ;;  %5589 = vst [vmem:[%s8468_s16 + $0xe0] sm:$0xff] %v5955_v11  ;;  %v8786_v60 = vmax.f32 %v8784_v29, %v8785_v30  ;;  %v8787_v21 = vld [vmem:[#allocation5_spill] sm:$0xff]  ;;  %v8788_v4 = vld [vmem:[#allocation2_spill] sm:$0xff]  ;;  %v8791_v16 = vld [vmem:[#allocation12_spill] sm:$0xff]  ;;  %v4823_v24 = vmax.f32 %v8480_v36, %v8486_v8  ;;  %v4724_v44 = vmax.f32 %v8539_v28, %v3846_v10  ;;  %v3899_v53 = vpop.f32.mrb[138].mxu1 }
 0x318   : > { %v4918_v49 = vmax.f32 %v8780_v19, %v4818_v34  ;;  %v4917_v42 = vmax.f32 %v8783_v35, %v4817_v52  ;;  %v4721_v45 = vmax.f32 %v8788_v4, %v8787_v21  ;;  %v8789_v12 = vld [vmem:[#allocation9_spill] sm:$0xff]  ;;  %v8790_v17 = vld [vmem:[#allocation6_spill] sm:$0xff]  ;;  %5590 = vst [vmem:[%s8468_s16 + $0xe8] sm:$0xff] %v5956_v3  ;;  %v8795_v63 = vld [vmem:[#allocation11_spill] sm:$0xff]  ;;  %v3901_v34 = vpop.f32.mrb[139].mxu1  ;;  %v4726_v52 = vmax.f32 %v3895_v39, %v3899_v53 }
 0x319   : > { %v4919_v62 = vmax.f32 %v8786_v60, %v4819_v56  ;;  %v5121_v48 = vmax.f32 %v5021_v25, 0.0  ;;  %v4723_v0 = vmax.f32 %v8790_v17, %v8789_v12  ;;  %v8792_v40 = vld [vmem:[#allocation10_spill] sm:$0xff]  ;;  %v8794_v33 = vld [vmem:[#allocation13_spill] sm:$0xff]  ;;  %v3852_v26 = vpop.f32.mrb[140].mxu0  ;;  %v4725_v8 = vmax.f32 %v8548_v61, %v3848_v23 }
 0x31a   : > { %v4820_v13 = vmax.f32 %v8792_v40, %v8791_v16  ;;  %v5023_v31 = vadd.f32 %v8751_v54, %v4918_v49  ;;  %v5022_v7 = vadd.f32 %v8751_v54, %v4917_v42  ;;  %v8793_v58 = vld [vmem:[#allocation14_spill] sm:$0xff]  ;;  %v4821_v47 = vmax.f32 %v8795_v63, %v8794_v33  ;;  %v3854_v28 = vpop.f32.mrb[141].mxu0 }
 0x31b   : > { %v5024_v59 = vadd.f32 %v8751_v54, %v4919_v62  ;;  %v4822_v55 = vmax.f32 %v8793_v58, %v8482_v57  ;;  %v4923_v27 = vmax.f32 %v4723_v0, %v4823_v24  ;;  %v4727_v37 = vmax.f32 %v3897_v20, %v3901_v34 }
 0x31c   : > { %v4920_v38 = vmax.f32 %v4720_v5, %v4820_v13  ;;  %v5123_v22 = vmax.f32 %v5023_v31, 0.0  ;;  %v5122_v11 = vmax.f32 %v5022_v7, 0.0  ;;  %v4921_v14 = vmax.f32 %v4721_v45, %v4821_v47  ;;  %v3856_v5 = vpop.f32.mrb[142].mxu0 }
 0x31d   : > { %v5124_v50 = vmax.f32 %v5024_v59, 0.0  ;;  %v4922_v51 = vmax.f32 %v4722_v46, %v4822_v55  ;;  %v5028_v32 = vadd.f32 %v8751_v54, %v4923_v27  ;;  %v4824_v41 = vmax.f32 %v3852_v26, %v3856_v5  ;;  %v3858_v46 = vpop.f32.mrb[143].mxu0  ;;  %v3905_v43 = vpop.f32.mrb[140].mxu1 }
 0x31e   : > { %v5025_v57 = vadd.f32 %v8751_v54, %v4920_v38  ;;  %v5957_v1 = vpack.c.bf16 %v5122_v11, %v5121_v48  ;;  %v5026_v25 = vadd.f32 %v8751_v54, %v4921_v14  ;;  %v4825_v19 = vmax.f32 %v3854_v28, %v3858_v46  ;;  %v3907_v61 = vpop.f32.mrb[141].mxu1 }
 0x31f   : > { %v5958_v56 = vpack.c.bf16 %v5124_v50, %v5123_v22  ;;  %v5027_v36 = vadd.f32 %v8751_v54, %v4922_v51  ;;  %v5128_v15 = vmax.f32 %v5028_v32, 0.0  ;;  %v4924_v49 = vmax.f32 %v4724_v44, %v4824_v41  ;;  %v3909_v35 = vpop.f32.mrb[142].mxu1 }
 0x320   : > { %v5125_v9 = vmax.f32 %v5025_v57, 0.0  ;;  %5591 = vst [vmem:[%s8468_s16 + $0xf0] sm:$0xff] %v5957_v1  ;;  %v5126_v10 = vmax.f32 %v5026_v25, 0.0  ;;  %v4925_v42 = vmax.f32 %v4725_v8, %v4825_v19  ;;  %v4826_v30 = vmax.f32 %v3905_v43, %v3909_v35  ;;  %v3911_v60 = vpop.f32.mrb[143].mxu1 }
 0x321   : > { %5592 = vst [vmem:[%s8468_s16 + $0xf8] sm:$0xff] %v5958_v56  ;;  %v5127_v2 = vmax.f32 %v5027_v36, 0.0  ;;  %v5029_v29 = vadd.f32 %v8751_v54, %v4924_v49  ;;  %v4827_v21 = vmax.f32 %v3907_v61, %v3911_v60 }
 0x322   : > { %v5959_v18 = vpack.c.bf16 %v5126_v10, %v5125_v9  ;;  %v5030_v62 = vadd.f32 %v8751_v54, %v4925_v42  ;;  %v4926_v45 = vmax.f32 %v4726_v52, %v4826_v30 }
 0x323   : > { %v5960_v6 = vpack.c.bf16 %v5128_v15, %v5127_v2  ;;  %v5129_v4 = vmax.f32 %v5029_v29, 0.0  ;;  %v4927_v3 = vmax.f32 %v4727_v37, %v4827_v21 }
 0x324   : > { %5593 = vst [vmem:[%s8468_s16 + $0x100] sm:$0xff] %v5959_v18  ;;  %v5130_v23 = vmax.f32 %v5030_v62, 0.0  ;;  %v5031_v48 = vadd.f32 %v8751_v54, %v4926_v45 }
 0x325   : > { %5594 = vst [vmem:[%s8468_s16 + $0x108] sm:$0xff] %v5960_v6  ;;  %v5032_v17 = vadd.f32 %v8751_v54, %v4927_v3 }
 0x326   : > { %v5961_v12 = vpack.c.bf16 %v5130_v23, %v5129_v4  ;;  %v5131_v0 = vmax.f32 %v5031_v48, 0.0 }
 0x327   : > { %v5132_v16 = vmax.f32 %v5032_v17, 0.0 }
 0x328   : > { %5595 = vst [vmem:[%s8468_s16 + $0x110] sm:$0xff] %v5961_v12 }
 0x329   : > { %v5962_v40 = vpack.c.bf16 %v5132_v16, %v5131_v0  ;;  %v3948_v13 = vpop.f32.mrb[144].mxu0 }
 0x32a   : > { %v3950_v39 = vpop.f32.mrb[145].mxu0 }
 0x32b   : > { %5596 = vst [vmem:[%s8468_s16 + $0x118] sm:$0xff] %v5962_v40  ;;  %v3952_v31 = vpop.f32.mrb[146].mxu0 }
 0x32c   : > { %v4728_v7 = vmax.f32 %v3948_v13, %v3952_v31  ;;  %v3954_v59 = vpop.f32.mrb[147].mxu0 }
 0x32d   : > { %v4001_v58 = vpop.f32.mrb[144].mxu1  ;;  %v4729_v55 = vmax.f32 %v3950_v39, %v3954_v59 }
 0x32e   : > { %v4003_v20 = vpop.f32.mrb[145].mxu1 }
 0x32f   : > { %v4005_v38 = vpop.f32.mrb[146].mxu1 }
 0x330   : > { %v4730_v33 = vmax.f32 %v4001_v58, %v4005_v38  ;;  %v4007_v63 = vpop.f32.mrb[147].mxu1 }
 0x331   : > { %v4731_v47 = vmax.f32 %v4003_v20, %v4007_v63  ;;  %v3958_v24 = vpop.f32.mrb[148].mxu0 }
 0x332   : > { %v3960_v44 = vpop.f32.mrb[149].mxu0 }
 0x333   : > { %v3962_v53 = vpop.f32.mrb[150].mxu0 }
 0x334   : > { %v4828_v22 = vmax.f32 %v3958_v24, %v3962_v53  ;;  %v3964_v11 = vpop.f32.mrb[151].mxu0 }
 0x335   : > { %v4011_v50 = vpop.f32.mrb[148].mxu1  ;;  %v4829_v51 = vmax.f32 %v3960_v44, %v3964_v11 }
 0x336   : > { %v4013_v34 = vpop.f32.mrb[149].mxu1  ;;  %v4928_v57 = vmax.f32 %v4728_v7, %v4828_v22 }
 0x337   : > { %v4015_v14 = vpop.f32.mrb[150].mxu1  ;;  %v4929_v27 = vmax.f32 %v4729_v55, %v4829_v51 }
 0x338   : > { %v5033_v52 = vadd.f32 %v8751_v54, %v4928_v57  ;;  %v4830_v26 = vmax.f32 %v4011_v50, %v4015_v14  ;;  %v4017_v1 = vpop.f32.mrb[151].mxu1 }
 0x339   : > { %v5034_v56 = vadd.f32 %v8751_v54, %v4929_v27  ;;  %v4831_v36 = vmax.f32 %v4013_v34, %v4017_v1 }
 0x33a   : > { %v5133_v8 = vmax.f32 %v5033_v52, 0.0  ;;  %v4930_v28 = vmax.f32 %v4730_v33, %v4830_v26 }
 0x33b   : > { %v5134_v9 = vmax.f32 %v5034_v56, 0.0  ;;  %v4931_v25 = vmax.f32 %v4731_v47, %v4831_v36 }
 0x33c   : > { %v5035_v32 = vadd.f32 %v8751_v54, %v4930_v28 }
 0x33d   : > { %v5963_v37 = vpack.c.bf16 %v5134_v9, %v5133_v8  ;;  %v5036_v5 = vadd.f32 %v8751_v54, %v4931_v25 }
 0x33e   : > { %v5135_v2 = vmax.f32 %v5035_v32, 0.0 }
 0x33f   : > { %5597 = vst [vmem:[%s8468_s16 + $0x120] sm:$0xff] %v5963_v37  ;;  %v5136_v41 = vmax.f32 %v5036_v5, 0.0 }
 0x341   : > { %v5964_v46 = vpack.c.bf16 %v5136_v41, %v5135_v2  ;;  %v4054_v10 = vpop.f32.mrb[152].mxu0 }
 0x342   : > { %v4056_v15 = vpop.f32.mrb[153].mxu0 }
 0x343   : > { %5598 = vst [vmem:[%s8468_s16 + $0x128] sm:$0xff] %v5964_v46  ;;  %v4058_v43 = vpop.f32.mrb[154].mxu0 }
 0x344   : > { %v4107_v19 = vpop.f32.mrb[152].mxu1  ;;  %v4732_v61 = vmax.f32 %v4054_v10, %v4058_v43  ;;  %v4060_v49 = vpop.f32.mrb[155].mxu0 }
 0x345   : > { %v4109_v18 = vpop.f32.mrb[153].mxu1  ;;  %v4733_v6 = vmax.f32 %v4056_v15, %v4060_v49 }
 0x346   : > { %v4111_v35 = vpop.f32.mrb[154].mxu1 }
 0x347   : > { %v4734_v42 = vmax.f32 %v4107_v19, %v4111_v35  ;;  %v4113_v29 = vpop.f32.mrb[155].mxu1 }
 0x348   : > { %v4735_v30 = vmax.f32 %v4109_v18, %v4113_v29 }
 0x349   : > { %v4064_v60 = vpop.f32.mrb[156].mxu0 }
 0x34a   : > { %v4066_v62 = vpop.f32.mrb[157].mxu0 }
 0x34b   : > { %v4068_v21 = vpop.f32.mrb[158].mxu0 }
 0x34c   : > { %v4117_v4 = vpop.f32.mrb[156].mxu1  ;;  %v4832_v45 = vmax.f32 %v4064_v60, %v4068_v21  ;;  %v4070_v23 = vpop.f32.mrb[159].mxu0 }
 0x34d   : > { %v4119_v3 = vpop.f32.mrb[157].mxu1  ;;  %v4833_v48 = vmax.f32 %v4066_v62, %v4070_v23 }
 0x34e   : > { %v4932_v12 = vmax.f32 %v4732_v61, %v4832_v45  ;;  %v4121_v17 = vpop.f32.mrb[158].mxu1 }
 0x34f   : > { %v4834_v0 = vmax.f32 %v4117_v4, %v4121_v17  ;;  %v4933_v16 = vmax.f32 %v4733_v6, %v4833_v48  ;;  %v4123_v40 = vpop.f32.mrb[159].mxu1 }
 0x350   : > { %v5037_v13 = vadd.f32 %v8751_v54, %v4932_v12  ;;  %v4835_v39 = vmax.f32 %v4119_v3, %v4123_v40 }
 0x351   : > { %v4934_v31 = vmax.f32 %v4734_v42, %v4834_v0  ;;  %v5038_v7 = vadd.f32 %v8751_v54, %v4933_v16 }
 0x352   : > { %v5137_v59 = vmax.f32 %v5037_v13, 0.0  ;;  %v4935_v58 = vmax.f32 %v4735_v30, %v4835_v39 }
 0x353   : > { %v5039_v55 = vadd.f32 %v8751_v54, %v4934_v31  ;;  %v5138_v20 = vmax.f32 %v5038_v7, 0.0 }
 0x354   : > { %v5040_v38 = vadd.f32 %v8751_v54, %v4935_v58 }
 0x355   : > { %v5139_v33 = vmax.f32 %v5039_v55, 0.0  ;;  %v5965_v63 = vpack.c.bf16 %v5138_v20, %v5137_v59 }
 0x356   : > { %v5140_v47 = vmax.f32 %v5040_v38, 0.0 }
 0x357   : > { %5599 = vst [vmem:[%s8468_s16 + $0x130] sm:$0xff] %v5965_v63 }
 0x358   : > { %v5966_v24 = vpack.c.bf16 %v5140_v47, %v5139_v33  ;;  %v4160_v44 = vpop.f32.mrb[160].mxu0 }
 0x359   : > { %v4162_v53 = vpop.f32.mrb[161].mxu0 }
 0x35a   : > { %5600 = vst [vmem:[%s8468_s16 + $0x138] sm:$0xff] %v5966_v24  ;;  %v4164_v22 = vpop.f32.mrb[162].mxu0 }
 0x35b   : > { %v4736_v11 = vmax.f32 %v4160_v44, %v4164_v22  ;;  %v4166_v50 = vpop.f32.mrb[163].mxu0 }
 0x35c   : > { %v4213_v51 = vpop.f32.mrb[160].mxu1  ;;  %v4737_v34 = vmax.f32 %v4162_v53, %v4166_v50 }
 0x35d   : > { %v4215_v57 = vpop.f32.mrb[161].mxu1 }
 0x35e   : > { %v4217_v14 = vpop.f32.mrb[162].mxu1 }
 0x35f   : > { %v4738_v27 = vmax.f32 %v4213_v51, %v4217_v14  ;;  %v4219_v52 = vpop.f32.mrb[163].mxu1 }
 0x360   : > { %v4739_v26 = vmax.f32 %v4215_v57, %v4219_v52  ;;  %v4170_v1 = vpop.f32.mrb[164].mxu0 }
 0x361   : > { %v4172_v56 = vpop.f32.mrb[165].mxu0 }
 0x362   : > { %v4174_v36 = vpop.f32.mrb[166].mxu0 }
 0x363   : > { %v4836_v8 = vmax.f32 %v4170_v1, %v4174_v36  ;;  %v4176_v28 = vpop.f32.mrb[167].mxu0 }
 0x364   : > { %v4223_v9 = vpop.f32.mrb[164].mxu1  ;;  %v4837_v25 = vmax.f32 %v4172_v56, %v4176_v28 }
 0x365   : > { %v4225_v32 = vpop.f32.mrb[165].mxu1  ;;  %v4936_v37 = vmax.f32 %v4736_v11, %v4836_v8 }
 0x366   : > { %v4227_v5 = vpop.f32.mrb[166].mxu1  ;;  %v4937_v2 = vmax.f32 %v4737_v34, %v4837_v25 }
 0x367   : > { %v5041_v41 = vadd.f32 %v8751_v54, %v4936_v37  ;;  %v4838_v46 = vmax.f32 %v4223_v9, %v4227_v5  ;;  %v4229_v10 = vpop.f32.mrb[167].mxu1 }
 0x368   : > { %v5042_v15 = vadd.f32 %v8751_v54, %v4937_v2  ;;  %v4839_v43 = vmax.f32 %v4225_v32, %v4229_v10 }
 0x369   : > { %v5141_v19 = vmax.f32 %v5041_v41, 0.0  ;;  %v4938_v61 = vmax.f32 %v4738_v27, %v4838_v46 }
 0x36a   : > { %v5142_v49 = vmax.f32 %v5042_v15, 0.0  ;;  %v4939_v18 = vmax.f32 %v4739_v26, %v4839_v43 }
 0x36b   : > { %v5043_v6 = vadd.f32 %v8751_v54, %v4938_v61 }
 0x36c   : > { %v5967_v35 = vpack.c.bf16 %v5142_v49, %v5141_v19  ;;  %v5044_v42 = vadd.f32 %v8751_v54, %v4939_v18 }
 0x36d   : > { %v5143_v29 = vmax.f32 %v5043_v6, 0.0 }
 0x36e   : > { %5601 = vst [vmem:[%s8468_s16 + $0x140] sm:$0xff] %v5967_v35  ;;  %v5144_v30 = vmax.f32 %v5044_v42, 0.0 }
 0x370   : > { %v5968_v60 = vpack.c.bf16 %v5144_v30, %v5143_v29  ;;  %v4266_v62 = vpop.f32.mrb[168].mxu0 }
 0x371   : > { %v4268_v21 = vpop.f32.mrb[169].mxu0 }
 0x372   : > { %5602 = vst [vmem:[%s8468_s16 + $0x148] sm:$0xff] %v5968_v60  ;;  %v4270_v4 = vpop.f32.mrb[170].mxu0 }
 0x373   : > { %v4740_v45 = vmax.f32 %v4266_v62, %v4270_v4  ;;  %v4272_v23 = vpop.f32.mrb[171].mxu0 }
 0x374   : > { %v4319_v3 = vpop.f32.mrb[168].mxu1  ;;  %v4741_v48 = vmax.f32 %v4268_v21, %v4272_v23 }
 0x375   : > { %v4321_v12 = vpop.f32.mrb[169].mxu1 }
 0x376   : > { %v4323_v17 = vpop.f32.mrb[170].mxu1 }
 0x377   : > { %v4742_v0 = vmax.f32 %v4319_v3, %v4323_v17  ;;  %v4325_v16 = vpop.f32.mrb[171].mxu1 }
 0x378   : > { %v4743_v40 = vmax.f32 %v4321_v12, %v4325_v16  ;;  %v4276_v13 = vpop.f32.mrb[172].mxu0 }
 0x379   : > { %v4278_v39 = vpop.f32.mrb[173].mxu0 }
 0x37a   : > { %v4280_v31 = vpop.f32.mrb[174].mxu0 }
 0x37b   : > { %v4840_v7 = vmax.f32 %v4276_v13, %v4280_v31  ;;  %v4282_v59 = vpop.f32.mrb[175].mxu0 }
 0x37c   : > { %v4329_v58 = vpop.f32.mrb[172].mxu1  ;;  %v4841_v55 = vmax.f32 %v4278_v39, %v4282_v59 }
 0x37d   : > { %v4331_v20 = vpop.f32.mrb[173].mxu1  ;;  %v4940_v38 = vmax.f32 %v4740_v45, %v4840_v7 }
 0x37e   : > { %v4333_v33 = vpop.f32.mrb[174].mxu1  ;;  %v4941_v63 = vmax.f32 %v4741_v48, %v4841_v55 }
 0x37f   : > { %v5045_v47 = vadd.f32 %v8751_v54, %v4940_v38  ;;  %v4842_v24 = vmax.f32 %v4329_v58, %v4333_v33  ;;  %v4335_v44 = vpop.f32.mrb[175].mxu1 }
 0x380   : > { %v5046_v53 = vadd.f32 %v8751_v54, %v4941_v63  ;;  %v4843_v22 = vmax.f32 %v4331_v20, %v4335_v44 }
 0x381   : > { %v5145_v11 = vmax.f32 %v5045_v47, 0.0  ;;  %v4942_v50 = vmax.f32 %v4742_v0, %v4842_v24 }
 0x382   : > { %v5146_v51 = vmax.f32 %v5046_v53, 0.0  ;;  %v4943_v34 = vmax.f32 %v4743_v40, %v4843_v22 }
 0x383   : > { %v5047_v57 = vadd.f32 %v8751_v54, %v4942_v50 }
 0x384   : > { %v5969_v14 = vpack.c.bf16 %v5146_v51, %v5145_v11  ;;  %v5048_v27 = vadd.f32 %v8751_v54, %v4943_v34 }
 0x385   : > { %v5147_v52 = vmax.f32 %v5047_v57, 0.0 }
 0x386   : > { %5603 = vst [vmem:[%s8468_s16 + $0x150] sm:$0xff] %v5969_v14  ;;  %v5148_v26 = vmax.f32 %v5048_v27, 0.0 }
 0x388   : > { %v5970_v1 = vpack.c.bf16 %v5148_v26, %v5147_v52  ;;  %v4372_v56 = vpop.f32.mrb[176].mxu0 }
 0x389   : > { %v4374_v36 = vpop.f32.mrb[177].mxu0 }
 0x38a   : > { %5604 = vst [vmem:[%s8468_s16 + $0x158] sm:$0xff] %v5970_v1  ;;  %v4376_v8 = vpop.f32.mrb[178].mxu0 }
 0x38b   : > { %v4744_v28 = vmax.f32 %v4372_v56, %v4376_v8  ;;  %v4378_v9 = vpop.f32.mrb[179].mxu0 }
 0x38c   : > { %v4425_v25 = vpop.f32.mrb[176].mxu1  ;;  %v4745_v32 = vmax.f32 %v4374_v36, %v4378_v9 }
 0x38d   : > { %v4427_v37 = vpop.f32.mrb[177].mxu1 }
 0x38e   : > { %v4429_v5 = vpop.f32.mrb[178].mxu1 }
 0x38f   : > { %v4746_v2 = vmax.f32 %v4425_v25, %v4429_v5  ;;  %v4431_v41 = vpop.f32.mrb[179].mxu1 }
 0x390   : > { %v4382_v46 = vpop.f32.mrb[180].mxu0  ;;  %v4747_v10 = vmax.f32 %v4427_v37, %v4431_v41 }
 0x391   : > { %v4384_v15 = vpop.f32.mrb[181].mxu0 }
 0x392   : > { %v4386_v43 = vpop.f32.mrb[182].mxu0 }
 0x393   : > { %v4844_v19 = vmax.f32 %v4382_v46, %v4386_v43  ;;  %v4388_v61 = vpop.f32.mrb[183].mxu0 }
 0x394   : > { %v4435_v49 = vpop.f32.mrb[180].mxu1  ;;  %v4845_v18 = vmax.f32 %v4384_v15, %v4388_v61 }
 0x395   : > { %v4944_v6 = vmax.f32 %v4744_v28, %v4844_v19  ;;  %v4437_v35 = vpop.f32.mrb[181].mxu1 }
 0x396   : > { %v4945_v42 = vmax.f32 %v4745_v32, %v4845_v18  ;;  %v4439_v29 = vpop.f32.mrb[182].mxu1 }
 0x397   : > { %v5049_v30 = vadd.f32 %v8751_v54, %v4944_v6  ;;  %v4846_v60 = vmax.f32 %v4435_v49, %v4439_v29  ;;  %v4441_v62 = vpop.f32.mrb[183].mxu1 }
 0x398   : > { %v5050_v21 = vadd.f32 %v8751_v54, %v4945_v42  ;;  %v4847_v4 = vmax.f32 %v4437_v35, %v4441_v62 }
 0x399   : > { %v5149_v45 = vmax.f32 %v5049_v30, 0.0  ;;  %v4946_v23 = vmax.f32 %v4746_v2, %v4846_v60 }
 0x39a   : > { %v5150_v3 = vmax.f32 %v5050_v21, 0.0  ;;  %v4947_v48 = vmax.f32 %v4747_v10, %v4847_v4 }
 0x39b   : > { %v5051_v12 = vadd.f32 %v8751_v54, %v4946_v23 }
 0x39c   : > { %v5971_v17 = vpack.c.bf16 %v5150_v3, %v5149_v45  ;;  %v5052_v0 = vadd.f32 %v8751_v54, %v4947_v48 }
 0x39d   : > { %v5151_v16 = vmax.f32 %v5051_v12, 0.0 }
 0x39e   : > { %5605 = vst [vmem:[%s8468_s16 + $0x160] sm:$0xff] %v5971_v17  ;;  %v5152_v40 = vmax.f32 %v5052_v0, 0.0 }
 0x3a0   : > { %v5972_v13 = vpack.c.bf16 %v5152_v40, %v5151_v16  ;;  %v4478_v39 = vpop.f32.mrb[184].mxu0 }
 0x3a1   : > { %v4480_v31 = vpop.f32.mrb[185].mxu0 }
 0x3a2   : > { %5606 = vst [vmem:[%s8468_s16 + $0x168] sm:$0xff] %v5972_v13  ;;  %v4482_v7 = vpop.f32.mrb[186].mxu0 }
 0x3a3   : > { %v4748_v59 = vmax.f32 %v4478_v39, %v4482_v7  ;;  %v4484_v58 = vpop.f32.mrb[187].mxu0 }
 0x3a4   : > { %v4531_v55 = vpop.f32.mrb[184].mxu1  ;;  %v4749_v20 = vmax.f32 %v4480_v31, %v4484_v58 }
 0x3a5   : > { %v4533_v38 = vpop.f32.mrb[185].mxu1 }
 0x3a6   : > { %v4535_v33 = vpop.f32.mrb[186].mxu1 }
 0x3a7   : > { %v4750_v63 = vmax.f32 %v4531_v55, %v4535_v33  ;;  %v4537_v47 = vpop.f32.mrb[187].mxu1 }
 0x3a8   : > { %v4751_v24 = vmax.f32 %v4533_v38, %v4537_v47  ;;  %v4488_v44 = vpop.f32.mrb[188].mxu0 }
 0x3a9   : > { %v4490_v53 = vpop.f32.mrb[189].mxu0 }
 0x3aa   : > { %v4492_v22 = vpop.f32.mrb[190].mxu0 }
 0x3ab   : > { %v4848_v11 = vmax.f32 %v4488_v44, %v4492_v22  ;;  %v4494_v50 = vpop.f32.mrb[191].mxu0 }
 0x3ac   : > { %v4849_v51 = vmax.f32 %v4490_v53, %v4494_v50  ;;  %v4541_v34 = vpop.f32.mrb[188].mxu1 }
 0x3ad   : > { %v4948_v57 = vmax.f32 %v4748_v59, %v4848_v11  ;;  %v4543_v14 = vpop.f32.mrb[189].mxu1 }
 0x3ae   : > { %v4949_v27 = vmax.f32 %v4749_v20, %v4849_v51  ;;  %v4545_v52 = vpop.f32.mrb[190].mxu1 }
 0x3af   : > { %v5053_v26 = vadd.f32 %v8751_v54, %v4948_v57  ;;  %v4850_v1 = vmax.f32 %v4541_v34, %v4545_v52  ;;  %v4547_v56 = vpop.f32.mrb[191].mxu1 }
 0x3b0   : > { %v5054_v36 = vadd.f32 %v8751_v54, %v4949_v27  ;;  %v4851_v8 = vmax.f32 %v4543_v14, %v4547_v56 }
 0x3b1   : > { %v5153_v28 = vmax.f32 %v5053_v26, 0.0  ;;  %v4950_v9 = vmax.f32 %v4750_v63, %v4850_v1 }
 0x3b2   : > { %v5154_v25 = vmax.f32 %v5054_v36, 0.0  ;;  %v4951_v32 = vmax.f32 %v4751_v24, %v4851_v8 }
 0x3b3   : > { %v5055_v37 = vadd.f32 %v8751_v54, %v4950_v9 }
 0x3b4   : > { %v5973_v5 = vpack.c.bf16 %v5154_v25, %v5153_v28  ;;  %v5056_v2 = vadd.f32 %v8751_v54, %v4951_v32  ;;  %v4584_v41 = vpop.f32.mrb[192].mxu0  ;;  %v4637_v46 = vpop.f32.mrb[192].mxu1 }
 0x3b5   : > { %v5155_v10 = vmax.f32 %v5055_v37, 0.0  ;;  %v4586_v15 = vpop.f32.mrb[193].mxu0  ;;  %v4639_v43 = vpop.f32.mrb[193].mxu1 }
 0x3b6   : > { %5607 = vst [vmem:[%s8468_s16 + $0x170] sm:$0xff] %v5973_v5  ;;  %v5156_v19 = vmax.f32 %v5056_v2, 0.0  ;;  %v4588_v61 = vpop.f32.mrb[194].mxu0  ;;  %v4641_v49 = vpop.f32.mrb[194].mxu1 }
 0x3b7   : > { %v4752_v18 = vmax.f32 %v4584_v41, %v4588_v61  ;;  %v4754_v6 = vmax.f32 %v4637_v46, %v4641_v49  ;;  %v4590_v35 = vpop.f32.mrb[195].mxu0  ;;  %v4643_v42 = vpop.f32.mrb[195].mxu1 }
 0x3b8   : > { %v5974_v29 = vpack.c.bf16 %v5156_v19, %v5155_v10  ;;  %v4753_v30 = vmax.f32 %v4586_v15, %v4590_v35  ;;  %v4755_v60 = vmax.f32 %v4639_v43, %v4643_v42 }
 0x3ba   : > { %5608 = vst [vmem:[%s8468_s16 + $0x178] sm:$0xff] %v5974_v29 }
 0x3bc   : > { %v4594_v62 = vpop.f32.mrb[196].mxu0  ;;  %v4647_v21 = vpop.f32.mrb[196].mxu1 }
 0x3bd   : > { %v4596_v4 = vpop.f32.mrb[197].mxu0  ;;  %v4649_v45 = vpop.f32.mrb[197].mxu1 }
 0x3be   : > { %v4598_v23 = vpop.f32.mrb[198].mxu0  ;;  %v4651_v3 = vpop.f32.mrb[198].mxu1 }
 0x3bf   : > { %v4852_v48 = vmax.f32 %v4594_v62, %v4598_v23  ;;  %v4854_v12 = vmax.f32 %v4647_v21, %v4651_v3  ;;  %v4600_v17 = vpop.f32.mrb[199].mxu0  ;;  %v4653_v0 = vpop.f32.mrb[199].mxu1 }
 0x3c0   : > { %v4853_v16 = vmax.f32 %v4596_v4, %v4600_v17  ;;  %v4855_v40 = vmax.f32 %v4649_v45, %v4653_v0 }
 0x3c1   : > { %v4952_v13 = vmax.f32 %v4752_v18, %v4852_v48  ;;  %v4954_v39 = vmax.f32 %v4754_v6, %v4854_v12 }
 0x3c2   : > { %v4953_v31 = vmax.f32 %v4753_v30, %v4853_v16  ;;  %v4955_v7 = vmax.f32 %v4755_v60, %v4855_v40 }
 0x3c3   : > { %v5057_v59 = vadd.f32 %v8751_v54, %v4952_v13  ;;  %v5059_v58 = vadd.f32 %v8751_v54, %v4954_v39 }
 0x3c4   : > { %v5058_v55 = vadd.f32 %v8751_v54, %v4953_v31  ;;  %v5060_v20 = vadd.f32 %v8751_v54, %v4955_v7 }
 0x3c5   : > { %v5157_v38 = vmax.f32 %v5057_v59, 0.0  ;;  %v5159_v33 = vmax.f32 %v5059_v58, 0.0 }
 0x3c6   : > { %v5158_v63 = vmax.f32 %v5058_v55, 0.0  ;;  %v5160_v47 = vmax.f32 %v5060_v20, 0.0 }
 0x3c8   : > { %v5975_v24 = vpack.c.bf16 %v5158_v63, %v5157_v38  ;;  %v5976_v44 = vpack.c.bf16 %v5160_v47, %v5159_v33 }
 0x3ca   : > { %5609 = vst [vmem:[%s8468_s16 + $0x180] sm:$0xff] %v5975_v24  ;;  %5610 = vst [vmem:[%s8468_s16 + $0x188] sm:$0xff] %v5976_v44 }
 0x3cb PF: > { %s13_s12 = sadd.s32 1, %s6166_s12  }
 0x3cc   : > { %p10_p4 = scmp.ge.s32.totalorder %s13_s12, 4  }
 0x3ce   :  { %12 = sbr.rel (!%p10_p4) target bundleno = 1 (0x1), region = 62 }

// kernel: net_forward.5
= control target key start
LH: loop header
LB: loop body
LE: loop exit
PB: predicated region body
PF: predicated region fallthrough
CT: control target
= control target key end

     0   :  { %s2883_s12 = smov 0   ;;  %s4047_s0 = inlined_call_operand.vmem [shape: bf16[2,32,3328], index: 0, kind: input, shape index: {}]   ;;  %s4048_s1 = inlined_call_operand.vmem [shape: bf16[64,128], index: 1, kind: input, shape index: {}]   ;;  %s4049_s2 = inlined_call_operand.vmem [shape: f32[16,1], index: 2, kind: input, shape index: {}]   ;;  %s4050_s3 = inlined_call_operand.vmem [shape: bf16[2,16,3328], index: 3, kind: output, shape index: {}]  }
   0x1 LB: > { %s2616_s13 = sadd.s32 4294967295, %s2857_s12   ;;  %p2620_p0 = scmp.ge.s32.totalorder %s2857_s12, 1  ;;  %s2857_s12 = sphi %s2883_s12, %s13_s12  }
   0x2   : > { %p137_p1 = scmp.lt.s32.totalorder %s2857_s12, 3 }
   0x4   : > { %p138_p2 = pnand %p2620_p0, %p137_p1 }
   0x5   : > { %p161_p3 = scmp.lt.s32.totalorder (!%p138_p2), %s2616_s13, 1  ;;  %s2859_s18 = smov (!%p138_p2), 127   ;;  %v2862_v10 = vmov (!%p138_p2), 0   ;;  %vm546_vm0 = vcmask (!%p138_p2), 1039360   ;;  %vm760_vm1 = vcmask (!%p138_p2), 580608   ;;  %vm974_vm2 = vcmask (!%p138_p2), 572416  }
   0x6   : > { %141 = sbr.rel (%p138_p2) target bundleno = 701 (0x2bd), region = 32  ;;  %s2860_s19 = smov (!%p138_p2), 71   ;;  %1192 = vmatprep.mubr.bf16.mxu0 (!%p138_p2), %v2862_v10  ;;  %1265 = vmatprep.mubr.bf16.mxu1 (!%p138_p2), %v2862_v10 }
   0x7   : > { %s2861_s20 = smov (!%p138_p2), 70   ;;  %2764 = vset.pattern.permute.xlu1 (!%p138_p2), %v2862_v10  ;;  %2763 = vset.pattern.permute.xlu0 (!%p138_p2), %v2862_v10 }
   0xd   : > { %s4052_s13 = smov (!%p161_p3, %s2616_s13), 1 }
   0xe   : > { %s2749_s14 = smul.u32 416, %s4052_s13 }
   0xf   : > { %s2750_s16 = smul.u32 208, %s4052_s13 }
  0x10   : > { %s2897_s17 = scalar_lea.vmem %s4047_s0, %s2749_s14 }
  0x11   : > { %v2765_v0 = vld [vmem:[%s2897_s17 + $0xc] ss:$104 sps:$4 sm:$0xff]   ;;  %v2903_v2 = vld [vmem:[%s2897_s17 + $0x10] ss:$104 sps:$4 sm:$0xff]   ;;  %v2774_v4 = vld [vmem:[%s2897_s17] ss:$104 sps:$4 sm:$0xff]  }
  0x12   : > { %v2767_v1 = vld [vmem:[%s2897_s17 + $0x4] ss:$104 sps:$4 sm:$0xff]   ;;  %448 = vrot.lane.b32.xlu1 %v2765_v0, %s2859_s18  ;;  %1233 = vmatprep.subr.bf16.mxu1 %v2765_v0  ;;  %v2771_v3 = vld [vmem:[%s2897_s17 + $0x8] ss:$104 sps:$4 sm:$0xff]   ;;  %v2772_v6 = vld [vmem:[%s2897_s17 + $0xd4] ss:$104 sps:$4 sm:$0xff]  }
  0x13   : > { %444 = vrot.lane.b32.xlu0 %v2767_v1, %s2859_s18  ;;  %1160 = vmatprep.subr.bf16.mxu0 %v2767_v1  ;;  %v2775_v5 = vld [vmem:[%s2897_s17 + $0xdc] ss:$104 sps:$4 sm:$0xff]   ;;  %v2777_v7 = vld [vmem:[%s2897_s17 + $0xd8] ss:$104 sps:$4 sm:$0xff]   ;;  %v2972_v15 = vld [vmem:[%s2897_s17 + $0xe8] ss:$104 sps:$4 sm:$0xff]  }
  0x14   : > { %1234 = vmatpush1.bf16.msra.mxu1 %v2771_v3  ;;  %1161 = vmatpush1.bf16.msra.mxu0 %v2774_v4  ;;  %v2778_v8 = vld [vmem:[%s2897_s17 + $0xd0] ss:$104 sps:$4 sm:$0xff]   ;;  %v2920_v9 = vld [vmem:[%s2897_s17 + $0xe0] ss:$104 sps:$4 sm:$0xff]   ;;  %v2957_v12 = vld [vmem:[%s2897_s17 + $0x14] ss:$104 sps:$4 sm:$0xff]  }
  0x15   : > { %1235 = vmatprep.subr.bf16.mxu1 %v2775_v5  ;;  %1162 = vmatprep.subr.bf16.mxu0 %v2772_v6  ;;  %v2952_v11 = vld [vmem:[%s2897_s17 + $0x18] ss:$104 sps:$4 sm:$0xff]   ;;  %v2967_v14 = vld [vmem:[%s2897_s17 + $0x1c] ss:$104 sps:$4 sm:$0xff]   ;;  %v2987_v18 = vld [vmem:[%s2897_s17 + $0xec] ss:$104 sps:$4 sm:$0xff]  }
  0x16   : > { %450 = vrot.lane.b32.xlu1 %v2903_v2, %s2859_s18  ;;  %v2962_v13 = vld [vmem:[%s2897_s17 + $0x20] ss:$104 sps:$4 sm:$0xff]   ;;  %v2977_v16 = vld [vmem:[%s2897_s17 + $0xe4] ss:$104 sps:$4 sm:$0xff]   ;;  %v2982_v17 = vld [vmem:[%s2897_s17 + $0xf0] ss:$104 sps:$4 sm:$0xff]  }
  0x17   : > { %446 = vrot.lane.b32.xlu0 %v2771_v3, %s2859_s18  ;;  %v3024_v19 = vld [vmem:[%s2897_s17 + $0x28] ss:$104 sps:$4 sm:$0xff]   ;;  %v3029_v20 = vld [vmem:[%s2897_s17 + $0x24] ss:$104 sps:$4 sm:$0xff]   ;;  %v3044_v23 = vld [vmem:[%s2897_s17 + $0xf8] ss:$104 sps:$4 sm:$0xff]  }
  0x18   : > { %1236 = vmatpush1.bf16.msra.mxu1 %v2777_v7  ;;  %1163 = vmatpush1.bf16.msra.mxu0 %v2778_v8  ;;  %v3034_v21 = vld [vmem:[%s2897_s17 + $0x30] ss:$104 sps:$4 sm:$0xff]   ;;  %v3039_v22 = vld [vmem:[%s2897_s17 + $0x2c] ss:$104 sps:$4 sm:$0xff]   ;;  %v3054_v27 = vld [vmem:[%s2897_s17 + $0x100] ss:$104 sps:$4 sm:$0xff]  }
  0x19   : > { %v3049_v24 = vld [vmem:[%s2897_s17 + $0xf4] ss:$104 sps:$4 sm:$0xff]   ;;  %v3135_v62 = vld [vmem:[%s2897_s17 + $0x38] ss:$104 sps:$4 sm:$0xff]  }
  0x1a   : > { %496 = vrot.lane.b32.xlu1 %v2772_v6, %s2859_s18  ;;  %v3059_v28 = vld [vmem:[%s2897_s17 + $0xfc] ss:$104 sps:$4 sm:$0xff]  }
  0x1b   : > { %442 = vrot.lane.b32.xlu0 %v2774_v4, %s2859_s18 }
  0x1e   : > { %500 = vrot.lane.b32.xlu1 %v2775_v5, %s2859_s18 }
  0x1f   : > { %498 = vrot.lane.b32.xlu0 %v2777_v7, %s2859_s18 }
  0x22   : > { %494 = vrot.lane.b32.xlu1 %v2778_v8, %s2859_s18 }
  0x23   : > { %502 = vrot.lane.b32.xlu0 %v2920_v9, %s2859_s18 }
  0x26   : > { %660 = vrot.lane.b32.xlu1 %v2771_v3, %s2860_s19 }
  0x27   : > { %658 = vrot.lane.b32.xlu0 %v2767_v1, %s2860_s19 }
  0x2a   : > { %664 = vrot.lane.b32.xlu1 %v2903_v2, %s2860_s19 }
  0x2b   : > { %662 = vrot.lane.b32.xlu0 %v2765_v0, %s2860_s19 }
  0x2e   : > { %710 = vrot.lane.b32.xlu1 %v2772_v6, %s2860_s19 }
  0x2f   : > { %656 = vrot.lane.b32.xlu0 %v2774_v4, %s2860_s19 }
  0x32   : > { %714 = vrot.lane.b32.xlu1 %v2775_v5, %s2860_s19 }
  0x33   : > { %712 = vrot.lane.b32.xlu0 %v2777_v7, %s2860_s19 }
  0x36   : > { %708 = vrot.lane.b32.xlu1 %v2778_v8, %s2860_s19 }
  0x37   : > { %716 = vrot.lane.b32.xlu0 %v2920_v9, %s2860_s19 }
  0x3a   : > { %874 = vrot.lane.b32.xlu1 %v2771_v3, %s2861_s20 }
  0x3b   : > { %872 = vrot.lane.b32.xlu0 %v2767_v1, %s2861_s20 }
  0x3e   : > { %878 = vrot.lane.b32.xlu1 %v2903_v2, %s2861_s20 }
  0x3f   : > { %876 = vrot.lane.b32.xlu0 %v2765_v0, %s2861_s20  ;;  %v3141_v0 = vld [vmem:[%s2897_s17 + $0x34] ss:$104 sps:$4 sm:$0xff]  }
  0x42   : > { %924 = vrot.lane.b32.xlu1 %v2772_v6, %s2861_s20  ;;  %v3152_v6 = vld [vmem:[%s2897_s17 + $0x3c] ss:$104 sps:$4 sm:$0xff]  }
  0x43   : > { %870 = vrot.lane.b32.xlu0 %v2774_v4, %s2861_s20 }
  0x46   : > { %928 = vrot.lane.b32.xlu1 %v2775_v5, %s2861_s20  ;;  %v3147_v5 = vld [vmem:[%s2897_s17 + $0x40] ss:$104 sps:$4 sm:$0xff]  }
  0x47   : > { %926 = vrot.lane.b32.xlu0 %v2777_v7, %s2861_s20 }
  0x4a   : > { %922 = vrot.lane.b32.xlu1 %v2778_v8, %s2861_s20 }
  0x4b   : > { %930 = vrot.lane.b32.xlu0 %v2920_v9, %s2861_s20 }
  0x4e   : > { %454 = vrot.lane.b32.xlu1 %v2952_v11, %s2859_s18 }
  0x4f   : > { %452 = vrot.lane.b32.xlu0 %v2957_v12, %s2859_s18 }
  0x52   : > { %458 = vrot.lane.b32.xlu1 %v2962_v13, %s2859_s18 }
  0x53   : > { %456 = vrot.lane.b32.xlu0 %v2967_v14, %s2859_s18 }
  0x56   : > { %506 = vrot.lane.b32.xlu1 %v2972_v15, %s2859_s18 }
  0x57   : > { %504 = vrot.lane.b32.xlu0 %v2977_v16, %s2859_s18 }
  0x5a   : > { %510 = vrot.lane.b32.xlu1 %v2982_v17, %s2859_s18 }
  0x5b   : > { %508 = vrot.lane.b32.xlu0 %v2987_v18, %s2859_s18 }
  0x5e   : > { %668 = vrot.lane.b32.xlu1 %v2952_v11, %s2860_s19 }
  0x5f   : > { %666 = vrot.lane.b32.xlu0 %v2957_v12, %s2860_s19 }
  0x62   : > { %672 = vrot.lane.b32.xlu1 %v2962_v13, %s2860_s19 }
  0x63   : > { %670 = vrot.lane.b32.xlu0 %v2967_v14, %s2860_s19 }
  0x66   : > { %720 = vrot.lane.b32.xlu1 %v2972_v15, %s2860_s19 }
  0x67   : > { %718 = vrot.lane.b32.xlu0 %v2977_v16, %s2860_s19 }
  0x6a   : > { %724 = vrot.lane.b32.xlu1 %v2982_v17, %s2860_s19 }
  0x6b   : > { %722 = vrot.lane.b32.xlu0 %v2987_v18, %s2860_s19 }
  0x6e   : > { %882 = vrot.lane.b32.xlu1 %v2952_v11, %s2861_s20 }
  0x6f   : > { %880 = vrot.lane.b32.xlu0 %v2957_v12, %s2861_s20 }
  0x72   : > { %886 = vrot.lane.b32.xlu1 %v2962_v13, %s2861_s20 }
  0x73   : > { %884 = vrot.lane.b32.xlu0 %v2967_v14, %s2861_s20 }
  0x76   : > { %934 = vrot.lane.b32.xlu1 %v2972_v15, %s2861_s20 }
  0x77   : > { %932 = vrot.lane.b32.xlu0 %v2977_v16, %s2861_s20 }
  0x7a   : > { %938 = vrot.lane.b32.xlu1 %v2982_v17, %s2861_s20 }
  0x7b   : > { %936 = vrot.lane.b32.xlu0 %v2987_v18, %s2861_s20 }
  0x7e   : > { %462 = vrot.lane.b32.xlu1 %v3024_v19, %s2859_s18 }
  0x7f   : > { %460 = vrot.lane.b32.xlu0 %v3029_v20, %s2859_s18 }
  0x82   : > { %466 = vrot.lane.b32.xlu1 %v3034_v21, %s2859_s18 }
  0x83   : > { %464 = vrot.lane.b32.xlu0 %v3039_v22, %s2859_s18 }
  0x84   : > { %v449_v25 = vpop.permute.xlu1 %448 }
  0x85   : > { %v445_v26 = vpop.permute.xlu0 %444 }
  0x86   : > { %514 = vrot.lane.b32.xlu1 %v3044_v23, %s2859_s18 }
  0x87   : > { %512 = vrot.lane.b32.xlu0 %v3049_v24, %s2859_s18 }
  0x88   : > { %v3061_v29 = vpop.permute.xlu1 %450 }
  0x89   : > { %v447_v30 = vpop.permute.xlu0 %446  ;;  %v550_v31 = vsel %vm546_vm0, %v449_v25, %v3061_v29 }
  0x8a   : > { %518 = vrot.lane.b32.xlu1 %v3054_v27, %s2859_s18  ;;  %1237 = vmatprep.subr.bf16.mxu1 %v550_v31  ;;  %v548_v32 = vsel %vm546_vm0, %v445_v26, %v447_v30  ;;  %v549_v33 = vsel %vm546_vm0, %v447_v30, %v449_v25  ;;  %v3162_v30 = vld [vmem:[%s2897_s17 + $0x108] ss:$104 sps:$4 sm:$0xff]   ;;  %v3167_v31 = vld [vmem:[%s2897_s17 + $0x104] ss:$104 sps:$4 sm:$0xff]  }
  0x8b   : > { %516 = vrot.lane.b32.xlu0 %v3059_v28, %s2859_s18  ;;  %1164 = vmatprep.subr.bf16.mxu0 %v548_v32 }
  0x8c   : > { %1238 = vmatpush1.bf16.msra.mxu1 %v549_v33  ;;  %v497_v34 = vpop.permute.xlu1 %496 }
  0x8d   : > { %v3071_v35 = vpop.permute.xlu0 %442 }
  0x8e   : > { %676 = vrot.lane.b32.xlu1 %v3024_v19, %s2860_s19  ;;  %v547_v36 = vsel %vm546_vm0, %v3071_v35, %v445_v26 }
  0x8f   : > { %674 = vrot.lane.b32.xlu0 %v3029_v20, %s2860_s19  ;;  %1165 = vmatpush1.bf16.msra.mxu0 %v547_v36  ;;  %v3176_v36 = vld [vmem:[%s2897_s17 + $0x110] ss:$104 sps:$4 sm:$0xff]  }
  0x90   : > { %v501_v37 = vpop.permute.xlu1 %500 }
  0x91   : > { %v499_v38 = vpop.permute.xlu0 %498 }
  0x92   : > { %680 = vrot.lane.b32.xlu1 %v3034_v21, %s2860_s19  ;;  %v573_v39 = vsel %vm546_vm0, %v497_v34, %v499_v38  ;;  %v574_v44 = vsel %vm546_vm0, %v499_v38, %v501_v37 }
  0x93   : > { %678 = vrot.lane.b32.xlu0 %v3039_v22, %s2860_s19  ;;  %1166 = vmatprep.subr.bf16.mxu0 %v573_v39 }
  0x94   : > { %v3084_v40 = vpop.permute.xlu1 %494 }
  0x95   : > { %v3086_v41 = vpop.permute.xlu0 %502  ;;  %v572_v42 = vsel %vm546_vm0, %v3084_v40, %v497_v34 }
  0x96   : > { %728 = vrot.lane.b32.xlu1 %v3044_v23, %s2860_s19  ;;  %1167 = vmatpush1.bf16.msra.mxu0 %v572_v42  ;;  %v575_v43 = vsel %vm546_vm0, %v501_v37, %v3086_v41  ;;  %v3181_v37 = vld [vmem:[%s2897_s17 + $0x10c] ss:$104 sps:$4 sm:$0xff]  }
  0x97   : > { %726 = vrot.lane.b32.xlu0 %v3049_v24, %s2860_s19  ;;  %1239 = vmatprep.subr.bf16.mxu1 %v575_v43 }
  0x98   : > { %1240 = vmatpush1.bf16.msra.mxu1 %v574_v44  ;;  %v661_v45 = vpop.permute.xlu1 %660 }
  0x99   : > { %v659_v46 = vpop.permute.xlu0 %658 }
  0x9a   : > { %732 = vrot.lane.b32.xlu1 %v3054_v27, %s2860_s19  ;;  %v762_v47 = vsel %vm760_vm1, %v659_v46, %v661_v45 }
  0x9b   : > { %730 = vrot.lane.b32.xlu0 %v3059_v28, %s2860_s19  ;;  %1168 = vmatprep.subr.bf16.mxu0 %v762_v47 }
  0x9c   : > { %v3102_v48 = vpop.permute.xlu1 %664 }
  0x9d   : > { %v663_v49 = vpop.permute.xlu0 %662 }
  0x9e   : > { %890 = vrot.lane.b32.xlu1 %v3024_v19, %s2861_s20  ;;  %v764_v50 = vsel %vm760_vm1, %v663_v49, %v3102_v48  ;;  %v763_v51 = vsel %vm760_vm1, %v661_v45, %v663_v49 }
  0x9f   : > { %888 = vrot.lane.b32.xlu0 %v3029_v20, %s2861_s20  ;;  %1241 = vmatprep.subr.bf16.mxu1 %v764_v50 }
  0xa0   : > { %1242 = vmatpush1.bf16.msra.mxu1 %v763_v51  ;;  %v711_v52 = vpop.permute.xlu1 %710 }
  0xa1   : > { %v3111_v53 = vpop.permute.xlu0 %656 }
  0xa2   : > { %894 = vrot.lane.b32.xlu1 %v3034_v21, %s2861_s20  ;;  %v761_v54 = vsel %vm760_vm1, %v3111_v53, %v659_v46  ;;  %v3197_v46 = vld [vmem:[%s4048_s1] sm:$0xff]  }
  0xa3   : > { %892 = vrot.lane.b32.xlu0 %v3039_v22, %s2861_s20  ;;  %1169 = vmatpush1.bf16.msra.mxu0 %v761_v54 }
  0xa4   : > { %v715_v55 = vpop.permute.xlu1 %714 }
  0xa5   : > { %v713_v56 = vpop.permute.xlu0 %712 }
  0xa6   : > { %942 = vrot.lane.b32.xlu1 %v3044_v23, %s2861_s20  ;;  %v787_v57 = vsel %vm760_vm1, %v711_v52, %v713_v56  ;;  %v788_v63 = vsel %vm760_vm1, %v713_v56, %v715_v55 }
  0xa7   : > { %940 = vrot.lane.b32.xlu0 %v3049_v24, %s2861_s20  ;;  %1170 = vmatprep.subr.bf16.mxu0 %v787_v57  ;;  %v3254_v57 = vld [vmem:[%s4048_s1 + $0x10] sm:$0xff]  }
  0xa8   : > { %v3124_v58 = vpop.permute.xlu1 %708 }
  0xa9   : > { %v3126_v59 = vpop.permute.xlu0 %716  ;;  %v786_v60 = vsel %vm760_vm1, %v3124_v58, %v711_v52 }
  0xaa   : > { %946 = vrot.lane.b32.xlu1 %v3054_v27, %s2861_s20  ;;  %1171 = vmatpush1.bf16.msra.mxu0 %v786_v60  ;;  %v789_v61 = vsel %vm760_vm1, %v715_v55, %v3126_v59 }
  0xab   : > { %944 = vrot.lane.b32.xlu0 %v3059_v28, %s2861_s20  ;;  %1243 = vmatprep.subr.bf16.mxu1 %v789_v61 }
  0xac   : > { %1244 = vmatpush1.bf16.msra.mxu1 %v788_v63  ;;  %v875_v1 = vpop.permute.xlu1 %874 }
  0xad   : > { %v873_v3 = vpop.permute.xlu0 %872 }
  0xae   : > { %470 = vrot.lane.b32.xlu1 %v3135_v62, %s2859_s18  ;;  %v976_v4 = vsel %vm974_vm2, %v873_v3, %v875_v1 }
  0xaf   : > { %468 = vrot.lane.b32.xlu0 %v3141_v0, %s2859_s18  ;;  %1172 = vmatprep.subr.bf16.mxu0 %v976_v4 }
  0xb0   : > { %v3154_v7 = vpop.permute.xlu1 %878 }
  0xb1   : > { %v877_v8 = vpop.permute.xlu0 %876 }
  0xb2   : > { %474 = vrot.lane.b32.xlu1 %v3147_v5, %s2859_s18  ;;  %v978_v25 = vsel %vm974_vm2, %v877_v8, %v3154_v7  ;;  %v977_v26 = vsel %vm974_vm2, %v875_v1, %v877_v8 }
  0xb3   : > { %472 = vrot.lane.b32.xlu0 %v3152_v6, %s2859_s18  ;;  %1245 = vmatprep.subr.bf16.mxu1 %v978_v25  ;;  %v3279_v25 = vld [vmem:[%s4048_s1 + $0x18] sm:$0xff]  }
  0xb4   : > { %1246 = vmatpush1.bf16.msra.mxu1 %v977_v26  ;;  %v925_v32 = vpop.permute.xlu1 %924 }
  0xb5   : > { %v3169_v33 = vpop.permute.xlu0 %870 }
  0xb6   : > { %522 = vrot.lane.b32.xlu1 %v3162_v30, %s2859_s18  ;;  %v975_v34 = vsel %vm974_vm2, %v3169_v33, %v873_v3 }
  0xb7   : > { %520 = vrot.lane.b32.xlu0 %v3167_v31, %s2859_s18  ;;  %1173 = vmatpush1.bf16.msra.mxu0 %v975_v34 }
  0xb8   : > { %v929_v38 = vpop.permute.xlu1 %928 }
  0xb9   : > { %v927_v39 = vpop.permute.xlu0 %926 }
  0xba   : > { %526 = vrot.lane.b32.xlu1 %v3176_v36, %s2859_s18  ;;  %v1001_v42 = vsel %vm974_vm2, %v925_v32, %v927_v39  ;;  %v1002_v49 = vsel %vm974_vm2, %v927_v39, %v929_v38 }
  0xbb   : > { %524 = vrot.lane.b32.xlu0 %v3181_v37, %s2859_s18  ;;  %1174 = vmatprep.subr.bf16.mxu0 %v1001_v42  ;;  %v3296_v42 = vld [vmem:[%s2897_s17 + $0x48] ss:$104 sps:$4 sm:$0xff]  }
  0xbc   : > { %v3188_v43 = vpop.permute.xlu1 %922 }
  0xbd   : > { %v3190_v44 = vpop.permute.xlu0 %930  ;;  %v1000_v45 = vsel %vm974_vm2, %v3188_v43, %v925_v32 }
  0xbe   : > { %684 = vrot.lane.b32.xlu1 %v3135_v62, %s2860_s19  ;;  %1175 = vmatpush1.bf16.msra.mxu0 %v1000_v45  ;;  %v1003_v47 = vsel %vm974_vm2, %v929_v38, %v3190_v44  ;;  %v3302_v45 = vld [vmem:[%s2897_s17 + $0x44] ss:$104 sps:$4 sm:$0xff]  }
  0xbf   : > { %682 = vrot.lane.b32.xlu0 %v3141_v0, %s2860_s19  ;;  %1247 = vmatprep.subr.bf16.mxu1 %v1003_v47 }
  0xc0   : > { %1248 = vmatpush1.bf16.msra.mxu1 %v1002_v49  ;;  %v455_v50 = vpop.permute.xlu1 %454  ;;  %1306 = vmatprep.subr.bf16.mxu0 %v2957_v12 }
  0xc1   : > { %v453_v51 = vpop.permute.xlu0 %452  ;;  %1193 = vmatmul.mubr.bf16.vlgmr.msra.gmra.mrb[0].mxu0 %v3197_v46  ;;  %1379 = vmatprep.subr.bf16.mxu1 %v2967_v14 }
  0xc2   : > { %688 = vrot.lane.b32.xlu1 %v3147_v5, %s2860_s19  ;;  %1307 = vmatpush1.bf16.msra.mxu0 %v2903_v2  ;;  %v3224_v2 = vld [vmem:[%s4048_s1 + $0x8] sm:$0xff]   ;;  %v551_v54 = vsel %vm546_vm0, %v3061_v29, %v453_v51 }
  0xc3   : > { %686 = vrot.lane.b32.xlu0 %v3152_v6, %s2860_s19  ;;  %1266 = vmatmul.mubr.bf16.vlgmr.msra.gmra.mrb[0].mxu1 %v3197_v46 }
  0xc4   : > { %1380 = vmatpush1.bf16.msra.mxu1 %v2952_v11  ;;  %v3216_v52 = vpop.permute.xlu1 %458  ;;  %1308 = vmatprep.subr.bf16.mxu0 %v2977_v16  ;;  %v552_v11 = vsel %vm546_vm0, %v453_v51, %v455_v50  ;;  %v3313_v51 = vld [vmem:[%s2897_s17 + $0x50] ss:$104 sps:$4 sm:$0xff]  }
  0xc5   : > { %v457_v12 = vpop.permute.xlu0 %456  ;;  %1381 = vmatprep.subr.bf16.mxu1 %v2987_v18  ;;  %1202 = vmatprep.mubr.bf16.mxu0 %v2862_v10 }
  0xc6   : > { %736 = vrot.lane.b32.xlu1 %v3162_v30, %s2860_s19  ;;  %1309 = vmatpush1.bf16.msra.mxu0 %v2920_v9  ;;  %v554_v16 = vsel %vm546_vm0, %v457_v12, %v3216_v52 }
  0xc7   : > { %734 = vrot.lane.b32.xlu0 %v3167_v31, %s2860_s19  ;;  %1310 = vmatprep.subr.bf16.mxu0 %v552_v11 }
  0xc8   : > { %1382 = vmatpush1.bf16.msra.mxu1 %v2972_v15  ;;  %v507_v14 = vpop.permute.xlu1 %506  ;;  %1275 = vmatprep.mubr.bf16.mxu1 %v2862_v10  ;;  %v553_v15 = vsel %vm546_vm0, %v455_v50, %v457_v12  ;;  %v3319_v12 = vld [vmem:[%s2897_s17 + $0x4c] ss:$104 sps:$4 sm:$0xff]  }
  0xc9   : > { %1383 = vmatprep.subr.bf16.mxu1 %v554_v16  ;;  %v505_v18 = vpop.permute.xlu0 %504  ;;  %1203 = vmatmul.mubr.bf16.gmra.mrb[4].mxu0 %v3224_v2 }
  0xca   : > { %740 = vrot.lane.b32.xlu1 %v3176_v36, %s2860_s19  ;;  %1311 = vmatpush1.bf16.msra.mxu0 %v551_v54  ;;  %v577_v9 = vsel %vm546_vm0, %v505_v18, %v507_v14  ;;  %v576_v56 = vsel %vm546_vm0, %v3086_v41, %v505_v18  ;;  %v3327_v54 = vld [vmem:[%s2897_s17 + $0x118] ss:$104 sps:$4 sm:$0xff]  }
  0xcb   : > { %738 = vrot.lane.b32.xlu0 %v3181_v37, %s2860_s19  ;;  %1312 = vmatprep.subr.bf16.mxu0 %v577_v9  ;;  %v3332_v9 = vld [vmem:[%s2897_s17 + $0x114] ss:$104 sps:$4 sm:$0xff]  }
  0xcc   : > { %1384 = vmatpush1.bf16.msra.mxu1 %v553_v15  ;;  %v3245_v55 = vpop.permute.xlu1 %510  ;;  %1212 = vmatprep.mubr.bf16.mxu0 %v2862_v10 }
  0xcd   : > { %v509_v29 = vpop.permute.xlu0 %508  ;;  %1276 = vmatmul.mubr.bf16.gmra.mrb[4].mxu1 %v3224_v2 }
  0xce   : > { %898 = vrot.lane.b32.xlu1 %v3135_v62, %s2861_s20  ;;  %1313 = vmatpush1.bf16.msra.mxu0 %v576_v56  ;;  %v579_v60 = vsel %vm546_vm0, %v509_v29, %v3245_v55  ;;  %v578_v61 = vsel %vm546_vm0, %v507_v14, %v509_v29 }
  0xcf   : > { %896 = vrot.lane.b32.xlu0 %v3141_v0, %s2861_s20  ;;  %1385 = vmatprep.subr.bf16.mxu1 %v579_v60  ;;  %v3342_v60 = vld [vmem:[%s2897_s17 + $0x120] ss:$104 sps:$4 sm:$0xff]  }
  0xd0   : > { %1386 = vmatpush1.bf16.msra.mxu1 %v578_v61  ;;  %v669_v41 = vpop.permute.xlu1 %668  ;;  %1285 = vmatprep.mubr.bf16.mxu1 %v2862_v10  ;;  %v3347_v61 = vld [vmem:[%s2897_s17 + $0x11c] ss:$104 sps:$4 sm:$0xff]  }
  0xd1   : > { %v667_v63 = vpop.permute.xlu0 %666  ;;  %1213 = vmatmul.mubr.bf16.gmra.mrb[8].mxu0 %v3254_v57 }
  0xd2   : > { %902 = vrot.lane.b32.xlu1 %v3147_v5, %s2861_s20  ;;  %v766_v1 = vsel %vm760_vm1, %v667_v63, %v669_v41  ;;  %v765_v3 = vsel %vm760_vm1, %v3102_v48, %v667_v63  ;;  %1222 = vmatprep.mubr.bf16.mxu0 %v2862_v10 }
  0xd3   : > { %900 = vrot.lane.b32.xlu0 %v3152_v6, %s2861_s20  ;;  %1314 = vmatprep.subr.bf16.mxu0 %v766_v1 }
  0xd4   : > { %1315 = vmatpush1.bf16.msra.mxu0 %v765_v3  ;;  %v3273_v4 = vpop.permute.xlu1 %672 }
  0xd5   : > { %v671_v8 = vpop.permute.xlu0 %670  ;;  %1286 = vmatmul.mubr.bf16.gmra.mrb[8].mxu1 %v3254_v57 }
  0xd6   : > { %950 = vrot.lane.b32.xlu1 %v3162_v30, %s2861_s20  ;;  %v768_v48 = vsel %vm760_vm1, %v671_v8, %v3273_v4  ;;  %v767_v26 = vsel %vm760_vm1, %v669_v41, %v671_v8  ;;  %1295 = vmatprep.mubr.bf16.mxu1 %v2862_v10 }
  0xd7   : > { %948 = vrot.lane.b32.xlu0 %v3167_v31, %s2861_s20  ;;  %1387 = vmatprep.subr.bf16.mxu1 %v768_v48 }
  0xd8   : > { %1388 = vmatpush1.bf16.msra.mxu1 %v767_v26  ;;  %v721_v32 = vpop.permute.xlu1 %720 }
  0xd9   : > { %v719_v34 = vpop.permute.xlu0 %718  ;;  %1223 = vmatmul.mubr.bf16.gmra.mrb[12].mxu0 %v3279_v25 }
  0xda   : > { %954 = vrot.lane.b32.xlu1 %v3176_v36, %s2861_s20  ;;  %v791_v38 = vsel %vm760_vm1, %v719_v34, %v721_v32  ;;  %v790_v39 = vsel %vm760_vm1, %v3126_v59, %v719_v34  ;;  %1338 = vmatprep.mubr.bf16.mxu0 %v2862_v10 }
  0xdb   : > { %952 = vrot.lane.b32.xlu0 %v3181_v37, %s2861_s20  ;;  %1316 = vmatprep.subr.bf16.mxu0 %v791_v38 }
  0xdc   : > { %1317 = vmatpush1.bf16.msra.mxu0 %v790_v39  ;;  %v3304_v47 = vpop.permute.xlu1 %724 }
  0xdd   : > { %v723_v49 = vpop.permute.xlu0 %722  ;;  %1296 = vmatmul.mubr.bf16.gmra.mrb[12].mxu1 %v3279_v25 }
  0xde   : > { %478 = vrot.lane.b32.xlu1 %v3296_v42, %s2859_s18  ;;  %v793_v59 = vsel %vm760_vm1, %v723_v49, %v3304_v47  ;;  %v792_v50 = vsel %vm760_vm1, %v721_v32, %v723_v49  ;;  %1411 = vmatprep.mubr.bf16.mxu1 %v2862_v10 }
  0xdf   : > { %476 = vrot.lane.b32.xlu0 %v3302_v45, %s2859_s18  ;;  %1389 = vmatprep.subr.bf16.mxu1 %v793_v59 }
  0xe0   : > { %1390 = vmatpush1.bf16.msra.mxu1 %v792_v50  ;;  %v883_v11 = vpop.permute.xlu1 %882 }
  0xe1   : > { %v881_v14 = vpop.permute.xlu0 %880 }
  0xe2   : > { %482 = vrot.lane.b32.xlu1 %v3313_v51, %s2859_s18  ;;  %v980_v16 = vsel %vm974_vm2, %v881_v14, %v883_v11  ;;  %v979_v18 = vsel %vm974_vm2, %v3154_v7, %v881_v14 }
  0xe3   : > { %480 = vrot.lane.b32.xlu0 %v3319_v12, %s2859_s18  ;;  %1318 = vmatprep.subr.bf16.mxu0 %v980_v16 }
  0xe4   : > { %1319 = vmatpush1.bf16.msra.mxu0 %v979_v18  ;;  %v3334_v15 = vpop.permute.xlu1 %886 }
  0xe5   : > { %v885_v29 = vpop.permute.xlu0 %884 }
  0xe6   : > { %530 = vrot.lane.b32.xlu1 %v3327_v54, %s2859_s18  ;;  %v982_v56 = vsel %vm974_vm2, %v885_v29, %v3334_v15  ;;  %v981_v7 = vsel %vm974_vm2, %v883_v11, %v885_v29 }
  0xe7   : > { %528 = vrot.lane.b32.xlu0 %v3332_v9, %s2859_s18  ;;  %1391 = vmatprep.subr.bf16.mxu1 %v982_v56 }
  0xe8   : > { %1392 = vmatpush1.bf16.msra.mxu1 %v981_v7  ;;  %v935_v41 = vpop.permute.xlu1 %934 }
  0xe9   : > { %v933_v63 = vpop.permute.xlu0 %932 }
  0xea   : > { %534 = vrot.lane.b32.xlu1 %v3342_v60, %s2859_s18  ;;  %v1005_v1 = vsel %vm974_vm2, %v933_v63, %v935_v41  ;;  %v1004_v3 = vsel %vm974_vm2, %v3190_v44, %v933_v63 }
  0xeb   : > { %532 = vrot.lane.b32.xlu0 %v3347_v61, %s2859_s18  ;;  %1320 = vmatprep.subr.bf16.mxu0 %v1005_v1 }
  0xec   : > { %1321 = vmatpush1.bf16.msra.mxu0 %v1004_v3  ;;  %v3356_v8 = vpop.permute.xlu1 %938  ;;  %v3441_v3 = vld [vmem:[%s2897_s17 + $0x58] ss:$104 sps:$4 sm:$0xff]  }
  0xed   : > { %v937_v48 = vpop.permute.xlu0 %936  ;;  %1452 = vmatprep.subr.bf16.mxu0 %v3029_v20 }
  0xee   : > { %692 = vrot.lane.b32.xlu1 %v3296_v42, %s2860_s19  ;;  %v1007_v26 = vsel %vm974_vm2, %v937_v48, %v3356_v8  ;;  %v1006_v32 = vsel %vm974_vm2, %v935_v41, %v937_v48  ;;  %v3446_v48 = vld [vmem:[%s2897_s17 + $0x54] ss:$104 sps:$4 sm:$0xff]  }
  0xef   : > { %690 = vrot.lane.b32.xlu0 %v3302_v45, %s2860_s19  ;;  %1393 = vmatprep.subr.bf16.mxu1 %v1007_v26 }
  0xf0   : > { %1339 = vmatmul.mubr.bf16.vlgmr.msra.gmra.mrb[16].mxu0 %v3197_v46  ;;  %1394 = vmatpush1.bf16.msra.mxu1 %v1006_v32  ;;  %v463_v44 = vpop.permute.xlu1 %462 }
  0xf1   : > { %1453 = vmatpush1.bf16.msra.mxu0 %v2962_v13  ;;  %v461_v34 = vpop.permute.xlu0 %460  ;;  %1525 = vmatprep.subr.bf16.mxu1 %v3039_v22 }
  0xf2   : > { %696 = vrot.lane.b32.xlu1 %v3313_v51, %s2860_s19  ;;  %1454 = vmatprep.subr.bf16.mxu0 %v3049_v24  ;;  %v556_v22 = vsel %vm546_vm0, %v461_v34, %v463_v44 }
  0xf3   : > { %694 = vrot.lane.b32.xlu0 %v3319_v12, %s2860_s19  ;;  %1412 = vmatmul.mubr.bf16.vlgmr.msra.gmra.mrb[16].mxu1 %v3197_v46 }
  0xf4   : > { %1526 = vmatpush1.bf16.msra.mxu1 %v3024_v19  ;;  %v3376_v20 = vpop.permute.xlu1 %466  ;;  %1348 = vmatprep.mubr.bf16.mxu0 %v2862_v10  ;;  %v555_v19 = vsel %vm546_vm0, %v3216_v52, %v461_v34  ;;  %v3457_v34 = vld [vmem:[%s2897_s17 + $0x60] ss:$104 sps:$4 sm:$0xff]  }
  0xf5   : > { %1455 = vmatpush1.bf16.msra.mxu0 %v2982_v17  ;;  %v465_v13 = vpop.permute.xlu0 %464  ;;  %1527 = vmatprep.subr.bf16.mxu1 %v3059_v28 }
  0xf6   : > { %1456 = vmatprep.subr.bf16.mxu0 %v556_v22  ;;  %744 = vrot.lane.b32.xlu1 %v3327_v54, %s2860_s19  ;;  %v558_v24 = vsel %vm546_vm0, %v465_v13, %v3376_v20 }
  0xf7   : > { %742 = vrot.lane.b32.xlu0 %v3332_v9, %s2860_s19  ;;  %1421 = vmatprep.mubr.bf16.mxu1 %v2862_v10 }
  0xf8   : > { %1528 = vmatpush1.bf16.msra.mxu1 %v3044_v23  ;;  %v515_v17 = vpop.permute.xlu1 %514  ;;  %1349 = vmatmul.mubr.bf16.gmra.mrb[20].mxu0 %v3224_v2  ;;  %v557_v23 = vsel %vm546_vm0, %v463_v44, %v465_v13  ;;  %v3463_v13 = vld [vmem:[%s2897_s17 + $0x5c] ss:$104 sps:$4 sm:$0xff]  }
  0xf9   : > { %1457 = vmatpush1.bf16.msra.mxu0 %v555_v19  ;;  %1529 = vmatprep.subr.bf16.mxu1 %v558_v24  ;;  %v513_v28 = vpop.permute.xlu0 %512 }
  0xfa   : > { %748 = vrot.lane.b32.xlu1 %v3342_v60, %s2860_s19  ;;  %v581_v38 = vsel %vm546_vm0, %v513_v28, %v515_v17  ;;  %v580_v39 = vsel %vm546_vm0, %v3245_v55, %v513_v28  ;;  %1358 = vmatprep.mubr.bf16.mxu0 %v2862_v10  ;;  %v3471_v28 = vld [vmem:[%s2897_s17 + $0x128] ss:$104 sps:$4 sm:$0xff]  }
  0xfb   : > { %746 = vrot.lane.b32.xlu0 %v3347_v61, %s2860_s19  ;;  %1458 = vmatprep.subr.bf16.mxu0 %v581_v38  ;;  %v3476_v38 = vld [vmem:[%s2897_s17 + $0x124] ss:$104 sps:$4 sm:$0xff]  }
  0xfc   : > { %1530 = vmatpush1.bf16.msra.mxu1 %v557_v23  ;;  %v3402_v52 = vpop.permute.xlu1 %518 }
  0xfd   : > { %1459 = vmatpush1.bf16.msra.mxu0 %v580_v39  ;;  %v517_v49 = vpop.permute.xlu0 %516  ;;  %1422 = vmatmul.mubr.bf16.gmra.mrb[20].mxu1 %v3224_v2 }
  0xfe   : > { %v582_v59 = vsel %vm546_vm0, %v515_v17, %v517_v49  ;;  %906 = vrot.lane.b32.xlu1 %v3296_v42, %s2861_s20  ;;  %v583_v55 = vsel %vm546_vm0, %v517_v49, %v3402_v52  ;;  %1431 = vmatprep.mubr.bf16.mxu1 %v2862_v10 }
  0xff   : > { %904 = vrot.lane.b32.xlu0 %v3302_v45, %s2861_s20  ;;  %1531 = vmatprep.subr.bf16.mxu1 %v583_v55  ;;  %v3491_v55 = vld [vmem:[%s2897_s17 + $0x12c] ss:$104 sps:$4 sm:$0xff]  }
 0x100   : > { %1532 = vmatpush1.bf16.msra.mxu1 %v582_v59  ;;  %v677_v50 = vpop.permute.xlu1 %676  ;;  %1359 = vmatmul.mubr.bf16.gmra.mrb[24].mxu0 %v3254_v57  ;;  %v3486_v59 = vld [vmem:[%s2897_s17 + $0x130] ss:$104 sps:$4 sm:$0xff]  }
 0x101   : > { %v675_v11 = vpop.permute.xlu0 %674  ;;  %1368 = vmatprep.mubr.bf16.mxu0 %v2862_v10 }
 0x102   : > { %v769_v14 = vsel %vm760_vm1, %v3273_v4, %v675_v11  ;;  %910 = vrot.lane.b32.xlu1 %v3313_v51, %s2861_s20  ;;  %v770_v16 = vsel %vm760_vm1, %v675_v11, %v677_v50 }
 0x103   : > { %908 = vrot.lane.b32.xlu0 %v3319_v12, %s2861_s20  ;;  %1460 = vmatprep.subr.bf16.mxu0 %v770_v16 }
 0x104   : > { %1461 = vmatpush1.bf16.msra.mxu0 %v769_v14  ;;  %v3422_v18 = vpop.permute.xlu1 %680 }
 0x105   : > { %v679_v29 = vpop.permute.xlu0 %678  ;;  %1432 = vmatmul.mubr.bf16.gmra.mrb[24].mxu1 %v3254_v57 }
 0x106   : > { %v771_v56 = vsel %vm760_vm1, %v677_v50, %v679_v29  ;;  %958 = vrot.lane.b32.xlu1 %v3327_v54, %s2861_s20  ;;  %v772_v4 = vsel %vm760_vm1, %v679_v29, %v3422_v18  ;;  %1441 = vmatprep.mubr.bf16.mxu1 %v2862_v10 }
 0x107   : > { %956 = vrot.lane.b32.xlu0 %v3332_v9, %s2861_s20  ;;  %1533 = vmatprep.subr.bf16.mxu1 %v772_v4 }
 0x108   : > { %1534 = vmatpush1.bf16.msra.mxu1 %v771_v56  ;;  %v729_v7 = vpop.permute.xlu1 %728  ;;  %1369 = vmatmul.mubr.bf16.gmra.mrb[28].mxu0 %v3279_v25 }
 0x109   : > { %v727_v41 = vpop.permute.xlu0 %726  ;;  %1484 = vmatprep.mubr.bf16.mxu0 %v2862_v10 }
 0x10a   : > { %v794_v63 = vsel %vm760_vm1, %v3304_v47, %v727_v41  ;;  %962 = vrot.lane.b32.xlu1 %v3342_v60, %s2861_s20  ;;  %v795_v1 = vsel %vm760_vm1, %v727_v41, %v729_v7 }
 0x10b   : > { %960 = vrot.lane.b32.xlu0 %v3347_v61, %s2861_s20  ;;  %1462 = vmatprep.subr.bf16.mxu0 %v795_v1 }
 0x10c   : > { %1463 = vmatpush1.bf16.msra.mxu0 %v794_v63  ;;  %v3448_v26 = vpop.permute.xlu1 %732 }
 0x10d   : > { %v731_v32 = vpop.permute.xlu0 %730  ;;  %1442 = vmatmul.mubr.bf16.gmra.mrb[28].mxu1 %v3279_v25 }
 0x10e   : > { %v796_v47 = vsel %vm760_vm1, %v729_v7, %v731_v32  ;;  %486 = vrot.lane.b32.xlu1 %v3441_v3, %s2859_s18  ;;  %v797_v44 = vsel %vm760_vm1, %v731_v32, %v3448_v26  ;;  %1557 = vmatprep.mubr.bf16.mxu1 %v2862_v10 }
 0x10f   : > { %484 = vrot.lane.b32.xlu0 %v3446_v48, %s2859_s18  ;;  %1535 = vmatprep.subr.bf16.mxu1 %v797_v44 }
 0x110   : > { %1536 = vmatpush1.bf16.msra.mxu1 %v796_v47  ;;  %v891_v22 = vpop.permute.xlu1 %890 }
 0x111   : > { %v889_v19 = vpop.permute.xlu0 %888 }
 0x112   : > { %v983_v17 = vsel %vm974_vm2, %v3334_v15, %v889_v19  ;;  %490 = vrot.lane.b32.xlu1 %v3457_v34, %s2859_s18  ;;  %v984_v24 = vsel %vm974_vm2, %v889_v19, %v891_v22 }
 0x113   : > { %488 = vrot.lane.b32.xlu0 %v3463_v13, %s2859_s18  ;;  %1464 = vmatprep.subr.bf16.mxu0 %v984_v24 }
 0x114   : > { %1465 = vmatpush1.bf16.msra.mxu0 %v983_v17  ;;  %v3478_v39 = vpop.permute.xlu1 %894 }
 0x115   : > { %v893_v23 = vpop.permute.xlu0 %892 }
 0x116   : > { %v985_v15 = vsel %vm974_vm2, %v891_v22, %v893_v23  ;;  %538 = vrot.lane.b32.xlu1 %v3471_v28, %s2859_s18  ;;  %v986_v49 = vsel %vm974_vm2, %v893_v23, %v3478_v39 }
 0x117   : > { %536 = vrot.lane.b32.xlu0 %v3476_v38, %s2859_s18  ;;  %1537 = vmatprep.subr.bf16.mxu1 %v986_v49 }
 0x118   : > { %1538 = vmatpush1.bf16.msra.mxu1 %v985_v15  ;;  %v943_v50 = vpop.permute.xlu1 %942 }
 0x119   : > { %v941_v11 = vpop.permute.xlu0 %940 }
 0x11a   : > { %v1008_v14 = vsel %vm974_vm2, %v3356_v8, %v941_v11  ;;  %542 = vrot.lane.b32.xlu1 %v3486_v59, %s2859_s18  ;;  %v1009_v16 = vsel %vm974_vm2, %v941_v11, %v943_v50 }
 0x11b   : > { %540 = vrot.lane.b32.xlu0 %v3491_v55, %s2859_s18  ;;  %1466 = vmatprep.subr.bf16.mxu0 %v1009_v16  ;;  %v3585_v16 = vld [vmem:[%s2897_s17 + $0x134] ss:$104 sps:$4 sm:$0xff]  }
 0x11c   : > { %1467 = vmatpush1.bf16.msra.mxu0 %v1008_v14  ;;  %v3500_v29 = vpop.permute.xlu1 %946 }
 0x11d   : > { %v945_v56 = vpop.permute.xlu0 %944  ;;  %1598 = vmatprep.subr.bf16.mxu0 %v3141_v0 }
 0x11e   : > { %v1010_v4 = vsel %vm974_vm2, %v943_v50, %v945_v56  ;;  %700 = vrot.lane.b32.xlu1 %v3441_v3, %s2860_s19  ;;  %v1011_v8 = vsel %vm974_vm2, %v945_v56, %v3500_v29  ;;  %v3590_v56 = vld [vmem:[%s2897_s17 + $0x64] ss:$104 sps:$4 sm:$0xff]  }
 0x11f   : > { %698 = vrot.lane.b32.xlu0 %v3446_v48, %s2860_s19  ;;  %1539 = vmatprep.subr.bf16.mxu1 %v1011_v8 }
 0x120   : > { %1485 = vmatmul.mubr.bf16.vlgmr.msra.gmra.mrb[32].mxu0 %v3197_v46  ;;  %1540 = vmatpush1.bf16.msra.mxu1 %v1010_v4  ;;  %v471_v7 = vpop.permute.xlu1 %470 }
 0x121   : > { %1599 = vmatpush1.bf16.msra.mxu0 %v3034_v21  ;;  %v469_v41 = vpop.permute.xlu0 %468  ;;  %1671 = vmatprep.subr.bf16.mxu1 %v3152_v6 }
 0x122   : > { %704 = vrot.lane.b32.xlu1 %v3457_v34, %s2860_s19  ;;  %1600 = vmatprep.subr.bf16.mxu0 %v3167_v31  ;;  %v560_v6 = vsel %vm546_vm0, %v469_v41, %v471_v7 }
 0x123   : > { %702 = vrot.lane.b32.xlu0 %v3463_v13, %s2860_s19  ;;  %1558 = vmatmul.mubr.bf16.vlgmr.msra.gmra.mrb[32].mxu1 %v3197_v46 }
 0x124   : > { %1672 = vmatpush1.bf16.msra.mxu1 %v3135_v62  ;;  %v3520_v0 = vpop.permute.xlu1 %474  ;;  %1494 = vmatprep.mubr.bf16.mxu0 %v2862_v10  ;;  %v559_v62 = vsel %vm546_vm0, %v3376_v20, %v469_v41 }
 0x125   : > { %1601 = vmatpush1.bf16.msra.mxu0 %v3054_v27  ;;  %v473_v21 = vpop.permute.xlu0 %472  ;;  %1673 = vmatprep.subr.bf16.mxu1 %v3181_v37 }
 0x126   : > { %1602 = vmatprep.subr.bf16.mxu0 %v560_v6  ;;  %752 = vrot.lane.b32.xlu1 %v3471_v28, %s2860_s19  ;;  %v562_v31 = vsel %vm546_vm0, %v473_v21, %v3520_v0 }
 0x127   : > { %750 = vrot.lane.b32.xlu0 %v3476_v38, %s2860_s19  ;;  %1567 = vmatprep.mubr.bf16.mxu1 %v2862_v10 }
 0x128   : > { %1674 = vmatpush1.bf16.msra.mxu1 %v3162_v30  ;;  %v523_v27 = vpop.permute.xlu1 %522  ;;  %1495 = vmatmul.mubr.bf16.gmra.mrb[36].mxu0 %v3224_v2  ;;  %v561_v30 = vsel %vm546_vm0, %v471_v7, %v473_v21 }
 0x129   : > { %1603 = vmatpush1.bf16.msra.mxu0 %v559_v62  ;;  %1675 = vmatprep.subr.bf16.mxu1 %v562_v31  ;;  %v521_v37 = vpop.permute.xlu0 %520 }
 0x12a   : > { %v584_v63 = vsel %vm546_vm0, %v3402_v52, %v521_v37  ;;  %756 = vrot.lane.b32.xlu1 %v3486_v59, %s2860_s19  ;;  %v585_v1 = vsel %vm546_vm0, %v521_v37, %v523_v27  ;;  %1504 = vmatprep.mubr.bf16.mxu0 %v2862_v10 }
 0x12b   : > { %754 = vrot.lane.b32.xlu0 %v3491_v55, %s2860_s19  ;;  %1604 = vmatprep.subr.bf16.mxu0 %v585_v1 }
 0x12c   : > { %1676 = vmatpush1.bf16.msra.mxu1 %v561_v30  ;;  %v3546_v20 = vpop.permute.xlu1 %526  ;;  %v232_v30 = vld [vmem:[%s4049_s2] sm:$0xff] }
 0x12d   : > { %1605 = vmatpush1.bf16.msra.mxu0 %v584_v63  ;;  %v525_v32 = vpop.permute.xlu0 %524  ;;  %1568 = vmatmul.mubr.bf16.gmra.mrb[36].mxu1 %v3224_v2  ;;  %v233_v63 = vld [vmem:[%s4049_s2 + $0x8] sm:$0xff] }
 0x12e   : > { %v586_v52 = vsel %vm546_vm0, %v523_v27, %v525_v32  ;;  %914 = vrot.lane.b32.xlu1 %v3441_v3, %s2861_s20  ;;  %v587_v47 = vsel %vm546_vm0, %v525_v32, %v3546_v20  ;;  %1577 = vmatprep.mubr.bf16.mxu1 %v2862_v10 }
 0x12f   : > { %912 = vrot.lane.b32.xlu0 %v3446_v48, %s2861_s20  ;;  %1677 = vmatprep.subr.bf16.mxu1 %v587_v47 }
 0x130   : > { %1678 = vmatpush1.bf16.msra.mxu1 %v586_v52  ;;  %v685_v44 = vpop.permute.xlu1 %684  ;;  %1505 = vmatmul.mubr.bf16.gmra.mrb[40].mxu0 %v3254_v57 }
 0x131   : > { %v683_v22 = vpop.permute.xlu0 %682  ;;  %1514 = vmatprep.mubr.bf16.mxu0 %v2862_v10 }
 0x132   : > { %v773_v19 = vsel %vm760_vm1, %v3422_v18, %v683_v22  ;;  %918 = vrot.lane.b32.xlu1 %v3457_v34, %s2861_s20  ;;  %v774_v17 = vsel %vm760_vm1, %v683_v22, %v685_v44 }
 0x133   : > { %916 = vrot.lane.b32.xlu0 %v3463_v13, %s2861_s20  ;;  %1606 = vmatprep.subr.bf16.mxu0 %v774_v17 }
 0x134   : > { %1607 = vmatpush1.bf16.msra.mxu0 %v773_v19  ;;  %v3566_v24 = vpop.permute.xlu1 %688 }
 0x135   : > { %v687_v23 = vpop.permute.xlu0 %686  ;;  %1578 = vmatmul.mubr.bf16.gmra.mrb[40].mxu1 %v3254_v57 }
 0x136   : > { %v775_v15 = vsel %vm760_vm1, %v685_v44, %v687_v23  ;;  %966 = vrot.lane.b32.xlu1 %v3471_v28, %s2861_s20  ;;  %v776_v18 = vsel %vm760_vm1, %v687_v23, %v3566_v24  ;;  %1587 = vmatprep.mubr.bf16.mxu1 %v2862_v10 }
 0x137   : > { %964 = vrot.lane.b32.xlu0 %v3476_v38, %s2861_s20  ;;  %1679 = vmatprep.subr.bf16.mxu1 %v776_v18 }
 0x138   : > { %1680 = vmatpush1.bf16.msra.mxu1 %v775_v15  ;;  %v737_v49 = vpop.permute.xlu1 %736  ;;  %1515 = vmatmul.mubr.bf16.gmra.mrb[44].mxu0 %v3279_v25 }
 0x139   : > { %v735_v50 = vpop.permute.xlu0 %734  ;;  %1630 = vmatprep.mubr.bf16.mxu0 %v2862_v10 }
 0x13a   : > { %v798_v11 = vsel %vm760_vm1, %v3448_v26, %v735_v50  ;;  %970 = vrot.lane.b32.xlu1 %v3486_v59, %s2861_s20  ;;  %v799_v14 = vsel %vm760_vm1, %v735_v50, %v737_v49 }
 0x13b   : > { %968 = vrot.lane.b32.xlu0 %v3491_v55, %s2861_s20  ;;  %1608 = vmatprep.subr.bf16.mxu0 %v799_v14 }
 0x13c   : > { %1609 = vmatpush1.bf16.msra.mxu0 %v798_v11  ;;  %v3592_v4 = vpop.permute.xlu1 %740 }
 0x13d   : > { %v739_v8 = vpop.permute.xlu0 %738  ;;  %1588 = vmatmul.mubr.bf16.gmra.mrb[44].mxu1 %v3279_v25 }
 0x13e   : > { %v800_v26 = vsel %vm760_vm1, %v737_v49, %v739_v8  ;;  %544 = vrot.lane.b32.xlu1 %v3585_v16, %s2859_s18  ;;  %v801_v7 = vsel %vm760_vm1, %v739_v8, %v3592_v4  ;;  %1703 = vmatprep.mubr.bf16.mxu1 %v2862_v10 }
 0x13f   : > { %492 = vrot.lane.b32.xlu0 %v3590_v56, %s2859_s18  ;;  %1681 = vmatprep.subr.bf16.mxu1 %v801_v7  ;;  %s3958_s18 = scalar_lea.vmem %s4050_s3, %s2750_s16 }
 0x140   : > { %1682 = vmatpush1.bf16.msra.mxu1 %v800_v26  ;;  %v899_v41 = vpop.permute.xlu1 %898 }
 0x141   : > { %v897_v21 = vpop.permute.xlu0 %896 }
 0x142   : > { %v987_v6 = vsel %vm974_vm2, %v3478_v39, %v897_v21  ;;  %758 = vrot.lane.b32.xlu1 %v3585_v16, %s2860_s19  ;;  %v988_v62 = vsel %vm974_vm2, %v897_v21, %v899_v41 }
 0x143   : > { %706 = vrot.lane.b32.xlu0 %v3590_v56, %s2860_s19  ;;  %1610 = vmatprep.subr.bf16.mxu0 %v988_v62 }
 0x144   : > { %1611 = vmatpush1.bf16.msra.mxu0 %v987_v6  ;;  %v3610_v27 = vpop.permute.xlu1 %902 }
 0x145   : > { %v901_v31 = vpop.permute.xlu0 %900 }
 0x146   : > { %v989_v37 = vsel %vm974_vm2, %v899_v41, %v901_v31  ;;  %972 = vrot.lane.b32.xlu1 %v3585_v16, %s2861_s20  ;;  %v990_v39 = vsel %vm974_vm2, %v901_v31, %v3610_v27 }
 0x147   : > { %920 = vrot.lane.b32.xlu0 %v3590_v56, %s2861_s20  ;;  %1683 = vmatprep.subr.bf16.mxu1 %v990_v39 }
 0x148   : > { %1684 = vmatpush1.bf16.msra.mxu1 %v989_v37  ;;  %v951_v1 = vpop.permute.xlu1 %950 }
 0x149   : > { %v949_v32 = vpop.permute.xlu0 %948 }
 0x14a   : > { %v1012_v52 = vsel %vm974_vm2, %v3500_v29, %v949_v32  ;;  %v1013_v47 = vsel %vm974_vm2, %v949_v32, %v951_v1  ;;  %2272 = vperm.xlu1 %2764, %v233_v63  }
 0x14b   : > { %1612 = vmatprep.subr.bf16.mxu0 %v1013_v47  ;;  %2267 = vperm.xlu0 %2763, %v232_v30  }
 0x14c   : > { %1613 = vmatpush1.bf16.msra.mxu0 %v1012_v52  ;;  %v3628_v44 = vpop.permute.xlu1 %954 }
 0x14d   : > { %v953_v22 = vpop.permute.xlu0 %952  ;;  %1744 = vmatprep.subr.bf16.mxu0 %v3302_v45 }
 0x14e   : > { %v1014_v19 = vsel %vm974_vm2, %v951_v1, %v953_v22  ;;  %v1015_v17 = vsel %vm974_vm2, %v953_v22, %v3628_v44 }
 0x14f   : > { %1685 = vmatprep.subr.bf16.mxu1 %v1015_v17  ;;  %1631 = vmatmul.mubr.bf16.vlgmr.msra.gmra.mrb[48].mxu0 %v3197_v46 }
 0x150   : > { %1686 = vmatpush1.bf16.msra.mxu1 %v1014_v19  ;;  %1745 = vmatpush1.bf16.msra.mxu0 %v3147_v5  ;;  %v479_v29 = vpop.permute.xlu1 %478 }
 0x151   : > { %v477_v23 = vpop.permute.xlu0 %476  ;;  %1746 = vmatprep.subr.bf16.mxu0 %v3332_v9  ;;  %1817 = vmatprep.subr.bf16.mxu1 %v3319_v12 }
 0x152   : > { %1640 = vmatprep.mubr.bf16.mxu0 %v2862_v10  ;;  %v564_v15 = vsel %vm546_vm0, %v477_v23, %v479_v29  ;;  %v563_v5 = vsel %vm546_vm0, %v3520_v0, %v477_v23 }
 0x153   : > { %1704 = vmatmul.mubr.bf16.vlgmr.msra.gmra.mrb[48].mxu1 %v3197_v46 }
 0x154   : > { %1747 = vmatpush1.bf16.msra.mxu0 %v3176_v36  ;;  %1818 = vmatpush1.bf16.msra.mxu1 %v3296_v42  ;;  %v3642_v45 = vpop.permute.xlu1 %482 }
 0x155   : > { %v481_v18 = vpop.permute.xlu0 %480  ;;  %1748 = vmatprep.subr.bf16.mxu0 %v564_v15  ;;  %1819 = vmatprep.subr.bf16.mxu1 %v3347_v61 }
 0x156   : > { %1713 = vmatprep.mubr.bf16.mxu1 %v2862_v10  ;;  %v566_v42 = vsel %vm546_vm0, %v481_v18, %v3642_v45  ;;  %v565_v0 = vsel %vm546_vm0, %v479_v29, %v481_v18 }
 0x157   : > { %1641 = vmatmul.mubr.bf16.gmra.mrb[52].mxu0 %v3224_v2 }
 0x158   : > { %1749 = vmatpush1.bf16.msra.mxu0 %v563_v5  ;;  %1820 = vmatpush1.bf16.msra.mxu1 %v3327_v54  ;;  %v531_v36 = vpop.permute.xlu1 %530 }
 0x159   : > { %1821 = vmatprep.subr.bf16.mxu1 %v566_v42  ;;  %v529_v12 = vpop.permute.xlu0 %528  ;;  %1650 = vmatprep.mubr.bf16.mxu0 %v2862_v10 }
 0x15a   : > { %v588_v9 = vsel %vm546_vm0, %v3546_v20, %v529_v12  ;;  %v589_v61 = vsel %vm546_vm0, %v529_v12, %v531_v36 }
 0x15b   : > { %1750 = vmatprep.subr.bf16.mxu0 %v589_v61  ;;  %1714 = vmatmul.mubr.bf16.gmra.mrb[52].mxu1 %v3224_v2 }
 0x15c   : > { %1751 = vmatpush1.bf16.msra.mxu0 %v588_v9  ;;  %1822 = vmatpush1.bf16.msra.mxu1 %v565_v0  ;;  %v3659_v54 = vpop.permute.xlu1 %534 }
 0x15d   : > { %v533_v49 = vpop.permute.xlu0 %532  ;;  %1723 = vmatprep.mubr.bf16.mxu1 %v2862_v10 }
 0x15e   : > { %v590_v50 = vsel %vm546_vm0, %v531_v36, %v533_v49  ;;  %v591_v11 = vsel %vm546_vm0, %v533_v49, %v3659_v54 }
 0x15f   : > { %1823 = vmatprep.subr.bf16.mxu1 %v591_v11  ;;  %1651 = vmatmul.mubr.bf16.gmra.mrb[56].mxu0 %v3254_v57 }
 0x160   : > { %1824 = vmatpush1.bf16.msra.mxu1 %v590_v50  ;;  %v693_v20 = vpop.permute.xlu1 %692  ;;  %1660 = vmatprep.mubr.bf16.mxu0 %v2862_v10 }
 0x161   : > { %v691_v14 = vpop.permute.xlu0 %690 }
 0x162   : > { %v777_v8 = vsel %vm760_vm1, %v3566_v24, %v691_v14  ;;  %v778_v26 = vsel %vm760_vm1, %v691_v14, %v693_v20 }
 0x163   : > { %1752 = vmatprep.subr.bf16.mxu0 %v778_v26  ;;  %1724 = vmatmul.mubr.bf16.gmra.mrb[56].mxu1 %v3254_v57 }
 0x164   : > { %1753 = vmatpush1.bf16.msra.mxu0 %v777_v8  ;;  %v3671_v7 = vpop.permute.xlu1 %696  ;;  %1733 = vmatprep.mubr.bf16.mxu1 %v2862_v10 }
 0x165   : > { %v695_v41 = vpop.permute.xlu0 %694 }
 0x166   : > { %v779_v21 = vsel %vm760_vm1, %v693_v20, %v695_v41  ;;  %v780_v6 = vsel %vm760_vm1, %v695_v41, %v3671_v7 }
 0x167   : > { %1825 = vmatprep.subr.bf16.mxu1 %v780_v6  ;;  %1661 = vmatmul.mubr.bf16.gmra.mrb[60].mxu0 %v3279_v25 }
 0x168   : > { %1826 = vmatpush1.bf16.msra.mxu1 %v779_v21  ;;  %v745_v24 = vpop.permute.xlu1 %744  ;;  %1776 = vmatprep.mubr.bf16.mxu0 %v2862_v10 }
 0x169   : > { %v743_v62 = vpop.permute.xlu0 %742 }
 0x16a   : > { %v802_v31 = vsel %vm760_vm1, %v3592_v4, %v743_v62  ;;  %v803_v37 = vsel %vm760_vm1, %v743_v62, %v745_v24 }
 0x16b   : > { %1754 = vmatprep.subr.bf16.mxu0 %v803_v37  ;;  %1734 = vmatmul.mubr.bf16.gmra.mrb[60].mxu1 %v3279_v25 }
 0x16c   : > { %1755 = vmatpush1.bf16.msra.mxu0 %v802_v31  ;;  %v3683_v39 = vpop.permute.xlu1 %748  ;;  %1849 = vmatprep.mubr.bf16.mxu1 %v2862_v10 }
 0x16d   : > { %v747_v63 = vpop.permute.xlu0 %746 }
 0x16e   : > { %v804_v1 = vsel %vm760_vm1, %v745_v24, %v747_v63  ;;  %v805_v30 = vsel %vm760_vm1, %v747_v63, %v3683_v39 }
 0x16f   : > { %1827 = vmatprep.subr.bf16.mxu1 %v805_v30 }
 0x170   : > { %1828 = vmatpush1.bf16.msra.mxu1 %v804_v1  ;;  %v907_v32 = vpop.permute.xlu1 %906 }
 0x171   : > { %v905_v4 = vpop.permute.xlu0 %904 }
 0x172   : > { %v991_v52 = vsel %vm974_vm2, %v3610_v27, %v905_v4  ;;  %v992_v47 = vsel %vm974_vm2, %v905_v4, %v907_v32 }
 0x173   : > { %1756 = vmatprep.subr.bf16.mxu0 %v992_v47 }
 0x174   : > { %1757 = vmatpush1.bf16.msra.mxu0 %v991_v52  ;;  %v3692_v22 = vpop.permute.xlu1 %910 }
 0x175   : > { %v909_v19 = vpop.permute.xlu0 %908 }
 0x176   : > { %v993_v17 = vsel %vm974_vm2, %v907_v32, %v909_v19  ;;  %v994_v29 = vsel %vm974_vm2, %v909_v19, %v3692_v22 }
 0x177   : > { %1829 = vmatprep.subr.bf16.mxu1 %v994_v29 }
 0x178   : > { %1830 = vmatpush1.bf16.msra.mxu1 %v993_v17  ;;  %v959_v23 = vpop.permute.xlu1 %958 }
 0x179   : > { %v957_v15 = vpop.permute.xlu0 %956 }
 0x17a   : > { %v1016_v18 = vsel %vm974_vm2, %v3628_v44, %v957_v15  ;;  %v1017_v27 = vsel %vm974_vm2, %v957_v15, %v959_v23 }
 0x17b   : > { %1758 = vmatprep.subr.bf16.mxu0 %v1017_v27 }
 0x17c   : > { %1759 = vmatpush1.bf16.msra.mxu0 %v1016_v18  ;;  %v3700_v5 = vpop.permute.xlu1 %962 }
 0x17d   : > { %v961_v36 = vpop.permute.xlu0 %960  ;;  %1890 = vmatprep.subr.bf16.mxu0 %v3446_v48 }
 0x17e   : > { %v1018_v42 = vsel %vm974_vm2, %v959_v23, %v961_v36  ;;  %v1019_v12 = vsel %vm974_vm2, %v961_v36, %v3700_v5 }
 0x17f   : > { %1777 = vmatmul.mubr.bf16.vlgmr.msra.gmra.mrb[64].mxu0 %v3197_v46  ;;  %1831 = vmatprep.subr.bf16.mxu1 %v1019_v12 }
 0x180   : > { %1832 = vmatpush1.bf16.msra.mxu1 %v1018_v42  ;;  %1891 = vmatpush1.bf16.msra.mxu0 %v3313_v51  ;;  %v487_v44 = vpop.permute.xlu1 %486 }
 0x181   : > { %v485_v9 = vpop.permute.xlu0 %484  ;;  %1892 = vmatprep.subr.bf16.mxu0 %v3476_v38  ;;  %1963 = vmatprep.subr.bf16.mxu1 %v3463_v13 }
 0x182   : > { %1786 = vmatprep.mubr.bf16.mxu0 %v2862_v10  ;;  %v568_v61 = vsel %vm546_vm0, %v485_v9, %v487_v44  ;;  %v567_v51 = vsel %vm546_vm0, %v3642_v45, %v485_v9 }
 0x183   : > { %1850 = vmatmul.mubr.bf16.vlgmr.msra.gmra.mrb[64].mxu1 %v3197_v46 }
 0x184   : > { %1893 = vmatpush1.bf16.msra.mxu0 %v3342_v60  ;;  %1964 = vmatpush1.bf16.msra.mxu1 %v3441_v3  ;;  %v3714_v48 = vpop.permute.xlu1 %490 }
 0x185   : > { %v489_v0 = vpop.permute.xlu0 %488  ;;  %1894 = vmatprep.subr.bf16.mxu0 %v568_v61  ;;  %1965 = vmatprep.subr.bf16.mxu1 %v3491_v55 }
 0x186   : > { %1859 = vmatprep.mubr.bf16.mxu1 %v2862_v10  ;;  %v570_v60 = vsel %vm546_vm0, %v489_v0, %v3714_v48  ;;  %v569_v55 = vsel %vm546_vm0, %v487_v44, %v489_v0 }
 0x187   : > { %1787 = vmatmul.mubr.bf16.gmra.mrb[68].mxu0 %v3224_v2 }
 0x188   : > { %1895 = vmatpush1.bf16.msra.mxu0 %v567_v51  ;;  %1966 = vmatpush1.bf16.msra.mxu1 %v3471_v28  ;;  %v539_v46 = vpop.permute.xlu1 %538 }
 0x189   : > { %1967 = vmatprep.subr.bf16.mxu1 %v570_v60  ;;  %v537_v3 = vpop.permute.xlu0 %536  ;;  %1796 = vmatprep.mubr.bf16.mxu0 %v2862_v10 }
 0x18a   : > { %v592_v13 = vsel %vm546_vm0, %v3659_v54, %v537_v3  ;;  %v593_v38 = vsel %vm546_vm0, %v537_v3, %v539_v46 }
 0x18b   : > { %1860 = vmatmul.mubr.bf16.gmra.mrb[68].mxu1 %v3224_v2  ;;  %1896 = vmatprep.subr.bf16.mxu0 %v593_v38 }
 0x18c   : > { %1897 = vmatpush1.bf16.msra.mxu0 %v592_v13  ;;  %1968 = vmatpush1.bf16.msra.mxu1 %v569_v55  ;;  %v3731_v28 = vpop.permute.xlu1 %542 }
 0x18d   : > { %v541_v45 = vpop.permute.xlu0 %540  ;;  %1869 = vmatprep.mubr.bf16.mxu1 %v2862_v10 }
 0x18e   : > { %v594_v49 = vsel %vm546_vm0, %v539_v46, %v541_v45  ;;  %v595_v50 = vsel %vm546_vm0, %v541_v45, %v3731_v28 }
 0x18f   : > { %1797 = vmatmul.mubr.bf16.gmra.mrb[72].mxu0 %v3254_v57  ;;  %1969 = vmatprep.subr.bf16.mxu1 %v595_v50 }
 0x190   : > { %1970 = vmatpush1.bf16.msra.mxu1 %v594_v49  ;;  %v701_v54 = vpop.permute.xlu1 %700  ;;  %1806 = vmatprep.mubr.bf16.mxu0 %v2862_v10 }
 0x191   : > { %v699_v2 = vpop.permute.xlu0 %698 }
 0x192   : > { %v781_v11 = vsel %vm760_vm1, %v3671_v7, %v699_v2  ;;  %v782_v20 = vsel %vm760_vm1, %v699_v2, %v701_v54 }
 0x193   : > { %1870 = vmatmul.mubr.bf16.gmra.mrb[72].mxu1 %v3254_v57  ;;  %1898 = vmatprep.subr.bf16.mxu0 %v782_v20 }
 0x194   : > { %1899 = vmatpush1.bf16.msra.mxu0 %v781_v11  ;;  %v3743_v14 = vpop.permute.xlu1 %704  ;;  %1879 = vmatprep.mubr.bf16.mxu1 %v2862_v10  ;;  %v3746_v8 = vpop.f32.mrb[0].mxu0 }
 0x195   : > { %v703_v26 = vpop.permute.xlu0 %702  ;;  %v3748_v41 = vpop.f32.mrb[1].mxu0 }
 0x196   : > { %v783_v21 = vsel %vm760_vm1, %v701_v54, %v703_v26  ;;  %v784_v7 = vsel %vm760_vm1, %v703_v26, %v3743_v14  ;;  %v3753_v6 = vpop.f32.mrb[0].mxu1  ;;  %v3755_v24 = vpop.f32.mrb[2].mxu0 }
 0x197   : > { %1807 = vmatmul.mubr.bf16.gmra.mrb[76].mxu0 %v3279_v25  ;;  %1971 = vmatprep.subr.bf16.mxu1 %v784_v7  ;;  %v3758_v57 = vpop.f32.mrb[1].mxu1  ;;  %v3760_v62 = vpop.f32.mrb[3].mxu0 }
 0x198   : > { %1972 = vmatpush1.bf16.msra.mxu1 %v783_v21  ;;  %v753_v31 = vpop.permute.xlu1 %752  ;;  %1922 = vmatprep.mubr.bf16.mxu0 %v2862_v10  ;;  %v3763_v37 = vpop.f32.mrb[2].mxu1 }
 0x199   : > { %v751_v63 = vpop.permute.xlu0 %750  ;;  %v3765_v1 = vpop.f32.mrb[3].mxu1 }
 0x19a   : > { %v806_v30 = vsel %vm760_vm1, %v3683_v39, %v751_v63  ;;  %v807_v32 = vsel %vm760_vm1, %v751_v63, %v753_v31 }
 0x19b   : > { %1880 = vmatmul.mubr.bf16.gmra.mrb[76].mxu1 %v3279_v25  ;;  %1900 = vmatprep.subr.bf16.mxu0 %v807_v32 }
 0x19c   : > { %1901 = vmatpush1.bf16.msra.mxu0 %v806_v30  ;;  %v3771_v4 = vpop.permute.xlu1 %756  ;;  %1995 = vmatprep.mubr.bf16.mxu1 %v2862_v10  ;;  %v1204_v52 = vpop.f32.mrb[4].mxu0 }
 0x19d   : > { %v755_v47 = vpop.permute.xlu0 %754  ;;  %v2109_v19 = vmax.f32 %v3746_v8, %v1204_v52  ;;  %v3775_v17 = vpop.f32.mrb[5].mxu0 }
 0x19e   : > { %v808_v29 = vsel %vm760_vm1, %v753_v31, %v755_v47  ;;  %v809_v39 = vsel %vm760_vm1, %v755_v47, %v3771_v4  ;;  %v2110_v25 = vmax.f32 %v3748_v41, %v3775_v17  ;;  %v3782_v23 = vpop.f32.mrb[6].mxu0 }
 0x19f   : > { %1973 = vmatprep.subr.bf16.mxu1 %v809_v39  ;;  %v2135_v15 = vmax.f32 %v3755_v24, %v3782_v23  ;;  %v3786_v18 = vpop.f32.mrb[7].mxu0  ;;  %v3826_v39 = vld [vmem:[%s4048_s1] sm:$0xff]  }
 0x1a0   : > { %1974 = vmatpush1.bf16.msra.mxu1 %v808_v29  ;;  %v915_v27 = vpop.permute.xlu1 %914  ;;  %v3788_v36 = vpop.f32.mrb[4].mxu1  ;;  %v2136_v42 = vmax.f32 %v3760_v62, %v3786_v18  ;;  %v3892_v18 = vld [vmem:[%s4048_s1 + $0x10] sm:$0xff]  }
 0x1a1   : > { %v913_v12 = vpop.permute.xlu0 %912  ;;  %v2111_v44 = vmax.f32 %v3753_v6, %v3788_v36  ;;  %v3794_v9 = vpop.f32.mrb[5].mxu1 }
 0x1a2   : > { %v995_v61 = vsel %vm974_vm2, %v3692_v22, %v913_v12  ;;  %v996_v0 = vsel %vm974_vm2, %v913_v12, %v915_v27  ;;  %v2112_v51 = vmax.f32 %v3758_v57, %v3794_v9  ;;  %v3801_v46 = vpop.f32.mrb[6].mxu1  ;;  %v3874_v57 = vld [vmem:[%s4048_s1 + $0x8] sm:$0xff]  }
 0x1a3   : > { %1902 = vmatprep.subr.bf16.mxu0 %v996_v0  ;;  %v2137_v60 = vmax.f32 %v3763_v37, %v3801_v46  ;;  %v3805_v3 = vpop.f32.mrb[7].mxu1 }
 0x1a4   : > { %1903 = vmatpush1.bf16.msra.mxu0 %v995_v61  ;;  %v3807_v13 = vpop.permute.xlu1 %918  ;;  %v2138_v38 = vmax.f32 %v3765_v1, %v3805_v3  ;;  %v1214_v22 = vpop.f32.mrb[8].mxu0 }
 0x1a5   : > { %v917_v55 = vpop.permute.xlu0 %916  ;;  %v1216_v45 = vpop.f32.mrb[9].mxu0 }
 0x1a6   : > { %v997_v49 = vsel %vm974_vm2, %v915_v27, %v917_v55  ;;  %v998_v50 = vsel %vm974_vm2, %v917_v55, %v3807_v13  ;;  %v1218_v54 = vpop.f32.mrb[10].mxu0 }
 0x1a7   : > { %1975 = vmatprep.subr.bf16.mxu1 %v998_v50  ;;  %v1220_v2 = vpop.f32.mrb[11].mxu0 }
 0x1a8   : > { %1976 = vmatpush1.bf16.msra.mxu1 %v997_v49  ;;  %v967_v11 = vpop.permute.xlu1 %966  ;;  %v1287_v20 = vpop.f32.mrb[8].mxu1 }
 0x1a9   : > { %v965_v8 = vpop.permute.xlu0 %964  ;;  %v1289_v26 = vpop.f32.mrb[9].mxu1 }
 0x1aa   : > { %v1020_v41 = vsel %vm974_vm2, %v3700_v5, %v965_v8  ;;  %v1021_v21 = vsel %vm974_vm2, %v965_v8, %v967_v11  ;;  %v1291_v7 = vpop.f32.mrb[10].mxu1 }
 0x1ab   : > { %1904 = vmatprep.subr.bf16.mxu0 %v1021_v21  ;;  %v1293_v6 = vpop.f32.mrb[11].mxu1 }
 0x1ac   : > { %1905 = vmatpush1.bf16.msra.mxu0 %v1020_v41  ;;  %v3817_v31 = vpop.permute.xlu1 %970  ;;  %v1224_v63 = vpop.f32.mrb[12].mxu0 }
 0x1ad   : > { %v969_v30 = vpop.permute.xlu0 %968  ;;  %2036 = vmatprep.subr.bf16.mxu0 %v3590_v56  ;;  %v2161_v32 = vmax.f32 %v1214_v22, %v1224_v63  ;;  %v1226_v52 = vpop.f32.mrb[13].mxu0 }
 0x1ae   : > { %v1022_v47 = vsel %vm974_vm2, %v967_v11, %v969_v30  ;;  %v1023_v17 = vsel %vm974_vm2, %v969_v30, %v3817_v31  ;;  %v2162_v5 = vmax.f32 %v1216_v45, %v1226_v52  ;;  %v1228_v29 = vpop.f32.mrb[14].mxu0 }
 0x1af   : > { %1923 = vmatmul.mubr.bf16.vlgmr.msra.gmra.mrb[80].mxu0 %v3826_v39  ;;  %1977 = vmatprep.subr.bf16.mxu1 %v1023_v17  ;;  %v3829_v27 = vmax.f32 %v2109_v19, %v2161_v32  ;;  %v2187_v36 = vmax.f32 %v1218_v54, %v1228_v29  ;;  %v1230_v12 = vpop.f32.mrb[15].mxu0 }
 0x1b0   : > { %1978 = vmatpush1.bf16.msra.mxu1 %v1022_v47  ;;  %2037 = vmatpush1.bf16.msra.mxu0 %v3457_v34  ;;  %v1297_v61 = vpop.f32.mrb[12].mxu1  ;;  %v3832_v0 = vmax.f32 %v2110_v25, %v2162_v5  ;;  %v2188_v22 = vmax.f32 %v1220_v2, %v1230_v12 }
 0x1b1   : > { %v493_v55 = vpop.permute.xlu0 %492  ;;  %2733 = vmatprep.subr.bf16.mxu1 %v3590_v56  ;;  %2038 = vmatprep.subr.bf16.mxu0 %v3585_v16  ;;  %v2163_v45 = vmax.f32 %v1287_v20, %v1297_v61  ;;  %v1299_v49 = vpop.f32.mrb[13].mxu1  ;;  %v3840_v50 = vmax.f32 %v2135_v15, %v2187_v36 }
 0x1b2   : > { %1932 = vmatprep.mubr.bf16.mxu0 %v2862_v10  ;;  %v2164_v19 = vmax.f32 %v1289_v26, %v1299_v49  ;;  %v1301_v54 = vpop.f32.mrb[14].mxu1  ;;  %v3848_v56 = vmax.f32 %v2136_v42, %v2188_v22  ;;  %v650_v24 = vsel %vm546_vm0, %v493_v55, %v3071_v35 }
 0x1b3   : > { %1996 = vmatmul.mubr.bf16.vlgmr.msra.gmra.mrb[80].mxu1 %v3826_v39  ;;  %v3843_v25 = vmax.f32 %v2111_v44, %v2163_v45  ;;  %v2189_v2 = vmax.f32 %v1291_v7, %v1301_v54  ;;  %v1303_v11 = vpop.f32.mrb[15].mxu1  ;;  %v545_v44 = vpop.permute.xlu1 %544 }
 0x1b4   : > { %2741 = vmatpush1.bf16.msra.mxu1 %v3457_v34  ;;  %2039 = vmatpush1.bf16.msra.mxu0 %v3486_v59  ;;  %v3857_v23 = vmax.f32 %v2112_v51, %v2164_v19  ;;  %v2190_v15 = vmax.f32 %v1293_v6, %v1303_v11  ;;  %v571_v34 = vsel %vm546_vm0, %v3714_v48, %v493_v55 }
 0x1b5   : > { %2040 = vmatprep.subr.bf16.mxu0 %v650_v24  ;;  %2734 = vmatprep.subr.bf16.mxu1 %v3585_v16  ;;  %v3863_v62 = vmax.f32 %v2137_v60, %v2189_v2  ;;  %v654_v16 = vsel %vm546_vm0, %v545_v44, %v3084_v40  ;;  %v707_v37 = vpop.permute.xlu0 %706  ;;  %v596_v48 = vsel %vm546_vm0, %v3731_v28, %v545_v44 }
 0x1b6   : > { %2005 = vmatprep.mubr.bf16.mxu1 %v2862_v10  ;;  %v2242_v35 = vmax.f32 %v2138_v38, %v2190_v15  ;;  %v864_v1 = vsel %vm760_vm1, %v707_v37, %v3111_v53  ;;  %v785_v40 = vsel %vm760_vm1, %v3743_v14, %v707_v37 }
 0x1b7   : > { %1933 = vmatmul.mubr.bf16.gmra.mrb[84].mxu0 %v3874_v57 }
 0x1b8   : > { %2742 = vmatpush1.bf16.msra.mxu1 %v3486_v59  ;;  %2041 = vmatpush1.bf16.msra.mxu0 %v571_v34  ;;  %v759_v59 = vpop.permute.xlu1 %758 }
 0x1b9   : > { %2735 = vmatprep.subr.bf16.mxu1 %v650_v24  ;;  %2042 = vmatprep.subr.bf16.mxu0 %v654_v16  ;;  %v868_v53 = vsel %vm760_vm1, %v759_v59, %v3124_v58  ;;  %v921_v28 = vpop.permute.xlu0 %920  ;;  %v810_v14 = vsel %vm760_vm1, %v3771_v4, %v759_v59 }
 0x1ba   : > { %1942 = vmatprep.mubr.bf16.mxu0 %v2862_v10  ;;  %v1078_v9 = vsel %vm974_vm2, %v921_v28, %v3169_v33  ;;  %v999_v3 = vsel %vm974_vm2, %v3807_v13, %v921_v28  ;;  %v3919_v33 = vld [vmem:[%s4048_s1 + $0x18] sm:$0xff]  }
 0x1bb   : > { %2006 = vmatmul.mubr.bf16.gmra.mrb[84].mxu1 %v3874_v57 }
 0x1bc   : > { %2743 = vmatpush1.bf16.msra.mxu1 %v571_v34  ;;  %2043 = vmatpush1.bf16.msra.mxu0 %v596_v48  ;;  %v973_v58 = vpop.permute.xlu1 %972 }
 0x1bd   : > { %2736 = vmatprep.subr.bf16.mxu1 %v654_v16  ;;  %2044 = vmatprep.subr.bf16.mxu0 %v864_v1  ;;  %v1082_v20 = vsel %vm974_vm2, %v973_v58, %v3188_v43  ;;  %v1024_v26 = vsel %vm974_vm2, %v3817_v31, %v973_v58 }
 0x1be   : > { %2015 = vmatprep.mubr.bf16.mxu1 %v2862_v10 }
 0x1bf   : > { %1943 = vmatmul.mubr.bf16.gmra.mrb[88].mxu0 %v3892_v18 }
 0x1c0   : > { %2744 = vmatpush1.bf16.msra.mxu1 %v596_v48  ;;  %2045 = vmatpush1.bf16.msra.mxu0 %v785_v40 }
 0x1c1   : > { %2737 = vmatprep.subr.bf16.mxu1 %v864_v1  ;;  %2046 = vmatprep.subr.bf16.mxu0 %v868_v53 }
 0x1c2   : > { %1952 = vmatprep.mubr.bf16.mxu0 %v2862_v10 }
 0x1c3   : > { %2016 = vmatmul.mubr.bf16.gmra.mrb[88].mxu1 %v3892_v18  ;;  %v3901_v42 = vpop.f32.mrb[16].mxu0 }
 0x1c4   : > { %2745 = vmatpush1.bf16.msra.mxu1 %v785_v40  ;;  %2047 = vmatpush1.bf16.msra.mxu0 %v810_v14  ;;  %v3905_v51 = vpop.f32.mrb[17].mxu0 }
 0x1c5   : > { %2738 = vmatprep.subr.bf16.mxu1 %v868_v53  ;;  %2048 = vmatprep.subr.bf16.mxu0 %v1078_v9  ;;  %v3907_v46 = vpop.f32.mrb[18].mxu0 }
 0x1c6   : > { %2025 = vmatprep.mubr.bf16.mxu1 %v2862_v10  ;;  %v3910_v4 = vpop.f32.mrb[16].mxu1  ;;  %v3912_v60 = vpop.f32.mrb[19].mxu0 }
 0x1c7   : > { %1953 = vmatmul.mubr.bf16.gmra.mrb[92].mxu0 %v3919_v33  ;;  %v3922_v38 = vpop.f32.mrb[17].mxu1 }
 0x1c8   : > { %2746 = vmatpush1.bf16.msra.mxu1 %v810_v14  ;;  %2049 = vmatpush1.bf16.msra.mxu0 %v999_v3  ;;  %v3926_v8 = vpop.f32.mrb[18].mxu1 }
 0x1c9   : > { %2739 = vmatprep.subr.bf16.mxu1 %v1078_v9  ;;  %2050 = vmatprep.subr.bf16.mxu0 %v1082_v20  ;;  %v3931_v13 = vpop.permute.xlu1 %2272  ;;  %v3933_v41 = vpop.f32.mrb[19].mxu1 }
 0x1ca   : > { %2068 = vmatprep.mubr.bf16.mxu0 %v2862_v10  ;;  %v2301_v21 = vadd.f32 %v3931_v13, %v3840_v50  ;;  %v2302_v43 = vadd.f32 %v3931_v13, %v3848_v56  ;;  %v2303_v7 = vadd.f32 %v3931_v13, %v3863_v62  ;;  %v2304_v6 = vadd.f32 %v3931_v13, %v2242_v35  ;;  %v3943_v31 = vpop.permute.xlu0 %2267 }
 0x1cb   : > { %2026 = vmatmul.mubr.bf16.gmra.mrb[92].mxu1 %v3919_v33  ;;  %v2275_v63 = vadd.f32 %v3943_v31, %v3829_v27  ;;  %v2276_v30 = vadd.f32 %v3943_v31, %v3832_v0  ;;  %v2277_v32 = vadd.f32 %v3943_v31, %v3843_v25  ;;  %v2278_v52 = vadd.f32 %v3943_v31, %v3857_v23  ;;  %v1350_v47 = vpop.f32.mrb[20].mxu0 }
 0x1cc   : > { %2747 = vmatpush1.bf16.msra.mxu1 %v999_v3  ;;  %2051 = vmatpush1.bf16.msra.mxu0 %v1024_v26  ;;  %v2353_v17 = vmax.f32 %v2301_v21, 0.0  ;;  %v2354_v5 = vmax.f32 %v2302_v43, 0.0  ;;  %v2355_v29 = vmax.f32 %v2303_v7, 0.0  ;;  %v2356_v36 = vmax.f32 %v2304_v6, 0.0  ;;  %v1352_v12 = vpop.f32.mrb[21].mxu0 }
 0x1cd   : > { %2740 = vmatprep.subr.bf16.mxu1 %v1082_v20  ;;  %2088 = vmatprep.mubr.bf16.mxu1 %v2862_v10  ;;  %v2327_v27 = vmax.f32 %v2275_v63, 0.0  ;;  %v2328_v61 = vmax.f32 %v2276_v30, 0.0  ;;  %v2329_v0 = vmax.f32 %v2277_v32, 0.0  ;;  %v2330_v22 = vmax.f32 %v2278_v52, 0.0  ;;  %v1354_v55 = vpop.f32.mrb[22].mxu0 }
 0x1ce   : > { %v2720_v45 = vpack.c.bf16 %v2354_v5, %v2353_v17  ;;  %v2721_v49 = vpack.c.bf16 %v2356_v36, %v2355_v29  ;;  %v2113_v19 = vmax.f32 %v3901_v42, %v1350_v47  ;;  %v2114_v50 = vmax.f32 %v3905_v51, %v1352_v12  ;;  %v1356_v54 = vpop.f32.mrb[23].mxu0 }
 0x1cf   : > { %2069 = vmatmul.mubr.bf16.vlgmr.msra.gmra.mrb[96].mxu0 %v3826_v39  ;;  %v2707_v25 = vpack.c.bf16 %v2328_v61, %v2327_v27  ;;  %v2708_v2 = vpack.c.bf16 %v2330_v22, %v2329_v0  ;;  %v2139_v56 = vmax.f32 %v3907_v46, %v1354_v55  ;;  %v2140_v11 = vmax.f32 %v3912_v60, %v1356_v54 }
 0x1d0   : > { %2748 = vmatpush1.bf16.msra.mxu1 %v1024_v26  ;;  %2078 = vmatprep.mubr.bf16.mxu0 %v2862_v10  ;;  %2548 = vst [vmem:[%s3958_s18 + $0x68] sm:$0xff] %v2720_v45  ;;  %2549 = vst [vmem:[%s3958_s18 + $0x70] sm:$0xff] %v2721_v49  ;;  %v1423_v24 = vpop.f32.mrb[20].mxu1 }
 0x1d1   : > { %2535 = vst [vmem:[%s3958_s18] sm:$0xff] %v2707_v25  ;;  %2536 = vst [vmem:[%s3958_s18 + $0x8] sm:$0xff] %v2708_v2  ;;  %v2115_v23 = vmax.f32 %v3910_v4, %v1423_v24  ;;  %v1425_v15 = vpop.f32.mrb[21].mxu1 }
 0x1d2   : > { %v2116_v44 = vmax.f32 %v3922_v38, %v1425_v15  ;;  %v1427_v39 = vpop.f32.mrb[22].mxu1 }
 0x1d3   : > { %2089 = vmatmul.mubr.bf16.vlgmr.msra.gmra.mrb[96].mxu1 %v3892_v18  ;;  %v2141_v62 = vmax.f32 %v3926_v8, %v1427_v39  ;;  %v1429_v35 = vpop.f32.mrb[23].mxu1  ;;  %v1360_v34 = vpop.f32.mrb[24].mxu0 }
 0x1d4   : > { %2098 = vmatprep.mubr.bf16.mxu1 %v2862_v10  ;;  %v2142_v16 = vmax.f32 %v3933_v41, %v1429_v35  ;;  %v1362_v37 = vpop.f32.mrb[25].mxu0 }
 0x1d5   : > { %v1364_v48 = vpop.f32.mrb[26].mxu0 }
 0x1d6   : > { %v1366_v1 = vpop.f32.mrb[27].mxu0 }
 0x1d7   : > { %2079 = vmatmul.mubr.bf16.gmra.mrb[100].mxu0 %v3874_v57 }
 0x1d8   : > { %v1433_v59 = vpop.f32.mrb[24].mxu1 }
 0x1d9   : > { %v1435_v40 = vpop.f32.mrb[25].mxu1 }
 0x1da   : > { %v1437_v53 = vpop.f32.mrb[26].mxu1 }
 0x1db   : > { %2099 = vmatmul.mubr.bf16.gmra.mrb[100].mxu1 %v3919_v33  ;;  %v1439_v28 = vpop.f32.mrb[27].mxu1  ;;  %v1370_v18 = vpop.f32.mrb[28].mxu0 }
 0x1dc   : > { %v2165_v14 = vmax.f32 %v1360_v34, %v1370_v18  ;;  %v1372_v42 = vpop.f32.mrb[29].mxu0 }
 0x1dd   : > { %v2166_v9 = vmax.f32 %v1362_v37, %v1372_v42  ;;  %v1374_v51 = vpop.f32.mrb[30].mxu0 }
 0x1de   : > { %v2217_v58 = vmax.f32 %v2113_v19, %v2165_v14  ;;  %v2191_v10 = vmax.f32 %v1364_v48, %v1374_v51  ;;  %v1376_v46 = vpop.f32.mrb[31].mxu0 }
 0x1df   : > { %v2218_v4 = vmax.f32 %v2114_v50, %v2166_v9  ;;  %v2192_v60 = vmax.f32 %v1366_v1, %v1376_v46 }
 0x1e0   : > { %v2279_v3 = vadd.f32 %v3943_v31, %v2217_v58  ;;  %v1443_v38 = vpop.f32.mrb[28].mxu1  ;;  %v2243_v57 = vmax.f32 %v2139_v56, %v2191_v10 }
 0x1e1   : > { %v2167_v20 = vmax.f32 %v1433_v59, %v1443_v38  ;;  %v2280_v8 = vadd.f32 %v3943_v31, %v2218_v4  ;;  %v1445_v26 = vpop.f32.mrb[29].mxu1  ;;  %v2244_v33 = vmax.f32 %v2140_v11, %v2192_v60 }
 0x1e2   : > { %v2331_v41 = vmax.f32 %v2279_v3, 0.0  ;;  %v2168_v21 = vmax.f32 %v1435_v40, %v1445_v26  ;;  %v2305_v43 = vadd.f32 %v3931_v13, %v2243_v57  ;;  %v1447_v7 = vpop.f32.mrb[30].mxu1 }
 0x1e3   : > { %v2219_v6 = vmax.f32 %v2115_v23, %v2167_v20  ;;  %v2332_v63 = vmax.f32 %v2280_v8, 0.0  ;;  %v2193_v30 = vmax.f32 %v1437_v53, %v1447_v7  ;;  %v2306_v32 = vadd.f32 %v3931_v13, %v2244_v33  ;;  %v1449_v52 = vpop.f32.mrb[31].mxu1 }
 0x1e4   : > { %v2220_v47 = vmax.f32 %v2116_v44, %v2168_v21  ;;  %v2357_v17 = vmax.f32 %v2305_v43, 0.0  ;;  %v2194_v5 = vmax.f32 %v1439_v28, %v1449_v52 }
 0x1e5   : > { %v2281_v29 = vadd.f32 %v3943_v31, %v2219_v6  ;;  %v2709_v36 = vpack.c.bf16 %v2332_v63, %v2331_v41  ;;  %v2245_v12 = vmax.f32 %v2141_v62, %v2193_v30  ;;  %v2358_v27 = vmax.f32 %v2306_v32, 0.0 }
 0x1e6   : > { %v2282_v61 = vadd.f32 %v3943_v31, %v2220_v47  ;;  %v2246_v0 = vmax.f32 %v2142_v16, %v2194_v5 }
 0x1e7   : > { %v2333_v22 = vmax.f32 %v2281_v29, 0.0  ;;  %2537 = vst [vmem:[%s3958_s18 + $0x10] sm:$0xff] %v2709_v36  ;;  %v2307_v55 = vadd.f32 %v3931_v13, %v2245_v12  ;;  %v2722_v45 = vpack.c.bf16 %v2358_v27, %v2357_v17 }
 0x1e8   : > { %v2334_v49 = vmax.f32 %v2282_v61, 0.0  ;;  %v2308_v19 = vadd.f32 %v3931_v13, %v2246_v0 }
 0x1e9   : > { %v2359_v50 = vmax.f32 %v2307_v55, 0.0  ;;  %2550 = vst [vmem:[%s3958_s18 + $0x78] sm:$0xff] %v2722_v45 }
 0x1ea   : > { %v2710_v54 = vpack.c.bf16 %v2334_v49, %v2333_v22  ;;  %v2360_v25 = vmax.f32 %v2308_v19, 0.0 }
 0x1ec   : > { %2538 = vst [vmem:[%s3958_s18 + $0x18] sm:$0xff] %v2710_v54  ;;  %v2723_v2 = vpack.c.bf16 %v2360_v25, %v2359_v50 }
 0x1ee   : > { %2551 = vst [vmem:[%s3958_s18 + $0x80] sm:$0xff] %v2723_v2 }
 0x1f3   : > { %v1486_v56 = vpop.f32.mrb[32].mxu0 }
 0x1f4   : > { %v1488_v11 = vpop.f32.mrb[33].mxu0 }
 0x1f5   : > { %v1490_v24 = vpop.f32.mrb[34].mxu0 }
 0x1f6   : > { %v1559_v23 = vpop.f32.mrb[32].mxu1  ;;  %v1492_v15 = vpop.f32.mrb[35].mxu0 }
 0x1f7   : > { %v1561_v44 = vpop.f32.mrb[33].mxu1 }
 0x1f8   : > { %v1563_v39 = vpop.f32.mrb[34].mxu1 }
 0x1f9   : > { %v1565_v62 = vpop.f32.mrb[35].mxu1 }
 0x1fb   : > { %v1496_v35 = vpop.f32.mrb[36].mxu0 }
 0x1fc   : > { %v2117_v34 = vmax.f32 %v1486_v56, %v1496_v35  ;;  %v1498_v16 = vpop.f32.mrb[37].mxu0 }
 0x1fd   : > { %v2118_v37 = vmax.f32 %v1488_v11, %v1498_v16  ;;  %v1500_v48 = vpop.f32.mrb[38].mxu0 }
 0x1fe   : > { %v2143_v1 = vmax.f32 %v1490_v24, %v1500_v48  ;;  %v1502_v59 = vpop.f32.mrb[39].mxu0 }
 0x1ff   : > { %v2144_v40 = vmax.f32 %v1492_v15, %v1502_v59 }
 0x200   : > { %v1569_v53 = vpop.f32.mrb[36].mxu1 }
 0x201   : > { %v2119_v28 = vmax.f32 %v1559_v23, %v1569_v53  ;;  %v1571_v18 = vpop.f32.mrb[37].mxu1 }
 0x202   : > { %v2120_v14 = vmax.f32 %v1561_v44, %v1571_v18  ;;  %v1573_v42 = vpop.f32.mrb[38].mxu1 }
 0x203   : > { %v2145_v9 = vmax.f32 %v1563_v39, %v1573_v42  ;;  %v1575_v51 = vpop.f32.mrb[39].mxu1  ;;  %v1506_v58 = vpop.f32.mrb[40].mxu0 }
 0x204   : > { %v2146_v10 = vmax.f32 %v1565_v62, %v1575_v51  ;;  %v1508_v46 = vpop.f32.mrb[41].mxu0 }
 0x205   : > { %v1510_v4 = vpop.f32.mrb[42].mxu0 }
 0x206   : > { %v1512_v60 = vpop.f32.mrb[43].mxu0 }
 0x208   : > { %v1579_v3 = vpop.f32.mrb[40].mxu1 }
 0x209   : > { %v1581_v38 = vpop.f32.mrb[41].mxu1 }
 0x20a   : > { %v1583_v57 = vpop.f32.mrb[42].mxu1 }
 0x20b   : > { %v1585_v20 = vpop.f32.mrb[43].mxu1  ;;  %v1516_v8 = vpop.f32.mrb[44].mxu0 }
 0x20c   : > { %v2169_v26 = vmax.f32 %v1506_v58, %v1516_v8  ;;  %v1518_v33 = vpop.f32.mrb[45].mxu0 }
 0x20d   : > { %v2170_v41 = vmax.f32 %v1508_v46, %v1518_v33  ;;  %v1520_v21 = vpop.f32.mrb[46].mxu0 }
 0x20e   : > { %v2221_v43 = vmax.f32 %v2117_v34, %v2169_v26  ;;  %v2195_v7 = vmax.f32 %v1510_v4, %v1520_v21  ;;  %v1522_v6 = vpop.f32.mrb[47].mxu0 }
 0x20f   : > { %v2222_v63 = vmax.f32 %v2118_v37, %v2170_v41  ;;  %v2196_v30 = vmax.f32 %v1512_v60, %v1522_v6 }
 0x210   : > { %v2283_v32 = vadd.f32 %v3943_v31, %v2221_v43  ;;  %v1589_v52 = vpop.f32.mrb[44].mxu1  ;;  %v2247_v47 = vmax.f32 %v2143_v1, %v2195_v7 }
 0x211   : > { %v2171_v17 = vmax.f32 %v1579_v3, %v1589_v52  ;;  %v2284_v5 = vadd.f32 %v3943_v31, %v2222_v63  ;;  %v1591_v29 = vpop.f32.mrb[45].mxu1  ;;  %v2248_v36 = vmax.f32 %v2144_v40, %v2196_v30 }
 0x212   : > { %v2335_v12 = vmax.f32 %v2283_v32, 0.0  ;;  %v2172_v27 = vmax.f32 %v1581_v38, %v1591_v29  ;;  %v2309_v61 = vadd.f32 %v3931_v13, %v2247_v47  ;;  %v1593_v0 = vpop.f32.mrb[46].mxu1 }
 0x213   : > { %v2223_v22 = vmax.f32 %v2119_v28, %v2171_v17  ;;  %v2336_v55 = vmax.f32 %v2284_v5, 0.0  ;;  %v2197_v45 = vmax.f32 %v1583_v57, %v1593_v0  ;;  %v2310_v49 = vadd.f32 %v3931_v13, %v2248_v36  ;;  %v1595_v19 = vpop.f32.mrb[47].mxu1 }
 0x214   : > { %v2224_v50 = vmax.f32 %v2120_v14, %v2172_v27  ;;  %v2361_v54 = vmax.f32 %v2309_v61, 0.0  ;;  %v2198_v25 = vmax.f32 %v1585_v20, %v1595_v19 }
 0x215   : > { %v2285_v2 = vadd.f32 %v3943_v31, %v2223_v22  ;;  %v2711_v56 = vpack.c.bf16 %v2336_v55, %v2335_v12  ;;  %v2249_v11 = vmax.f32 %v2145_v9, %v2197_v45  ;;  %v2362_v24 = vmax.f32 %v2310_v49, 0.0 }
 0x216   : > { %v2286_v23 = vadd.f32 %v3943_v31, %v2224_v50  ;;  %v2250_v15 = vmax.f32 %v2146_v10, %v2198_v25 }
 0x217   : > { %v2337_v44 = vmax.f32 %v2285_v2, 0.0  ;;  %2539 = vst [vmem:[%s3958_s18 + $0x20] sm:$0xff] %v2711_v56  ;;  %v2311_v39 = vadd.f32 %v3931_v13, %v2249_v11  ;;  %v2724_v62 = vpack.c.bf16 %v2362_v24, %v2361_v54 }
 0x218   : > { %v2338_v35 = vmax.f32 %v2286_v23, 0.0  ;;  %v2312_v34 = vadd.f32 %v3931_v13, %v2250_v15 }
 0x219   : > { %v2363_v16 = vmax.f32 %v2311_v39, 0.0  ;;  %2552 = vst [vmem:[%s3958_s18 + $0x88] sm:$0xff] %v2724_v62 }
 0x21a   : > { %v2712_v37 = vpack.c.bf16 %v2338_v35, %v2337_v44  ;;  %v2364_v48 = vmax.f32 %v2312_v34, 0.0 }
 0x21c   : > { %2540 = vst [vmem:[%s3958_s18 + $0x28] sm:$0xff] %v2712_v37  ;;  %v2725_v1 = vpack.c.bf16 %v2364_v48, %v2363_v16 }
 0x21e   : > { %2553 = vst [vmem:[%s3958_s18 + $0x90] sm:$0xff] %v2725_v1 }
 0x222   : > { %v1632_v59 = vpop.f32.mrb[48].mxu0 }
 0x223   : > { %v1634_v40 = vpop.f32.mrb[49].mxu0 }
 0x224   : > { %v1636_v53 = vpop.f32.mrb[50].mxu0 }
 0x225   : > { %v1638_v28 = vpop.f32.mrb[51].mxu0 }
 0x226   : > { %v1705_v18 = vpop.f32.mrb[48].mxu1 }
 0x227   : > { %v1707_v14 = vpop.f32.mrb[49].mxu1 }
 0x228   : > { %v1709_v42 = vpop.f32.mrb[50].mxu1 }
 0x229   : > { %v1711_v9 = vpop.f32.mrb[51].mxu1 }
 0x22a   : > { %v1642_v51 = vpop.f32.mrb[52].mxu0 }
 0x22b   : > { %v2121_v58 = vmax.f32 %v1632_v59, %v1642_v51  ;;  %v1644_v10 = vpop.f32.mrb[53].mxu0 }
 0x22c   : > { %v2122_v46 = vmax.f32 %v1634_v40, %v1644_v10  ;;  %v1646_v4 = vpop.f32.mrb[54].mxu0 }
 0x22d   : > { %v2147_v60 = vmax.f32 %v1636_v53, %v1646_v4  ;;  %v1648_v3 = vpop.f32.mrb[55].mxu0 }
 0x22e   : > { %v1715_v38 = vpop.f32.mrb[52].mxu1  ;;  %v2148_v57 = vmax.f32 %v1638_v28, %v1648_v3 }
 0x22f   : > { %v2123_v20 = vmax.f32 %v1705_v18, %v1715_v38  ;;  %v1717_v8 = vpop.f32.mrb[53].mxu1 }
 0x230   : > { %v2124_v26 = vmax.f32 %v1707_v14, %v1717_v8  ;;  %v1719_v33 = vpop.f32.mrb[54].mxu1 }
 0x231   : > { %v2149_v41 = vmax.f32 %v1709_v42, %v1719_v33  ;;  %v1721_v21 = vpop.f32.mrb[55].mxu1 }
 0x232   : > { %v2150_v43 = vmax.f32 %v1711_v9, %v1721_v21  ;;  %v1652_v7 = vpop.f32.mrb[56].mxu0 }
 0x233   : > { %v1654_v6 = vpop.f32.mrb[57].mxu0 }
 0x234   : > { %v1656_v63 = vpop.f32.mrb[58].mxu0 }
 0x235   : > { %v1658_v30 = vpop.f32.mrb[59].mxu0 }
 0x236   : > { %v1725_v32 = vpop.f32.mrb[56].mxu1 }
 0x237   : > { %v1727_v52 = vpop.f32.mrb[57].mxu1 }
 0x238   : > { %v1729_v47 = vpop.f32.mrb[58].mxu1 }
 0x239   : > { %v1731_v17 = vpop.f32.mrb[59].mxu1 }
 0x23a   : > { %v1662_v5 = vpop.f32.mrb[60].mxu0 }
 0x23b   : > { %v2173_v29 = vmax.f32 %v1652_v7, %v1662_v5  ;;  %v1664_v36 = vpop.f32.mrb[61].mxu0 }
 0x23c   : > { %v2174_v12 = vmax.f32 %v1654_v6, %v1664_v36  ;;  %v1666_v27 = vpop.f32.mrb[62].mxu0 }
 0x23d   : > { %v2225_v61 = vmax.f32 %v2121_v58, %v2173_v29  ;;  %v2199_v0 = vmax.f32 %v1656_v63, %v1666_v27  ;;  %v1668_v22 = vpop.f32.mrb[63].mxu0 }
 0x23e   : > { %v1735_v55 = vpop.f32.mrb[60].mxu1  ;;  %v2226_v45 = vmax.f32 %v2122_v46, %v2174_v12  ;;  %v2200_v49 = vmax.f32 %v1658_v30, %v1668_v22 }
 0x23f   : > { %v2287_v19 = vadd.f32 %v3943_v31, %v2225_v61  ;;  %v2175_v50 = vmax.f32 %v1725_v32, %v1735_v55  ;;  %v1737_v54 = vpop.f32.mrb[61].mxu1  ;;  %v2251_v25 = vmax.f32 %v2147_v60, %v2199_v0 }
 0x240   : > { %v2288_v2 = vadd.f32 %v3943_v31, %v2226_v45  ;;  %v2176_v56 = vmax.f32 %v1727_v52, %v1737_v54  ;;  %v1739_v11 = vpop.f32.mrb[62].mxu1  ;;  %v2252_v24 = vmax.f32 %v2148_v57, %v2200_v49 }
 0x241   : > { %v2339_v23 = vmax.f32 %v2287_v19, 0.0  ;;  %v2227_v15 = vmax.f32 %v2123_v20, %v2175_v50  ;;  %v2313_v44 = vadd.f32 %v3931_v13, %v2251_v25  ;;  %v2201_v39 = vmax.f32 %v1729_v47, %v1739_v11  ;;  %v1741_v62 = vpop.f32.mrb[63].mxu1 }
 0x242   : > { %v2340_v35 = vmax.f32 %v2288_v2, 0.0  ;;  %v2228_v34 = vmax.f32 %v2124_v26, %v2176_v56  ;;  %v2314_v16 = vadd.f32 %v3931_v13, %v2252_v24  ;;  %v2202_v37 = vmax.f32 %v1731_v17, %v1741_v62 }
 0x243   : > { %v2289_v48 = vadd.f32 %v3943_v31, %v2227_v15  ;;  %v2365_v1 = vmax.f32 %v2313_v44, 0.0  ;;  %v2253_v59 = vmax.f32 %v2149_v41, %v2201_v39 }
 0x244   : > { %v2713_v40 = vpack.c.bf16 %v2340_v35, %v2339_v23  ;;  %v2290_v53 = vadd.f32 %v3943_v31, %v2228_v34  ;;  %v2366_v28 = vmax.f32 %v2314_v16, 0.0  ;;  %v2254_v18 = vmax.f32 %v2150_v43, %v2202_v37 }
 0x245   : > { %v2341_v14 = vmax.f32 %v2289_v48, 0.0  ;;  %v2315_v42 = vadd.f32 %v3931_v13, %v2253_v59 }
 0x246   : > { %2541 = vst [vmem:[%s3958_s18 + $0x30] sm:$0xff] %v2713_v40  ;;  %v2342_v9 = vmax.f32 %v2290_v53, 0.0  ;;  %v2726_v51 = vpack.c.bf16 %v2366_v28, %v2365_v1  ;;  %v2316_v58 = vadd.f32 %v3931_v13, %v2254_v18 }
 0x247   : > { %v2367_v10 = vmax.f32 %v2315_v42, 0.0 }
 0x248   : > { %v2714_v46 = vpack.c.bf16 %v2342_v9, %v2341_v14  ;;  %2554 = vst [vmem:[%s3958_s18 + $0x98] sm:$0xff] %v2726_v51  ;;  %v2368_v4 = vmax.f32 %v2316_v58, 0.0 }
 0x24a   : > { %2542 = vst [vmem:[%s3958_s18 + $0x38] sm:$0xff] %v2714_v46  ;;  %v2727_v60 = vpack.c.bf16 %v2368_v4, %v2367_v10 }
 0x24c   : > { %2555 = vst [vmem:[%s3958_s18 + $0xa0] sm:$0xff] %v2727_v60 }
 0x252   : > { %v1778_v3 = vpop.f32.mrb[64].mxu0 }
 0x253   : > { %v1780_v38 = vpop.f32.mrb[65].mxu0 }
 0x254   : > { %v1782_v57 = vpop.f32.mrb[66].mxu0 }
 0x255   : > { %v1784_v20 = vpop.f32.mrb[67].mxu0 }
 0x256   : > { %v1851_v8 = vpop.f32.mrb[64].mxu1 }
 0x257   : > { %v1853_v26 = vpop.f32.mrb[65].mxu1 }
 0x258   : > { %v1855_v33 = vpop.f32.mrb[66].mxu1 }
 0x259   : > { %v1857_v41 = vpop.f32.mrb[67].mxu1 }
 0x25a   : > { %v1788_v21 = vpop.f32.mrb[68].mxu0 }
 0x25b   : > { %v2125_v43 = vmax.f32 %v1778_v3, %v1788_v21  ;;  %v1790_v7 = vpop.f32.mrb[69].mxu0 }
 0x25c   : > { %v2126_v6 = vmax.f32 %v1780_v38, %v1790_v7  ;;  %v1792_v63 = vpop.f32.mrb[70].mxu0 }
 0x25d   : > { %v2151_v30 = vmax.f32 %v1782_v57, %v1792_v63  ;;  %v1794_v32 = vpop.f32.mrb[71].mxu0 }
 0x25e   : > { %v1861_v52 = vpop.f32.mrb[68].mxu1  ;;  %v2152_v47 = vmax.f32 %v1784_v20, %v1794_v32 }
 0x25f   : > { %v2127_v17 = vmax.f32 %v1851_v8, %v1861_v52  ;;  %v1863_v5 = vpop.f32.mrb[69].mxu1 }
 0x260   : > { %v2128_v29 = vmax.f32 %v1853_v26, %v1863_v5  ;;  %v1865_v36 = vpop.f32.mrb[70].mxu1 }
 0x261   : > { %v2153_v12 = vmax.f32 %v1855_v33, %v1865_v36  ;;  %v1867_v27 = vpop.f32.mrb[71].mxu1 }
 0x262   : > { %v1798_v61 = vpop.f32.mrb[72].mxu0  ;;  %v2154_v0 = vmax.f32 %v1857_v41, %v1867_v27 }
 0x263   : > { %v1800_v22 = vpop.f32.mrb[73].mxu0 }
 0x264   : > { %v1802_v55 = vpop.f32.mrb[74].mxu0 }
 0x265   : > { %v1804_v45 = vpop.f32.mrb[75].mxu0 }
 0x266   : > { %v1871_v49 = vpop.f32.mrb[72].mxu1 }
 0x267   : > { %v1873_v19 = vpop.f32.mrb[73].mxu1 }
 0x268   : > { %v1875_v50 = vpop.f32.mrb[74].mxu1 }
 0x269   : > { %v1877_v54 = vpop.f32.mrb[75].mxu1 }
 0x26a   : > { %v1808_v25 = vpop.f32.mrb[76].mxu0 }
 0x26b   : > { %v2177_v2 = vmax.f32 %v1798_v61, %v1808_v25  ;;  %v1810_v56 = vpop.f32.mrb[77].mxu0 }
 0x26c   : > { %v2178_v11 = vmax.f32 %v1800_v22, %v1810_v56  ;;  %v1812_v24 = vpop.f32.mrb[78].mxu0 }
 0x26d   : > { %v2229_v23 = vmax.f32 %v2125_v43, %v2177_v2  ;;  %v2203_v15 = vmax.f32 %v1802_v55, %v1812_v24  ;;  %v1814_v44 = vpop.f32.mrb[79].mxu0 }
 0x26e   : > { %v2230_v39 = vmax.f32 %v2126_v6, %v2178_v11  ;;  %v2204_v62 = vmax.f32 %v1804_v45, %v1814_v44  ;;  %v1881_v35 = vpop.f32.mrb[76].mxu1 }
 0x26f   : > { %v2291_v34 = vadd.f32 %v3943_v31, %v2229_v23  ;;  %v2255_v16 = vmax.f32 %v2151_v30, %v2203_v15  ;;  %v2179_v37 = vmax.f32 %v1871_v49, %v1881_v35  ;;  %v1883_v48 = vpop.f32.mrb[77].mxu1 }
 0x270   : > { %v2292_v1 = vadd.f32 %v3943_v31, %v2230_v39  ;;  %v2256_v59 = vmax.f32 %v2152_v47, %v2204_v62  ;;  %v2180_v40 = vmax.f32 %v1873_v19, %v1883_v48  ;;  %v1885_v53 = vpop.f32.mrb[78].mxu1 }
 0x271   : > { %v2343_v28 = vmax.f32 %v2291_v34, 0.0  ;;  %v2317_v18 = vadd.f32 %v3931_v13, %v2255_v16  ;;  %v2231_v14 = vmax.f32 %v2127_v17, %v2179_v37  ;;  %v2205_v42 = vmax.f32 %v1875_v50, %v1885_v53  ;;  %v1887_v9 = vpop.f32.mrb[79].mxu1 }
 0x272   : > { %v2344_v51 = vmax.f32 %v2292_v1, 0.0  ;;  %v2318_v58 = vadd.f32 %v3931_v13, %v2256_v59  ;;  %v2232_v10 = vmax.f32 %v2128_v29, %v2180_v40  ;;  %v2206_v46 = vmax.f32 %v1877_v54, %v1887_v9 }
 0x273   : > { %v2369_v4 = vmax.f32 %v2317_v18, 0.0  ;;  %v2293_v60 = vadd.f32 %v3943_v31, %v2231_v14  ;;  %v2257_v3 = vmax.f32 %v2153_v12, %v2205_v42 }
 0x274   : > { %v2715_v38 = vpack.c.bf16 %v2344_v51, %v2343_v28  ;;  %v2370_v57 = vmax.f32 %v2318_v58, 0.0  ;;  %v2294_v20 = vadd.f32 %v3943_v31, %v2232_v10  ;;  %v2258_v8 = vmax.f32 %v2154_v0, %v2206_v46 }
 0x275   : > { %v2345_v26 = vmax.f32 %v2293_v60, 0.0  ;;  %v2319_v33 = vadd.f32 %v3931_v13, %v2257_v3 }
 0x276   : > { %2543 = vst [vmem:[%s3958_s18 + $0x40] sm:$0xff] %v2715_v38  ;;  %v2728_v41 = vpack.c.bf16 %v2370_v57, %v2369_v4  ;;  %v2346_v21 = vmax.f32 %v2294_v20, 0.0  ;;  %v2320_v43 = vadd.f32 %v3931_v13, %v2258_v8 }
 0x277   : > { %v2371_v7 = vmax.f32 %v2319_v33, 0.0 }
 0x278   : > { %2556 = vst [vmem:[%s3958_s18 + $0xa8] sm:$0xff] %v2728_v41  ;;  %v2716_v6 = vpack.c.bf16 %v2346_v21, %v2345_v26  ;;  %v2372_v63 = vmax.f32 %v2320_v43, 0.0 }
 0x27a   : > { %2544 = vst [vmem:[%s3958_s18 + $0x48] sm:$0xff] %v2716_v6  ;;  %v2729_v30 = vpack.c.bf16 %v2372_v63, %v2371_v7 }
 0x27c   : > { %2557 = vst [vmem:[%s3958_s18 + $0xb0] sm:$0xff] %v2729_v30 }
 0x282   : > { %v1924_v32 = vpop.f32.mrb[80].mxu0 }
 0x283   : > { %v1926_v52 = vpop.f32.mrb[81].mxu0 }
 0x284   : > { %v1928_v47 = vpop.f32.mrb[82].mxu0 }
 0x285   : > { %v1930_v17 = vpop.f32.mrb[83].mxu0 }
 0x286   : > { %v1997_v5 = vpop.f32.mrb[80].mxu1 }
 0x287   : > { %v1999_v29 = vpop.f32.mrb[81].mxu1 }
 0x288   : > { %v2001_v36 = vpop.f32.mrb[82].mxu1 }
 0x289   : > { %v2003_v12 = vpop.f32.mrb[83].mxu1 }
 0x28a   : > { %v1934_v27 = vpop.f32.mrb[84].mxu0 }
 0x28b   : > { %v2129_v61 = vmax.f32 %v1924_v32, %v1934_v27  ;;  %v1936_v0 = vpop.f32.mrb[85].mxu0 }
 0x28c   : > { %v2130_v22 = vmax.f32 %v1926_v52, %v1936_v0  ;;  %v1938_v55 = vpop.f32.mrb[86].mxu0 }
 0x28d   : > { %v2155_v45 = vmax.f32 %v1928_v47, %v1938_v55  ;;  %v1940_v49 = vpop.f32.mrb[87].mxu0 }
 0x28e   : > { %v2156_v19 = vmax.f32 %v1930_v17, %v1940_v49  ;;  %v2007_v50 = vpop.f32.mrb[84].mxu1 }
 0x28f   : > { %v2131_v54 = vmax.f32 %v1997_v5, %v2007_v50  ;;  %v2009_v25 = vpop.f32.mrb[85].mxu1 }
 0x290   : > { %v2132_v2 = vmax.f32 %v1999_v29, %v2009_v25  ;;  %v2011_v56 = vpop.f32.mrb[86].mxu1 }
 0x291   : > { %v2157_v11 = vmax.f32 %v2001_v36, %v2011_v56  ;;  %v2013_v24 = vpop.f32.mrb[87].mxu1 }
 0x292   : > { %v2158_v23 = vmax.f32 %v2003_v12, %v2013_v24  ;;  %v1944_v15 = vpop.f32.mrb[88].mxu0 }
 0x293   : > { %v1946_v44 = vpop.f32.mrb[89].mxu0 }
 0x294   : > { %v1948_v39 = vpop.f32.mrb[90].mxu0 }
 0x295   : > { %v1950_v62 = vpop.f32.mrb[91].mxu0 }
 0x296   : > { %v2017_v35 = vpop.f32.mrb[88].mxu1 }
 0x297   : > { %v2019_v34 = vpop.f32.mrb[89].mxu1 }
 0x298   : > { %v2021_v16 = vpop.f32.mrb[90].mxu1 }
 0x299   : > { %v2023_v37 = vpop.f32.mrb[91].mxu1 }
 0x29a   : > { %v1954_v48 = vpop.f32.mrb[92].mxu0 }
 0x29b   : > { %v2181_v1 = vmax.f32 %v1944_v15, %v1954_v48  ;;  %v1956_v59 = vpop.f32.mrb[93].mxu0 }
 0x29c   : > { %v2182_v40 = vmax.f32 %v1946_v44, %v1956_v59  ;;  %v1958_v53 = vpop.f32.mrb[94].mxu0 }
 0x29d   : > { %v2233_v28 = vmax.f32 %v2129_v61, %v2181_v1  ;;  %v2207_v18 = vmax.f32 %v1948_v39, %v1958_v53  ;;  %v1960_v14 = vpop.f32.mrb[95].mxu0 }
 0x29e   : > { %v2234_v42 = vmax.f32 %v2130_v22, %v2182_v40  ;;  %v2208_v9 = vmax.f32 %v1950_v62, %v1960_v14  ;;  %v2027_v51 = vpop.f32.mrb[92].mxu1 }
 0x29f   : > { %v2295_v58 = vadd.f32 %v3943_v31, %v2233_v28  ;;  %v2259_v10 = vmax.f32 %v2155_v45, %v2207_v18  ;;  %v2183_v46 = vmax.f32 %v2017_v35, %v2027_v51  ;;  %v2029_v4 = vpop.f32.mrb[93].mxu1 }
 0x2a0   : > { %v2296_v60 = vadd.f32 %v3943_v31, %v2234_v42  ;;  %v2260_v3 = vmax.f32 %v2156_v19, %v2208_v9  ;;  %v2184_v38 = vmax.f32 %v2019_v34, %v2029_v4  ;;  %v2031_v57 = vpop.f32.mrb[94].mxu1 }
 0x2a1   : > { %v2347_v20 = vmax.f32 %v2295_v58, 0.0  ;;  %v2321_v8 = vadd.f32 %v3931_v13, %v2259_v10  ;;  %v2235_v26 = vmax.f32 %v2131_v54, %v2183_v46  ;;  %v2209_v33 = vmax.f32 %v2021_v16, %v2031_v57  ;;  %v2033_v41 = vpop.f32.mrb[95].mxu1 }
 0x2a2   : > { %v2348_v21 = vmax.f32 %v2296_v60, 0.0  ;;  %v2322_v43 = vadd.f32 %v3931_v13, %v2260_v3  ;;  %v2236_v7 = vmax.f32 %v2132_v2, %v2184_v38  ;;  %v2210_v6 = vmax.f32 %v2023_v37, %v2033_v41  ;;  %v2070_v63 = vpop.f32.mrb[96].mxu0 }
 0x2a3   : > { %v2373_v30 = vmax.f32 %v2321_v8, 0.0  ;;  %v2297_v32 = vadd.f32 %v3943_v31, %v2235_v26  ;;  %v2261_v52 = vmax.f32 %v2157_v11, %v2209_v33  ;;  %v2072_v47 = vpop.f32.mrb[97].mxu0 }
 0x2a4   : > { %v2717_v17 = vpack.c.bf16 %v2348_v21, %v2347_v20  ;;  %v2374_v5 = vmax.f32 %v2322_v43, 0.0  ;;  %v2298_v29 = vadd.f32 %v3943_v31, %v2236_v7  ;;  %v2262_v36 = vmax.f32 %v2158_v23, %v2210_v6  ;;  %v2074_v12 = vpop.f32.mrb[98].mxu0 }
 0x2a5   : > { %v2349_v27 = vmax.f32 %v2297_v32, 0.0  ;;  %v2323_v61 = vadd.f32 %v3931_v13, %v2261_v52  ;;  %v2076_v0 = vpop.f32.mrb[99].mxu0 }
 0x2a6   : > { %2545 = vst [vmem:[%s3958_s18 + $0x50] sm:$0xff] %v2717_v17  ;;  %v2730_v22 = vpack.c.bf16 %v2374_v5, %v2373_v30  ;;  %v2350_v55 = vmax.f32 %v2298_v29, 0.0  ;;  %v2324_v45 = vadd.f32 %v3931_v13, %v2262_v36  ;;  %v2090_v49 = vpop.f32.mrb[96].mxu1 }
 0x2a7   : > { %v2375_v19 = vmax.f32 %v2323_v61, 0.0  ;;  %v2092_v50 = vpop.f32.mrb[97].mxu1 }
 0x2a8   : > { %2558 = vst [vmem:[%s3958_s18 + $0xb8] sm:$0xff] %v2730_v22  ;;  %v2718_v54 = vpack.c.bf16 %v2350_v55, %v2349_v27  ;;  %v2376_v25 = vmax.f32 %v2324_v45, 0.0  ;;  %v2094_v2 = vpop.f32.mrb[98].mxu1 }
 0x2a9   : > { %v2096_v56 = vpop.f32.mrb[99].mxu1 }
 0x2aa   : > { %2546 = vst [vmem:[%s3958_s18 + $0x58] sm:$0xff] %v2718_v54  ;;  %v2731_v11 = vpack.c.bf16 %v2376_v25, %v2375_v19  ;;  %v2080_v24 = vpop.f32.mrb[100].mxu0 }
 0x2ab   : > { %v2133_v23 = vmax.f32 %v2070_v63, %v2080_v24  ;;  %v2082_v15 = vpop.f32.mrb[101].mxu0 }
 0x2ac   : > { %2559 = vst [vmem:[%s3958_s18 + $0xc0] sm:$0xff] %v2731_v11  ;;  %v2134_v44 = vmax.f32 %v2072_v47, %v2082_v15  ;;  %v2084_v39 = vpop.f32.mrb[102].mxu0 }
 0x2ad   : > { %v2159_v62 = vmax.f32 %v2074_v12, %v2084_v39  ;;  %v2086_v35 = vpop.f32.mrb[103].mxu0 }
 0x2ae   : > { %v2160_v34 = vmax.f32 %v2076_v0, %v2086_v35  ;;  %v2100_v16 = vpop.f32.mrb[100].mxu1 }
 0x2af   : > { %v2185_v37 = vmax.f32 %v2090_v49, %v2100_v16  ;;  %v2102_v48 = vpop.f32.mrb[101].mxu1 }
 0x2b0   : > { %v2186_v1 = vmax.f32 %v2092_v50, %v2102_v48  ;;  %v2104_v59 = vpop.f32.mrb[102].mxu1 }
 0x2b1   : > { %v2237_v40 = vmax.f32 %v2133_v23, %v2185_v37  ;;  %v2211_v53 = vmax.f32 %v2094_v2, %v2104_v59  ;;  %v2106_v28 = vpop.f32.mrb[103].mxu1 }
 0x2b2   : > { %v2238_v18 = vmax.f32 %v2134_v44, %v2186_v1  ;;  %v2212_v14 = vmax.f32 %v2096_v56, %v2106_v28 }
 0x2b3   : > { %v2299_v42 = vadd.f32 %v3943_v31, %v2237_v40  ;;  %v2263_v9 = vmax.f32 %v2159_v62, %v2211_v53 }
 0x2b4   : > { %v2300_v51 = vadd.f32 %v3943_v31, %v2238_v18  ;;  %v2264_v58 = vmax.f32 %v2160_v34, %v2212_v14 }
 0x2b5   : > { %v2351_v10 = vmax.f32 %v2299_v42, 0.0  ;;  %v2325_v46 = vadd.f32 %v3931_v13, %v2263_v9 }
 0x2b6   : > { %v2352_v4 = vmax.f32 %v2300_v51, 0.0  ;;  %v2326_v60 = vadd.f32 %v3931_v13, %v2264_v58 }
 0x2b7   : > { %v2377_v3 = vmax.f32 %v2325_v46, 0.0 }
 0x2b8   : > { %v2719_v38 = vpack.c.bf16 %v2352_v4, %v2351_v10  ;;  %v2378_v57 = vmax.f32 %v2326_v60, 0.0 }
 0x2ba   : > { %2547 = vst [vmem:[%s3958_s18 + $0x60] sm:$0xff] %v2719_v38  ;;  %v2732_v20 = vpack.c.bf16 %v2378_v57, %v2377_v3 }
 0x2bc   : > { %2560 = vst [vmem:[%s3958_s18 + $0xc8] sm:$0xff] %v2732_v20 }
 0x2bd PF: > { %s13_s12 = sadd.s32 1, %s2857_s12  }
 0x2be   : > { %p10_p4 = scmp.ge.s32.totalorder %s13_s12, 4  }
 0x2c0   :  { %12 = sbr.rel (!%p10_p4) target bundleno = 1 (0x1), region = 62 }

// kernel: net_forward.6
= control target key start
LH: loop header
LB: loop body
LE: loop exit
PB: predicated region body
PF: predicated region fallthrough
CT: control target
= control target key end

     0   :  { %s1640_s12 = smov 0   ;;  %s2385_s0 = inlined_call_operand.vmem [shape: bf16[2,64,896], index: 0, kind: input, shape index: {}]   ;;  %s2386_s1 = inlined_call_operand.vmem [shape: bf16[96,256], index: 1, kind: input, shape index: {}]   ;;  %s2387_s2 = inlined_call_operand.vmem [shape: f32[24,1], index: 2, kind: input, shape index: {}]   ;;  %s2388_s3 = inlined_call_operand.vmem [shape: bf16[2,24,896], index: 3, kind: output, shape index: {}]  }
   0x1 LB: > { %s1409_s13 = sadd.s32 4294967295, %s1614_s12   ;;  %p1413_p0 = scmp.ge.s32.totalorder %s1614_s12, 1  ;;  %s1614_s12 = sphi %s1640_s12, %s13_s12  }
   0x2   : > { %p137_p1 = scmp.lt.s32.totalorder %s1614_s12, 3 }
   0x4   : > { %p138_p2 = pnand %p1413_p0, %p137_p1 }
   0x5   : > { %p161_p3 = scmp.lt.s32.totalorder (!%p138_p2), %s1409_s13, 1  ;;  %s1616_s18 = smov (!%p138_p2), 127   ;;  %v1812_v20 = vld [vmem:[%s2386_s1 + $0x4] ss:$8 sps:$4 sm:$0xff] (!%p138_p2)   ;;  %vm391_vm0 = vcmask (!%p138_p2), 1039360   ;;  %vm513_vm1 = vcmask (!%p138_p2), 809984  }
   0x6   : > { %141 = sbr.rel (%p138_p2) target bundleno = 572 (0x23c), region = 32  ;;  %s1617_s19 = smov (!%p138_p2), 99   ;;  %821 = vmatprep.mubr.bf16.mxu0 (!%p138_p2), %v1812_v20  ;;  %914 = vmatprep.mubr.bf16.mxu1 (!%p138_p2), %v1812_v20  ;;  %vm635_vm2 = vcmask (!%p138_p2), 801792  }
   0x7   : > { %s1618_s20 = smov (!%p138_p2), 98  }
   0xd   : > { %s2390_s13 = smov (!%p161_p3, %s1409_s13), 1 }
   0xe   : > { %s1534_s14 = smul.u32 224, %s2390_s13 }
   0xf   : > { %s1535_s26 = smul.u32 84, %s2390_s13 }
  0x10   : > { %s1654_s17 = scalar_lea.vmem %s2385_s0, %s1534_s14 }
  0x11   : > { %v1657_v0 = vld [vmem:[%s1654_s17 + $0x4] ss:$28 sps:$4 sm:$0xff]   ;;  %v1671_v3 = vld [vmem:[%s1654_s17 + $0x3c] ss:$28 sps:$4 sm:$0xff]   ;;  %v1684_v6 = vld [vmem:[%s1654_s17 + $0x74] ss:$28 sps:$4 sm:$0xff]   ;;  %s2290_s29 = scalar_lea.vmem %s2388_s3, %s1535_s26 }
  0x12   : > { %v1660_v1 = vld [vmem:[%s1654_s17] ss:$28 sps:$4 sm:$0xff]   ;;  %337 = vrot.lane.b32.xlu0 %v1657_v0, %s1616_s18  ;;  %v1665_v2 = vld [vmem:[%s1654_s17 + $0x8] ss:$28 sps:$4 sm:$0xff]   ;;  %789 = vmatprep.subr.bf16.mxu0 %v1657_v0  ;;  %v1675_v4 = vld [vmem:[%s1654_s17 + $0x38] ss:$28 sps:$4 sm:$0xff]  }
  0x13   : > { %335 = vrot.lane.b32.xlu1 %v1660_v1, %s1616_s18  ;;  %790 = vmatpush1.bf16.msra.mxu0 %v1660_v1  ;;  %v1681_v5 = vld [vmem:[%s1654_s17 + $0x40] ss:$28 sps:$4 sm:$0xff]   ;;  %v1691_v7 = vld [vmem:[%s1654_s17 + $0x70] ss:$28 sps:$4 sm:$0xff]   ;;  %v1562_v10 = vld [vmem:[%s1654_s17 + $0x78] ss:$28 sps:$4 sm:$0xff]  }
  0x14   : > { %791 = vmatprep.subr.bf16.mxu0 %v1671_v3  ;;  %v1696_v8 = vld [vmem:[%s1654_s17 + $0xac] ss:$28 sps:$4 sm:$0xff]   ;;  %v1706_v11 = vld [vmem:[%s1654_s17 + $0x44] ss:$28 sps:$4 sm:$0xff]   ;;  %v1720_v13 = vld [vmem:[%s1654_s17 + $0x7c] ss:$28 sps:$4 sm:$0xff]  }
  0x15   : > { %v1699_v9 = vld [vmem:[%s1654_s17 + $0xc] ss:$28 sps:$4 sm:$0xff]   ;;  %v1579_v15 = vld [vmem:[%s1654_s17 + $0xb4] ss:$28 sps:$4 sm:$0xff]   ;;  %v1760_v18 = vld [vmem:[%s1654_s17 + $0x80] ss:$28 sps:$4 sm:$0xff]  }
  0x16   : > { %339 = vrot.lane.b32.xlu0 %v1665_v2, %s1616_s18  ;;  %882 = vmatprep.subr.bf16.mxu1 %v1699_v9  ;;  %v1711_v12 = vld [vmem:[%s1654_s17 + $0xa8] ss:$28 sps:$4 sm:$0xff]   ;;  %v1567_v14 = vld [vmem:[%s1654_s17 + $0xb0] ss:$28 sps:$4 sm:$0xff]   ;;  %v1772_v19 = vld [vmem:[%s1654_s17 + $0xb8] ss:$28 sps:$4 sm:$0xff]  }
  0x17   : > { %351 = vrot.lane.b32.xlu1 %v1671_v3, %s1616_s18  ;;  %792 = vmatpush1.bf16.msra.mxu0 %v1675_v4  ;;  %v1734_v16 = vld [vmem:[%s1654_s17 + $0x10] ss:$28 sps:$4 sm:$0xff]   ;;  %v1747_v17 = vld [vmem:[%s1654_s17 + $0x48] ss:$28 sps:$4 sm:$0xff]   ;;  %v1847_v24 = vld [vmem:[%s1654_s17 + $0x18] ss:$28 sps:$4 sm:$0xff]  }
  0x18   : > { %793 = vmatprep.subr.bf16.mxu0 %v1684_v6  ;;  %883 = vmatpush1.bf16.msra.mxu1 %v1665_v2  ;;  %v1842_v23 = vld [vmem:[%s1654_s17 + $0x14] ss:$28 sps:$4 sm:$0xff]   ;;  %v1855_v29 = vld [vmem:[%s1654_s17 + $0x4c] ss:$28 sps:$4 sm:$0xff]   ;;  %v1870_v35 = vld [vmem:[%s1654_s17 + $0x84] ss:$28 sps:$4 sm:$0xff]  }
  0x19   : > { %884 = vmatprep.subr.bf16.mxu1 %v1706_v11  ;;  %v1860_v30 = vld [vmem:[%s1654_s17 + $0x50] ss:$28 sps:$4 sm:$0xff]   ;;  %v1875_v36 = vld [vmem:[%s1654_s17 + $0x88] ss:$28 sps:$4 sm:$0xff]   ;;  %v1881_v40 = vld [vmem:[%s1654_s17 + $0xbc] ss:$28 sps:$4 sm:$0xff]  }
  0x1a   : > { %353 = vrot.lane.b32.xlu0 %v1681_v5, %s1616_s18  ;;  %v1886_v41 = vld [vmem:[%s1654_s17 + $0xc0] ss:$28 sps:$4 sm:$0xff]  }
  0x1b   : > { %349 = vrot.lane.b32.xlu1 %v1675_v4, %s1616_s18  ;;  %794 = vmatpush1.bf16.msra.mxu0 %v1691_v7 }
  0x1c   : > { %795 = vmatprep.subr.bf16.mxu0 %v1696_v8  ;;  %885 = vmatpush1.bf16.msra.mxu1 %v1681_v5 }
  0x1d   : > { %886 = vmatprep.subr.bf16.mxu1 %v1720_v13 }
  0x1e   : > { %365 = vrot.lane.b32.xlu0 %v1684_v6, %s1616_s18 }
  0x1f   : > { %367 = vrot.lane.b32.xlu1 %v1562_v10, %s1616_s18  ;;  %796 = vmatpush1.bf16.msra.mxu0 %v1711_v12 }
  0x20   : > { %887 = vmatpush1.bf16.msra.mxu1 %v1562_v10 }
  0x21   : > { %888 = vmatprep.subr.bf16.mxu1 %v1579_v15 }
  0x22   : > { %363 = vrot.lane.b32.xlu0 %v1691_v7, %s1616_s18 }
  0x23   : > { %379 = vrot.lane.b32.xlu1 %v1696_v8, %s1616_s18 }
  0x24   : > { %889 = vmatpush1.bf16.msra.mxu1 %v1567_v14 }
  0x26   : > { %381 = vrot.lane.b32.xlu0 %v1567_v14, %s1616_s18 }
  0x27   : > { %377 = vrot.lane.b32.xlu1 %v1711_v12, %s1616_s18 }
  0x2a   : > { %341 = vrot.lane.b32.xlu0 %v1699_v9, %s1616_s18 }
  0x2b   : > { %343 = vrot.lane.b32.xlu1 %v1734_v16, %s1616_s18 }
  0x2e   : > { %459 = vrot.lane.b32.xlu0 %v1657_v0, %s1617_s19 }
  0x2f   : > { %461 = vrot.lane.b32.xlu1 %v1665_v2, %s1617_s19 }
  0x32   : > { %457 = vrot.lane.b32.xlu0 %v1660_v1, %s1617_s19 }
  0x33   : > { %355 = vrot.lane.b32.xlu1 %v1706_v11, %s1616_s18 }
  0x36   : > { %357 = vrot.lane.b32.xlu0 %v1747_v17, %s1616_s18 }
  0x37   : > { %473 = vrot.lane.b32.xlu1 %v1671_v3, %s1617_s19 }
  0x3a   : > { %475 = vrot.lane.b32.xlu0 %v1681_v5, %s1617_s19 }
  0x3b   : > { %471 = vrot.lane.b32.xlu1 %v1675_v4, %s1617_s19 }
  0x3e   : > { %369 = vrot.lane.b32.xlu0 %v1720_v13, %s1616_s18 }
  0x3f   : > { %371 = vrot.lane.b32.xlu1 %v1760_v18, %s1616_s18 }
  0x42   : > { %487 = vrot.lane.b32.xlu0 %v1684_v6, %s1617_s19 }
  0x43   : > { %489 = vrot.lane.b32.xlu1 %v1562_v10, %s1617_s19 }
  0x46   : > { %485 = vrot.lane.b32.xlu0 %v1691_v7, %s1617_s19 }
  0x47   : > { %383 = vrot.lane.b32.xlu1 %v1579_v15, %s1616_s18 }
  0x4a   : > { %385 = vrot.lane.b32.xlu0 %v1772_v19, %s1616_s18 }
  0x4b   : > { %501 = vrot.lane.b32.xlu1 %v1696_v8, %s1617_s19 }
  0x4e   : > { %503 = vrot.lane.b32.xlu0 %v1567_v14, %s1617_s19 }
  0x4f   : > { %499 = vrot.lane.b32.xlu1 %v1711_v12, %s1617_s19 }
  0x52   : > { %463 = vrot.lane.b32.xlu0 %v1699_v9, %s1617_s19 }
  0x53   : > { %465 = vrot.lane.b32.xlu1 %v1734_v16, %s1617_s19 }
  0x56   : > { %581 = vrot.lane.b32.xlu0 %v1657_v0, %s1618_s20 }
  0x57   : > { %583 = vrot.lane.b32.xlu1 %v1665_v2, %s1618_s20 }
  0x5a   : > { %579 = vrot.lane.b32.xlu0 %v1660_v1, %s1618_s20 }
  0x5b   : > { %477 = vrot.lane.b32.xlu1 %v1706_v11, %s1617_s19 }
  0x5e   : > { %479 = vrot.lane.b32.xlu0 %v1747_v17, %s1617_s19 }
  0x5f   : > { %595 = vrot.lane.b32.xlu1 %v1671_v3, %s1618_s20 }
  0x62   : > { %597 = vrot.lane.b32.xlu0 %v1681_v5, %s1618_s20 }
  0x63   : > { %593 = vrot.lane.b32.xlu1 %v1675_v4, %s1618_s20 }
  0x66   : > { %491 = vrot.lane.b32.xlu0 %v1720_v13, %s1617_s19 }
  0x67   : > { %493 = vrot.lane.b32.xlu1 %v1760_v18, %s1617_s19 }
  0x6a   : > { %609 = vrot.lane.b32.xlu0 %v1684_v6, %s1618_s20 }
  0x6b   : > { %611 = vrot.lane.b32.xlu1 %v1562_v10, %s1618_s20 }
  0x6e   : > { %607 = vrot.lane.b32.xlu0 %v1691_v7, %s1618_s20 }
  0x6f   : > { %505 = vrot.lane.b32.xlu1 %v1579_v15, %s1617_s19 }
  0x72   : > { %507 = vrot.lane.b32.xlu0 %v1772_v19, %s1617_s19 }
  0x73   : > { %623 = vrot.lane.b32.xlu1 %v1696_v8, %s1618_s20 }
  0x76   : > { %625 = vrot.lane.b32.xlu0 %v1567_v14, %s1618_s20 }
  0x77   : > { %621 = vrot.lane.b32.xlu1 %v1711_v12, %s1618_s20 }
  0x7a   : > { %585 = vrot.lane.b32.xlu0 %v1699_v9, %s1618_s20 }
  0x7b   : > { %587 = vrot.lane.b32.xlu1 %v1734_v16, %s1618_s20 }
  0x7e   : > { %599 = vrot.lane.b32.xlu0 %v1706_v11, %s1618_s20 }
  0x7f   : > { %601 = vrot.lane.b32.xlu1 %v1747_v17, %s1618_s20 }
  0x82   : > { %613 = vrot.lane.b32.xlu0 %v1720_v13, %s1618_s20 }
  0x83   : > { %615 = vrot.lane.b32.xlu1 %v1760_v18, %s1618_s20 }
  0x84   : > { %v338_v21 = vpop.permute.xlu0 %337 }
  0x85   : > { %v1838_v22 = vpop.permute.xlu1 %335 }
  0x86   : > { %627 = vrot.lane.b32.xlu0 %v1579_v15, %s1618_s20  ;;  %v392_v28 = vsel %vm391_vm0, %v1838_v22, %v338_v21 }
  0x87   : > { %629 = vrot.lane.b32.xlu1 %v1772_v19, %s1618_s20 }
  0x88   : > { %v340_v25 = vpop.permute.xlu0 %339 }
  0x89   : > { %v352_v26 = vpop.permute.xlu1 %351  ;;  %v393_v27 = vsel %vm391_vm0, %v338_v21, %v340_v25 }
  0x8a   : > { %345 = vrot.lane.b32.xlu0 %v1842_v23, %s1616_s18  ;;  %797 = vmatprep.subr.bf16.mxu0 %v393_v27 }
  0x8b   : > { %347 = vrot.lane.b32.xlu1 %v1847_v24, %s1616_s18  ;;  %798 = vmatpush1.bf16.msra.mxu0 %v392_v28 }
  0x8c   : > { %v354_v31 = vpop.permute.xlu0 %353 }
  0x8d   : > { %v1862_v32 = vpop.permute.xlu1 %349  ;;  %v399_v33 = vsel %vm391_vm0, %v352_v26, %v354_v31 }
  0x8e   : > { %359 = vrot.lane.b32.xlu0 %v1855_v29, %s1616_s18  ;;  %799 = vmatprep.subr.bf16.mxu0 %v399_v33  ;;  %v398_v34 = vsel %vm391_vm0, %v1862_v32, %v352_v26 }
  0x8f   : > { %361 = vrot.lane.b32.xlu1 %v1860_v30, %s1616_s18  ;;  %800 = vmatpush1.bf16.msra.mxu0 %v398_v34 }
  0x90   : > { %v366_v37 = vpop.permute.xlu0 %365 }
  0x91   : > { %v368_v38 = vpop.permute.xlu1 %367 }
  0x92   : > { %373 = vrot.lane.b32.xlu0 %v1870_v35, %s1616_s18  ;;  %v405_v39 = vsel %vm391_vm0, %v366_v37, %v368_v38 }
  0x93   : > { %375 = vrot.lane.b32.xlu1 %v1875_v36, %s1616_s18  ;;  %801 = vmatprep.subr.bf16.mxu0 %v405_v39 }
  0x94   : > { %v1888_v42 = vpop.permute.xlu0 %363 }
  0x95   : > { %v380_v43 = vpop.permute.xlu1 %379  ;;  %v404_v44 = vsel %vm391_vm0, %v1888_v42, %v366_v37 }
  0x96   : > { %387 = vrot.lane.b32.xlu0 %v1881_v40, %s1616_s18  ;;  %802 = vmatpush1.bf16.msra.mxu0 %v404_v44 }
  0x97   : > { %389 = vrot.lane.b32.xlu1 %v1886_v41, %s1616_s18 }
  0x98   : > { %v1896_v45 = vpop.permute.xlu0 %381 }
  0x99   : > { %v1898_v46 = vpop.permute.xlu1 %377  ;;  %v411_v47 = vsel %vm391_vm0, %v380_v43, %v1896_v45 }
  0x9a   : > { %469 = vrot.lane.b32.xlu0 %v1847_v24, %s1617_s19  ;;  %803 = vmatprep.subr.bf16.mxu0 %v411_v47  ;;  %v410_v48 = vsel %vm391_vm0, %v1898_v46, %v380_v43 }
  0x9b   : > { %467 = vrot.lane.b32.xlu1 %v1842_v23, %s1617_s19  ;;  %804 = vmatpush1.bf16.msra.mxu0 %v410_v48 }
  0x9c   : > { %v342_v49 = vpop.permute.xlu0 %341 }
  0x9d   : > { %v1908_v50 = vpop.permute.xlu1 %343  ;;  %v394_v51 = vsel %vm391_vm0, %v340_v25, %v342_v49 }
  0x9e   : > { %483 = vrot.lane.b32.xlu0 %v1860_v30, %s1617_s19  ;;  %v395_v52 = vsel %vm391_vm0, %v342_v49, %v1908_v50 }
  0x9f   : > { %481 = vrot.lane.b32.xlu1 %v1855_v29, %s1617_s19  ;;  %890 = vmatprep.subr.bf16.mxu1 %v395_v52 }
  0xa0   : > { %891 = vmatpush1.bf16.msra.mxu1 %v394_v51  ;;  %v460_v53 = vpop.permute.xlu0 %459 }
  0xa1   : > { %v462_v54 = vpop.permute.xlu1 %461 }
  0xa2   : > { %497 = vrot.lane.b32.xlu0 %v1875_v36, %s1617_s19  ;;  %v515_v55 = vsel %vm513_vm1, %v460_v53, %v462_v54 }
  0xa3   : > { %495 = vrot.lane.b32.xlu1 %v1870_v35, %s1617_s19  ;;  %805 = vmatprep.subr.bf16.mxu0 %v515_v55 }
  0xa4   : > { %v1922_v56 = vpop.permute.xlu0 %457 }
  0xa5   : > { %v356_v57 = vpop.permute.xlu1 %355  ;;  %v514_v58 = vsel %vm513_vm1, %v1922_v56, %v460_v53 }
  0xa6   : > { %511 = vrot.lane.b32.xlu0 %v1886_v41, %s1617_s19  ;;  %806 = vmatpush1.bf16.msra.mxu0 %v514_v58  ;;  %v400_v62 = vsel %vm391_vm0, %v354_v31, %v356_v57  ;;  %v216_v58 = vld [vmem:[%s2387_s2] sm:$0xff] }
  0xa7   : > { %509 = vrot.lane.b32.xlu1 %v1881_v40, %s1617_s19 }
  0xa8   : > { %v1930_v59 = vpop.permute.xlu0 %357 }
  0xa9   : > { %v474_v60 = vpop.permute.xlu1 %473  ;;  %v401_v61 = vsel %vm391_vm0, %v356_v57, %v1930_v59 }
  0xaa   : > { %591 = vrot.lane.b32.xlu0 %v1847_v24, %s1618_s20  ;;  %892 = vmatprep.subr.bf16.mxu1 %v401_v61 }
  0xab   : > { %589 = vrot.lane.b32.xlu1 %v1842_v23, %s1618_s20  ;;  %893 = vmatpush1.bf16.msra.mxu1 %v400_v62  ;;  %v1619_v62 = vmov 0  }
  0xac   : > { %v476_v63 = vpop.permute.xlu0 %475  ;;  %1548 = vset.pattern.permute.xlu0 %v1619_v62  ;;  %1549 = vset.pattern.permute.xlu1 %v1619_v62 }
  0xad   : > { %v1939_v0 = vpop.permute.xlu1 %471  ;;  %v521_v1 = vsel %vm513_vm1, %v474_v60, %v476_v63 }
  0xae   : > { %605 = vrot.lane.b32.xlu0 %v1860_v30, %s1618_s20  ;;  %807 = vmatprep.subr.bf16.mxu0 %v521_v1  ;;  %v520_v2 = vsel %vm513_vm1, %v1939_v0, %v474_v60  ;;  %v217_v60 = vld [vmem:[%s2387_s2 + $0x8] sm:$0xff] }
  0xaf   : > { %603 = vrot.lane.b32.xlu1 %v1855_v29, %s1618_s20  ;;  %808 = vmatpush1.bf16.msra.mxu0 %v520_v2 }
  0xb0   : > { %v370_v3 = vpop.permute.xlu0 %369 }
  0xb1   : > { %v1948_v4 = vpop.permute.xlu1 %371  ;;  %v406_v5 = vsel %vm391_vm0, %v368_v38, %v370_v3 }
  0xb2   : > { %619 = vrot.lane.b32.xlu0 %v1875_v36, %s1618_s20  ;;  %v407_v6 = vsel %vm391_vm0, %v370_v3, %v1948_v4  ;;  %v218_v3 = vld [vmem:[%s2387_s2 + $0x10] sm:$0xff] }
  0xb3   : > { %617 = vrot.lane.b32.xlu1 %v1870_v35, %s1618_s20  ;;  %894 = vmatprep.subr.bf16.mxu1 %v407_v6 }
  0xb4   : > { %895 = vmatpush1.bf16.msra.mxu1 %v406_v5  ;;  %v488_v7 = vpop.permute.xlu0 %487 }
  0xb5   : > { %v490_v8 = vpop.permute.xlu1 %489 }
  0xb6   : > { %633 = vrot.lane.b32.xlu0 %v1886_v41, %s1618_s20  ;;  %v527_v9 = vsel %vm513_vm1, %v488_v7, %v490_v8 }
  0xb7   : > { %631 = vrot.lane.b32.xlu1 %v1881_v40, %s1618_s20  ;;  %809 = vmatprep.subr.bf16.mxu0 %v527_v9 }
  0xb8   : > { %v1962_v10 = vpop.permute.xlu0 %485 }
  0xb9   : > { %v384_v11 = vpop.permute.xlu1 %383  ;;  %v526_v12 = vsel %vm513_vm1, %v1962_v10, %v488_v7 }
  0xba   : > { %810 = vmatpush1.bf16.msra.mxu0 %v526_v12  ;;  %v412_v21 = vsel %vm391_vm0, %v1896_v45, %v384_v11  ;;  %1214 = vperm.xlu0 %1548, %v216_v58  }
  0xbb   : > { %1219 = vperm.xlu1 %1549, %v217_v60  }
  0xbc   : > { %v1966_v13 = vpop.permute.xlu0 %385 }
  0xbd   : > { %v502_v14 = vpop.permute.xlu1 %501  ;;  %v413_v15 = vsel %vm391_vm0, %v384_v11, %v1966_v13 }
  0xbe   : > { %896 = vmatprep.subr.bf16.mxu1 %v413_v15 }
  0xbf   : > { %897 = vmatpush1.bf16.msra.mxu1 %v412_v21  ;;  %1224 = vperm.xlu1 %1549, %v218_v3  }
  0xc0   : > { %v504_v25 = vpop.permute.xlu0 %503 }
  0xc1   : > { %v1972_v26 = vpop.permute.xlu1 %499  ;;  %v533_v27 = vsel %vm513_vm1, %v502_v14, %v504_v25 }
  0xc2   : > { %811 = vmatprep.subr.bf16.mxu0 %v533_v27  ;;  %v532_v28 = vsel %vm513_vm1, %v1972_v26, %v502_v14 }
  0xc3   : > { %812 = vmatpush1.bf16.msra.mxu0 %v532_v28 }
  0xc4   : > { %v464_v31 = vpop.permute.xlu0 %463 }
  0xc5   : > { %v1977_v33 = vpop.permute.xlu1 %465  ;;  %v516_v34 = vsel %vm513_vm1, %v462_v54, %v464_v31 }
  0xc6   : > { %v517_v37 = vsel %vm513_vm1, %v464_v31, %v1977_v33 }
  0xc7   : > { %898 = vmatprep.subr.bf16.mxu1 %v517_v37  ;;  %v2029_v37 = vld [vmem:[%s2386_s1] ss:$8 sps:$4 sm:$0xff]  }
  0xc8   : > { %899 = vmatpush1.bf16.msra.mxu1 %v516_v34  ;;  %v582_v38 = vpop.permute.xlu0 %581 }
  0xc9   : > { %v584_v39 = vpop.permute.xlu1 %583 }
  0xca   : > { %v637_v43 = vsel %vm635_vm2, %v582_v38, %v584_v39 }
  0xcb   : > { %813 = vmatprep.subr.bf16.mxu0 %v637_v43 }
  0xcc   : > { %v1983_v44 = vpop.permute.xlu0 %579 }
  0xcd   : > { %v478_v45 = vpop.permute.xlu1 %477  ;;  %v636_v47 = vsel %vm635_vm2, %v1983_v44, %v582_v38 }
  0xce   : > { %814 = vmatpush1.bf16.msra.mxu0 %v636_v47  ;;  %v522_v52 = vsel %vm513_vm1, %v476_v63, %v478_v45 }
  0xd0   : > { %v1987_v48 = vpop.permute.xlu0 %479 }
  0xd1   : > { %v596_v49 = vpop.permute.xlu1 %595  ;;  %v523_v51 = vsel %vm513_vm1, %v478_v45, %v1987_v48  ;;  %v2038_v45 = vld [vmem:[%s2386_s1 + $0x14] ss:$8 sps:$4 sm:$0xff]  }
  0xd2   : > { %900 = vmatprep.subr.bf16.mxu1 %v523_v51 }
  0xd3   : > { %901 = vmatpush1.bf16.msra.mxu1 %v522_v52  ;;  %v2054_v52 = vld [vmem:[%s2386_s1 + $0x10] ss:$8 sps:$4 sm:$0xff]  }
  0xd4   : > { %v598_v53 = vpop.permute.xlu0 %597 }
  0xd5   : > { %v1992_v54 = vpop.permute.xlu1 %593  ;;  %v643_v55 = vsel %vm635_vm2, %v596_v49, %v598_v53 }
  0xd6   : > { %815 = vmatprep.subr.bf16.mxu0 %v643_v55  ;;  %v642_v57 = vsel %vm635_vm2, %v1992_v54, %v596_v49  ;;  %v2064_v55 = vld [vmem:[%s2386_s1 + $0x24] ss:$8 sps:$4 sm:$0xff]  }
  0xd7   : > { %816 = vmatpush1.bf16.msra.mxu0 %v642_v57 }
  0xd8   : > { %v492_v61 = vpop.permute.xlu0 %491 }
  0xd9   : > { %v2003_v63 = vpop.permute.xlu1 %493  ;;  %v528_v1 = vsel %vm513_vm1, %v490_v8, %v492_v61 }
  0xda   : > { %v529_v2 = vsel %vm513_vm1, %v492_v61, %v2003_v63  ;;  %v2080_v61 = vld [vmem:[%s2386_s1 + $0x20] ss:$8 sps:$4 sm:$0xff]  }
  0xdb   : > { %902 = vmatprep.subr.bf16.mxu1 %v529_v2 }
  0xdc   : > { %903 = vmatpush1.bf16.msra.mxu1 %v528_v1  ;;  %v610_v5 = vpop.permute.xlu0 %609 }
  0xdd   : > { %v612_v6 = vpop.permute.xlu1 %611 }
  0xde   : > { %v649_v7 = vsel %vm635_vm2, %v610_v5, %v612_v6 }
  0xdf   : > { %817 = vmatprep.subr.bf16.mxu0 %v649_v7 }
  0xe0   : > { %v2012_v9 = vpop.permute.xlu0 %607 }
  0xe1   : > { %v506_v8 = vpop.permute.xlu1 %505  ;;  %v648_v11 = vsel %vm635_vm2, %v2012_v9, %v610_v5 }
  0xe2   : > { %818 = vmatpush1.bf16.msra.mxu0 %v648_v11  ;;  %v534_v21 = vsel %vm513_vm1, %v504_v25, %v506_v8 }
  0xe4   : > { %v2016_v12 = vpop.permute.xlu0 %507 }
  0xe5   : > { %v624_v14 = vpop.permute.xlu1 %623  ;;  %v535_v15 = vsel %vm513_vm1, %v506_v8, %v2016_v12  ;;  %v2112_v8 = vld [vmem:[%s2386_s1 + $0x44] ss:$8 sps:$4 sm:$0xff]  }
  0xe6   : > { %904 = vmatprep.subr.bf16.mxu1 %v535_v15 }
  0xe7   : > { %905 = vmatpush1.bf16.msra.mxu1 %v534_v21 }
  0xe8   : > { %v626_v27 = vpop.permute.xlu0 %625 }
  0xe9   : > { %v2021_v28 = vpop.permute.xlu1 %621  ;;  %v655_v31 = vsel %vm635_vm2, %v624_v14, %v626_v27 }
  0xea   : > { %819 = vmatprep.subr.bf16.mxu0 %v655_v31  ;;  %v654_v34 = vsel %vm635_vm2, %v2021_v28, %v624_v14  ;;  %v2133_v31 = vld [vmem:[%s2386_s1 + $0x40] ss:$8 sps:$4 sm:$0xff]  }
  0xeb   : > { %820 = vmatpush1.bf16.msra.mxu0 %v654_v34 }
  0xec   : > { %v586_v38 = vpop.permute.xlu0 %585  ;;  %975 = vmatprep.subr.bf16.mxu0 %v1842_v23 }
  0xed   : > { %v2032_v25 = vpop.permute.xlu1 %587  ;;  %v638_v43 = vsel %vm635_vm2, %v584_v39, %v586_v38 }
  0xee   : > { %822 = vmatmul.mubr.bf16.vlgmr.msra.gmra.mrb[0].mxu0 %v2029_v37  ;;  %v639_v47 = vsel %vm635_vm2, %v586_v38, %v2032_v25 }
  0xef   : > { %906 = vmatprep.subr.bf16.mxu1 %v639_v47  ;;  %976 = vmatpush1.bf16.msra.mxu0 %v1734_v16 }
  0xf0   : > { %907 = vmatpush1.bf16.msra.mxu1 %v638_v43  ;;  %v600_v49 = vpop.permute.xlu0 %599  ;;  %977 = vmatprep.subr.bf16.mxu0 %v1855_v29 }
  0xf1   : > { %v2045_v23 = vpop.permute.xlu1 %601  ;;  %v644_v39 = vsel %vm635_vm2, %v598_v53, %v600_v49  ;;  %831 = vmatprep.mubr.bf16.mxu0 %v2038_v45 }
  0xf2   : > { %v645_v51 = vsel %vm635_vm2, %v600_v49, %v2045_v23 }
  0xf3   : > { %908 = vmatprep.subr.bf16.mxu1 %v645_v51  ;;  %978 = vmatpush1.bf16.msra.mxu0 %v1747_v17 }
  0xf4   : > { %909 = vmatpush1.bf16.msra.mxu1 %v644_v39  ;;  %v614_v16 = vpop.permute.xlu0 %613  ;;  %979 = vmatprep.subr.bf16.mxu0 %v1870_v35 }
  0xf5   : > { %v2058_v29 = vpop.permute.xlu1 %615  ;;  %v650_v53 = vsel %vm635_vm2, %v612_v6, %v614_v16  ;;  %v2107_v6 = vld [vmem:[%s2386_s1 + $0x30] ss:$8 sps:$4 sm:$0xff]  }
  0xf6   : > { %832 = vmatmul.mubr.bf16.gmra.mrb[4].mxu0 %v2054_v52  ;;  %v651_v57 = vsel %vm635_vm2, %v614_v16, %v2058_v29 }
  0xf7   : > { %910 = vmatprep.subr.bf16.mxu1 %v651_v57  ;;  %980 = vmatpush1.bf16.msra.mxu0 %v1760_v18 }
  0xf8   : > { %911 = vmatpush1.bf16.msra.mxu1 %v650_v53  ;;  %v628_v17 = vpop.permute.xlu0 %627  ;;  %981 = vmatprep.subr.bf16.mxu0 %v1881_v40  ;;  %v2086_v40 = vld [vmem:[%s2386_s1 + $0x34] ss:$8 sps:$4 sm:$0xff]   ;;  %v2158_v53 = vld [vmem:[%s2386_s1 + $0x50] ss:$8 sps:$4 sm:$0xff]  }
  0xf9   : > { %v2071_v35 = vpop.permute.xlu1 %629  ;;  %v656_v58 = vsel %vm635_vm2, %v626_v27, %v628_v17  ;;  %841 = vmatprep.mubr.bf16.mxu0 %v2064_v55 }
  0xfa   : > { %v657_v60 = vsel %vm635_vm2, %v628_v17, %v2071_v35 }
  0xfb   : > { %912 = vmatprep.subr.bf16.mxu1 %v657_v60  ;;  %982 = vmatpush1.bf16.msra.mxu0 %v1772_v19 }
  0xfc   : > { %913 = vmatpush1.bf16.msra.mxu1 %v656_v58  ;;  %v346_v18 = vpop.permute.xlu0 %345 }
  0xfd   : > { %v396_v62 = vsel %vm391_vm0, %v1908_v50, %v346_v18  ;;  %v2090_v1 = vpop.permute.xlu1 %347 }
  0xfe   : > { %842 = vmatmul.mubr.bf16.gmra.mrb[8].mxu0 %v2080_v61  ;;  %v397_v2 = vsel %vm391_vm0, %v346_v18, %v2090_v1 }
  0xff   : > { %915 = vmatmul.mubr.bf16.vlgmr.msra.gmra.mrb[0].mxu1 %v2029_v37  ;;  %983 = vmatprep.subr.bf16.mxu0 %v397_v2 }
 0x100   : > { %984 = vmatpush1.bf16.msra.mxu0 %v396_v62  ;;  %v360_v19 = vpop.permute.xlu0 %359  ;;  %851 = vmatprep.mubr.bf16.mxu0 %v2086_v40 }
 0x101   : > { %v402_v3 = vsel %vm391_vm0, %v1930_v59, %v360_v19  ;;  %v2099_v5 = vpop.permute.xlu1 %361  ;;  %924 = vmatprep.mubr.bf16.mxu1 %v2038_v45 }
 0x102   : > { %v403_v50 = vsel %vm391_vm0, %v360_v19, %v2099_v5 }
 0x103   : > { %985 = vmatprep.subr.bf16.mxu0 %v403_v50 }
 0x104   : > { %986 = vmatpush1.bf16.msra.mxu0 %v402_v3  ;;  %v374_v7 = vpop.permute.xlu0 %373 }
 0x105   : > { %v408_v59 = vsel %vm391_vm0, %v1948_v4, %v374_v7  ;;  %v2116_v11 = vpop.permute.xlu1 %375 }
 0x106   : > { %852 = vmatmul.mubr.bf16.gmra.mrb[12].mxu0 %v2107_v6  ;;  %v409_v14 = vsel %vm391_vm0, %v374_v7, %v2116_v11 }
 0x107   : > { %925 = vmatmul.mubr.bf16.gmra.mrb[4].mxu1 %v2054_v52  ;;  %987 = vmatprep.subr.bf16.mxu0 %v409_v14 }
 0x108   : > { %988 = vmatpush1.bf16.msra.mxu0 %v408_v59  ;;  %v388_v15 = vpop.permute.xlu0 %387  ;;  %861 = vmatprep.mubr.bf16.mxu0 %v2112_v8  ;;  %v451_v59 = vsel %vm391_vm0, %v2116_v11, %v1888_v42 }
 0x109   : > { %v414_v21 = vsel %vm391_vm0, %v1966_v13, %v388_v15  ;;  %v2125_v27 = vpop.permute.xlu1 %389  ;;  %934 = vmatprep.mubr.bf16.mxu1 %v2064_v55  ;;  %v2140_v13 = vld [vmem:[%s2386_s1 + $0x54] ss:$8 sps:$4 sm:$0xff]  }
 0x10a   : > { %v415_v4 = vsel %vm391_vm0, %v388_v15, %v2125_v27  ;;  %v455_v42 = vsel %vm391_vm0, %v2125_v27, %v1898_v46 }
 0x10b   : > { %989 = vmatprep.subr.bf16.mxu0 %v415_v4 }
 0x10c   : > { %990 = vmatpush1.bf16.msra.mxu0 %v414_v21  ;;  %v470_v34 = vpop.permute.xlu0 %469 }
 0x10d   : > { %v468_v38 = vpop.permute.xlu1 %467  ;;  %v565_v43 = vsel %vm513_vm1, %v470_v34, %v1922_v56 }
 0x10e   : > { %v518_v47 = vsel %vm513_vm1, %v1977_v33, %v468_v38  ;;  %862 = vmatmul.mubr.bf16.gmra.mrb[16].mxu0 %v2133_v31  ;;  %v519_v49 = vsel %vm513_vm1, %v468_v38, %v470_v34  ;;  %1482 = vmatprep.subr.bf16.mxu1 %v565_v43 }
 0x10f   : > { %935 = vmatmul.mubr.bf16.gmra.mrb[8].mxu1 %v2080_v61  ;;  %991 = vmatprep.subr.bf16.mxu0 %v519_v49 }
 0x110   : > { %992 = vmatpush1.bf16.msra.mxu0 %v518_v47  ;;  %1483 = vmatpush3.bf16.msra.mxu1 %v1847_v24  ;;  %v484_v56 = vpop.permute.xlu0 %483 }
 0x111   : > { %v482_v39 = vpop.permute.xlu1 %481  ;;  %v569_v51 = vsel %vm513_vm1, %v484_v56, %v1939_v0  ;;  %871 = vmatprep.mubr.bf16.mxu0 %v2140_v13  ;;  %944 = vmatprep.mubr.bf16.mxu1 %v2086_v40 }
 0x112   : > { %v524_v33 = vsel %vm513_vm1, %v1987_v48, %v482_v39  ;;  %v525_v16 = vsel %vm513_vm1, %v482_v39, %v484_v56  ;;  %1484 = vmatprep.subr.bf16.mxu1 %v569_v51 }
 0x113   : > { %993 = vmatprep.subr.bf16.mxu0 %v525_v16 }
 0x114   : > { %994 = vmatpush1.bf16.msra.mxu0 %v524_v33  ;;  %1485 = vmatpush3.bf16.msra.mxu1 %v1860_v30  ;;  %v498_v24 = vpop.permute.xlu0 %497 }
 0x115   : > { %v496_v0 = vpop.permute.xlu1 %495  ;;  %v573_v57 = vsel %vm513_vm1, %v498_v24, %v1962_v10 }
 0x116   : > { %v530_v48 = vsel %vm513_vm1, %v2003_v63, %v496_v0  ;;  %872 = vmatmul.mubr.bf16.gmra.mrb[20].mxu0 %v2158_v53  ;;  %v531_v17 = vsel %vm513_vm1, %v496_v0, %v498_v24  ;;  %1486 = vmatprep.subr.bf16.mxu1 %v573_v57 }
 0x117   : > { %945 = vmatmul.mubr.bf16.gmra.mrb[12].mxu1 %v2107_v6  ;;  %995 = vmatprep.subr.bf16.mxu0 %v531_v17 }
 0x118   : > { %996 = vmatpush1.bf16.msra.mxu0 %v530_v48  ;;  %1487 = vmatpush3.bf16.msra.mxu1 %v1875_v36  ;;  %v512_v30 = vpop.permute.xlu0 %511 }
 0x119   : > { %v510_v58 = vpop.permute.xlu1 %509  ;;  %v577_v60 = vsel %vm513_vm1, %v512_v30, %v1972_v26  ;;  %954 = vmatprep.mubr.bf16.mxu1 %v2112_v8  ;;  %1007 = vmatprep.mubr.bf16.mxu0 %v1812_v20 }
 0x11a   : > { %v536_v10 = vsel %vm513_vm1, %v2016_v12, %v510_v58  ;;  %v537_v63 = vsel %vm513_vm1, %v510_v58, %v512_v30  ;;  %1488 = vmatprep.subr.bf16.mxu1 %v577_v60  ;;  %v443_v12 = vsel %vm391_vm0, %v2090_v1, %v1838_v22  ;;  %v447_v22 = vsel %vm391_vm0, %v2099_v5, %v1862_v32 }
 0x11b   : > { %997 = vmatprep.subr.bf16.mxu0 %v537_v63 }
 0x11c   : > { %998 = vmatpush1.bf16.msra.mxu0 %v536_v10  ;;  %1489 = vmatpush3.bf16.msra.mxu1 %v1886_v41  ;;  %v592_v36 = vpop.permute.xlu0 %591 }
 0x11d   : > { %v590_v18 = vpop.permute.xlu1 %589  ;;  %v687_v62 = vsel %vm635_vm2, %v592_v36, %v1983_v44 }
 0x11e   : > { %v640_v26 = vsel %vm635_vm2, %v2032_v25, %v590_v18  ;;  %v641_v2 = vsel %vm635_vm2, %v590_v18, %v592_v36  ;;  %1490 = vmatprep.subr.bf16.mxu1 %v687_v62 }
 0x11f   : > { %955 = vmatmul.mubr.bf16.gmra.mrb[16].mxu1 %v2133_v31  ;;  %999 = vmatprep.subr.bf16.mxu0 %v641_v2 }
 0x120   : > { %1000 = vmatpush1.bf16.msra.mxu0 %v640_v26  ;;  %1491 = vmatpush3.bf16.msra.mxu1 %v443_v12  ;;  %v606_v41 = vpop.permute.xlu0 %605 }
 0x121   : > { %v604_v19 = vpop.permute.xlu1 %603  ;;  %v691_v44 = vsel %vm635_vm2, %v606_v41, %v1992_v54  ;;  %964 = vmatprep.mubr.bf16.mxu1 %v2140_v13 }
 0x122   : > { %v646_v25 = vsel %vm635_vm2, %v2045_v23, %v604_v19  ;;  %v647_v3 = vsel %vm635_vm2, %v604_v19, %v606_v41  ;;  %1492 = vmatprep.subr.bf16.mxu1 %v691_v44 }
 0x123   : > { %1001 = vmatprep.subr.bf16.mxu0 %v647_v3 }
 0x124   : > { %1002 = vmatpush1.bf16.msra.mxu0 %v646_v25  ;;  %1493 = vmatpush3.bf16.msra.mxu1 %v447_v22  ;;  %v620_v1 = vpop.permute.xlu0 %619 }
 0x125   : > { %v618_v50 = vpop.permute.xlu1 %617  ;;  %v695_v54 = vsel %vm635_vm2, %v620_v1, %v2012_v9 }
 0x126   : > { %v652_v7 = vsel %vm635_vm2, %v2058_v29, %v618_v50  ;;  %v653_v23 = vsel %vm635_vm2, %v618_v50, %v620_v1  ;;  %1494 = vmatprep.subr.bf16.mxu1 %v695_v54 }
 0x127   : > { %965 = vmatmul.mubr.bf16.gmra.mrb[20].mxu1 %v2158_v53  ;;  %1003 = vmatprep.subr.bf16.mxu0 %v653_v23 }
 0x128   : > { %1004 = vmatpush1.bf16.msra.mxu0 %v652_v7  ;;  %1495 = vmatpush3.bf16.msra.mxu1 %v451_v59  ;;  %v634_v32 = vpop.permute.xlu0 %633 }
 0x129   : > { %v632_v5 = vpop.permute.xlu1 %631  ;;  %v699_v9 = vsel %vm635_vm2, %v634_v32, %v2021_v28  ;;  %1100 = vmatprep.mubr.bf16.mxu1 %v1812_v20 }
 0x12a   : > { %v658_v29 = vsel %vm635_vm2, %v2071_v35, %v632_v5  ;;  %v659_v14 = vsel %vm635_vm2, %v632_v5, %v634_v32  ;;  %1496 = vmatprep.subr.bf16.mxu1 %v699_v9 }
 0x12b   : > { %1005 = vmatprep.subr.bf16.mxu0 %v659_v14 }
 0x12c   : > { %1006 = vmatpush1.bf16.msra.mxu0 %v658_v29  ;;  %1497 = vmatpush3.bf16.msra.mxu1 %v455_v42 }
 0x12f   : > { %1008 = vmatmul.mubr.bf16.vlgmr.msra.gmra.mrb[24].mxu0 %v2029_v37  ;;  %1101 = vmatmul.mubr.bf16.vlgmr.msra.gmra.mrb[24].mxu1 %v2029_v37 }
 0x130   : > { %1017 = vmatprep.mubr.bf16.mxu0 %v2038_v45  ;;  %1108 = vmatprep.mubr.bf16.mxu1 %v2038_v45 }
 0x137   : > { %1018 = vmatmul.mubr.bf16.gmra.mrb[28].mxu0 %v2054_v52  ;;  %1109 = vmatmul.mubr.bf16.gmra.mrb[28].mxu1 %v2054_v52 }
 0x138   : > { %1027 = vmatprep.mubr.bf16.mxu0 %v2064_v55  ;;  %1116 = vmatprep.mubr.bf16.mxu1 %v2064_v55 }
 0x139   : > { %v2274_v26 = vpop.permute.xlu0 %1214 }
 0x13a   : > { %v2282_v25 = vpop.permute.xlu1 %1219 }
 0x13f   : > { %1028 = vmatmul.mubr.bf16.gmra.mrb[32].mxu0 %v2080_v61  ;;  %1117 = vmatmul.mubr.bf16.gmra.mrb[32].mxu1 %v2080_v61 }
 0x140   : > { %1037 = vmatprep.mubr.bf16.mxu0 %v2086_v40  ;;  %1124 = vmatprep.mubr.bf16.mxu1 %v2086_v40 }
 0x147   : > { %1038 = vmatmul.mubr.bf16.gmra.mrb[36].mxu0 %v2107_v6  ;;  %1125 = vmatmul.mubr.bf16.gmra.mrb[36].mxu1 %v2107_v6 }
 0x148   : > { %1047 = vmatprep.mubr.bf16.mxu0 %v2112_v8  ;;  %1132 = vmatprep.mubr.bf16.mxu1 %v2112_v8 }
 0x14f   : > { %1048 = vmatmul.mubr.bf16.gmra.mrb[40].mxu0 %v2133_v31  ;;  %1133 = vmatmul.mubr.bf16.gmra.mrb[40].mxu1 %v2133_v31 }
 0x150   : > { %1057 = vmatprep.mubr.bf16.mxu0 %v2140_v13  ;;  %1140 = vmatprep.mubr.bf16.mxu1 %v2140_v13 }
 0x157   : > { %1058 = vmatmul.mubr.bf16.gmra.mrb[44].mxu0 %v2158_v53  ;;  %1141 = vmatmul.mubr.bf16.gmra.mrb[44].mxu1 %v2158_v53 }
 0x1c1   : > { %v823_v20 = vpop.f32.mrb[0].mxu0 }
 0x1c2   : > { %v825_v46 = vpop.f32.mrb[1].mxu0 }
 0x1c3   : > { %v827_v28 = vpop.f32.mrb[2].mxu0 }
 0x1c4   : > { %v2235_v37 = vpop.f32.mrb[3].mxu0 }
 0x1c9   : > { %v2237_v45 = vpop.f32.mrb[4].mxu0 }
 0x1ca   : > { %v2239_v52 = vpop.f32.mrb[5].mxu0 }
 0x1cb   : > { %v837_v55 = vpop.f32.mrb[6].mxu0 }
 0x1cc   : > { %v1149_v35 = vmax.f32 %v823_v20, %v837_v55  ;;  %v839_v61 = vpop.f32.mrb[7].mxu0 }
 0x1cd   : > { %v1150_v40 = vmax.f32 %v825_v46, %v839_v61 }
 0x1d1   : > { %v843_v6 = vpop.f32.mrb[8].mxu0 }
 0x1d2   : > { %v1156_v8 = vmax.f32 %v827_v28, %v843_v6  ;;  %v845_v11 = vpop.f32.mrb[9].mxu0  ;;  %v2241_v15 = vpop.f32.mrb[0].mxu1 }
 0x1d3   : > { %v1157_v21 = vmax.f32 %v2235_v37, %v845_v11  ;;  %v2244_v27 = vpop.f32.mrb[1].mxu1  ;;  %v847_v4 = vpop.f32.mrb[10].mxu0 }
 0x1d4   : > { %v1163_v31 = vmax.f32 %v2237_v45, %v847_v4  ;;  %v2247_v34 = vpop.f32.mrb[2].mxu1  ;;  %v849_v38 = vpop.f32.mrb[11].mxu0 }
 0x1d5   : > { %v1164_v43 = vmax.f32 %v2239_v52, %v849_v38  ;;  %v2250_v13 = vpop.f32.mrb[3].mxu1  ;;  %v2292_v52 = vpop.permute.xlu1 %1224 }
 0x1d9   : > { %v853_v47 = vpop.f32.mrb[12].mxu0 }
 0x1da   : > { %v2252_v49 = vpop.f32.mrb[4].mxu1  ;;  %v855_v56 = vpop.f32.mrb[13].mxu0 }
 0x1db   : > { %v2254_v39 = vpop.f32.mrb[5].mxu1  ;;  %v857_v51 = vpop.f32.mrb[14].mxu0 }
 0x1dc   : > { %v2256_v33 = vpop.f32.mrb[6].mxu1  ;;  %v859_v16 = vpop.f32.mrb[15].mxu0 }
 0x1dd   : > { %v1151_v53 = vmax.f32 %v2241_v15, %v2256_v33  ;;  %v2260_v24 = vpop.f32.mrb[7].mxu1 }
 0x1de   : > { %v1152_v0 = vmax.f32 %v2244_v27, %v2260_v24 }
 0x1e1   : > { %v863_v57 = vpop.f32.mrb[16].mxu0 }
 0x1e2   : > { %v2264_v48 = vpop.f32.mrb[8].mxu1  ;;  %v865_v17 = vpop.f32.mrb[17].mxu0 }
 0x1e3   : > { %v1158_v30 = vmax.f32 %v2247_v34, %v2264_v48  ;;  %v2268_v58 = vpop.f32.mrb[9].mxu1  ;;  %v867_v60 = vpop.f32.mrb[18].mxu0 }
 0x1e4   : > { %v1159_v10 = vmax.f32 %v2250_v13, %v2268_v58  ;;  %v1170_v63 = vmax.f32 %v853_v47, %v867_v60  ;;  %v869_v36 = vpop.f32.mrb[19].mxu0  ;;  %v2272_v18 = vpop.f32.mrb[10].mxu1 }
 0x1e5   : > { %v1171_v62 = vmax.f32 %v855_v56, %v869_v36  ;;  %v1165_v2 = vmax.f32 %v2252_v49, %v2272_v18  ;;  %v2278_v12 = vpop.f32.mrb[11].mxu1 }
 0x1e6   : > { %v1191_v41 = vmax.f32 %v1149_v35, %v1170_v63  ;;  %v1166_v19 = vmax.f32 %v2254_v39, %v2278_v12 }
 0x1e7   : > { %v1192_v44 = vmax.f32 %v1150_v40, %v1171_v62 }
 0x1e8   : > { %v1227_v3 = vadd.f32 %v2274_v26, %v1191_v41 }
 0x1e9   : > { %v1228_v22 = vadd.f32 %v2274_v26, %v1192_v44  ;;  %v873_v1 = vpop.f32.mrb[20].mxu0 }
 0x1ea   : > { %v1248_v50 = vmax.f32 %v1227_v3, 0.0  ;;  %v1177_v54 = vmax.f32 %v857_v51, %v873_v1  ;;  %v875_v7 = vpop.f32.mrb[21].mxu0  ;;  %v946_v23 = vpop.f32.mrb[12].mxu1 }
 0x1eb   : > { %v1249_v59 = vmax.f32 %v1228_v22, 0.0  ;;  %v1178_v32 = vmax.f32 %v859_v16, %v875_v7  ;;  %v877_v5 = vpop.f32.mrb[22].mxu0  ;;  %v948_v9 = vpop.f32.mrb[13].mxu1 }
 0x1ec   : > { %v1198_v29 = vmax.f32 %v1156_v8, %v1177_v54  ;;  %v1184_v14 = vmax.f32 %v863_v57, %v877_v5  ;;  %v879_v42 = vpop.f32.mrb[23].mxu0  ;;  %v950_v20 = vpop.f32.mrb[14].mxu1 }
 0x1ed   : > { %v1470_v46 = vpack.c.bf16 %v1249_v59, %v1248_v50  ;;  %v1199_v28 = vmax.f32 %v1157_v21, %v1178_v32  ;;  %v1185_v37 = vmax.f32 %v865_v17, %v879_v42  ;;  %v952_v45 = vpop.f32.mrb[15].mxu1 }
 0x1ee   : > { %v1205_v55 = vmax.f32 %v1163_v31, %v1184_v14  ;;  %v1234_v35 = vadd.f32 %v2282_v25, %v1198_v29 }
 0x1ef   : > { %1342 = vst [vmem:[%s2290_s29] sm:$0xff] %v1470_v46  ;;  %v1235_v61 = vadd.f32 %v2282_v25, %v1199_v28  ;;  %v1206_v40 = vmax.f32 %v1164_v43, %v1185_v37 }
 0x1f0   : > { %v1255_v6 = vmax.f32 %v1234_v35, 0.0  ;;  %v1241_v8 = vadd.f32 %v2292_v52, %v1205_v55 }
 0x1f1   : > { %v1256_v11 = vmax.f32 %v1235_v61, 0.0  ;;  %v1242_v4 = vadd.f32 %v2292_v52, %v1206_v40 }
 0x1f2   : > { %v1262_v21 = vmax.f32 %v1241_v8, 0.0  ;;  %v956_v38 = vpop.f32.mrb[16].mxu1 }
 0x1f3   : > { %v1474_v47 = vpack.c.bf16 %v1256_v11, %v1255_v6  ;;  %v1263_v56 = vmax.f32 %v1242_v4, 0.0  ;;  %v958_v51 = vpop.f32.mrb[17].mxu1 }
 0x1f4   : > { %v960_v16 = vpop.f32.mrb[18].mxu1 }
 0x1f5   : > { %1346 = vst [vmem:[%s2290_s29 + $0x1c] sm:$0xff] %v1474_v47  ;;  %v1478_v31 = vpack.c.bf16 %v1263_v56, %v1262_v21  ;;  %v1172_v57 = vmax.f32 %v946_v23, %v960_v16  ;;  %v962_v17 = vpop.f32.mrb[19].mxu1 }
 0x1f6   : > { %v1173_v60 = vmax.f32 %v948_v9, %v962_v17 }
 0x1f7   : > { %1350 = vst [vmem:[%s2290_s29 + $0x38] sm:$0xff] %v1478_v31  ;;  %v1193_v43 = vmax.f32 %v1151_v53, %v1172_v57 }
 0x1f8   : > { %v1194_v63 = vmax.f32 %v1152_v0, %v1173_v60 }
 0x1f9   : > { %v1229_v36 = vadd.f32 %v2274_v26, %v1193_v43 }
 0x1fa   : > { %v1230_v62 = vadd.f32 %v2274_v26, %v1194_v63  ;;  %v966_v41 = vpop.f32.mrb[20].mxu1 }
 0x1fb   : > { %v1250_v44 = vmax.f32 %v1229_v36, 0.0  ;;  %v1179_v3 = vmax.f32 %v950_v20, %v966_v41  ;;  %v968_v22 = vpop.f32.mrb[21].mxu1 }
 0x1fc   : > { %v1251_v1 = vmax.f32 %v1230_v62, 0.0  ;;  %v1180_v50 = vmax.f32 %v952_v45, %v968_v22  ;;  %v970_v54 = vpop.f32.mrb[22].mxu1 }
 0x1fd   : > { %v1200_v15 = vmax.f32 %v1158_v30, %v1179_v3  ;;  %v1186_v33 = vmax.f32 %v956_v38, %v970_v54  ;;  %v972_v53 = vpop.f32.mrb[23].mxu1 }
 0x1fe   : > { %v1471_v27 = vpack.c.bf16 %v1251_v1, %v1250_v44  ;;  %v1201_v24 = vmax.f32 %v1159_v10, %v1180_v50  ;;  %v1187_v0 = vmax.f32 %v958_v51, %v972_v53 }
 0x1ff   : > { %v1236_v7 = vadd.f32 %v2282_v25, %v1200_v15  ;;  %v1207_v23 = vmax.f32 %v1165_v2, %v1186_v33 }
 0x200   : > { %1343 = vst [vmem:[%s2290_s29 + $0x8] sm:$0xff] %v1471_v27  ;;  %v1237_v59 = vadd.f32 %v2282_v25, %v1201_v24  ;;  %v1208_v34 = vmax.f32 %v1166_v19, %v1187_v0 }
 0x201   : > { %v1257_v48 = vmax.f32 %v1236_v7, 0.0  ;;  %v1243_v30 = vadd.f32 %v2292_v52, %v1207_v23 }
 0x202   : > { %v1258_v13 = vmax.f32 %v1237_v59, 0.0  ;;  %v1244_v58 = vadd.f32 %v2292_v52, %v1208_v34  ;;  %v1498_v10 = vpop.f32.mrb[24].mxu1  ;;  %v2326_v32 = vpop.f32.mrb[24].mxu0 }
 0x203   : > { %v1264_v49 = vmax.f32 %v1243_v30, 0.0  ;;  %v1499_v18 = vpop.f32.mrb[25].mxu1  ;;  %v2328_v2 = vpop.f32.mrb[25].mxu0 }
 0x204   : > { %v1475_v5 = vpack.c.bf16 %v1258_v13, %v1257_v48  ;;  %v1265_v9 = vmax.f32 %v1244_v58, 0.0  ;;  %v2330_v29 = vadd.f32 %v1499_v18, %v1498_v10  ;;  %v1501_v39 = vpop.f32.mrb[26].mxu1  ;;  %v2332_v12 = vpop.f32.mrb[26].mxu0 }
 0x205   : > { %v1502_v19 = vpop.f32.mrb[27].mxu1  ;;  %v2334_v14 = vpop.f32.mrb[27].mxu0 }
 0x206   : > { %1347 = vst [vmem:[%s2290_s29 + $0x24] sm:$0xff] %v1475_v5  ;;  %v1479_v42 = vpack.c.bf16 %v1265_v9, %v1264_v49  ;;  %v2337_v20 = vadd.f32 %v1502_v19, %v1501_v39 }
 0x208   : > { %1351 = vst [vmem:[%s2290_s29 + $0x40] sm:$0xff] %v1479_v42 }
 0x20a   : > { %v1504_v46 = vpop.f32.mrb[28].mxu1  ;;  %v2340_v28 = vpop.f32.mrb[28].mxu0 }
 0x20b   : > { %v1505_v37 = vpop.f32.mrb[29].mxu1  ;;  %v2342_v45 = vpop.f32.mrb[29].mxu0 }
 0x20c   : > { %v2344_v55 = vadd.f32 %v1505_v37, %v1504_v46  ;;  %v1507_v35 = vpop.f32.mrb[30].mxu1  ;;  %v1023_v61 = vpop.f32.mrb[30].mxu0 }
 0x20d   : > { %v1508_v40 = vpop.f32.mrb[31].mxu1  ;;  %v1153_v6 = vmax.f32 %v2326_v32, %v1023_v61  ;;  %v1025_v8 = vpop.f32.mrb[31].mxu0 }
 0x20e   : > { %v1509_v11 = vadd.f32 %v1508_v40, %v1507_v35  ;;  %v1154_v4 = vmax.f32 %v2328_v2, %v1025_v8 }
 0x210   : > { %v1155_v21 = vmax.f32 %v2330_v29, %v1509_v11 }
 0x212   : > { %v1510_v38 = vpop.f32.mrb[32].mxu1  ;;  %v1029_v47 = vpop.f32.mrb[32].mxu0 }
 0x213   : > { %v1511_v56 = vpop.f32.mrb[33].mxu1  ;;  %v1160_v51 = vmax.f32 %v2332_v12, %v1029_v47  ;;  %v1031_v16 = vpop.f32.mrb[33].mxu0 }
 0x214   : > { %v2350_v31 = vadd.f32 %v1511_v56, %v1510_v38  ;;  %v1161_v57 = vmax.f32 %v2334_v14, %v1031_v16  ;;  %v1513_v17 = vpop.f32.mrb[34].mxu1  ;;  %v1033_v60 = vpop.f32.mrb[34].mxu0 }
 0x215   : > { %v1514_v43 = vpop.f32.mrb[35].mxu1  ;;  %v1167_v63 = vmax.f32 %v2340_v28, %v1033_v60  ;;  %v2354_v36 = vpop.f32.mrb[35].mxu0 }
 0x216   : > { %v1162_v62 = vmax.f32 %v2337_v20, %v2350_v31  ;;  %v2358_v41 = vadd.f32 %v1514_v43, %v1513_v17  ;;  %v1168_v44 = vmax.f32 %v2342_v45, %v2354_v36 }
 0x218   : > { %v1169_v3 = vmax.f32 %v2344_v55, %v2358_v41 }
 0x21a   : > { %v1039_v22 = vpop.f32.mrb[36].mxu0  ;;  %v1516_v1 = vpop.f32.mrb[36].mxu1 }
 0x21b   : > { %v1041_v50 = vpop.f32.mrb[37].mxu0  ;;  %v1517_v54 = vpop.f32.mrb[37].mxu1 }
 0x21c   : > { %v1518_v15 = vadd.f32 %v1517_v54, %v1516_v1  ;;  %v1043_v33 = vpop.f32.mrb[38].mxu0  ;;  %v1519_v53 = vpop.f32.mrb[38].mxu1 }
 0x21d   : > { %v1045_v27 = vpop.f32.mrb[39].mxu0  ;;  %v1520_v24 = vpop.f32.mrb[39].mxu1 }
 0x21e   : > { %v1521_v0 = vadd.f32 %v1520_v24, %v1519_v53 }
 0x222   : > { %v1049_v7 = vpop.f32.mrb[40].mxu0  ;;  %v1522_v23 = vpop.f32.mrb[40].mxu1 }
 0x223   : > { %v1051_v59 = vpop.f32.mrb[41].mxu0  ;;  %v1523_v34 = vpop.f32.mrb[41].mxu1 }
 0x224   : > { %v1524_v48 = vadd.f32 %v1523_v34, %v1522_v23  ;;  %v1053_v30 = vpop.f32.mrb[42].mxu0  ;;  %v1525_v13 = vpop.f32.mrb[42].mxu1 }
 0x225   : > { %v1174_v58 = vmax.f32 %v1039_v22, %v1053_v30  ;;  %v1055_v10 = vpop.f32.mrb[43].mxu0  ;;  %v1526_v32 = vpop.f32.mrb[43].mxu1 }
 0x226   : > { %v1175_v49 = vmax.f32 %v1041_v50, %v1055_v10  ;;  %v1527_v18 = vadd.f32 %v1526_v32, %v1525_v13 }
 0x227   : > { %v1195_v2 = vmax.f32 %v1153_v6, %v1174_v58 }
 0x228   : > { %v1196_v5 = vmax.f32 %v1154_v4, %v1175_v49  ;;  %v1176_v9 = vmax.f32 %v1518_v15, %v1527_v18 }
 0x229   : > { %v1231_v29 = vadd.f32 %v2274_v26, %v1195_v2 }
 0x22a   : > { %v1232_v39 = vadd.f32 %v2274_v26, %v1196_v5  ;;  %v1197_v12 = vmax.f32 %v1155_v21, %v1176_v9  ;;  %v1059_v19 = vpop.f32.mrb[44].mxu0  ;;  %v1528_v14 = vpop.f32.mrb[44].mxu1 }
 0x22b   : > { %v1252_v42 = vmax.f32 %v1231_v29, 0.0  ;;  %v1181_v20 = vmax.f32 %v1043_v33, %v1059_v19  ;;  %v1061_v46 = vpop.f32.mrb[45].mxu0  ;;  %v1529_v28 = vpop.f32.mrb[45].mxu1 }
 0x22c   : > { %v1253_v37 = vmax.f32 %v1232_v39, 0.0  ;;  %v1233_v45 = vadd.f32 %v2274_v26, %v1197_v12  ;;  %v1182_v35 = vmax.f32 %v1045_v27, %v1061_v46  ;;  %v1530_v61 = vadd.f32 %v1529_v28, %v1528_v14  ;;  %v1063_v40 = vpop.f32.mrb[46].mxu0  ;;  %v1531_v6 = vpop.f32.mrb[46].mxu1 }
 0x22d   : > { %v1202_v8 = vmax.f32 %v1160_v51, %v1181_v20  ;;  %v1188_v11 = vmax.f32 %v1049_v7, %v1063_v40  ;;  %v1065_v4 = vpop.f32.mrb[47].mxu0  ;;  %v1532_v38 = vpop.f32.mrb[47].mxu1 }
 0x22e   : > { %v1472_v47 = vpack.c.bf16 %v1253_v37, %v1252_v42  ;;  %v1254_v21 = vmax.f32 %v1233_v45, 0.0  ;;  %v1203_v56 = vmax.f32 %v1161_v57, %v1182_v35  ;;  %v1183_v16 = vmax.f32 %v1521_v0, %v1530_v61 }
 0x22f   : > { %v1238_v31 = vadd.f32 %v2282_v25, %v1202_v8  ;;  %v1209_v17 = vmax.f32 %v1167_v63, %v1188_v11  ;;  %v1189_v60 = vmax.f32 %v1051_v59, %v1065_v4  ;;  %v1533_v43 = vadd.f32 %v1532_v38, %v1531_v6 }
 0x230   : > { %1344 = vst [vmem:[%s2290_s29 + $0x10] sm:$0xff] %v1472_v47  ;;  %v1473_v26 = vpack.c.bf16 %v1254_v21, %v1254_v21  ;;  %v1239_v36 = vadd.f32 %v2282_v25, %v1203_v56  ;;  %v1204_v22 = vmax.f32 %v1162_v62, %v1183_v16 }
 0x231   : > { %v1259_v51 = vmax.f32 %v1238_v31, 0.0  ;;  %v1245_v1 = vadd.f32 %v2292_v52, %v1209_v17  ;;  %v1210_v50 = vmax.f32 %v1168_v44, %v1189_v60  ;;  %v1190_v54 = vmax.f32 %v1524_v48, %v1533_v43 }
 0x232   : > { %1345 = vst [vmem:[%s2290_s29 + $0x18] sm:$0xf] %v1473_v26  ;;  %v1260_v57 = vmax.f32 %v1239_v36, 0.0  ;;  %v1240_v63 = vadd.f32 %v2282_v25, %v1204_v22 }
 0x233   : > { %v1266_v15 = vmax.f32 %v1245_v1, 0.0  ;;  %v1246_v33 = vadd.f32 %v2292_v52, %v1210_v50  ;;  %v1211_v53 = vmax.f32 %v1169_v3, %v1190_v54 }
 0x234   : > { %v1476_v62 = vpack.c.bf16 %v1260_v57, %v1259_v51  ;;  %v1261_v27 = vmax.f32 %v1240_v63, 0.0 }
 0x235   : > { %v1267_v24 = vmax.f32 %v1246_v33, 0.0  ;;  %v1247_v44 = vadd.f32 %v2292_v52, %v1211_v53 }
 0x236   : > { %1348 = vst [vmem:[%s2290_s29 + $0x2c] sm:$0xff] %v1476_v62  ;;  %v1477_v0 = vpack.c.bf16 %v1261_v27, %v1261_v27 }
 0x237   : > { %v1480_v7 = vpack.c.bf16 %v1267_v24, %v1266_v15  ;;  %v1268_v23 = vmax.f32 %v1247_v44, 0.0 }
 0x238   : > { %1349 = vst [vmem:[%s2290_s29 + $0x34] sm:$0xf] %v1477_v0 }
 0x239   : > { %1352 = vst [vmem:[%s2290_s29 + $0x48] sm:$0xff] %v1480_v7  ;;  %v1481_v59 = vpack.c.bf16 %v1268_v23, %v1268_v23 }
 0x23b   : > { %1353 = vst [vmem:[%s2290_s29 + $0x50] sm:$0xf] %v1481_v59 }
 0x23c PF: > { %s13_s12 = sadd.s32 1, %s1614_s12  }
 0x23d   : > { %p10_p4 = scmp.ge.s32.totalorder %s13_s12, 4  }
 0x23f   :  { %12 = sbr.rel (!%p10_p4) target bundleno = 1 (0x1), region = 62 }

// kernel: net_forward.7
= control target key start
LH: loop header
LB: loop body
LE: loop exit
PB: predicated region body
PF: predicated region fallthrough
CT: control target
= control target key end

     0   :  { %10 = vsyncpa [#allocation3], 0  ;;  %s2061_s0 = inlined_call_operand.vmem [shape: bf16[2,96,256], index: 0, kind: input, shape index: {}]   ;;  %s2062_s1 = inlined_call_operand.vmem [shape: bf16[160,384], index: 1, kind: input, shape index: {}]   ;;  %s2063_s2 = inlined_call_operand.vmem [shape: f32[40,1], index: 2, kind: input, shape index: {}]   ;;  %s2064_s3 = inlined_call_operand.vmem [shape: f32[3,40,256], index: 3, kind: input, shape index: {}]   ;;  %s2065_s4 = inlined_call_operand.vmem [shape: f32[1,3], index: 4, kind: input, shape index: {}]   ;;  %s2066_s5 = inlined_call_operand.hbm [shape: f32[2,1,3], index: 5, kind: output, shape index: {}]  }
   0x1   :  { %12 = vsyncpa [#allocation3 + $0x1], 0  ;;  %s1569_s18 = smov 0   ;;  %s1571_s19 = smov 0  }
   0x2   :  { %s1573_s20 = smov 0   ;;  %s1575_s21 = smov 0  }
   0x3 LB: > { %s1590_s22 = sadd.s32 4294967295, %s1532_s21   ;;  %s1252_s23 = sadd.s32 4294967294, %s1532_s21   ;;  %s1532_s21 = sphi %s1575_s21, %s2072_s21   ;;  %s1528_s20 = sphi %s1573_s20, %s2071_s20   ;;  %s1524_s19 = sphi %s1571_s19, %s2070_s19   ;;  %s1520_s18 = sphi %s1569_s18, %s2069_s18  }
   0x4   : > { %s1594_s24 = sadd.s32 1, %s1532_s21   ;;  %s135_s25 = sadd.s32 1, %s1528_s20 }
   0x5   : > { %s132_s26 = ssub.s32 %s1532_s21, %s1594_s24  ;;  %p145_p0 = scmp.ne.s32.totalorder %s1528_s20, %s1524_s19 }
   0x6   : > { %p133_p1 = scmp.eq.s32.totalorder %s132_s26, 0  ;;  %p146_p2 = scmp.eq.s32.totalorder %s1590_s22, 1 }
   0x7   : > { %p151_p3 = scmp.ne.s32.totalorder %s1524_s19, %s1520_s18  ;;  %p152_p4 = scmp.eq.s32.totalorder %s1252_s23, 1 }
   0x8   : > { %s1605_s27 = scalar_select %p133_p1, %s1528_s20, %s135_s25  }
   0x9   : > { %p1607_p5 = por %p146_p2, %p145_p0  ;;  %p1611_p6 = por %p152_p4, %p151_p3 }
   0xa   : > { %p1255_p7 = scmp.ge.s32.totalorder %s1532_s21, 1  ;;  %p190_p8 = scmp.lt.s32.totalorder %s1532_s21, 3 }
   0xc   : > { %p191_p9 = pnand %p1255_p7, %p190_p8 }
   0xd   : > { %p217_p10 = scmp.lt.s32.totalorder (!%p191_p9), %s1590_s22, 1  ;;  %s1534_s10 = smov (!%p191_p9), 127   ;;  %v1428_v12 = vld [vmem:[%s2062_s1 + $0x4] ss:$12 sps:$4 sm:$0xff] (!%p191_p9)   ;;  %v1537_v13 = vmov (!%p191_p9), 0   ;;  %vm352_vm0 = vcmask (!%p191_p9), 1039360  }
   0xe   : > { %194 = sbr.rel (%p191_p9) target bundleno = 1018 (0x3fa), region = 40  ;;  %s1535_s11 = smov (!%p191_p9), 113   ;;  %718 = vmatprep.mubr.bf16.mxu1 (!%p191_p9), %v1428_v12  ;;  %851 = vmatprep.mubr.bf16.mxu0 (!%p191_p9), %v1537_v13  ;;  %vm414_vm1 = vcmask (!%p191_p9), 924672   ;;  %v275_v34 = vld [vmem:[%s2063_s2] sm:$0xff] (!%p191_p9)  ;;  %v276_v35 = vld [vmem:[%s2063_s2 + $0x8] sm:$0xff] (!%p191_p9)  ;;  %v278_v38 = vld [vmem:[%s2063_s2 + $0x18] sm:$0xff] (!%p191_p9) }
   0xf   : > { %s1536_s12 = smov (!%p191_p9), 112   ;;  %1406 = vset.pattern.permute.xlu0 (!%p191_p9), %v1537_v13  ;;  %1407 = vset.pattern.permute.xlu1 (!%p191_p9), %v1537_v13  ;;  %v277_v41 = vld [vmem:[%s2063_s2 + $0x10] sm:$0xff] (!%p191_p9)  ;;  %v279_v46 = vld [vmem:[%s2063_s2 + $0x20] sm:$0xff] (!%p191_p9)  ;;  %vm476_vm2 = vcmask (!%p191_p9), 916480   ;;  %vm1164_vm3 = vcmask (!%p191_p9), 7168   ;;  %vm1166_vm4 = vcmask (!%p191_p9), 15360  }
  0x10   : > { %vm1170_vm5 = vcmask (!%p191_p9), 16384   ;;  %s215_s17 = sand.u32 (!%p191_p9), 1, %s1524_s19   ;;  %s1319_s23 = sshll.u32 (!%p191_p9), %s1590_s22, 4 }
  0x11   : > { %s216_s25 = scalar_lea.vmem (!%p191_p9), [#allocation2], %s215_s17  ;;  %s2018_s7 = scalar_lea.hbm (!%p191_p9), %s2066_s5, %s1319_s23 }
  0x12   : > { %s1197_s26 = sshll.u32 (!%p191_p9), %s216_s25, 4  ;;  %s1185_s8 = scalar_lea.sflag (!%p191_p9), [#allocation3], %s215_s17  ;;  %s2020_s26 = int_to_ptr.vmem [resolvable:$true] %s1197_s26 }
  0x15   : > { %s218_s30 = scalar_select %p217_p10, %s1590_s22, 1 }
  0x16   : > { %s1538_s22 = smov [#allocation2]  }
  0x17   : > { %s1362_s6 = smul.u32 96, %s218_s30 }
  0x19   : > { %s1622_s9 = scalar_lea.vmem %s2061_s0, %s1362_s6 }
  0x1a   : > { %v1408_v0 = vld [vmem:[%s1622_s9 + $0x10] ss:$8 sps:$4 sm:$0xff]   ;;  %v1410_v1 = vld [vmem:[%s1622_s9] ss:$8 sps:$4 sm:$0xff]   ;;  %v1412_v2 = vld [vmem:[%s1622_s9 + $0x14] ss:$8 sps:$4 sm:$0xff]  }
  0x1b   : > { %332 = vrot.lane.b32.xlu1 %v1408_v0, %s1534_s10  ;;  %v1413_v3 = vld [vmem:[%s1622_s9 + $0x4] ss:$8 sps:$4 sm:$0xff]   ;;  %328 = vrot.lane.b32.xlu0 %v1410_v1, %s1534_s10  ;;  %v1416_v5 = vld [vmem:[%s1622_s9 + $0x20] ss:$8 sps:$4 sm:$0xff]  }
  0x1c   : > { %686 = vmatprep.subr.bf16.mxu1 %v1413_v3  ;;  %v1414_v4 = vld [vmem:[%s1622_s9 + $0x24] ss:$8 sps:$4 sm:$0xff]   ;;  %v1419_v7 = vld [vmem:[%s1622_s9 + $0x40] ss:$8 sps:$4 sm:$0xff]   ;;  %v1420_v8 = vld [vmem:[%s1622_s9 + $0x34] ss:$8 sps:$4 sm:$0xff]  }
  0x1d   : > { %687 = vmatpush1.bf16.msra.mxu1 %v1410_v1  ;;  %v1417_v6 = vld [vmem:[%s1622_s9 + $0x44] ss:$8 sps:$4 sm:$0xff]   ;;  %v1422_v9 = vld [vmem:[%s1622_s9 + $0x30] ss:$8 sps:$4 sm:$0xff]   ;;  %v1423_v10 = vld [vmem:[%s1622_s9 + $0x54] ss:$8 sps:$4 sm:$0xff]  }
  0x1e   : > { %688 = vmatprep.subr.bf16.mxu1 %v1412_v2  ;;  %v1425_v11 = vld [vmem:[%s1622_s9 + $0x50] ss:$8 sps:$4 sm:$0xff]   ;;  %s1470_s9 = scalar_lea.vmem %s2020_s26, 16 }
  0x1f   : > { %334 = vrot.lane.b32.xlu1 %v1412_v2, %s1534_s10  ;;  %330 = vrot.lane.b32.xlu0 %v1413_v3, %s1534_s10  ;;  %p1471_p11 = scmp.ne.s32.totalorder %s2020_s26, %s1470_s9 }
  0x21   : > { %689 = vmatpush1.bf16.msra.mxu1 %v1408_v0  ;;  %p1472_p12 = pnand %p1471_p11, %p1607_p5 }
  0x22   : > { %690 = vmatprep.subr.bf16.mxu1 %v1414_v4 }
  0x23   : > { %338 = vrot.lane.b32.xlu1 %v1414_v4, %s1534_s10  ;;  %336 = vrot.lane.b32.xlu0 %v1416_v5, %s1534_s10  ;;  %p1473_p13 = pneg %p1472_p12 }
  0x25   : > { %691 = vmatpush1.bf16.msra.mxu1 %v1416_v5 }
  0x26   : > { %692 = vmatprep.subr.bf16.mxu1 %v1420_v8 }
  0x27   : > { %408 = vrot.lane.b32.xlu1 %v1417_v6, %s1535_s11  ;;  %406 = vrot.lane.b32.xlu0 %v1419_v7, %s1535_s11 }
  0x29   : > { %693 = vmatpush1.bf16.msra.mxu1 %v1422_v9 }
  0x2a   : > { %694 = vmatprep.subr.bf16.mxu1 %v1417_v6 }
  0x2b   : > { %342 = vrot.lane.b32.xlu1 %v1420_v8, %s1534_s10  ;;  %340 = vrot.lane.b32.xlu0 %v1422_v9, %s1534_s10 }
  0x2d   : > { %695 = vmatpush1.bf16.msra.mxu1 %v1419_v7 }
  0x2e   : > { %696 = vmatprep.subr.bf16.mxu1 %v1423_v10 }
  0x2f   : > { %412 = vrot.lane.b32.xlu1 %v1423_v10, %s1535_s11  ;;  %410 = vrot.lane.b32.xlu0 %v1425_v11, %s1535_s11 }
  0x31   : > { %697 = vmatpush1.bf16.msra.mxu1 %v1425_v11 }
  0x33   : > { %346 = vrot.lane.b32.xlu1 %v1417_v6, %s1534_s10  ;;  %344 = vrot.lane.b32.xlu0 %v1419_v7, %s1534_s10 }
  0x37   : > { %454 = vrot.lane.b32.xlu1 %v1413_v3, %s1536_s12  ;;  %452 = vrot.lane.b32.xlu0 %v1410_v1, %s1536_s12 }
  0x3b   : > { %350 = vrot.lane.b32.xlu1 %v1423_v10, %s1534_s10  ;;  %348 = vrot.lane.b32.xlu0 %v1425_v11, %s1534_s10  ;;  %s1474_s10 = sshll.u32 %s1538_s22, 4  ;;  %s1475_s10 = int_to_ptr.vmem [resolvable:$false] %s1474_s10 }
  0x3c   : > { %p1477_p0 = scmp.lt.s32.totalorder %s2020_s26, %s1475_s10 }
  0x3f   : > { %458 = vrot.lane.b32.xlu1 %v1412_v2, %s1536_s12  ;;  %456 = vrot.lane.b32.xlu0 %v1408_v0, %s1536_s12 }
  0x43   : > { %392 = vrot.lane.b32.xlu1 %v1413_v3, %s1535_s11  ;;  %390 = vrot.lane.b32.xlu0 %v1410_v1, %s1535_s11 }
  0x47   : > { %462 = vrot.lane.b32.xlu1 %v1414_v4, %s1536_s12  ;;  %460 = vrot.lane.b32.xlu0 %v1416_v5, %s1536_s12 }
  0x4b   : > { %396 = vrot.lane.b32.xlu1 %v1412_v2, %s1535_s11  ;;  %394 = vrot.lane.b32.xlu0 %v1408_v0, %s1535_s11 }
  0x4f   : > { %466 = vrot.lane.b32.xlu1 %v1420_v8, %s1536_s12  ;;  %464 = vrot.lane.b32.xlu0 %v1422_v9, %s1536_s12 }
  0x53   : > { %400 = vrot.lane.b32.xlu1 %v1414_v4, %s1535_s11  ;;  %398 = vrot.lane.b32.xlu0 %v1416_v5, %s1535_s11 }
  0x57   : > { %470 = vrot.lane.b32.xlu1 %v1417_v6, %s1536_s12  ;;  %468 = vrot.lane.b32.xlu0 %v1419_v7, %s1536_s12 }
  0x5b   : > { %404 = vrot.lane.b32.xlu1 %v1420_v8, %s1535_s11  ;;  %402 = vrot.lane.b32.xlu0 %v1422_v9, %s1535_s11  ;;  %s1476_s11 = scalar_lea.vmem %s1475_s10, 32 }
  0x5c   : > { %p1478_p1 = scmp.lt.s32.totalorder %s1476_s11, %s1470_s9 }
  0x5e   : > { %p1479_p2 = por %p1478_p1, %p1477_p0 }
  0x5f   : > { %474 = vrot.lane.b32.xlu1 %v1423_v10, %s1536_s12  ;;  %472 = vrot.lane.b32.xlu0 %v1425_v11, %s1536_s12 }
  0x60   : > { %p1480_p3 = pnand %p1479_p2, %p1473_p13 }
  0x63   : > { %984 = vperm.xlu0 %1406, %v275_v34   ;;  %989 = vperm.xlu1 %1407, %v276_v35   ;;  %v1436_v34 = vld [vmem:[%s2062_s1 + $0x30] ss:$12 sps:$4 sm:$0xff]   ;;  %v1438_v35 = vld [vmem:[%s2062_s1 + $0x4c] ss:$12 sps:$4 sm:$0xff]  }
  0x67   : > { %999 = vperm.xlu0 %1406, %v278_v38   ;;  %994 = vperm.xlu1 %1407, %v277_v41   ;;  %v1442_v38 = vld [vmem:[%s2062_s1 + $0x64] ss:$12 sps:$4 sm:$0xff]   ;;  %v1446_v41 = vld [vmem:[%s2062_s1 + $0x7c] ss:$12 sps:$4 sm:$0xff]  }
  0x6b   : > { %1004 = vperm.xlu1 %1407, %v279_v46   ;;  %v1452_v46 = vld [vmem:[%s2062_s1 + $0x90] ss:$12 sps:$4 sm:$0xff]  }
  0x8d   : > { %v333_v14 = vpop.permute.xlu1 %332  ;;  %v329_v15 = vpop.permute.xlu0 %328 }
  0x91   : > { %v335_v16 = vpop.permute.xlu1 %334  ;;  %v331_v17 = vpop.permute.xlu0 %330 }
  0x92   : > { %v368_v18 = vsel %vm352_vm0, %v331_v17, %v329_v15  ;;  %v353_v19 = vsel %vm352_vm0, %v329_v15, %v331_v17  ;;  %v372_v21 = vsel %vm352_vm0, %v335_v16, %v333_v14  ;;  %v354_v23 = vsel %vm352_vm0, %v333_v14, %v335_v16 }
  0x93   : > { %698 = vmatprep.subr.bf16.mxu1 %v368_v18 }
  0x94   : > { %699 = vmatpush1.bf16.msra.mxu1 %v353_v19 }
  0x95   : > { %v339_v20 = vpop.permute.xlu1 %338  ;;  %v337_v22 = vpop.permute.xlu0 %336  ;;  %700 = vmatprep.subr.bf16.mxu1 %v372_v21 }
  0x96   : > { %v376_v25 = vsel %vm352_vm0, %v339_v20, %v337_v22  ;;  %v355_v29 = vsel %vm352_vm0, %v337_v22, %v339_v20 }
  0x98   : > { %701 = vmatpush1.bf16.msra.mxu1 %v354_v23 }
  0x99   : > { %v409_v24 = vpop.permute.xlu1 %408  ;;  %v407_v26 = vpop.permute.xlu0 %406  ;;  %702 = vmatprep.subr.bf16.mxu1 %v376_v25 }
  0x9a   : > { %v446_v27 = vsel %vm414_vm1, %v409_v24, %v407_v26  ;;  %v419_v28 = vsel %vm414_vm1, %v407_v26, %v409_v24  ;;  %v1426_v24 = vld [vmem:[%s2062_s1] ss:$12 sps:$4 sm:$0xff]   ;;  %v1430_v26 = vld [vmem:[%s2062_s1 + $0x1c] ss:$12 sps:$4 sm:$0xff]  }
  0x9b   : > { %819 = vmatprep.subr.bf16.mxu0 %v446_v27 }
  0x9c   : > { %703 = vmatpush1.bf16.msra.mxu1 %v355_v29  ;;  %820 = vmatpush1.bf16.msra.mxu0 %v419_v28 }
  0x9d   : > { %v343_v30 = vpop.permute.xlu1 %342  ;;  %v341_v31 = vpop.permute.xlu0 %340 }
  0x9e   : > { %v380_v32 = vsel %vm352_vm0, %v343_v30, %v341_v31  ;;  %v356_v33 = vsel %vm352_vm0, %v341_v31, %v343_v30  ;;  %v1429_v30 = vld [vmem:[%s2062_s1 + $0x8] ss:$12 sps:$4 sm:$0xff]   ;;  %v1432_v31 = vld [vmem:[%s2062_s1 + $0x18] ss:$12 sps:$4 sm:$0xff]  }
  0x9f   : > { %704 = vmatprep.subr.bf16.mxu1 %v380_v32  ;;  %v1434_v32 = vld [vmem:[%s2062_s1 + $0x34] ss:$12 sps:$4 sm:$0xff]  }
  0xa0   : > { %705 = vmatpush1.bf16.msra.mxu1 %v356_v33  ;;  %v1433_v33 = vld [vmem:[%s2062_s1 + $0x20] ss:$12 sps:$4 sm:$0xff]  }
  0xa1   : > { %v413_v36 = vpop.permute.xlu1 %412  ;;  %v411_v37 = vpop.permute.xlu0 %410 }
  0xa2   : > { %v450_v39 = vsel %vm414_vm1, %v413_v36, %v411_v37  ;;  %v420_v40 = vsel %vm414_vm1, %v411_v37, %v413_v36  ;;  %v1437_v36 = vld [vmem:[%s2062_s1 + $0x38] ss:$12 sps:$4 sm:$0xff]   ;;  %v1440_v37 = vld [vmem:[%s2062_s1 + $0x48] ss:$12 sps:$4 sm:$0xff]  }
  0xa3   : > { %821 = vmatprep.subr.bf16.mxu0 %v450_v39  ;;  %v1441_v39 = vld [vmem:[%s2062_s1 + $0x50] ss:$12 sps:$4 sm:$0xff]  }
  0xa4   : > { %822 = vmatpush1.bf16.msra.mxu0 %v420_v40  ;;  %v1444_v40 = vld [vmem:[%s2062_s1 + $0x60] ss:$12 sps:$4 sm:$0xff]  }
  0xa5   : > { %v347_v42 = vpop.permute.xlu1 %346  ;;  %v345_v43 = vpop.permute.xlu0 %344 }
  0xa6   : > { %v384_v44 = vsel %vm352_vm0, %v347_v42, %v345_v43  ;;  %v357_v45 = vsel %vm352_vm0, %v345_v43, %v347_v42  ;;  %v1445_v42 = vld [vmem:[%s2062_s1 + $0x68] ss:$12 sps:$4 sm:$0xff]   ;;  %v1448_v43 = vld [vmem:[%s2062_s1 + $0x78] ss:$12 sps:$4 sm:$0xff]  }
  0xa7   : > { %706 = vmatprep.subr.bf16.mxu1 %v384_v44  ;;  %v1450_v44 = vld [vmem:[%s2062_s1 + $0x94] ss:$12 sps:$4 sm:$0xff]  }
  0xa8   : > { %707 = vmatpush1.bf16.msra.mxu1 %v357_v45  ;;  %v1449_v45 = vld [vmem:[%s2062_s1 + $0x80] ss:$12 sps:$4 sm:$0xff]  }
  0xa9   : > { %v455_v47 = vpop.permute.xlu1 %454  ;;  %v453_v48 = vpop.permute.xlu0 %452 }
  0xaa   : > { %v492_v49 = vsel %vm476_vm2, %v455_v47, %v453_v48  ;;  %v477_v50 = vsel %vm476_vm2, %v453_v48, %v455_v47  ;;  %v1454_v47 = vld [vmem:[%s2062_s1 + $0xac] ss:$12 sps:$4 sm:$0xff]  }
  0xab   : > { %823 = vmatprep.subr.bf16.mxu0 %v492_v49  ;;  %v1453_v48 = vld [vmem:[%s2062_s1 + $0x98] ss:$12 sps:$4 sm:$0xff]   ;;  %v1456_v49 = vld [vmem:[%s2062_s1 + $0xa8] ss:$12 sps:$4 sm:$0xff]  }
  0xac   : > { %824 = vmatpush1.bf16.msra.mxu0 %v477_v50  ;;  %v1458_v50 = vld [vmem:[%s2062_s1 + $0xc4] ss:$12 sps:$4 sm:$0xff]  }
  0xad   : > { %v351_v51 = vpop.permute.xlu1 %350  ;;  %v349_v52 = vpop.permute.xlu0 %348 }
  0xae   : > { %v388_v53 = vsel %vm352_vm0, %v351_v51, %v349_v52  ;;  %v358_v54 = vsel %vm352_vm0, %v349_v52, %v351_v51  ;;  %v1457_v51 = vld [vmem:[%s2062_s1 + $0xb0] ss:$12 sps:$4 sm:$0xff]   ;;  %v1460_v52 = vld [vmem:[%s2062_s1 + $0xc0] ss:$12 sps:$4 sm:$0xff]  }
  0xaf   : > { %708 = vmatprep.subr.bf16.mxu1 %v388_v53  ;;  %v1462_v53 = vld [vmem:[%s2062_s1 + $0xdc] ss:$12 sps:$4 sm:$0xff]  }
  0xb0   : > { %709 = vmatpush1.bf16.msra.mxu1 %v358_v54  ;;  %v1461_v54 = vld [vmem:[%s2062_s1 + $0xc8] ss:$12 sps:$4 sm:$0xff]  }
  0xb1   : > { %v459_v55 = vpop.permute.xlu1 %458  ;;  %v457_v56 = vpop.permute.xlu0 %456 }
  0xb2   : > { %v496_v57 = vsel %vm476_vm2, %v459_v55, %v457_v56  ;;  %v478_v58 = vsel %vm476_vm2, %v457_v56, %v459_v55  ;;  %v1464_v55 = vld [vmem:[%s2062_s1 + $0xd8] ss:$12 sps:$4 sm:$0xff]   ;;  %v1465_v56 = vld [vmem:[%s2062_s1 + $0xe0] ss:$12 sps:$4 sm:$0xff]  }
  0xb3   : > { %825 = vmatprep.subr.bf16.mxu0 %v496_v57 }
  0xb4   : > { %826 = vmatpush1.bf16.msra.mxu0 %v478_v58 }
  0xb5   : > { %v393_v59 = vpop.permute.xlu1 %392  ;;  %v391_v60 = vpop.permute.xlu0 %390 }
  0xb6   : > { %v430_v61 = vsel %vm414_vm1, %v393_v59, %v391_v60  ;;  %v415_v62 = vsel %vm414_vm1, %v391_v60, %v393_v59 }
  0xb7   : > { %710 = vmatprep.subr.bf16.mxu1 %v430_v61 }
  0xb8   : > { %711 = vmatpush1.bf16.msra.mxu1 %v415_v62 }
  0xb9   : > { %v463_v63 = vpop.permute.xlu1 %462  ;;  %v461_v0 = vpop.permute.xlu0 %460 }
  0xba   : > { %v500_v1 = vsel %vm476_vm2, %v463_v63, %v461_v0  ;;  %v479_v2 = vsel %vm476_vm2, %v461_v0, %v463_v63 }
  0xbb   : > { %827 = vmatprep.subr.bf16.mxu0 %v500_v1 }
  0xbc   : > { %828 = vmatpush1.bf16.msra.mxu0 %v479_v2 }
  0xbd   : > { %v397_v3 = vpop.permute.xlu1 %396  ;;  %v395_v4 = vpop.permute.xlu0 %394 }
  0xbe   : > { %v434_v5 = vsel %vm414_vm1, %v397_v3, %v395_v4  ;;  %v416_v6 = vsel %vm414_vm1, %v395_v4, %v397_v3 }
  0xbf   : > { %712 = vmatprep.subr.bf16.mxu1 %v434_v5 }
  0xc0   : > { %713 = vmatpush1.bf16.msra.mxu1 %v416_v6 }
  0xc1   : > { %v467_v7 = vpop.permute.xlu1 %466  ;;  %v465_v8 = vpop.permute.xlu0 %464 }
  0xc2   : > { %v504_v9 = vsel %vm476_vm2, %v467_v7, %v465_v8  ;;  %v480_v10 = vsel %vm476_vm2, %v465_v8, %v467_v7 }
  0xc3   : > { %829 = vmatprep.subr.bf16.mxu0 %v504_v9 }
  0xc4   : > { %830 = vmatpush1.bf16.msra.mxu0 %v480_v10 }
  0xc5   : > { %v401_v11 = vpop.permute.xlu1 %400  ;;  %v399_v12 = vpop.permute.xlu0 %398 }
  0xc6   : > { %v438_v14 = vsel %vm414_vm1, %v401_v11, %v399_v12  ;;  %v417_v15 = vsel %vm414_vm1, %v399_v12, %v401_v11 }
  0xc7   : > { %714 = vmatprep.subr.bf16.mxu1 %v438_v14 }
  0xc8   : > { %715 = vmatpush1.bf16.msra.mxu1 %v417_v15 }
  0xc9   : > { %v471_v16 = vpop.permute.xlu1 %470  ;;  %v469_v17 = vpop.permute.xlu0 %468 }
  0xca   : > { %v508_v18 = vsel %vm476_vm2, %v471_v16, %v469_v17  ;;  %v481_v19 = vsel %vm476_vm2, %v469_v17, %v471_v16 }
  0xcb   : > { %831 = vmatprep.subr.bf16.mxu0 %v508_v18 }
  0xcc   : > { %832 = vmatpush1.bf16.msra.mxu0 %v481_v19 }
  0xcd   : > { %v405_v20 = vpop.permute.xlu1 %404  ;;  %v403_v21 = vpop.permute.xlu0 %402 }
  0xce   : > { %v442_v22 = vsel %vm414_vm1, %v405_v20, %v403_v21  ;;  %v418_v23 = vsel %vm414_vm1, %v403_v21, %v405_v20 }
  0xcf   : > { %716 = vmatprep.subr.bf16.mxu1 %v442_v22 }
  0xd0   : > { %717 = vmatpush1.bf16.msra.mxu1 %v418_v23 }
  0xd1   : > { %v475_v25 = vpop.permute.xlu1 %474  ;;  %v473_v27 = vpop.permute.xlu0 %472 }
  0xd2   : > { %v512_v28 = vsel %vm476_vm2, %v475_v25, %v473_v27  ;;  %v482_v29 = vsel %vm476_vm2, %v473_v27, %v475_v25 }
  0xd3   : > { %833 = vmatprep.subr.bf16.mxu0 %v512_v28  ;;  %719 = vmatmul.mubr.bf16.vlgmr.msra.gmra.mrb[0].mxu1 %v1426_v24 }
  0xd4   : > { %834 = vmatpush1.bf16.msra.mxu0 %v482_v29  ;;  %728 = vmatprep.mubr.bf16.mxu1 %v1430_v26 }
  0xd7   : > { %852 = vmatmul.mubr.bf16.vlgmr.msra.gmra.mrb[0].mxu0 %v1429_v30 }
  0xd8   : > { %861 = vmatprep.mubr.bf16.mxu0 %v1537_v13 }
  0xdb   : > { %729 = vmatmul.mubr.bf16.gmra.mrb[4].mxu1 %v1432_v31 }
  0xdc   : > { %738 = vmatprep.mubr.bf16.mxu1 %v1434_v32 }
  0xdf   : > { %862 = vmatmul.mubr.bf16.gmra.mrb[4].mxu0 %v1433_v33 }
  0xe0   : > { %871 = vmatprep.mubr.bf16.mxu0 %v1537_v13 }
  0xe3   : > { %739 = vmatmul.mubr.bf16.gmra.mrb[8].mxu1 %v1436_v34 }
  0xe4   : > { %748 = vmatprep.mubr.bf16.mxu1 %v1438_v35 }
  0xe7   : > { %872 = vmatmul.mubr.bf16.gmra.mrb[8].mxu0 %v1437_v36 }
  0xe8   : > { %881 = vmatprep.mubr.bf16.mxu0 %v1537_v13 }
  0xeb   : > { %749 = vmatmul.mubr.bf16.gmra.mrb[12].mxu1 %v1440_v37 }
  0xec   : > { %758 = vmatprep.mubr.bf16.mxu1 %v1442_v38 }
  0xef   : > { %882 = vmatmul.mubr.bf16.gmra.mrb[12].mxu0 %v1441_v39 }
  0xf0   : > { %891 = vmatprep.mubr.bf16.mxu0 %v1537_v13 }
  0xf3   : > { %759 = vmatmul.mubr.bf16.gmra.mrb[16].mxu1 %v1444_v40 }
  0xf4   : > { %768 = vmatprep.mubr.bf16.mxu1 %v1446_v41 }
  0xf7   : > { %892 = vmatmul.mubr.bf16.gmra.mrb[16].mxu0 %v1445_v42 }
  0xf8   : > { %901 = vmatprep.mubr.bf16.mxu0 %v1537_v13 }
  0xfb   : > { %769 = vmatmul.mubr.bf16.gmra.mrb[20].mxu1 %v1448_v43 }
  0xfc   : > { %778 = vmatprep.mubr.bf16.mxu1 %v1450_v44 }
  0xff   : > { %902 = vmatmul.mubr.bf16.gmra.mrb[20].mxu0 %v1449_v45 }
 0x100   : > { %911 = vmatprep.mubr.bf16.mxu0 %v1537_v13 }
 0x103   : > { %779 = vmatmul.mubr.bf16.gmra.mrb[24].mxu1 %v1452_v46 }
 0x104   : > { %788 = vmatprep.mubr.bf16.mxu1 %v1454_v47 }
 0x107   : > { %912 = vmatmul.mubr.bf16.gmra.mrb[24].mxu0 %v1453_v48 }
 0x108   : > { %921 = vmatprep.mubr.bf16.mxu0 %v1537_v13 }
 0x10b   : > { %789 = vmatmul.mubr.bf16.gmra.mrb[28].mxu1 %v1456_v49 }
 0x10c   : > { %798 = vmatprep.mubr.bf16.mxu1 %v1458_v50 }
 0x10f   : > { %922 = vmatmul.mubr.bf16.gmra.mrb[28].mxu0 %v1457_v51 }
 0x110   : > { %931 = vmatprep.mubr.bf16.mxu0 %v1537_v13 }
 0x113   : > { %799 = vmatmul.mubr.bf16.gmra.mrb[32].mxu1 %v1460_v52 }
 0x114   : > { %808 = vmatprep.mubr.bf16.mxu1 %v1462_v53 }
 0x117   : > { %932 = vmatmul.mubr.bf16.gmra.mrb[32].mxu0 %v1461_v54 }
 0x118   : > { %941 = vmatprep.mubr.bf16.mxu0 %v1537_v13 }
 0x11b   : > { %809 = vmatmul.mubr.bf16.gmra.mrb[36].mxu1 %v1464_v55 }
 0x11f   : > { %942 = vmatmul.mubr.bf16.gmra.mrb[36].mxu0 %v1465_v56 }
 0x1a6   : > { %v720_v57 = vpop.f32.mrb[0].mxu1 }
 0x1a7   : > { %v722_v58 = vpop.f32.mrb[1].mxu1 }
 0x1a8   : > { %v724_v59 = vpop.f32.mrb[2].mxu1 }
 0x1a9   : > { %v726_v60 = vpop.f32.mrb[3].mxu1 }
 0x1aa   : > { %v853_v61 = vpop.f32.mrb[0].mxu0 }
 0x1ab   : > { %v1813_v62 = vadd.f32 %v853_v61, %v720_v57  ;;  %v855_v63 = vpop.f32.mrb[1].mxu0 }
 0x1ac   : > { %v1815_v0 = vadd.f32 %v855_v63, %v722_v58  ;;  %v857_v1 = vpop.f32.mrb[2].mxu0 }
 0x1ad   : > { %v1817_v2 = vadd.f32 %v857_v1, %v724_v59  ;;  %v859_v13 = vpop.f32.mrb[3].mxu0 }
 0x1ae   : > { %v1819_v3 = vadd.f32 %v859_v13, %v726_v60  ;;  %v730_v4 = vpop.f32.mrb[4].mxu1 }
 0x1af   : > { %v732_v5 = vpop.f32.mrb[5].mxu1 }
 0x1b0   : > { %v734_v6 = vpop.f32.mrb[6].mxu1 }
 0x1b1   : > { %v736_v7 = vpop.f32.mrb[7].mxu1 }
 0x1b2   : > { %v863_v8 = vpop.f32.mrb[4].mxu0 }
 0x1b3   : > { %v1821_v9 = vadd.f32 %v863_v8, %v730_v4  ;;  %v865_v10 = vpop.f32.mrb[5].mxu0 }
 0x1b4   : > { %v1823_v11 = vadd.f32 %v865_v10, %v732_v5  ;;  %v867_v12 = vpop.f32.mrb[6].mxu0 }
 0x1b5   : > { %v1825_v14 = vadd.f32 %v867_v12, %v734_v6  ;;  %v869_v15 = vpop.f32.mrb[7].mxu0 }
 0x1b6   : > { %v1827_v16 = vadd.f32 %v869_v15, %v736_v7  ;;  %v740_v17 = vpop.f32.mrb[8].mxu1 }
 0x1b7   : > { %v742_v18 = vpop.f32.mrb[9].mxu1 }
 0x1b8   : > { %v744_v19 = vpop.f32.mrb[10].mxu1 }
 0x1b9   : > { %v746_v20 = vpop.f32.mrb[11].mxu1 }
 0x1ba   : > { %v873_v21 = vpop.f32.mrb[8].mxu0 }
 0x1bb   : > { %v1829_v22 = vadd.f32 %v873_v21, %v740_v17  ;;  %v875_v23 = vpop.f32.mrb[9].mxu0 }
 0x1bc   : > { %v1831_v24 = vadd.f32 %v875_v23, %v742_v18  ;;  %v877_v25 = vpop.f32.mrb[10].mxu0 }
 0x1bd   : > { %v1833_v26 = vadd.f32 %v877_v25, %v744_v19  ;;  %v879_v27 = vpop.f32.mrb[11].mxu0 }
 0x1be   : > { %v1835_v28 = vadd.f32 %v879_v27, %v746_v20  ;;  %v750_v29 = vpop.f32.mrb[12].mxu1 }
 0x1bf   : > { %v952_v30 = vmax.f32 %v1813_v62, %v1833_v26  ;;  %v752_v31 = vpop.f32.mrb[13].mxu1  ;;  %v1027_v62 = vld [vmem:[%s2064_s3] sm:$0xff] }
 0x1c0   : > { %v953_v32 = vmax.f32 %v1815_v0, %v1835_v28  ;;  %v754_v33 = vpop.f32.mrb[14].mxu1 }
 0x1c1   : > { %v756_v34 = vpop.f32.mrb[15].mxu1 }
 0x1c2   : > { %v883_v35 = vpop.f32.mrb[12].mxu0 }
 0x1c3   : > { %v1841_v36 = vadd.f32 %v883_v35, %v750_v29  ;;  %v885_v37 = vpop.f32.mrb[13].mxu0 }
 0x1c4   : > { %v1843_v38 = vadd.f32 %v885_v37, %v752_v31  ;;  %v887_v39 = vpop.f32.mrb[14].mxu0 }
 0x1c5   : > { %v954_v40 = vmax.f32 %v1817_v2, %v1841_v36  ;;  %v1847_v41 = vadd.f32 %v887_v39, %v754_v33  ;;  %v889_v42 = vpop.f32.mrb[15].mxu0 }
 0x1c6   : > { %v955_v43 = vmax.f32 %v1819_v3, %v1843_v38  ;;  %v1851_v44 = vadd.f32 %v889_v42, %v756_v34  ;;  %v760_v45 = vpop.f32.mrb[16].mxu1 }
 0x1c7   : > { %v956_v46 = vmax.f32 %v1821_v9, %v1847_v41  ;;  %v762_v47 = vpop.f32.mrb[17].mxu1 }
 0x1c8   : > { %v957_v48 = vmax.f32 %v1823_v11, %v1851_v44  ;;  %v764_v49 = vpop.f32.mrb[18].mxu1 }
 0x1c9   : > { %v766_v50 = vpop.f32.mrb[19].mxu1 }
 0x1ca   : > { %v893_v51 = vpop.f32.mrb[16].mxu0 }
 0x1cb   : > { %v1857_v52 = vadd.f32 %v893_v51, %v760_v45  ;;  %v895_v53 = vpop.f32.mrb[17].mxu0 }
 0x1cc   : > { %v1859_v54 = vadd.f32 %v895_v53, %v762_v47  ;;  %v897_v55 = vpop.f32.mrb[18].mxu0 }
 0x1cd   : > { %v958_v56 = vmax.f32 %v1825_v14, %v1857_v52  ;;  %v1863_v57 = vadd.f32 %v897_v55, %v764_v49  ;;  %v899_v58 = vpop.f32.mrb[19].mxu0 }
 0x1ce   : > { %v959_v59 = vmax.f32 %v1827_v16, %v1859_v54  ;;  %v1867_v60 = vadd.f32 %v899_v58, %v766_v50  ;;  %v770_v61 = vpop.f32.mrb[20].mxu1  ;;  %v1314_v16 = vld [vmem:[%s2064_s3 + $0xc8] sm:$0xff] }
 0x1cf   : > { %v960_v63 = vmax.f32 %v1829_v22, %v1863_v57  ;;  %v772_v1 = vpop.f32.mrb[21].mxu1  ;;  %v1303_v22 = vld [vmem:[%s2064_s3 + $0x70] sm:$0xff]  ;;  %v1304_v57 = vld [vmem:[%s2064_s3 + $0x78] sm:$0xff] }
 0x1d0   : > { %v961_v13 = vmax.f32 %v1831_v24, %v1867_v60  ;;  %v774_v4 = vpop.f32.mrb[22].mxu1  ;;  %v1306_v60 = vld [vmem:[%s2064_s3 + $0x88] sm:$0xff] }
 0x1d1   : > { %v776_v5 = vpop.f32.mrb[23].mxu1 }
 0x1d2   : > { %v903_v6 = vpop.f32.mrb[20].mxu0 }
 0x1d3   : > { %v904_v7 = vadd.f32 %v903_v6, %v770_v61  ;;  %v905_v8 = vpop.f32.mrb[21].mxu0 }
 0x1d4   : > { %v906_v10 = vadd.f32 %v905_v8, %v772_v1  ;;  %v907_v12 = vpop.f32.mrb[22].mxu0 }
 0x1d5   : > { %v908_v15 = vadd.f32 %v907_v12, %v774_v4  ;;  %v909_v17 = vpop.f32.mrb[23].mxu0 }
 0x1d6   : > { %v910_v18 = vadd.f32 %v909_v17, %v776_v5  ;;  %v780_v19 = vpop.f32.mrb[24].mxu1 }
 0x1d7   : > { %v782_v20 = vpop.f32.mrb[25].mxu1 }
 0x1d8   : > { %v784_v21 = vpop.f32.mrb[26].mxu1 }
 0x1d9   : > { %v786_v23 = vpop.f32.mrb[27].mxu1 }
 0x1da   : > { %v913_v25 = vpop.f32.mrb[24].mxu0 }
 0x1db   : > { %v914_v27 = vadd.f32 %v913_v25, %v780_v19  ;;  %v915_v29 = vpop.f32.mrb[25].mxu0 }
 0x1dc   : > { %v1873_v31 = vadd.f32 %v915_v29, %v782_v20  ;;  %v917_v33 = vpop.f32.mrb[26].mxu0  ;;  %v985_v20 = vpop.permute.xlu0 %984 }
 0x1dd   : > { %v1875_v34 = vadd.f32 %v917_v33, %v784_v21  ;;  %v919_v35 = vpop.f32.mrb[27].mxu0 }
 0x1de   : > { %v1877_v37 = vadd.f32 %v919_v35, %v786_v23  ;;  %v790_v39 = vpop.f32.mrb[28].mxu1 }
 0x1df   : > { %v792_v42 = vpop.f32.mrb[29].mxu1 }
 0x1e0   : > { %v794_v45 = vpop.f32.mrb[30].mxu1 }
 0x1e1   : > { %v796_v47 = vpop.f32.mrb[31].mxu1 }
 0x1e2   : > { %v923_v49 = vpop.f32.mrb[28].mxu0 }
 0x1e3   : > { %v1879_v50 = vadd.f32 %v923_v49, %v790_v39  ;;  %v925_v51 = vpop.f32.mrb[29].mxu0  ;;  %v990_v39 = vpop.permute.xlu1 %989 }
 0x1e4   : > { %v1881_v53 = vadd.f32 %v925_v51, %v792_v42  ;;  %v927_v55 = vpop.f32.mrb[30].mxu0 }
 0x1e5   : > { %v928_v58 = vadd.f32 %v927_v55, %v794_v45  ;;  %v929_v61 = vpop.f32.mrb[31].mxu0  ;;  %v1028_v45 = vld [vmem:[%s2064_s3 + $0x8] sm:$0xff] }
 0x1e6   : > { %v930_v1 = vadd.f32 %v929_v61, %v796_v47  ;;  %v800_v4 = vpop.f32.mrb[32].mxu1 }
 0x1e7   : > { %v962_v5 = vmax.f32 %v904_v7, %v928_v58  ;;  %v802_v6 = vpop.f32.mrb[33].mxu1  ;;  %v1299_v58 = vld [vmem:[%s2064_s3 + $0x50] sm:$0xff] }
 0x1e8   : > { %v963_v8 = vmax.f32 %v906_v10, %v930_v1  ;;  %v804_v12 = vpop.f32.mrb[34].mxu1  ;;  %v1309_v10 = vld [vmem:[%s2064_s3 + $0xa0] sm:$0xff] }
 0x1e9   : > { %v972_v17 = vmax.f32 %v952_v30, %v962_v5  ;;  %v806_v19 = vpop.f32.mrb[35].mxu1 }
 0x1ea   : > { %v973_v21 = vmax.f32 %v953_v32, %v963_v8  ;;  %v933_v23 = vpop.f32.mrb[32].mxu0  ;;  %v1310_v32 = vld [vmem:[%s2064_s3 + $0xa8] sm:$0xff] }
 0x1eb   : > { %v1007_v25 = vadd.f32 %v985_v20, %v972_v17  ;;  %v934_v29 = vadd.f32 %v933_v23, %v800_v4  ;;  %v935_v33 = vpop.f32.mrb[33].mxu0  ;;  %v995_v23 = vpop.permute.xlu1 %994 }
 0x1ec   : > { %v1008_v35 = vadd.f32 %v985_v20, %v973_v21  ;;  %v936_v7 = vadd.f32 %v935_v33, %v802_v6  ;;  %v937_v42 = vpop.f32.mrb[34].mxu0 }
 0x1ed   : > { %v1017_v26 = vmax.f32 %v1007_v25, 0.0  ;;  %v964_v30 = vmax.f32 %v908_v15, %v934_v29  ;;  %v938_v0 = vadd.f32 %v937_v42, %v804_v12  ;;  %v939_v28 = vpop.f32.mrb[35].mxu0  ;;  %v1300_v15 = vld [vmem:[%s2064_s3 + $0x58] sm:$0xff]  ;;  %v1029_v25 = vld [vmem:[%s2064_s3 + $0x10] sm:$0xff]  ;;  %v1302_v42 = vld [vmem:[%s2064_s3 + $0x68] sm:$0xff] }
 0x1ee   : > { %v1018_v47 = vmax.f32 %v1008_v35, 0.0  ;;  %v965_v49 = vmax.f32 %v910_v18, %v936_v7  ;;  %v940_v51 = vadd.f32 %v939_v28, %v806_v19  ;;  %v810_v55 = vpop.f32.mrb[36].mxu1  ;;  %v1030_v35 = vld [vmem:[%s2064_s3 + $0x18] sm:$0xff]  ;;  %v1031_v28 = vld [vmem:[%s2064_s3 + $0x20] sm:$0xff] }
 0x1ef   : > { %v974_v61 = vmax.f32 %v954_v40, %v964_v30  ;;  %v966_v1 = vmax.f32 %v914_v27, %v938_v0  ;;  %v812_v4 = vpop.f32.mrb[37].mxu1  ;;  %v1129_v5 = vmul.f32 %v1309_v10, %v1017_v26  ;;  %v1037_v6 = vmul.f32 %v1027_v62, %v1017_v26  ;;  %v1005_v54 = vpop.permute.xlu1 %1004 }
 0x1f0   : > { %v975_v18 = vmax.f32 %v955_v43, %v965_v49  ;;  %v967_v8 = vmax.f32 %v1873_v31, %v940_v51  ;;  %v1130_v12 = vmul.f32 %v1310_v32, %v1018_v47  ;;  %v1038_v17 = vmul.f32 %v1028_v45, %v1018_v47  ;;  %v814_v19 = vpop.f32.mrb[38].mxu1  ;;  %v1032_v51 = vld [vmem:[%s2064_s3 + $0x28] sm:$0xff] }
 0x1f1   : > { %v1009_v20 = vadd.f32 %v990_v39, %v974_v61  ;;  %v976_v21 = vmax.f32 %v956_v46, %v966_v1  ;;  %v816_v2 = vpop.f32.mrb[39].mxu1  ;;  %v1083_v36 = vmul.f32 %v1299_v58, %v1017_v26  ;;  %v1084_v40 = vmul.f32 %v1300_v15, %v1018_v47  ;;  %v1311_v61 = vld [vmem:[%s2064_s3 + $0xb0] sm:$0xff]  ;;  %v1000_v1 = vpop.permute.xlu0 %999 }
 0x1f2   : > { %v1010_v27 = vadd.f32 %v990_v39, %v975_v18  ;;  %v977_v3 = vmax.f32 %v957_v48, %v967_v8  ;;  %v943_v38 = vpop.f32.mrb[36].mxu0  ;;  %v1139_v43 = vadd.f32 %v1130_v12, %v1129_v5  ;;  %v1047_v31 = vadd.f32 %v1038_v17, %v1037_v6  ;;  %v1301_v48 = vld [vmem:[%s2064_s3 + $0x60] sm:$0xff] }
 0x1f3   : > { %v1019_v29 = vmax.f32 %v1009_v20, 0.0  ;;  %v1011_v33 = vadd.f32 %v995_v23, %v976_v21  ;;  %v944_v9 = vadd.f32 %v943_v38, %v810_v55  ;;  %v945_v41 = vpop.f32.mrb[37].mxu0  ;;  %v1093_v46 = vadd.f32 %v1084_v40, %v1083_v36  ;;  %v1315_v38 = vld [vmem:[%s2064_s3 + $0xd0] sm:$0xff] }
 0x1f4   : > { %v1020_v39 = vmax.f32 %v1010_v27, 0.0  ;;  %v1012_v7 = vadd.f32 %v995_v23, %v977_v3  ;;  %v946_v11 = vadd.f32 %v945_v41, %v812_v4  ;;  %v947_v44 = vpop.f32.mrb[38].mxu0  ;;  %1140 = vadd.xlane.f32.xlu1 %v1139_v43  ;;  %1048 = vadd.xlane.f32.xlu0 %v1047_v31  ;;  %v1034_v23 = vld [vmem:[%s2064_s3 + $0x38] sm:$0xff]  ;;  %v1035_v3 = vld [vmem:[%s2064_s3 + $0x40] sm:$0xff] }
 0x1f5   : > { %v1021_v10 = vmax.f32 %v1011_v33, 0.0  ;;  %v968_v62 = vmax.f32 %v1875_v34, %v944_v9  ;;  %v948_v26 = vadd.f32 %v947_v44, %v814_v19  ;;  %v949_v30 = vpop.f32.mrb[39].mxu0  ;;  %v1039_v0 = vmul.f32 %v1029_v25, %v1019_v29  ;;  %v1036_v33 = vld [vmem:[%s2064_s3 + $0x48] sm:$0xff]  ;;  %v1316_v9 = vld [vmem:[%s2064_s3 + $0xd8] sm:$0xff]  ;;  %v1317_v41 = vld [vmem:[%s2064_s3 + $0xe0] sm:$0xff] }
 0x1f6   : > { %v1022_v32 = vmax.f32 %v1012_v7, 0.0  ;;  %v969_v45 = vmax.f32 %v1877_v37, %v946_v11  ;;  %v950_v47 = vadd.f32 %v949_v30, %v816_v2  ;;  %v1040_v49 = vmul.f32 %v1030_v35, %v1020_v39  ;;  %v1312_v37 = vld [vmem:[%s2064_s3 + $0xb8] sm:$0xff]  ;;  %v1318_v11 = vld [vmem:[%s2064_s3 + $0xe8] sm:$0xff]  ;;  %v1307_v44 = vld [vmem:[%s2064_s3 + $0x90] sm:$0xff] }
 0x1f7   : > { %v978_v34 = vmax.f32 %v958_v56, %v968_v62  ;;  %v970_v55 = vmax.f32 %v1879_v50, %v948_v26  ;;  %v1085_v58 = vmul.f32 %v1301_v48, %v1019_v29  ;;  %v1086_v15 = vmul.f32 %v1302_v42, %v1020_v39  ;;  %v1313_v50 = vld [vmem:[%s2064_s3 + $0xc0] sm:$0xff]  ;;  %v1308_v48 = vld [vmem:[%s2064_s3 + $0x98] sm:$0xff] }
 0x1f8   : > { %v979_v4 = vmax.f32 %v959_v59, %v969_v45  ;;  %v971_v14 = vmax.f32 %v1881_v53, %v950_v47  ;;  %1094 = vadd.xlane.f32.xlu0 %v1093_v46  ;;  %v1050_v52 = vadd.f32 %v1040_v49, %v1039_v0  ;;  %v1041_v56 = vmul.f32 %v1031_v28, %v1021_v10 }
 0x1f9   : > { %v1013_v5 = vadd.f32 %v1000_v1, %v978_v34  ;;  %v980_v6 = vmax.f32 %v960_v63, %v970_v55  ;;  %v1096_v18 = vadd.f32 %v1086_v15, %v1085_v58  ;;  %v1042_v8 = vmul.f32 %v1032_v51, %v1022_v32  ;;  %v1305_v63 = vld [vmem:[%s2064_s3 + $0x80] sm:$0xff] }
 0x1fa   : > { %v1014_v59 = vadd.f32 %v1000_v1, %v979_v4  ;;  %v981_v53 = vmax.f32 %v961_v13, %v971_v14  ;;  %1051 = vadd.xlane.f32.xlu1 %v1050_v52  ;;  %v1131_v12 = vmul.f32 %v1311_v61, %v1019_v29  ;;  %v1132_v17 = vmul.f32 %v1312_v37, %v1020_v39  ;;  %v1033_v13 = vld [vmem:[%s2064_s3 + $0x30] sm:$0xff] }
 0x1fb   : > { %v1023_v19 = vmax.f32 %v1013_v5, 0.0  ;;  %v1015_v20 = vadd.f32 %v1005_v54, %v980_v6  ;;  %v1053_v21 = vadd.f32 %v1042_v8, %v1041_v56  ;;  %v1133_v24 = vmul.f32 %v1313_v50, %v1021_v10 }
 0x1fc   : > { %v1024_v2 = vmax.f32 %v1014_v59, 0.0  ;;  %v1016_v36 = vadd.f32 %v1005_v54, %v981_v53  ;;  %1097 = vadd.xlane.f32.xlu0 %v1096_v18  ;;  %v1142_v40 = vadd.f32 %v1132_v17, %v1131_v12  ;;  %v1134_v27 = vmul.f32 %v1314_v16, %v1022_v32 }
 0x1fd   : > { %v1025_v43 = vmax.f32 %v1015_v20, 0.0  ;;  %v1087_v31 = vmul.f32 %v1303_v22, %v1021_v10  ;;  %v1088_v25 = vmul.f32 %v1304_v57, %v1022_v32  ;;  %v1089_v29 = vmul.f32 %v1305_v63, %v1023_v19 }
 0x1fe   : > { %v1026_v46 = vmax.f32 %v1016_v36, 0.0  ;;  %1054 = vadd.xlane.f32.xlu1 %v1053_v21  ;;  %v1145_v35 = vadd.f32 %v1134_v27, %v1133_v24  ;;  %v1090_v39 = vmul.f32 %v1306_v60, %v1024_v2  ;;  %v1043_v7 = vmul.f32 %v1033_v13, %v1023_v19 }
 0x1ff   : > { %v1099_v42 = vadd.f32 %v1088_v25, %v1087_v31  ;;  %v1044_v10 = vmul.f32 %v1034_v23, %v1024_v2  ;;  %v1045_v62 = vmul.f32 %v1035_v3, %v1025_v43  ;;  %v1135_v26 = vmul.f32 %v1315_v38, %v1023_v19 }
 0x200   : > { %1143 = vadd.xlane.f32.xlu0 %v1142_v40  ;;  %v1102_v30 = vadd.f32 %v1090_v39, %v1089_v29  ;;  %v1046_v0 = vmul.f32 %v1036_v33, %v1026_v46  ;;  %v1136_v28 = vmul.f32 %v1316_v9, %v1024_v2  ;;  %v1137_v32 = vmul.f32 %v1317_v41, %v1025_v43 }
 0x201   : > { %v1056_v45 = vadd.f32 %v1044_v10, %v1043_v7  ;;  %v1138_v47 = vmul.f32 %v1318_v11, %v1026_v46  ;;  %v1091_v49 = vmul.f32 %v1307_v44, %v1025_v43  ;;  %v1092_v51 = vmul.f32 %v1308_v48, %v1026_v46  ;;  %v1168_v11 = vld [vmem:[%s2065_s4] sm:$0x1] }
 0x202   : > { %1146 = vadd.xlane.f32.xlu1 %v1145_v35  ;;  %v1059_v34 = vadd.f32 %v1046_v0, %v1045_v62  ;;  %v1148_v55 = vadd.f32 %v1136_v28, %v1135_v26 }
 0x203   : > { %v1151_v58 = vadd.f32 %v1138_v47, %v1137_v32  ;;  %v1105_v15 = vadd.f32 %v1092_v51, %v1091_v49 }
 0x204   : > { %1100 = vadd.xlane.f32.xlu0 %v1099_v42 }
 0x206   : > { %1103 = vadd.xlane.f32.xlu1 %v1102_v30 }
 0x208   : > { %1057 = vadd.xlane.f32.xlu0 %v1056_v45 }
 0x20a   : > { %1060 = vadd.xlane.f32.xlu1 %v1059_v34 }
 0x20c   : > { %1149 = vadd.xlane.f32.xlu0 %v1148_v55 }
 0x20e   : > { %1152 = vadd.xlane.f32.xlu1 %v1151_v58 }
 0x210   : > { %1106 = vadd.xlane.f32.xlu0 %v1105_v15 }
 0x281   : > { %v1049_v61 = vpop.xlane.xlu0 %1048  ;;  %v1141_v37 = vpop.xlane.xlu1 %1140 }
 0x285   : > { %v1095_v1 = vpop.xlane.xlu0 %1094 }
 0x287   : > { %v1052_v4 = vpop.xlane.xlu1 %1051 }
 0x288   : > { %v1062_v6 = vadd.f32 %v1052_v4, %v1049_v61 }
 0x289   : > { %v1098_v14 = vpop.xlane.xlu0 %1097 }
 0x28a   : > { %v1108_v59 = vadd.f32 %v1098_v14, %v1095_v1 }
 0x28b   : > { %v1055_v52 = vpop.xlane.xlu1 %1054 }
 0x28c   : > { %v1063_v8 = vadd.f32 %v1062_v6, %v1055_v52 }
 0x28d   : > { %v1144_v56 = vpop.xlane.xlu0 %1143 }
 0x28e   : > { %v1154_v16 = vadd.f32 %v1144_v56, %v1141_v37 }
 0x28f   : > { %v1147_v50 = vpop.xlane.xlu1 %1146 }
 0x290   : > { %v1155_v17 = vadd.f32 %v1154_v16, %v1147_v50 }
 0x291   : > { %v1101_v5 = vpop.xlane.xlu0 %1100 }
 0x292   : > { %v1109_v22 = vadd.f32 %v1108_v59, %v1101_v5 }
 0x293   : > { %v1104_v18 = vpop.xlane.xlu1 %1103 }
 0x294   : > { %v1110_v24 = vadd.f32 %v1109_v22, %v1104_v18 }
 0x295   : > { %v1058_v54 = vpop.xlane.xlu0 %1057 }
 0x296   : > { %v1064_v53 = vadd.f32 %v1063_v8, %v1058_v54 }
 0x297   : > { %v1061_v12 = vpop.xlane.xlu1 %1060 }
 0x298   : > { %v1065_v57 = vadd.f32 %v1064_v53, %v1061_v12 }
 0x299   : > { %v1150_v63 = vpop.xlane.xlu0 %1149 }
 0x29a   : > { %v1066_v19 = vrot.slane %v1065_v57, 4  ;;  %v1156_v20 = vadd.f32 %v1155_v17, %v1150_v63 }
 0x29b   : > { %v1153_v21 = vpop.xlane.xlu1 %1152 }
 0x29c   : > { %v1067_v60 = vadd.f32 %v1066_v19, %v1065_v57  ;;  %v1157_v13 = vadd.f32 %v1156_v20, %v1153_v21 }
 0x29d   : > { %v1107_v2 = vpop.xlane.xlu0 %1106 }
 0x29e   : > { %v1068_v36 = vrot.slane %v1067_v60, 2  ;;  %v1158_v40 = vrot.slane %v1157_v13, 4  ;;  %v1111_v27 = vadd.f32 %v1110_v24, %v1107_v2 }
 0x2a0   : > { %v1159_v23 = vadd.f32 %v1158_v40, %v1157_v13  ;;  %v1112_v3 = vrot.slane %v1111_v27, 4  ;;  %v1069_v38 = vadd.f32 %v1068_v36, %v1067_v60 }
 0x2a2   : > { %v1160_v43 = vrot.slane %v1159_v23, 2  ;;  %v1113_v31 = vadd.f32 %v1112_v3, %v1111_v27  ;;  %v1070_v33 = vrot.slane %v1069_v38, 1 }
 0x2a4   : > { %v1161_v25 = vadd.f32 %v1160_v43, %v1159_v23  ;;  %v1114_v29 = vrot.slane %v1113_v31, 2  ;;  %v1071_v35 = vadd.f32 %v1070_v33, %v1069_v38 }
 0x2a6   : > { %v1115_v9 = vadd.f32 %v1114_v29, %v1113_v31  ;;  %v1162_v41 = vrot.slane %v1161_v25, 1 }
 0x2a8   : > { %v1116_v46 = vrot.slane %v1115_v9, 1  ;;  %v1163_v7 = vadd.f32 %v1162_v41, %v1161_v25 }
 0x2aa   : > { %v1117_v39 = vadd.f32 %v1116_v46, %v1115_v9 }
 0x2ac   : > { %v1165_v44 = vsel %vm1164_vm3, %v1071_v35, %v1117_v39 }
 0x2ad   : > { %v1167_v48 = vsel %vm1166_vm4, %v1165_v44, %v1163_v7 }
 0x2ae   : > { %v1169_v42 = vadd.f32 %v1168_v11, %v1167_v48 }
 0x2b0   : > { %v1171_v10 = vsel %vm1170_vm5, %v1169_v42, -inf }
 0x2b1   : > { %1172 = vmax.xlane.f32.xlu0 %v1171_v10 }
 0x33e   : > { %v1173_v62 = vpop.xlane.xlu0 %1172 }
 0x33f   : > { %v1174_v26 = vsub.f32 %v1169_v42, %v1173_v62 }
 0x341   : > { %v1175_v30 = vmul.f32 1.442695, %v1174_v26 }
 0x343   : > { %1466 = vpow2.f32 %v1175_v30 }
 0x34d   : > { %v1467_v0 = vpop.eup %1466 }
 0x34e   : > { %v1177_v28 = vsel %vm1170_vm5, %v1467_v0, 0.0 }
 0x34f   : > { %1178 = vadd.xlane.f32.xlu1 %v1177_v28 }
 0x3dc   : > { %v1179_v32 = vpop.xlane.xlu1 %1178 }
 0x3dd   : > { %1468 = vlog2.f32 %v1179_v32 }
 0x3e7   : > { %v1469_v45 = vpop.eup %1468 }
 0x3e8   : > { %v1181_v47 = vmul.f32 0.6931472, %v1469_v45 }
 0x3ea   : > { %v1182_v49 = vsub.f32 %v1174_v26, %v1181_v47 }
 0x3ec   : > { %1183 = vst.msk [vmem:[%s216_s25] sm:$0x1] %vm1170_vm5, %v1182_v49 }
 0x3ed   : > { %1483 = shalt.err (!%p1480_p3)
}
 0x3ee   : > { %s1484_s12 = scalar_lea.hbm %s2018_s7, 16  ;;  %s1488_s15 = scalar_lea.hbm %s2066_s5, 32 }
 0x3ef   : > { %p1485_p4 = scmp.ne.s32.totalorder %s2018_s7, %s1484_s12  ;;  %p1489_p9 = scmp.lt.u32.totalorder %s2018_s7, %s2066_s5 }
 0x3f0   : > { %p1490_p10 = scmp.lt.u32.totalorder %s1488_s15, %s1484_s12  ;;  %p1492_p12 = scmp.lt.u32.totalorder %s1484_s12, %s2018_s7 }
 0x3f1   : > { %p1486_p7 = pnand %p1485_p4, %p1607_p5 }
 0x3f2   : > { %p1491_p11 = por %p1490_p10, %p1489_p9 }
 0x3f3   : > { %p1487_p8 = pneg %p1486_p7 }
 0x3f4   : > { %p1493_p13 = por %p1492_p12, %p1491_p11 }
 0x3f6   : > { %p1494_p0 = pnand %p1493_p13, %p1487_p8 }
 0x3f8   : > { %1497 = shalt.err (!%p1494_p0)
}
 0x3f9   : > { %1363 = dma.vmem_to_hbm [thread:$0]  (%p1607_p5), %s2020_s26, 16, %s2018_s7, %s1185_s8  }
 0x3fa PF: > { %p1369_p1 = scmp.ge.s32.totalorder %s1532_s21, 2  ;;  %s1209_s23 = sand.u32 1, %s1520_s18  }
 0x3fb   : > { %s1210_s25 = scalar_lea.sflag [#allocation3], %s1209_s23 }
 0x3fc   : > { %p1366_p2 = pnand %p1369_p1, %p1611_p6 }
 0x3fe   : > { %1515 = dma.done.wait (!%p1366_p2), %s1210_s25, 16  }
 0x3ff   : > { %1517 = vsyncadd (!%p1366_p2), %s1210_s25, 4294967280  ;;  %p15_p3 = scmp.ge.s32.totalorder %s1594_s24, 4   ;;  %s2069_s18 = smov %s1524_s19 }
 0x400   : > { %s2070_s19 = smov %s1528_s20  ;;  %s2071_s20 = smov %s1605_s27 }
 0x401   : > { %s2072_s21 = smov %s1594_s24  ;;  %17 = sbr.rel (!%p15_p3) target bundleno = 3 (0x3), region = 77 }
 0x408   :  { %1214 = vsyncpa [#allocation3], 1 }
 0x409   :  { %1216 = vsyncpa [#allocation3 + $0x1], 1 }

</bundles_post_ra>
